<compile_context>
chip_gen: v6e
topology: v6e:2x2x1
jax: 0.10.0
libtpu: 0.0.40
codegen_flags: <defaults>
</compile_context>

<pallas_src>
import functools

import jax
import jax.numpy as jnp
from jax.experimental import pallas as pl
from jax.experimental.pallas import tpu as pltpu

_BN_EPS = 1e-5  # torch.nn.BatchNorm2d default


# ---------------------------------------------------------------------------
# small helpers
# ---------------------------------------------------------------------------
def _silu(y):
    return y * jax.nn.sigmoid(y)


@functools.lru_cache(maxsize=None)
def _vmem_limit_bytes():
    # ~3/4 of physical VMEM (v5e/v6e: 128 MiB -> 96 MiB, v7x: 64 MiB -> 48 MiB) so the
    # per-image stage-2 working set / large row tiles are not rejected by the
    # 16/32 MiB scoped default.
    try:
        cap = int(pltpu.get_tpu_info().vmem_capacity_bytes)
    except Exception:
        cap = 64 * 1024 * 1024
    return (cap * 3) // 4


def _mosaic_params():
    return pltpu.CompilerParams(
        dimension_semantics=("parallel",),
        vmem_limit_bytes=_vmem_limit_bytes())


def _pick_tm(m, row_bytes, budget=16 << 20):
    """Largest power-of-two row tile whose double-buffered footprint fits `budget`
    and that still yields >= 2 grid steps (megacore) whenever m allows it."""
    cap = max(8, budget // (2 * max(row_bytes, 1)))
    for tm in (1024, 512, 256, 128, 64, 32, 16, 8):
        if tm <= cap and m >= 2 * tm:
            return tm
    return min(m, 1024)


def _row_spec(tm, c):
    return pl.BlockSpec((tm, c), lambda i: (i, 0))


def _full2(r, c):
    return pl.BlockSpec((r, c), lambda i: (0, 0))


# ---------------------------------------------------------------------------
# Pallas kernels
# ---------------------------------------------------------------------------
def _cv1_cv2_kernel(x_ref, w1_ref, s1_ref, b1_ref, w2_ref, a_ref, y2_ref):
    """a = SiLU(BN(x @ w1)); y2 = x @ w2 -- single read of the bf16 x row-tile."""
    x = x_ref[...]
    t = jnp.dot(x, w1_ref[...], preferred_element_type=jnp.float32)
    a_ref[...] = _silu(t * s1_ref[...] + b1_ref[...]).astype(a_ref.dtype)
    y2_ref[...] = jnp.dot(x, w2_ref[...],
                          preferred_element_type=jnp.float32).astype(y2_ref.dtype)


def _bottleneck_kernel(h_ref, w1_ref, s1_ref, b1_ref, w2_ref, s2_ref, b2_ref,
                       o_ref, pad_ref, *, hh, ww, shortcut):
    """One full Bottleneck on one image, entirely in VMEM.

    h_ref / o_ref : (1, hh*ww, cm) bf16 blocks (flattened NHWC rows of one image).
    w*_ref        : (9, cm, cm) bf16 conv taps (kh-major), BN scale/bias (1, cm) f32.
    pad_ref       : (hh+2, ww+9, cm) f32 scratch holding the zero-padded image;
                    interior at rows [1, hh], cols [8, 8+ww) -> sublane-aligned stores.
    """
    cm = h_ref.shape[-1]

    def conv3x3(w_ref):
        acc = None
        for k in range(9):
            kh, kw = divmod(k, 3)
            p = pad_ref[kh:kh + hh, kw + 7:kw + 7 + ww, :].reshape(hh * ww, cm)
            y = jnp.dot(p.astype(w_ref.dtype), w_ref[k],
                        preferred_element_type=jnp.float32)
            acc = y if acc is None else acc + y
        return acc

    x32 = h_ref[0].astype(jnp.float32)                       # (hh*ww, cm) f32
    pad_ref[...] = jnp.zeros_like(pad_ref)                   # zero borders
    pad_ref[1:hh + 1, 8:8 + ww, :] = x32.reshape(hh, ww, cm)

    # first 3x3 conv + BN + SiLU  (t never leaves VMEM)
    t = _silu(conv3x3(w1_ref) * s1_ref[...] + b1_ref[...])
    pad_ref[1:hh + 1, 8:8 + ww, :] = t.reshape(hh, ww, cm)   # borders stay zero

    # second 3x3 conv + BN + SiLU (+ residual)
    u = _silu(conv3x3(w2_ref) * s2_ref[...] + b2_ref[...])
    if shortcut:
        u = u + x32
    o_ref[0] = u.astype(o_ref.dtype)


def _tail_kernel(h_ref, y2_ref, w3_ref, sa_ref, ba_ref, sb_ref, bb_ref,
                 w4a_ref, w4b_ref, s4_ref, b4_ref, o_ref):
    """Fused cv3(1x1) + concat-BN(2c_) + SiLU + cv4(1x1) + BN + SiLU."""
    y1 = jnp.dot(h_ref[...], w3_ref[...], preferred_element_type=jnp.float32)
    z1 = _silu(y1 * sa_ref[...] + ba_ref[...])
    z2 = _silu(y2_ref[...].astype(jnp.float32) * sb_ref[...] + bb_ref[...])
    y4 = (jnp.dot(z1.astype(w4a_ref.dtype), w4a_ref[...],
                  preferred_element_type=jnp.float32)
          + jnp.dot(z2.astype(w4b_ref.dtype), w4b_ref[...],
                    preferred_element_type=jnp.float32))
    o_ref[...] = _silu(y4 * s4_ref[...] + b4_ref[...]).astype(o_ref.dtype)


# ---------------------------------------------------------------------------
# pallas_call wrappers
# ---------------------------------------------------------------------------
def _pallas_cv1_cv2(x_mat, w1, s1, b1, w2):
    m, c1 = x_mat.shape
    cm = w1.shape[1]
    tm = _pick_tm(m, row_bytes=2 * c1 + 4 * cm)
    out_t = jax.ShapeDtypeStruct((m, cm), x_mat.dtype)
    return pl.pallas_call(
        _cv1_cv2_kernel,
        out_shape=(out_t, out_t),
        grid=(pl.cdiv(m, tm),),
        in_specs=[_row_spec(tm, c1), _full2(c1, cm), _full2(1, cm),
                  _full2(1, cm), _full2(c1, cm)],
        out_specs=(_row_spec(tm, cm), _row_spec(tm, cm)),
        compiler_params=_mosaic_params(),
    )(x_mat, w1, s1, b1, w2)


def _pallas_bottleneck(h, w1, s1, b1, w2, s2, b2, hh, ww, shortcut):
    nb, hw, cm = h.shape
    kernel = functools.partial(_bottleneck_kernel, hh=hh, ww=ww, shortcut=shortcut)
    img = pl.BlockSpec((1, hw, cm), lambda i: (i, 0, 0))
    w_spec = pl.BlockSpec((9, cm, cm), lambda i: (0, 0, 0))
    v_spec = pl.BlockSpec((1, cm), lambda i: (0, 0))
    return pl.pallas_call(
        kernel,
        out_shape=jax.ShapeDtypeStruct(h.shape, h.dtype),
        grid=(nb,),
        in_specs=[img, w_spec, v_spec, v_spec, w_spec, v_spec, v_spec],
        out_specs=img,
        scratch_shapes=[pltpu.VMEM((hh + 2, ww + 9, cm), jnp.float32)],
        compiler_params=_mosaic_params(),
    )(h, w1, s1, b1, w2, s2, b2)


def _pallas_tail(h, y2, w3, sa, ba, sb, bb, w4a, w4b, s4, b4):
    m, cm = h.shape
    c2 = w4a.shape[1]
    tm = _pick_tm(m, row_bytes=4 * cm + 4 * c2)
    return pl.pallas_call(
        _tail_kernel,
        out_shape=jax.ShapeDtypeStruct((m, c2), jnp.float32),
        grid=(pl.cdiv(m, tm),),
        in_specs=[_row_spec(tm, cm), _row_spec(tm, cm), _full2(cm, cm),
                  _full2(1, cm), _full2(1, cm), _full2(1, cm), _full2(1, cm),
                  _full2(cm, c2), _full2(cm, c2), _full2(1, c2), _full2(1, c2)],
        out_specs=_row_spec(tm, c2),
        compiler_params=_mosaic_params(),
    )(h, y2, w3, sa, ba, sb, bb, w4a, w4b, s4, b4)


# ---------------------------------------------------------------------------
# parameter plumbing (PyTorch layouts -> matmul layouts)
# ---------------------------------------------------------------------------
def _fold_bn(gamma, beta, mean, var, eps=_BN_EPS):
    s = (gamma / jnp.sqrt(var + eps)).astype(jnp.float32)
    b = (beta - mean * s).astype(jnp.float32)
    return s.reshape(1, -1), b.reshape(1, -1)


def _w1x1(w, dtype):  # (Cout, Cin, 1, 1) -> (Cin, Cout)
    return w[:, :, 0, 0].T.astype(dtype)


def _w3x3(w, dtype):  # (Cout, Cin, 3, 3) -> (9, Cin, Cout), tap index kh*3 + kw
    cout, cin = w.shape[0], w.shape[1]
    return w.transpose(2, 3, 1, 0).reshape(9, cin, cout).astype(dtype)


# ---------------------------------------------------------------------------
# full BottleneckCSP forward
# ---------------------------------------------------------------------------
@functools.partial(jax.jit, static_argnames=("n", "shortcut", "g"))
def bottleneck_csp_forward(x, params, *, n=1, shortcut=True, g=1):
    """x: (N, C1, H, W) float32; params: dict of PyTorch-layout weights / BN stats."""
    assert g == 1  # TODO(synk): grouped (g > 1) Bottleneck.cv2 conv not implemented.

    nb, c1, hh, ww = x.shape
    assert ww % 8 == 0, "W must be a multiple of 8 (sublane) for in-kernel reshapes"
    c_ = params["cv1_w"].shape[0]
    c2 = params["cv4_w"].shape[0]
    m = nb * hh * ww
    dt = jnp.bfloat16

    # Single NCHW -> (M, C) flatten at the boundary; bf16 cast fuses into the transpose.
    x_mat = x.transpose(0, 2, 3, 1).reshape(m, c1).astype(dt)

    # --- stage 1: fused cv1 (conv+BN+SiLU) and cv2 (plain conv), one read of x.
    s1, b1 = _fold_bn(params["cv1_bn_g"], params["cv1_bn_b"],
                      params["cv1_bn_m"], params["cv1_bn_v"])
    a, y2 = _pallas_cv1_cv2(x_mat, _w1x1(params["cv1_w"], dt), s1, b1,
                            _w1x1(params["cv2_w"], dt))

    # --- stage 2: n Bottlenecks, one fused pallas_call each (both 3x3 convs, BN, SiLU,
    #              residual) with the conv done in-VMEM against a padded per-image scratch.
    h = a.reshape(nb, hh * ww, c_)
    for i in range(n):
        s_a, b_a = _fold_bn(params[f"m{i}_cv1_bn_g"], params[f"m{i}_cv1_bn_b"],
                            params[f"m{i}_cv1_bn_m"], params[f"m{i}_cv1_bn_v"])
        s_b, b_b = _fold_bn(params[f"m{i}_cv2_bn_g"], params[f"m{i}_cv2_bn_b"],
                            params[f"m{i}_cv2_bn_m"], params[f"m{i}_cv2_bn_v"])
        h = _pallas_bottleneck(h, _w3x3(params[f"m{i}_cv1_w"], dt), s_a, b_a,
                               _w3x3(params[f"m{i}_cv2_w"], dt), s_b, b_b,
                               hh, ww, shortcut)
    h = h.reshape(m, c_)

    # --- stage 3: fused cv3 + concat-BN(2c_) + SiLU + cv4 (+BN+SiLU).
    s_cat, b_cat = _fold_bn(params["bn_g"], params["bn_b"],
                            params["bn_m"], params["bn_v"])
    s4, b4 = _fold_bn(params["cv4_bn_g"], params["cv4_bn_b"],
                      params["cv4_bn_m"], params["cv4_bn_v"])
    w4 = _w1x1(params["cv4_w"], dt)                                 # (2*c_, c2)
    out_mat = _pallas_tail(h, y2, _w1x1(params["cv3_w"], dt),
                           s_cat[:, :c_], b_cat[:, :c_],
                           s_cat[:, c_:], b_cat[:, c_:],
                           w4[:c_], w4[c_:], s4, b4)

    return out_mat.reshape(nb, hh, ww, c2).transpose(0, 3, 1, 2)


# ---------------------------------------------------------------------------
# pure-JAX reference (same math, no Pallas) for the sanity check
# ---------------------------------------------------------------------------
def _ref_conv2d(x, w, padding=0, groups=1):
    return jax.lax.conv_general_dilated(
        x, w, window_strides=(1, 1),
        padding=((padding, padding), (padding, padding)),
        dimension_numbers=("NCHW", "OIHW", "NCHW"),
        feature_group_count=groups)


def _ref_bn(x, g, b, m, v, eps=_BN_EPS):
    s = g / jnp.sqrt(v + eps)
    return x * s.reshape(1, -1, 1, 1) + (b - m * s).reshape(1, -1, 1, 1)


def _ref_silu(x):
    return x * jax.nn.sigmoid(x)


def _reference(x, p, n=1, shortcut=True, g=1):
    h = _ref_silu(_ref_bn(_ref_conv2d(x, p["cv1_w"]),
                          p["cv1_bn_g"], p["cv1_bn_b"], p["cv1_bn_m"], p["cv1_bn_v"]))
    for i in range(n):
        t = _ref_silu(_ref_bn(_ref_conv2d(h, p[f"m{i}_cv1_w"], padding=1),
                              p[f"m{i}_cv1_bn_g"], p[f"m{i}_cv1_bn_b"],
                              p[f"m{i}_cv1_bn_m"], p[f"m{i}_cv1_bn_v"]))
        u = _ref_silu(_ref_bn(_ref_conv2d(t, p[f"m{i}_cv2_w"], padding=1, groups=g),
                              p[f"m{i}_cv2_bn_g"], p[f"m{i}_cv2_bn_b"],
                              p[f"m{i}_cv2_bn_m"], p[f"m{i}_cv2_bn_v"]))
        h = h + u if shortcut else u
    y1 = _ref_conv2d(h, p["cv3_w"])
    y2 = _ref_conv2d(x, p["cv2_w"])
    z = _ref_silu(_ref_bn(jnp.concatenate([y1, y2], axis=1),
                          p["bn_g"], p["bn_b"], p["bn_m"], p["bn_v"]))
    return _ref_silu(_ref_bn(_ref_conv2d(z, p["cv4_w"]),
                             p["cv4_bn_g"], p["cv4_bn_b"],
                             p["cv4_bn_m"], p["cv4_bn_v"]))


if __name__ == "__main__":
    key = jax.random.PRNGKey(0)
    N, C1, C2, H, W, NREP = 2, 4, 8, 16, 16, 1
    E = 0.5
    c_ = int(C2 * E)

    kiter = iter(jax.random.split(key, 64))

    def conv_w(cout, cin, k):
        return 0.1 * jax.random.normal(next(kiter), (cout, cin, k, k), dtype=jnp.float32)

    def bn_params(c):
        return {
            "g": 1.0 + 0.1 * jax.random.normal(next(kiter), (c,), dtype=jnp.float32),
            "b": 0.1 * jax.random.normal(next(kiter), (c,), dtype=jnp.float32),
            "m": 0.1 * jax.random.normal(next(kiter), (c,), dtype=jnp.float32),
            "v": 1.0 + jnp.abs(jax.random.normal(next(kiter), (c,), dtype=jnp.float32)),
        }

    params = {}
    params["cv1_w"] = conv_w(c_, C1, 1)
    for kname, vv in bn_params(c_).items():
        params[f"cv1_bn_{kname}"] = vv
    params["cv2_w"] = conv_w(c_, C1, 1)
    params["cv3_w"] = conv_w(c_, c_, 1)
    params["cv4_w"] = conv_w(C2, 2 * c_, 1)
    for kname, vv in bn_params(C2).items():
        params[f"cv4_bn_{kname}"] = vv
    for kname, vv in bn_params(2 * c_).items():
        params[f"bn_{kname}"] = vv
    for i in range(NREP):
        params[f"m{i}_cv1_w"] = conv_w(c_, c_, 3)
        for kname, vv in bn_params(c_).items():
            params[f"m{i}_cv1_bn_{kname}"] = vv
        params[f"m{i}_cv2_w"] = conv_w(c_, c_, 3)
        for kname, vv in bn_params(c_).items():
            params[f"m{i}_cv2_bn_{kname}"] = vv

    x = jax.random.normal(next(kiter), (N, C1, H, W), dtype=jnp.float32)

    out = bottleneck_csp_forward(x, params, n=NREP, shortcut=True, g=1)
    out = jax.block_until_ready(out)

    ref = _reference(x, params, n=NREP, shortcut=True, g=1)
    assert out.shape == (N, C2, H, W), out.shape
    # bf16 matmuls with f32 accumulation / epilogues -> loosened tolerance vs f32 ref.
    assert jnp.allclose(out, ref, atol=2e-2, rtol=2e-2), float(jnp.max(jnp.abs(out - ref)))

    print("KERNEL_OK")
</pallas_src>

<mosaic_0001>
module attributes {stable_mosaic.version = 11 : i64} {
  func.func @_bottleneck_kernel(%arg0: i32, %arg1: memref<1x256x4xbf16, #tpu.memory_space<vmem>>, %arg2: memref<9x4x4xbf16, #tpu.memory_space<vmem>>, %arg3: memref<1x4xf32, #tpu.memory_space<vmem>>, %arg4: memref<1x4xf32, #tpu.memory_space<vmem>>, %arg5: memref<9x4x4xbf16, #tpu.memory_space<vmem>>, %arg6: memref<1x4xf32, #tpu.memory_space<vmem>>, %arg7: memref<1x4xf32, #tpu.memory_space<vmem>>, %arg8: memref<1x256x4xbf16, #tpu.memory_space<vmem>>, %arg9: memref<18x25x4xf32, #tpu.memory_space<vmem>>) attributes {dimension_semantics = [#tpu.dimension_semantics<parallel>], iteration_bounds = array<i64: 2>, scalar_prefetch = 0 : i64, scratch_operands = 1 : i64, tpu.core_type = #tpu.core_type<tc>, window_params = [{transform_indices = @transform_0, window_bounds = array<i64: 1, 256, 4>}, {pipeline_mode = #tpu.pipeline_mode<synchronous>, transform_indices = @transform_1, window_bounds = array<i64: 9, 4, 4>}, {pipeline_mode = #tpu.pipeline_mode<synchronous>, transform_indices = @transform_2, window_bounds = array<i64: 1, 4>}, {pipeline_mode = #tpu.pipeline_mode<synchronous>, transform_indices = @transform_3, window_bounds = array<i64: 1, 4>}, {pipeline_mode = #tpu.pipeline_mode<synchronous>, transform_indices = @transform_4, window_bounds = array<i64: 9, 4, 4>}, {pipeline_mode = #tpu.pipeline_mode<synchronous>, transform_indices = @transform_5, window_bounds = array<i64: 1, 4>}, {pipeline_mode = #tpu.pipeline_mode<synchronous>, transform_indices = @transform_6, window_bounds = array<i64: 1, 4>}, {transform_indices = @transform_7, window_bounds = array<i64: 1, 256, 4>}]} {
    %c0 = arith.constant 0 : index
    %c0_0 = arith.constant 0 : index
    %c0_1 = arith.constant 0 : index
    %0 = vector.load %arg1[%c0, %c0_0, %c0_1] : memref<1x256x4xbf16, #tpu.memory_space<vmem>>, vector<1x256x4xbf16>
    %1 = vector.shape_cast %0 : vector<1x256x4xbf16> to vector<256x4xbf16>
    %2 = arith.extf %1 : vector<256x4xbf16> to vector<256x4xf32>
    %cst = arith.constant 0.000000e+00 : f32
    %3 = vector.broadcast %cst : f32 to vector<18x25x4xf32>
    %c0_2 = arith.constant 0 : index
    %c0_3 = arith.constant 0 : index
    %c0_4 = arith.constant 0 : index
    %4 = vector.load %arg9[%c0_2, %c0_3, %c0_4] : memref<18x25x4xf32, #tpu.memory_space<vmem>>, vector<18x25x4xf32>
    tpu.vector_store %arg9[%c0_2, %c0_3, %c0_4], %3 {strides = array<i32>} : memref<18x25x4xf32, #tpu.memory_space<vmem>>, vector<18x25x4xf32>,
    %5 = vector.shape_cast %2 : vector<256x4xf32> to vector<16x16x4xf32>
    %c1 = arith.constant 1 : index
    %c8 = arith.constant 8 : index
    %c0_5 = arith.constant 0 : index
    %6 = vector.load %arg9[%c1, %c8, %c0_5] : memref<18x25x4xf32, #tpu.memory_space<vmem>>, vector<16x16x4xf32>
    tpu.vector_store %arg9[%c1, %c8, %c0_5], %5 {strides = array<i32>} : memref<18x25x4xf32, #tpu.memory_space<vmem>>, vector<16x16x4xf32>,
    %c0_6 = arith.constant 0 : index
    %c7 = arith.constant 7 : index
    %c0_7 = arith.constant 0 : index
    %7 = vector.load %arg9[%c0_6, %c7, %c0_7] : memref<18x25x4xf32, #tpu.memory_space<vmem>>, vector<16x16x4xf32>
    %8 = vector.shape_cast %7 : vector<16x16x4xf32> to vector<256x4xf32>
    %9 = arith.truncf %8 : vector<256x4xf32> to vector<256x4xbf16>
    %c0_8 = arith.constant 0 : index
    %c0_9 = arith.constant 0 : index
    %c0_10 = arith.constant 0 : index
    %10 = vector.load %arg2[%c0_8, %c0_9, %c0_10] : memref<9x4x4xbf16, #tpu.memory_space<vmem>>, vector<1x4x4xbf16>
    %11 = vector.shape_cast %10 : vector<1x4x4xbf16> to vector<4x4xbf16>
    %cst_11 = arith.constant dense<0.000000e+00> : vector<256x4xf32>
    %12 = tpu.matmul %9, %11, %cst_11 {dimension_numbers = #tpu.dot_dimension_numbers<[1], [0], [0], [1], [0, 0, 1, 1], [], []>} : vector<256x4xbf16>, vector<4x4xbf16>, vector<256x4xf32> -> vector<256x4xf32>
    %c0_12 = arith.constant 0 : index
    %c8_13 = arith.constant 8 : index
    %c0_14 = arith.constant 0 : index
    %13 = vector.load %arg9[%c0_12, %c8_13, %c0_14] : memref<18x25x4xf32, #tpu.memory_space<vmem>>, vector<16x16x4xf32>
    %14 = vector.shape_cast %13 : vector<16x16x4xf32> to vector<256x4xf32>
    %15 = arith.truncf %14 : vector<256x4xf32> to vector<256x4xbf16>
    %c1_15 = arith.constant 1 : index
    %c0_16 = arith.constant 0 : index
    %c0_17 = arith.constant 0 : index
    %16 = vector.load %arg2[%c1_15, %c0_16, %c0_17] : memref<9x4x4xbf16, #tpu.memory_space<vmem>>, vector<1x4x4xbf16>
    %17 = vector.shape_cast %16 : vector<1x4x4xbf16> to vector<4x4xbf16>
    %cst_18 = arith.constant dense<0.000000e+00> : vector<256x4xf32>
    %18 = tpu.matmul %15, %17, %cst_18 {dimension_numbers = #tpu.dot_dimension_numbers<[1], [0], [0], [1], [0, 0, 1, 1], [], []>} : vector<256x4xbf16>, vector<4x4xbf16>, vector<256x4xf32> -> vector<256x4xf32>
    %19 = arith.addf %12, %18 : vector<256x4xf32>
    %c0_19 = arith.constant 0 : index
    %c9 = arith.constant 9 : index
    %c0_20 = arith.constant 0 : index
    %20 = vector.load %arg9[%c0_19, %c9, %c0_20] : memref<18x25x4xf32, #tpu.memory_space<vmem>>, vector<16x16x4xf32>
    %21 = vector.shape_cast %20 : vector<16x16x4xf32> to vector<256x4xf32>
    %22 = arith.truncf %21 : vector<256x4xf32> to vector<256x4xbf16>
    %c2 = arith.constant 2 : index
    %c0_21 = arith.constant 0 : index
    %c0_22 = arith.constant 0 : index
    %23 = vector.load %arg2[%c2, %c0_21, %c0_22] : memref<9x4x4xbf16, #tpu.memory_space<vmem>>, vector<1x4x4xbf16>
    %24 = vector.shape_cast %23 : vector<1x4x4xbf16> to vector<4x4xbf16>
    %cst_23 = arith.constant dense<0.000000e+00> : vector<256x4xf32>
    %25 = tpu.matmul %22, %24, %cst_23 {dimension_numbers = #tpu.dot_dimension_numbers<[1], [0], [0], [1], [0, 0, 1, 1], [], []>} : vector<256x4xbf16>, vector<4x4xbf16>, vector<256x4xf32> -> vector<256x4xf32>
    %26 = arith.addf %19, %25 : vector<256x4xf32>
    %c1_24 = arith.constant 1 : index
    %c7_25 = arith.constant 7 : index
    %c0_26 = arith.constant 0 : index
    %27 = vector.load %arg9[%c1_24, %c7_25, %c0_26] : memref<18x25x4xf32, #tpu.memory_space<vmem>>, vector<16x16x4xf32>
    %28 = vector.shape_cast %27 : vector<16x16x4xf32> to vector<256x4xf32>
    %29 = arith.truncf %28 : vector<256x4xf32> to vector<256x4xbf16>
    %c3 = arith.constant 3 : index
    %c0_27 = arith.constant 0 : index
    %c0_28 = arith.constant 0 : index
    %30 = vector.load %arg2[%c3, %c0_27, %c0_28] : memref<9x4x4xbf16, #tpu.memory_space<vmem>>, vector<1x4x4xbf16>
    %31 = vector.shape_cast %30 : vector<1x4x4xbf16> to vector<4x4xbf16>
    %cst_29 = arith.constant dense<0.000000e+00> : vector<256x4xf32>
    %32 = tpu.matmul %29, %31, %cst_29 {dimension_numbers = #tpu.dot_dimension_numbers<[1], [0], [0], [1], [0, 0, 1, 1], [], []>} : vector<256x4xbf16>, vector<4x4xbf16>, vector<256x4xf32> -> vector<256x4xf32>
    %33 = arith.addf %26, %32 : vector<256x4xf32>
    %c1_30 = arith.constant 1 : index
    %c8_31 = arith.constant 8 : index
    %c0_32 = arith.constant 0 : index
    %34 = vector.load %arg9[%c1_30, %c8_31, %c0_32] : memref<18x25x4xf32, #tpu.memory_space<vmem>>, vector<16x16x4xf32>
    %35 = vector.shape_cast %34 : vector<16x16x4xf32> to vector<256x4xf32>
    %36 = arith.truncf %35 : vector<256x4xf32> to vector<256x4xbf16>
    %c4 = arith.constant 4 : index
    %c0_33 = arith.constant 0 : index
    %c0_34 = arith.constant 0 : index
    %37 = vector.load %arg2[%c4, %c0_33, %c0_34] : memref<9x4x4xbf16, #tpu.memory_space<vmem>>, vector<1x4x4xbf16>
    %38 = vector.shape_cast %37 : vector<1x4x4xbf16> to vector<4x4xbf16>
    %cst_35 = arith.constant dense<0.000000e+00> : vector<256x4xf32>
    %39 = tpu.matmul %36, %38, %cst_35 {dimension_numbers = #tpu.dot_dimension_numbers<[1], [0], [0], [1], [0, 0, 1, 1], [], []>} : vector<256x4xbf16>, vector<4x4xbf16>, vector<256x4xf32> -> vector<256x4xf32>
    %40 = arith.addf %33, %39 : vector<256x4xf32>
    %c1_36 = arith.constant 1 : index
    %c9_37 = arith.constant 9 : index
    %c0_38 = arith.constant 0 : index
    %41 = vector.load %arg9[%c1_36, %c9_37, %c0_38] : memref<18x25x4xf32, #tpu.memory_space<vmem>>, vector<16x16x4xf32>
    %42 = vector.shape_cast %41 : vector<16x16x4xf32> to vector<256x4xf32>
    %43 = arith.truncf %42 : vector<256x4xf32> to vector<256x4xbf16>
    %c5 = arith.constant 5 : index
    %c0_39 = arith.constant 0 : index
    %c0_40 = arith.constant 0 : index
    %44 = vector.load %arg2[%c5, %c0_39, %c0_40] : memref<9x4x4xbf16, #tpu.memory_space<vmem>>, vector<1x4x4xbf16>
    %45 = vector.shape_cast %44 : vector<1x4x4xbf16> to vector<4x4xbf16>
    %cst_41 = arith.constant dense<0.000000e+00> : vector<256x4xf32>
    %46 = tpu.matmul %43, %45, %cst_41 {dimension_numbers = #tpu.dot_dimension_numbers<[1], [0], [0], [1], [0, 0, 1, 1], [], []>} : vector<256x4xbf16>, vector<4x4xbf16>, vector<256x4xf32> -> vector<256x4xf32>
    %47 = arith.addf %40, %46 : vector<256x4xf32>
    %c2_42 = arith.constant 2 : index
    %c7_43 = arith.constant 7 : index
    %c0_44 = arith.constant 0 : index
    %48 = vector.load %arg9[%c2_42, %c7_43, %c0_44] : memref<18x25x4xf32, #tpu.memory_space<vmem>>, vector<16x16x4xf32>
    %49 = vector.shape_cast %48 : vector<16x16x4xf32> to vector<256x4xf32>
    %50 = arith.truncf %49 : vector<256x4xf32> to vector<256x4xbf16>
    %c6 = arith.constant 6 : index
    %c0_45 = arith.constant 0 : index
    %c0_46 = arith.constant 0 : index
    %51 = vector.load %arg2[%c6, %c0_45, %c0_46] : memref<9x4x4xbf16, #tpu.memory_space<vmem>>, vector<1x4x4xbf16>
    %52 = vector.shape_cast %51 : vector<1x4x4xbf16> to vector<4x4xbf16>
    %cst_47 = arith.constant dense<0.000000e+00> : vector<256x4xf32>
    %53 = tpu.matmul %50, %52, %cst_47 {dimension_numbers = #tpu.dot_dimension_numbers<[1], [0], [0], [1], [0, 0, 1, 1], [], []>} : vector<256x4xbf16>, vector<4x4xbf16>, vector<256x4xf32> -> vector<256x4xf32>
    %54 = arith.addf %47, %53 : vector<256x4xf32>
    %c2_48 = arith.constant 2 : index
    %c8_49 = arith.constant 8 : index
    %c0_50 = arith.constant 0 : index
    %55 = vector.load %arg9[%c2_48, %c8_49, %c0_50] : memref<18x25x4xf32, #tpu.memory_space<vmem>>, vector<16x16x4xf32>
    %56 = vector.shape_cast %55 : vector<16x16x4xf32> to vector<256x4xf32>
    %57 = arith.truncf %56 : vector<256x4xf32> to vector<256x4xbf16>
    %c7_51 = arith.constant 7 : index
    %c0_52 = arith.constant 0 : index
    %c0_53 = arith.constant 0 : index
    %58 = vector.load %arg2[%c7_51, %c0_52, %c0_53] : memref<9x4x4xbf16, #tpu.memory_space<vmem>>, vector<1x4x4xbf16>
    %59 = vector.shape_cast %58 : vector<1x4x4xbf16> to vector<4x4xbf16>
    %cst_54 = arith.constant dense<0.000000e+00> : vector<256x4xf32>
    %60 = tpu.matmul %57, %59, %cst_54 {dimension_numbers = #tpu.dot_dimension_numbers<[1], [0], [0], [1], [0, 0, 1, 1], [], []>} : vector<256x4xbf16>, vector<4x4xbf16>, vector<256x4xf32> -> vector<256x4xf32>
    %61 = arith.addf %54, %60 : vector<256x4xf32>
    %c2_55 = arith.constant 2 : index
    %c9_56 = arith.constant 9 : index
    %c0_57 = arith.constant 0 : index
    %62 = vector.load %arg9[%c2_55, %c9_56, %c0_57] : memref<18x25x4xf32, #tpu.memory_space<vmem>>, vector<16x16x4xf32>
    %63 = vector.shape_cast %62 : vector<16x16x4xf32> to vector<256x4xf32>
    %64 = arith.truncf %63 : vector<256x4xf32> to vector<256x4xbf16>
    %c8_58 = arith.constant 8 : index
    %c0_59 = arith.constant 0 : index
    %c0_60 = arith.constant 0 : index
    %65 = vector.load %arg2[%c8_58, %c0_59, %c0_60] : memref<9x4x4xbf16, #tpu.memory_space<vmem>>, vector<1x4x4xbf16>
    %66 = vector.shape_cast %65 : vector<1x4x4xbf16> to vector<4x4xbf16>
    %cst_61 = arith.constant dense<0.000000e+00> : vector<256x4xf32>
    %67 = tpu.matmul %64, %66, %cst_61 {dimension_numbers = #tpu.dot_dimension_numbers<[1], [0], [0], [1], [0, 0, 1, 1], [], []>} : vector<256x4xbf16>, vector<4x4xbf16>, vector<256x4xf32> -> vector<256x4xf32>
    %68 = arith.addf %61, %67 : vector<256x4xf32>
    %c0_62 = arith.constant 0 : index
    %c0_63 = arith.constant 0 : index
    %69 = vector.load %arg3[%c0_62, %c0_63] : memref<1x4xf32, #tpu.memory_space<vmem>>, vector<1x4xf32>
    %70 = vector.broadcast %69 : vector<1x4xf32> to vector<256x4xf32>
    %71 = arith.mulf %68, %70 : vector<256x4xf32>
    %c0_64 = arith.constant 0 : index
    %c0_65 = arith.constant 0 : index
    %72 = vector.load %arg4[%c0_64, %c0_65] : memref<1x4xf32, #tpu.memory_space<vmem>>, vector<1x4xf32>
    %73 = vector.broadcast %72 : vector<1x4xf32> to vector<256x4xf32>
    %74 = arith.addf %71, %73 : vector<256x4xf32>
    %75 = arith.negf %74 : vector<256x4xf32>
    %76 = math.exp %75 : vector<256x4xf32>
    %cst_66 = arith.constant 1.000000e+00 : f32
    %77 = vector.broadcast %cst_66 : f32 to vector<256x4xf32>
    %78 = arith.addf %77, %76 : vector<256x4xf32>
    %79 = arith.divf %77, %78 : vector<256x4xf32>
    %80 = arith.mulf %74, %79 : vector<256x4xf32>
    %81 = vector.shape_cast %80 : vector<256x4xf32> to vector<16x16x4xf32>
    %c1_67 = arith.constant 1 : index
    %c8_68 = arith.constant 8 : index
    %c0_69 = arith.constant 0 : index
    %82 = vector.load %arg9[%c1_67, %c8_68, %c0_69] : memref<18x25x4xf32, #tpu.memory_space<vmem>>, vector<16x16x4xf32>
    tpu.vector_store %arg9[%c1_67, %c8_68, %c0_69], %81 {strides = array<i32>} : memref<18x25x4xf32, #tpu.memory_space<vmem>>, vector<16x16x4xf32>,
    %c0_70 = arith.constant 0 : index
    %c7_71 = arith.constant 7 : index
    %c0_72 = arith.constant 0 : index
    %83 = vector.load %arg9[%c0_70, %c7_71, %c0_72] : memref<18x25x4xf32, #tpu.memory_space<vmem>>, vector<16x16x4xf32>
    %84 = vector.shape_cast %83 : vector<16x16x4xf32> to vector<256x4xf32>
    %85 = arith.truncf %84 : vector<256x4xf32> to vector<256x4xbf16>
    %c0_73 = arith.constant 0 : index
    %c0_74 = arith.constant 0 : index
    %c0_75 = arith.constant 0 : index
    %86 = vector.load %arg5[%c0_73, %c0_74, %c0_75] : memref<9x4x4xbf16, #tpu.memory_space<vmem>>, vector<1x4x4xbf16>
    %87 = vector.shape_cast %86 : vector<1x4x4xbf16> to vector<4x4xbf16>
    %cst_76 = arith.constant dense<0.000000e+00> : vector<256x4xf32>
    %88 = tpu.matmul %85, %87, %cst_76 {dimension_numbers = #tpu.dot_dimension_numbers<[1], [0], [0], [1], [0, 0, 1, 1], [], []>} : vector<256x4xbf16>, vector<4x4xbf16>, vector<256x4xf32> -> vector<256x4xf32>
    %c0_77 = arith.constant 0 : index
    %c8_78 = arith.constant 8 : index
    %c0_79 = arith.constant 0 : index
    %89 = vector.load %arg9[%c0_77, %c8_78, %c0_79] : memref<18x25x4xf32, #tpu.memory_space<vmem>>, vector<16x16x4xf32>
    %90 = vector.shape_cast %89 : vector<16x16x4xf32> to vector<256x4xf32>
    %91 = arith.truncf %90 : vector<256x4xf32> to vector<256x4xbf16>
    %c1_80 = arith.constant 1 : index
    %c0_81 = arith.constant 0 : index
    %c0_82 = arith.constant 0 : index
    %92 = vector.load %arg5[%c1_80, %c0_81, %c0_82] : memref<9x4x4xbf16, #tpu.memory_space<vmem>>, vector<1x4x4xbf16>
    %93 = vector.shape_cast %92 : vector<1x4x4xbf16> to vector<4x4xbf16>
    %cst_83 = arith.constant dense<0.000000e+00> : vector<256x4xf32>
    %94 = tpu.matmul %91, %93, %cst_83 {dimension_numbers = #tpu.dot_dimension_numbers<[1], [0], [0], [1], [0, 0, 1, 1], [], []>} : vector<256x4xbf16>, vector<4x4xbf16>, vector<256x4xf32> -> vector<256x4xf32>
    %95 = arith.addf %88, %94 : vector<256x4xf32>
    %c0_84 = arith.constant 0 : index
    %c9_85 = arith.constant 9 : index
    %c0_86 = arith.constant 0 : index
    %96 = vector.load %arg9[%c0_84, %c9_85, %c0_86] : memref<18x25x4xf32, #tpu.memory_space<vmem>>, vector<16x16x4xf32>
    %97 = vector.shape_cast %96 : vector<16x16x4xf32> to vector<256x4xf32>
    %98 = arith.truncf %97 : vector<256x4xf32> to vector<256x4xbf16>
    %c2_87 = arith.constant 2 : index
    %c0_88 = arith.constant 0 : index
    %c0_89 = arith.constant 0 : index
    %99 = vector.load %arg5[%c2_87, %c0_88, %c0_89] : memref<9x4x4xbf16, #tpu.memory_space<vmem>>, vector<1x4x4xbf16>
    %100 = vector.shape_cast %99 : vector<1x4x4xbf16> to vector<4x4xbf16>
    %cst_90 = arith.constant dense<0.000000e+00> : vector<256x4xf32>
    %101 = tpu.matmul %98, %100, %cst_90 {dimension_numbers = #tpu.dot_dimension_numbers<[1], [0], [0], [1], [0, 0, 1, 1], [], []>} : vector<256x4xbf16>, vector<4x4xbf16>, vector<256x4xf32> -> vector<256x4xf32>
    %102 = arith.addf %95, %101 : vector<256x4xf32>
    %c1_91 = arith.constant 1 : index
    %c7_92 = arith.constant 7 : index
    %c0_93 = arith.constant 0 : index
    %103 = vector.load %arg9[%c1_91, %c7_92, %c0_93] : memref<18x25x4xf32, #tpu.memory_space<vmem>>, vector<16x16x4xf32>
    %104 = vector.shape_cast %103 : vector<16x16x4xf32> to vector<256x4xf32>
    %105 = arith.truncf %104 : vector<256x4xf32> to vector<256x4xbf16>
    %c3_94 = arith.constant 3 : index
    %c0_95 = arith.constant 0 : index
    %c0_96 = arith.constant 0 : index
    %106 = vector.load %arg5[%c3_94, %c0_95, %c0_96] : memref<9x4x4xbf16, #tpu.memory_space<vmem>>, vector<1x4x4xbf16>
    %107 = vector.shape_cast %106 : vector<1x4x4xbf16> to vector<4x4xbf16>
    %cst_97 = arith.constant dense<0.000000e+00> : vector<256x4xf32>
    %108 = tpu.matmul %105, %107, %cst_97 {dimension_numbers = #tpu.dot_dimension_numbers<[1], [0], [0], [1], [0, 0, 1, 1], [], []>} : vector<256x4xbf16>, vector<4x4xbf16>, vector<256x4xf32> -> vector<256x4xf32>
    %109 = arith.addf %102, %108 : vector<256x4xf32>
    %c1_98 = arith.constant 1 : index
    %c8_99 = arith.constant 8 : index
    %c0_100 = arith.constant 0 : index
    %110 = vector.load %arg9[%c1_98, %c8_99, %c0_100] : memref<18x25x4xf32, #tpu.memory_space<vmem>>, vector<16x16x4xf32>
    %111 = vector.shape_cast %110 : vector<16x16x4xf32> to vector<256x4xf32>
    %112 = arith.truncf %111 : vector<256x4xf32> to vector<256x4xbf16>
    %c4_101 = arith.constant 4 : index
    %c0_102 = arith.constant 0 : index
    %c0_103 = arith.constant 0 : index
    %113 = vector.load %arg5[%c4_101, %c0_102, %c0_103] : memref<9x4x4xbf16, #tpu.memory_space<vmem>>, vector<1x4x4xbf16>
    %114 = vector.shape_cast %113 : vector<1x4x4xbf16> to vector<4x4xbf16>
    %cst_104 = arith.constant dense<0.000000e+00> : vector<256x4xf32>
    %115 = tpu.matmul %112, %114, %cst_104 {dimension_numbers = #tpu.dot_dimension_numbers<[1], [0], [0], [1], [0, 0, 1, 1], [], []>} : vector<256x4xbf16>, vector<4x4xbf16>, vector<256x4xf32> -> vector<256x4xf32>
    %116 = arith.addf %109, %115 : vector<256x4xf32>
    %c1_105 = arith.constant 1 : index
    %c9_106 = arith.constant 9 : index
    %c0_107 = arith.constant 0 : index
    %117 = vector.load %arg9[%c1_105, %c9_106, %c0_107] : memref<18x25x4xf32, #tpu.memory_space<vmem>>, vector<16x16x4xf32>
    %118 = vector.shape_cast %117 : vector<16x16x4xf32> to vector<256x4xf32>
    %119 = arith.truncf %118 : vector<256x4xf32> to vector<256x4xbf16>
    %c5_108 = arith.constant 5 : index
    %c0_109 = arith.constant 0 : index
    %c0_110 = arith.constant 0 : index
    %120 = vector.load %arg5[%c5_108, %c0_109, %c0_110] : memref<9x4x4xbf16, #tpu.memory_space<vmem>>, vector<1x4x4xbf16>
    %121 = vector.shape_cast %120 : vector<1x4x4xbf16> to vector<4x4xbf16>
    %cst_111 = arith.constant dense<0.000000e+00> : vector<256x4xf32>
    %122 = tpu.matmul %119, %121, %cst_111 {dimension_numbers = #tpu.dot_dimension_numbers<[1], [0], [0], [1], [0, 0, 1, 1], [], []>} : vector<256x4xbf16>, vector<4x4xbf16>, vector<256x4xf32> -> vector<256x4xf32>
    %123 = arith.addf %116, %122 : vector<256x4xf32>
    %c2_112 = arith.constant 2 : index
    %c7_113 = arith.constant 7 : index
    %c0_114 = arith.constant 0 : index
    %124 = vector.load %arg9[%c2_112, %c7_113, %c0_114] : memref<18x25x4xf32, #tpu.memory_space<vmem>>, vector<16x16x4xf32>
    %125 = vector.shape_cast %124 : vector<16x16x4xf32> to vector<256x4xf32>
    %126 = arith.truncf %125 : vector<256x4xf32> to vector<256x4xbf16>
    %c6_115 = arith.constant 6 : index
    %c0_116 = arith.constant 0 : index
    %c0_117 = arith.constant 0 : index
    %127 = vector.load %arg5[%c6_115, %c0_116, %c0_117] : memref<9x4x4xbf16, #tpu.memory_space<vmem>>, vector<1x4x4xbf16>
    %128 = vector.shape_cast %127 : vector<1x4x4xbf16> to vector<4x4xbf16>
    %cst_118 = arith.constant dense<0.000000e+00> : vector<256x4xf32>
    %129 = tpu.matmul %126, %128, %cst_118 {dimension_numbers = #tpu.dot_dimension_numbers<[1], [0], [0], [1], [0, 0, 1, 1], [], []>} : vector<256x4xbf16>, vector<4x4xbf16>, vector<256x4xf32> -> vector<256x4xf32>
    %130 = arith.addf %123, %129 : vector<256x4xf32>
    %c2_119 = arith.constant 2 : index
    %c8_120 = arith.constant 8 : index
    %c0_121 = arith.constant 0 : index
    %131 = vector.load %arg9[%c2_119, %c8_120, %c0_121] : memref<18x25x4xf32, #tpu.memory_space<vmem>>, vector<16x16x4xf32>
    %132 = vector.shape_cast %131 : vector<16x16x4xf32> to vector<256x4xf32>
    %133 = arith.truncf %132 : vector<256x4xf32> to vector<256x4xbf16>
    %c7_122 = arith.constant 7 : index
    %c0_123 = arith.constant 0 : index
    %c0_124 = arith.constant 0 : index
    %134 = vector.load %arg5[%c7_122, %c0_123, %c0_124] : memref<9x4x4xbf16, #tpu.memory_space<vmem>>, vector<1x4x4xbf16>
    %135 = vector.shape_cast %134 : vector<1x4x4xbf16> to vector<4x4xbf16>
    %cst_125 = arith.constant dense<0.000000e+00> : vector<256x4xf32>
    %136 = tpu.matmul %133, %135, %cst_125 {dimension_numbers = #tpu.dot_dimension_numbers<[1], [0], [0], [1], [0, 0, 1, 1], [], []>} : vector<256x4xbf16>, vector<4x4xbf16>, vector<256x4xf32> -> vector<256x4xf32>
    %137 = arith.addf %130, %136 : vector<256x4xf32>
    %c2_126 = arith.constant 2 : index
    %c9_127 = arith.constant 9 : index
    %c0_128 = arith.constant 0 : index
    %138 = vector.load %arg9[%c2_126, %c9_127, %c0_128] : memref<18x25x4xf32, #tpu.memory_space<vmem>>, vector<16x16x4xf32>
    %139 = vector.shape_cast %138 : vector<16x16x4xf32> to vector<256x4xf32>
    %140 = arith.truncf %139 : vector<256x4xf32> to vector<256x4xbf16>
    %c8_129 = arith.constant 8 : index
    %c0_130 = arith.constant 0 : index
    %c0_131 = arith.constant 0 : index
    %141 = vector.load %arg5[%c8_129, %c0_130, %c0_131] : memref<9x4x4xbf16, #tpu.memory_space<vmem>>, vector<1x4x4xbf16>
    %142 = vector.shape_cast %141 : vector<1x4x4xbf16> to vector<4x4xbf16>
    %cst_132 = arith.constant dense<0.000000e+00> : vector<256x4xf32>
    %143 = tpu.matmul %140, %142, %cst_132 {dimension_numbers = #tpu.dot_dimension_numbers<[1], [0], [0], [1], [0, 0, 1, 1], [], []>} : vector<256x4xbf16>, vector<4x4xbf16>, vector<256x4xf32> -> vector<256x4xf32>
    %144 = arith.addf %137, %143 : vector<256x4xf32>
    %c0_133 = arith.constant 0 : index
    %c0_134 = arith.constant 0 : index
    %145 = vector.load %arg6[%c0_133, %c0_134] : memref<1x4xf32, #tpu.memory_space<vmem>>, vector<1x4xf32>
    %146 = vector.broadcast %145 : vector<1x4xf32> to vector<256x4xf32>
    %147 = arith.mulf %144, %146 : vector<256x4xf32>
    %c0_135 = arith.constant 0 : index
    %c0_136 = arith.constant 0 : index
    %148 = vector.load %arg7[%c0_135, %c0_136] : memref<1x4xf32, #tpu.memory_space<vmem>>, vector<1x4xf32>
    %149 = vector.broadcast %148 : vector<1x4xf32> to vector<256x4xf32>
    %150 = arith.addf %147, %149 : vector<256x4xf32>
    %151 = arith.negf %150 : vector<256x4xf32>
    %152 = math.exp %151 : vector<256x4xf32>
    %cst_137 = arith.constant 1.000000e+00 : f32
    %153 = vector.broadcast %cst_137 : f32 to vector<256x4xf32>
    %154 = arith.addf %153, %152 : vector<256x4xf32>
    %155 = arith.divf %153, %154 : vector<256x4xf32>
    %156 = arith.mulf %150, %155 : vector<256x4xf32>
    %157 = arith.addf %156, %2 : vector<256x4xf32>
    %158 = arith.truncf %157 : vector<256x4xf32> to vector<256x4xbf16>
    %c0_138 = arith.constant 0 : index
    %c0_139 = arith.constant 0 : index
    %c0_140 = arith.constant 0 : index
    %159 = vector.load %arg8[%c0_138, %c0_139, %c0_140] : memref<1x256x4xbf16, #tpu.memory_space<vmem>>, vector<1x256x4xbf16>
    %160 = vector.shape_cast %159 : vector<1x256x4xbf16> to vector<256x4xbf16>
    %161 = vector.shape_cast %158 : vector<256x4xbf16> to vector<1x256x4xbf16>
    tpu.vector_store %arg8[%c0_138, %c0_139, %c0_140], %161 {strides = array<i32>} : memref<1x256x4xbf16, #tpu.memory_space<vmem>>, vector<1x256x4xbf16>,
    return
  }
  func.func @transform_0(%arg0: i32) -> (i32, i32, i32) {
    %c0_i32 = arith.constant 0 : i32
    %c0_i32_0 = arith.constant 0 : i32
    %c0_i32_1 = arith.constant 0 : i32
    return %arg0, %c0_i32, %c0_i32_0 : i32, i32, i32
  }
  func.func @transform_1(%arg0: i32) -> (i32, i32, i32) {
    %c0_i32 = arith.constant 0 : i32
    %c0_i32_0 = arith.constant 0 : i32
    %c0_i32_1 = arith.constant 0 : i32
    %c0_i32_2 = arith.constant 0 : i32
    return %c0_i32, %c0_i32_0, %c0_i32_1 : i32, i32, i32
  }
  func.func @transform_2(%arg0: i32) -> (i32, i32) {
    %c0_i32 = arith.constant 0 : i32
    %c0_i32_0 = arith.constant 0 : i32
    %c0_i32_1 = arith.constant 0 : i32
    return %c0_i32, %c0_i32_0 : i32, i32
  }
  func.func @transform_3(%arg0: i32) -> (i32, i32) {
    %c0_i32 = arith.constant 0 : i32
    %c0_i32_0 = arith.constant 0 : i32
    %c0_i32_1 = arith.constant 0 : i32
    return %c0_i32, %c0_i32_0 : i32, i32
  }
  func.func @transform_4(%arg0: i32) -> (i32, i32, i32) {
    %c0_i32 = arith.constant 0 : i32
    %c0_i32_0 = arith.constant 0 : i32
    %c0_i32_1 = arith.constant 0 : i32
    %c0_i32_2 = arith.constant 0 : i32
    return %c0_i32, %c0_i32_0, %c0_i32_1 : i32, i32, i32
  }
  func.func @transform_5(%arg0: i32) -> (i32, i32) {
    %c0_i32 = arith.constant 0 : i32
    %c0_i32_0 = arith.constant 0 : i32
    %c0_i32_1 = arith.constant 0 : i32
    return %c0_i32, %c0_i32_0 : i32, i32
  }
  func.func @transform_6(%arg0: i32) -> (i32, i32) {
    %c0_i32 = arith.constant 0 : i32
    %c0_i32_0 = arith.constant 0 : i32
    %c0_i32_1 = arith.constant 0 : i32
    return %c0_i32, %c0_i32_0 : i32, i32
  }
  func.func @transform_7(%arg0: i32) -> (i32, i32, i32) {
    %c0_i32 = arith.constant 0 : i32
    %c0_i32_0 = arith.constant 0 : i32
    %c0_i32_1 = arith.constant 0 : i32
    return %arg0, %c0_i32, %c0_i32_0 : i32, i32, i32
  }
}

module attributes {stable_mosaic.version = 11 : i64} {
  func.func @_cv1_cv2_kernel(%arg0: i32, %arg1: memref<256x4xbf16, #tpu.memory_space<vmem>>, %arg2: memref<4x4xbf16, #tpu.memory_space<vmem>>, %arg3: memref<1x4xf32, #tpu.memory_space<vmem>>, %arg4: memref<1x4xf32, #tpu.memory_space<vmem>>, %arg5: memref<4x4xbf16, #tpu.memory_space<vmem>>, %arg6: memref<256x4xbf16, #tpu.memory_space<vmem>>, %arg7: memref<256x4xbf16, #tpu.memory_space<vmem>>) attributes {dimension_semantics = [#tpu.dimension_semantics<parallel>], iteration_bounds = array<i64: 2>, scalar_prefetch = 0 : i64, scratch_operands = 0 : i64, tpu.core_type = #tpu.core_type<tc>, window_params = [{transform_indices = @transform_0, window_bounds = array<i64: 256, 4>}, {pipeline_mode = #tpu.pipeline_mode<synchronous>, transform_indices = @transform_1, window_bounds = array<i64: 4, 4>}, {pipeline_mode = #tpu.pipeline_mode<synchronous>, transform_indices = @transform_2, window_bounds = array<i64: 1, 4>}, {pipeline_mode = #tpu.pipeline_mode<synchronous>, transform_indices = @transform_3, window_bounds = array<i64: 1, 4>}, {pipeline_mode = #tpu.pipeline_mode<synchronous>, transform_indices = @transform_4, window_bounds = array<i64: 4, 4>}, {transform_indices = @transform_5, window_bounds = array<i64: 256, 4>}, {transform_indices = @transform_6, window_bounds = array<i64: 256, 4>}]} {
    %c0 = arith.constant 0 : index
    %c0_0 = arith.constant 0 : index
    %0 = vector.load %arg1[%c0, %c0_0] : memref<256x4xbf16, #tpu.memory_space<vmem>>, vector<256x4xbf16>
    %c0_1 = arith.constant 0 : index
    %c0_2 = arith.constant 0 : index
    %1 = vector.load %arg2[%c0_1, %c0_2] : memref<4x4xbf16, #tpu.memory_space<vmem>>, vector<4x4xbf16>
    %cst = arith.constant dense<0.000000e+00> : vector<256x4xf32>
    %2 = tpu.matmul %0, %1, %cst {dimension_numbers = #tpu.dot_dimension_numbers<[1], [0], [0], [1], [0, 0, 1, 1], [], []>} : vector<256x4xbf16>, vector<4x4xbf16>, vector<256x4xf32> -> vector<256x4xf32>
    %c0_3 = arith.constant 0 : index
    %c0_4 = arith.constant 0 : index
    %3 = vector.load %arg3[%c0_3, %c0_4] : memref<1x4xf32, #tpu.memory_space<vmem>>, vector<1x4xf32>
    %4 = vector.broadcast %3 : vector<1x4xf32> to vector<256x4xf32>
    %5 = arith.mulf %2, %4 : vector<256x4xf32>
    %c0_5 = arith.constant 0 : index
    %c0_6 = arith.constant 0 : index
    %6 = vector.load %arg4[%c0_5, %c0_6] : memref<1x4xf32, #tpu.memory_space<vmem>>, vector<1x4xf32>
    %7 = vector.broadcast %6 : vector<1x4xf32> to vector<256x4xf32>
    %8 = arith.addf %5, %7 : vector<256x4xf32>
    %9 = arith.negf %8 : vector<256x4xf32>
    %10 = math.exp %9 : vector<256x4xf32>
    %cst_7 = arith.constant 1.000000e+00 : f32
    %11 = vector.broadcast %cst_7 : f32 to vector<256x4xf32>
    %12 = arith.addf %11, %10 : vector<256x4xf32>
    %13 = arith.divf %11, %12 : vector<256x4xf32>
    %14 = arith.mulf %8, %13 : vector<256x4xf32>
    %15 = arith.truncf %14 : vector<256x4xf32> to vector<256x4xbf16>
    %c0_8 = arith.constant 0 : index
    %c0_9 = arith.constant 0 : index
    %16 = vector.load %arg6[%c0_8, %c0_9] : memref<256x4xbf16, #tpu.memory_space<vmem>>, vector<256x4xbf16>
    tpu.vector_store %arg6[%c0_8, %c0_9], %15 {strides = array<i32>} : memref<256x4xbf16, #tpu.memory_space<vmem>>, vector<256x4xbf16>,
    %c0_10 = arith.constant 0 : index
    %c0_11 = arith.constant 0 : index
    %17 = vector.load %arg5[%c0_10, %c0_11] : memref<4x4xbf16, #tpu.memory_space<vmem>>, vector<4x4xbf16>
    %cst_12 = arith.constant dense<0.000000e+00> : vector<256x4xf32>
    %18 = tpu.matmul %0, %17, %cst_12 {dimension_numbers = #tpu.dot_dimension_numbers<[1], [0], [0], [1], [0, 0, 1, 1], [], []>} : vector<256x4xbf16>, vector<4x4xbf16>, vector<256x4xf32> -> vector<256x4xf32>
    %19 = arith.truncf %18 : vector<256x4xf32> to vector<256x4xbf16>
    %c0_13 = arith.constant 0 : index
    %c0_14 = arith.constant 0 : index
    %20 = vector.load %arg7[%c0_13, %c0_14] : memref<256x4xbf16, #tpu.memory_space<vmem>>, vector<256x4xbf16>
    tpu.vector_store %arg7[%c0_13, %c0_14], %19 {strides = array<i32>} : memref<256x4xbf16, #tpu.memory_space<vmem>>, vector<256x4xbf16>,
    return
  }
  func.func @transform_0(%arg0: i32) -> (i32, i32) {
    %c0_i32 = arith.constant 0 : i32
    %c0_i32_0 = arith.constant 0 : i32
    return %arg0, %c0_i32 : i32, i32
  }
  func.func @transform_1(%arg0: i32) -> (i32, i32) {
    %c0_i32 = arith.constant 0 : i32
    %c0_i32_0 = arith.constant 0 : i32
    %c0_i32_1 = arith.constant 0 : i32
    return %c0_i32, %c0_i32_0 : i32, i32
  }
  func.func @transform_2(%arg0: i32) -> (i32, i32) {
    %c0_i32 = arith.constant 0 : i32
    %c0_i32_0 = arith.constant 0 : i32
    %c0_i32_1 = arith.constant 0 : i32
    return %c0_i32, %c0_i32_0 : i32, i32
  }
  func.func @transform_3(%arg0: i32) -> (i32, i32) {
    %c0_i32 = arith.constant 0 : i32
    %c0_i32_0 = arith.constant 0 : i32
    %c0_i32_1 = arith.constant 0 : i32
    return %c0_i32, %c0_i32_0 : i32, i32
  }
  func.func @transform_4(%arg0: i32) -> (i32, i32) {
    %c0_i32 = arith.constant 0 : i32
    %c0_i32_0 = arith.constant 0 : i32
    %c0_i32_1 = arith.constant 0 : i32
    return %c0_i32, %c0_i32_0 : i32, i32
  }
  func.func @transform_5(%arg0: i32) -> (i32, i32) {
    %c0_i32 = arith.constant 0 : i32
    %c0_i32_0 = arith.constant 0 : i32
    return %arg0, %c0_i32 : i32, i32
  }
  func.func @transform_6(%arg0: i32) -> (i32, i32) {
    %c0_i32 = arith.constant 0 : i32
    %c0_i32_0 = arith.constant 0 : i32
    return %arg0, %c0_i32 : i32, i32
  }
}

module attributes {stable_mosaic.version = 11 : i64} {
  func.func @_tail_kernel(%arg0: i32, %arg1: memref<256x4xbf16, #tpu.memory_space<vmem>>, %arg2: memref<256x4xbf16, #tpu.memory_space<vmem>>, %arg3: memref<4x4xbf16, #tpu.memory_space<vmem>>, %arg4: memref<1x4xf32, #tpu.memory_space<vmem>>, %arg5: memref<1x4xf32, #tpu.memory_space<vmem>>, %arg6: memref<1x4xf32, #tpu.memory_space<vmem>>, %arg7: memref<1x4xf32, #tpu.memory_space<vmem>>, %arg8: memref<4x8xbf16, #tpu.memory_space<vmem>>, %arg9: memref<4x8xbf16, #tpu.memory_space<vmem>>, %arg10: memref<1x8xf32, #tpu.memory_space<vmem>>, %arg11: memref<1x8xf32, #tpu.memory_space<vmem>>, %arg12: memref<256x8xf32, #tpu.memory_space<vmem>>) attributes {dimension_semantics = [#tpu.dimension_semantics<parallel>], iteration_bounds = array<i64: 2>, scalar_prefetch = 0 : i64, scratch_operands = 0 : i64, tpu.core_type = #tpu.core_type<tc>, window_params = [{transform_indices = @transform_0, window_bounds = array<i64: 256, 4>}, {transform_indices = @transform_1, window_bounds = array<i64: 256, 4>}, {pipeline_mode = #tpu.pipeline_mode<synchronous>, transform_indices = @transform_2, window_bounds = array<i64: 4, 4>}, {pipeline_mode = #tpu.pipeline_mode<synchronous>, transform_indices = @transform_3, window_bounds = array<i64: 1, 4>}, {pipeline_mode = #tpu.pipeline_mode<synchronous>, transform_indices = @transform_4, window_bounds = array<i64: 1, 4>}, {pipeline_mode = #tpu.pipeline_mode<synchronous>, transform_indices = @transform_5, window_bounds = array<i64: 1, 4>}, {pipeline_mode = #tpu.pipeline_mode<synchronous>, transform_indices = @transform_6, window_bounds = array<i64: 1, 4>}, {pipeline_mode = #tpu.pipeline_mode<synchronous>, transform_indices = @transform_7, window_bounds = array<i64: 4, 8>}, {pipeline_mode = #tpu.pipeline_mode<synchronous>, transform_indices = @transform_8, window_bounds = array<i64: 4, 8>}, {pipeline_mode = #tpu.pipeline_mode<synchronous>, transform_indices = @transform_9, window_bounds = array<i64: 1, 8>}, {pipeline_mode = #tpu.pipeline_mode<synchronous>, transform_indices = @transform_10, window_bounds = array<i64: 1, 8>}, {transform_indices = @transform_11, window_bounds = array<i64: 256, 8>}]} {
    %c0 = arith.constant 0 : index
    %c0_0 = arith.constant 0 : index
    %0 = vector.load %arg1[%c0, %c0_0] : memref<256x4xbf16, #tpu.memory_space<vmem>>, vector<256x4xbf16>
    %c0_1 = arith.constant 0 : index
    %c0_2 = arith.constant 0 : index
    %1 = vector.load %arg3[%c0_1, %c0_2] : memref<4x4xbf16, #tpu.memory_space<vmem>>, vector<4x4xbf16>
    %cst = arith.constant dense<0.000000e+00> : vector<256x4xf32>
    %2 = tpu.matmul %0, %1, %cst {dimension_numbers = #tpu.dot_dimension_numbers<[1], [0], [0], [1], [0, 0, 1, 1], [], []>} : vector<256x4xbf16>, vector<4x4xbf16>, vector<256x4xf32> -> vector<256x4xf32>
    %c0_3 = arith.constant 0 : index
    %c0_4 = arith.constant 0 : index
    %3 = vector.load %arg4[%c0_3, %c0_4] : memref<1x4xf32, #tpu.memory_space<vmem>>, vector<1x4xf32>
    %4 = vector.broadcast %3 : vector<1x4xf32> to vector<256x4xf32>
    %5 = arith.mulf %2, %4 : vector<256x4xf32>
    %c0_5 = arith.constant 0 : index
    %c0_6 = arith.constant 0 : index
    %6 = vector.load %arg5[%c0_5, %c0_6] : memref<1x4xf32, #tpu.memory_space<vmem>>, vector<1x4xf32>
    %7 = vector.broadcast %6 : vector<1x4xf32> to vector<256x4xf32>
    %8 = arith.addf %5, %7 : vector<256x4xf32>
    %9 = arith.negf %8 : vector<256x4xf32>
    %10 = math.exp %9 : vector<256x4xf32>
    %cst_7 = arith.constant 1.000000e+00 : f32
    %11 = vector.broadcast %cst_7 : f32 to vector<256x4xf32>
    %12 = arith.addf %11, %10 : vector<256x4xf32>
    %13 = arith.divf %11, %12 : vector<256x4xf32>
    %14 = arith.mulf %8, %13 : vector<256x4xf32>
    %c0_8 = arith.constant 0 : index
    %c0_9 = arith.constant 0 : index
    %15 = vector.load %arg2[%c0_8, %c0_9] : memref<256x4xbf16, #tpu.memory_space<vmem>>, vector<256x4xbf16>
    %16 = arith.extf %15 : vector<256x4xbf16> to vector<256x4xf32>
    %c0_10 = arith.constant 0 : index
    %c0_11 = arith.constant 0 : index
    %17 = vector.load %arg6[%c0_10, %c0_11] : memref<1x4xf32, #tpu.memory_space<vmem>>, vector<1x4xf32>
    %18 = vector.broadcast %17 : vector<1x4xf32> to vector<256x4xf32>
    %19 = arith.mulf %16, %18 : vector<256x4xf32>
    %c0_12 = arith.constant 0 : index
    %c0_13 = arith.constant 0 : index
    %20 = vector.load %arg7[%c0_12, %c0_13] : memref<1x4xf32, #tpu.memory_space<vmem>>, vector<1x4xf32>
    %21 = vector.broadcast %20 : vector<1x4xf32> to vector<256x4xf32>
    %22 = arith.addf %19, %21 : vector<256x4xf32>
    %23 = arith.negf %22 : vector<256x4xf32>
    %24 = math.exp %23 : vector<256x4xf32>
    %cst_14 = arith.constant 1.000000e+00 : f32
    %25 = vector.broadcast %cst_14 : f32 to vector<256x4xf32>
    %26 = arith.addf %25, %24 : vector<256x4xf32>
    %27 = arith.divf %25, %26 : vector<256x4xf32>
    %28 = arith.mulf %22, %27 : vector<256x4xf32>
    %29 = arith.truncf %14 : vector<256x4xf32> to vector<256x4xbf16>
    %c0_15 = arith.constant 0 : index
    %c0_16 = arith.constant 0 : index
    %30 = vector.load %arg8[%c0_15, %c0_16] : memref<4x8xbf16, #tpu.memory_space<vmem>>, vector<4x8xbf16>
    %cst_17 = arith.constant dense<0.000000e+00> : vector<256x8xf32>
    %31 = tpu.matmul %29, %30, %cst_17 {dimension_numbers = #tpu.dot_dimension_numbers<[1], [0], [0], [1], [0, 0, 1, 1], [], []>} : vector<256x4xbf16>, vector<4x8xbf16>, vector<256x8xf32> -> vector<256x8xf32>
    %32 = arith.truncf %28 : vector<256x4xf32> to vector<256x4xbf16>
    %c0_18 = arith.constant 0 : index
    %c0_19 = arith.constant 0 : index
    %33 = vector.load %arg9[%c0_18, %c0_19] : memref<4x8xbf16, #tpu.memory_space<vmem>>, vector<4x8xbf16>
    %cst_20 = arith.constant dense<0.000000e+00> : vector<256x8xf32>
    %34 = tpu.matmul %32, %33, %cst_20 {dimension_numbers = #tpu.dot_dimension_numbers<[1], [0], [0], [1], [0, 0, 1, 1], [], []>} : vector<256x4xbf16>, vector<4x8xbf16>, vector<256x8xf32> -> vector<256x8xf32>
    %35 = arith.addf %31, %34 : vector<256x8xf32>
    %c0_21 = arith.constant 0 : index
    %c0_22 = arith.constant 0 : index
    %36 = vector.load %arg10[%c0_21, %c0_22] : memref<1x8xf32, #tpu.memory_space<vmem>>, vector<1x8xf32>
    %37 = vector.broadcast %36 : vector<1x8xf32> to vector<256x8xf32>
    %38 = arith.mulf %35, %37 : vector<256x8xf32>
    %c0_23 = arith.constant 0 : index
    %c0_24 = arith.constant 0 : index
    %39 = vector.load %arg11[%c0_23, %c0_24] : memref<1x8xf32, #tpu.memory_space<vmem>>, vector<1x8xf32>
    %40 = vector.broadcast %39 : vector<1x8xf32> to vector<256x8xf32>
    %41 = arith.addf %38, %40 : vector<256x8xf32>
    %42 = arith.negf %41 : vector<256x8xf32>
    %43 = math.exp %42 : vector<256x8xf32>
    %cst_25 = arith.constant 1.000000e+00 : f32
    %44 = vector.broadcast %cst_25 : f32 to vector<256x8xf32>
    %45 = arith.addf %44, %43 : vector<256x8xf32>
    %46 = arith.divf %44, %45 : vector<256x8xf32>
    %47 = arith.mulf %41, %46 : vector<256x8xf32>
    %c0_26 = arith.constant 0 : index
    %c0_27 = arith.constant 0 : index
    %48 = vector.load %arg12[%c0_26, %c0_27] : memref<256x8xf32, #tpu.memory_space<vmem>>, vector<256x8xf32>
    tpu.vector_store %arg12[%c0_26, %c0_27], %47 {strides = array<i32>} : memref<256x8xf32, #tpu.memory_space<vmem>>, vector<256x8xf32>,
    return
  }
  func.func @transform_0(%arg0: i32) -> (i32, i32) {
    %c0_i32 = arith.constant 0 : i32
    %c0_i32_0 = arith.constant 0 : i32
    return %arg0, %c0_i32 : i32, i32
  }
  func.func @transform_1(%arg0: i32) -> (i32, i32) {
    %c0_i32 = arith.constant 0 : i32
    %c0_i32_0 = arith.constant 0 : i32
    return %arg0, %c0_i32 : i32, i32
  }
  func.func @transform_2(%arg0: i32) -> (i32, i32) {
    %c0_i32 = arith.constant 0 : i32
    %c0_i32_0 = arith.constant 0 : i32
    %c0_i32_1 = arith.constant 0 : i32
    return %c0_i32, %c0_i32_0 : i32, i32
  }
  func.func @transform_3(%arg0: i32) -> (i32, i32) {
    %c0_i32 = arith.constant 0 : i32
    %c0_i32_0 = arith.constant 0 : i32
    %c0_i32_1 = arith.constant 0 : i32
    return %c0_i32, %c0_i32_0 : i32, i32
  }
  func.func @transform_4(%arg0: i32) -> (i32, i32) {
    %c0_i32 = arith.constant 0 : i32
    %c0_i32_0 = arith.constant 0 : i32
    %c0_i32_1 = arith.constant 0 : i32
    return %c0_i32, %c0_i32_0 : i32, i32
  }
  func.func @transform_5(%arg0: i32) -> (i32, i32) {
    %c0_i32 = arith.constant 0 : i32
    %c0_i32_0 = arith.constant 0 : i32
    %c0_i32_1 = arith.constant 0 : i32
    return %c0_i32, %c0_i32_0 : i32, i32
  }
  func.func @transform_6(%arg0: i32) -> (i32, i32) {
    %c0_i32 = arith.constant 0 : i32
    %c0_i32_0 = arith.constant 0 : i32
    %c0_i32_1 = arith.constant 0 : i32
    return %c0_i32, %c0_i32_0 : i32, i32
  }
  func.func @transform_7(%arg0: i32) -> (i32, i32) {
    %c0_i32 = arith.constant 0 : i32
    %c0_i32_0 = arith.constant 0 : i32
    %c0_i32_1 = arith.constant 0 : i32
    return %c0_i32, %c0_i32_0 : i32, i32
  }
  func.func @transform_8(%arg0: i32) -> (i32, i32) {
    %c0_i32 = arith.constant 0 : i32
    %c0_i32_0 = arith.constant 0 : i32
    %c0_i32_1 = arith.constant 0 : i32
    return %c0_i32, %c0_i32_0 : i32, i32
  }
  func.func @transform_9(%arg0: i32) -> (i32, i32) {
    %c0_i32 = arith.constant 0 : i32
    %c0_i32_0 = arith.constant 0 : i32
    %c0_i32_1 = arith.constant 0 : i32
    return %c0_i32, %c0_i32_0 : i32, i32
  }
  func.func @transform_10(%arg0: i32) -> (i32, i32) {
    %c0_i32 = arith.constant 0 : i32
    %c0_i32_0 = arith.constant 0 : i32
    %c0_i32_1 = arith.constant 0 : i32
    return %c0_i32, %c0_i32_0 : i32, i32
  }
  func.func @transform_11(%arg0: i32) -> (i32, i32) {
    %c0_i32 = arith.constant 0 : i32
    %c0_i32_0 = arith.constant 0 : i32
    return %arg0, %c0_i32 : i32, i32
  }
}

</mosaic_0001>

<bundles_post_ra>
// kernel: bottleneck_csp_forward.5
= control target key start
LH: loop header
LB: loop body
LE: loop exit
PB: predicated region body
PF: predicated region fallthrough
CT: control target
= control target key end

     0   :  { %s3162_s17 = smov 0   ;;  %s4060_s0 = inlined_call_operand.vmem [shape: bf16[512,4], index: 0, kind: input, shape index: {}]   ;;  %s4061_s1 = inlined_call_operand.vmem [shape: bf16[512,4], index: 1, kind: input, shape index: {}]   ;;  %s4062_s2 = inlined_call_operand.vmem [shape: bf16[4,4], index: 2, kind: input, shape index: {}]   ;;  %s4063_s3 = inlined_call_operand.vmem [shape: f32[1,4], index: 3, kind: input, shape index: {}]   ;;  %s4064_s4 = inlined_call_operand.vmem [shape: f32[1,4], index: 4, kind: input, shape index: {}]   ;;  %s4065_s5 = inlined_call_operand.vmem [shape: f32[1,4], index: 5, kind: input, shape index: {}]   ;;  %s4066_s6 = inlined_call_operand.vmem [shape: f32[1,4], index: 6, kind: input, shape index: {}]   ;;  %s4067_s7 = inlined_call_operand.vmem [shape: bf16[4,8], index: 7, kind: input, shape index: {}]   ;;  %s4068_s8 = inlined_call_operand.vmem [shape: bf16[4,8], index: 8, kind: input, shape index: {}]   ;;  %s4069_s9 = inlined_call_operand.vmem [shape: f32[1,8], index: 9, kind: input, shape index: {}]   ;;  %s4070_s10 = inlined_call_operand.vmem [shape: f32[1,8], index: 10, kind: input, shape index: {}]   ;;  %s4071_s11 = inlined_call_operand.vmem [shape: f32[512,8], index: 11, kind: output, shape index: {}]  }
   0x1 LB: > { %s2269_s18 = sadd.s32 4294967295, %s3100_s17   ;;  %p2273_p0 = scmp.ge.s32.totalorder %s3100_s17, 1  ;;  %s3100_s17 = sphi %s3162_s17, %s21_s17  }
   0x2   : > { %p349_p1 = scmp.lt.s32.totalorder %s3100_s17, 3 }
   0x4   : > { %p350_p2 = pnand %p2273_p0, %p349_p1 }
   0x5   : > { %s2274_s21 = sshll.u32 (!%p350_p2), %s2269_s18, 5 }
   0x6   : > { %353 = sbr.rel (%p350_p2) target bundleno = 570 (0x23a), region = 64  ;;  %p395_p3 = scmp.lt.s32.totalorder (!%p350_p2), %s2274_s21, 63 }
   0xb   : > { %v445_v0 = vld [vmem:[%s4062_s2] sm:$0x3]  ;;  %vm575_vm0 = vcmask 1041408   ;;  %s4073_s21 = smov (!%p395_p3, %s2274_s21), 63  ;;  %vm526_vm1 = vcmask 31744   ;;  %vm2168_vm2 = vcmask 64512  }
   0xc   : > { %2682 = vmatprep.subr.msk.bf16.mxu0 %vm575_vm0, %v445_v0  ;;  %2683 = vmatprep.subr.msk.bf16.mxu1 %vm575_vm0, %v445_v0  ;;  %v577_v1 = vsel %vm575_vm0, %v445_v0, 0  ;;  %s2275_s22 = sshll.u32 %s4073_s21, 2  ;;  %v3230_v22 = vld [vmem:[%s4065_s5] ss:$0 sm:$0xff] }
   0xd   : > { %2579 = vmatpush3.bf16.msra.mxu0 %v577_v1  ;;  %2681 = vmatpush3.bf16.msra.mxu1 %v577_v1  ;;  %s3184_s25 = scalar_lea.vmem %s4060_s0, %s2275_s22  ;;  %s3223_s28 = scalar_lea.vmem %s4061_s1, %s2275_s22  ;;  %v3237_v27 = vld [vmem:[%s4066_s6] ss:$0 sm:$0xff] }
   0xe   : > { %v2694_v2 = vld [vmem:[%s3184_s25] sm:$0xff]   ;;  %v2696_v4 = vld [vmem:[%s3184_s25 + $0x8] sm:$0xff]   ;;  %v2698_v6 = vld [vmem:[%s3184_s25 + $0x10] sm:$0xff]  }
   0xf   : > { %v2695_v3 = vld [vmem:[%s3184_s25 + $0x40] sm:$0xff]   ;;  %2580 = vmatprep.mubr.msk.bf16.mxu0 %vm526_vm1, %v2694_v2  ;;  %v2697_v5 = vld [vmem:[%s3184_s25 + $0x48] sm:$0xff]   ;;  %v2699_v7 = vld [vmem:[%s3184_s25 + $0x50] sm:$0xff]  }
  0x10   : > { %2596 = vmatprep.mubr.msk.bf16.mxu1 %vm526_vm1, %v2695_v3  ;;  %2581 = vmatmul.mubr.msk.bf16.vlgmr.msra.gmra.mxu0 %vm526_vm1, %v2696_v4  ;;  %v2700_v8 = vld [vmem:[%s3184_s25 + $0x18] sm:$0xff]   ;;  %v2702_v10 = vld [vmem:[%s3184_s25 + $0x20] sm:$0xff]   ;;  %v2704_v12 = vld [vmem:[%s3184_s25 + $0x28] sm:$0xff]  }
  0x11   : > { %2597 = vmatmul.mubr.msk.bf16.vlgmr.msra.gmra.mxu1 %vm526_vm1, %v2697_v5  ;;  %2584 = vmatprep.mubr.msk.bf16.mxu0 %vm526_vm1, %v2698_v6  ;;  %v2701_v9 = vld [vmem:[%s3184_s25 + $0x58] sm:$0xff]   ;;  %v2703_v11 = vld [vmem:[%s3184_s25 + $0x60] sm:$0xff]   ;;  %v2705_v13 = vld [vmem:[%s3184_s25 + $0x68] sm:$0xff]  }
  0x12   : > { %2600 = vmatprep.mubr.msk.bf16.mxu1 %vm526_vm1, %v2699_v7  ;;  %v2706_v14 = vld [vmem:[%s3184_s25 + $0x30] sm:$0xff]   ;;  %v2708_v16 = vld [vmem:[%s3184_s25 + $0x38] sm:$0xff]   ;;  %v2449_v18 = vld [vmem:[%s3223_s28] sm:$0xff]  }
  0x13   : > { %v2707_v15 = vld [vmem:[%s3184_s25 + $0x70] sm:$0xff]   ;;  %v2709_v17 = vld [vmem:[%s3184_s25 + $0x78] sm:$0xff]   ;;  %v2450_v19 = vunpack.c.l.bf16 %v2449_v18  ;;  %v2451_v20 = vunpack.c.h.bf16 %v2449_v18  ;;  %v2512_v21 = vld [vmem:[%s3223_s28 + $0x8] sm:$0xff]  }
  0x14   : > { %v2454_v23 = vunpack.c.l.bf16 %v2512_v21  ;;  %v2455_v24 = vunpack.c.h.bf16 %v2512_v21  ;;  %v2513_v38 = vld [vmem:[%s3223_s28 + $0x10] sm:$0xff]   ;;  %v2514_v41 = vld [vmem:[%s3223_s28 + $0x18] sm:$0xff]   ;;  %v2515_v56 = vld [vmem:[%s3223_s28 + $0x20] sm:$0xff]  }
  0x15   : > { %v1113_v25 = vmul.f32 %v2450_v19, %v3230_v22  ;;  %v1114_v26 = vmul.f32 %v2451_v20, %v3230_v22  ;;  %v2458_v39 = vunpack.c.l.bf16 %v2513_v38  ;;  %v2459_v40 = vunpack.c.h.bf16 %v2513_v38  ;;  %v2516_v59 = vld [vmem:[%s3223_s28 + $0x28] sm:$0xff]   ;;  %v3294_v6 = vld [vmem:[%s4068_s8] sm:$0x3]  ;;  %v2518_v18 = vld [vmem:[%s3223_s28 + $0x38] sm:$0xff]  }
  0x16   : > { %v1115_v28 = vmul.f32 %v2454_v23, %v3230_v22  ;;  %v1116_v29 = vmul.f32 %v2455_v24, %v3230_v22  ;;  %v2462_v42 = vunpack.c.l.bf16 %v2514_v41  ;;  %v2463_v43 = vunpack.c.h.bf16 %v2514_v41  ;;  %2684 = vmatprep.subr.msk.bf16.mxu1 %vm575_vm0, %v3294_v6 }
  0x17   : > { %v3242_v30 = vadd.f32 %v3237_v27, %v1113_v25  ;;  %v3245_v31 = vadd.f32 %v3237_v27, %v1114_v26  ;;  %v1117_v44 = vmul.f32 %v2458_v39, %v3230_v22  ;;  %v1118_v45 = vmul.f32 %v2459_v40, %v3230_v22 }
  0x18   : > { %2585 = vmatmul.mubr.msk.bf16.gmra.mxu0 %vm526_vm1, %v2700_v8  ;;  %v3248_v32 = vadd.f32 %v3237_v27, %v1115_v28  ;;  %v3251_v33 = vadd.f32 %v3237_v27, %v1116_v29  ;;  %v1119_v46 = vmul.f32 %v2462_v42, %v3230_v22  ;;  %v1120_v47 = vmul.f32 %v2463_v43, %v3230_v22 }
  0x19   : > { %2601 = vmatmul.mubr.msk.bf16.gmra.mxu1 %vm526_vm1, %v2701_v9  ;;  %2588 = vmatprep.mubr.msk.bf16.mxu0 %vm526_vm1, %v2702_v10  ;;  %v2348_v34 = vmul.f32 -1.442695, %v3242_v30  ;;  %v2349_v35 = vmul.f32 -1.442695, %v3245_v31  ;;  %v3264_v48 = vadd.f32 %v3237_v27, %v1117_v44  ;;  %v3267_v49 = vadd.f32 %v3237_v27, %v1118_v45 }
  0x1a   : > { %2604 = vmatprep.mubr.msk.bf16.mxu1 %vm526_vm1, %v2703_v11  ;;  %v2350_v36 = vmul.f32 -1.442695, %v3248_v32  ;;  %v2351_v37 = vmul.f32 -1.442695, %v3251_v33  ;;  %v3270_v50 = vadd.f32 %v3237_v27, %v1119_v46  ;;  %v3273_v51 = vadd.f32 %v3237_v27, %v1120_v47  ;;  %v2519_v46 = vld [vmem:[%s3223_s28 + $0x40] sm:$0xff]  }
  0x1b   : > { %2710 = vpow2.f32 %v2348_v34  ;;  %v2352_v52 = vmul.f32 -1.442695, %v3264_v48  ;;  %v2353_v53 = vmul.f32 -1.442695, %v3267_v49  ;;  %v2466_v57 = vunpack.c.l.bf16 %v2515_v56  ;;  %v3316_v34 = vld [vmem:[%s4067_s7] sm:$0x3] }
  0x1c   : > { %2712 = vpow2.f32 %v2349_v35  ;;  %v2354_v54 = vmul.f32 -1.442695, %v3270_v50  ;;  %v2355_v55 = vmul.f32 -1.442695, %v3273_v51  ;;  %v2467_v58 = vunpack.c.h.bf16 %v2515_v56  ;;  %2685 = vmatprep.subr.msk.bf16.mxu0 %vm575_vm0, %v3316_v34 }
  0x1d   : > { %2714 = vpow2.f32 %v2350_v36  ;;  %v2470_v60 = vunpack.c.l.bf16 %v2516_v59  ;;  %v2471_v61 = vunpack.c.h.bf16 %v2516_v59  ;;  %v1121_v62 = vmul.f32 %v2466_v57, %v3230_v22 }
  0x1e   : > { %2716 = vpow2.f32 %v2351_v37  ;;  %v1122_v63 = vmul.f32 %v2467_v58, %v3230_v22  ;;  %v2478_v21 = vunpack.c.l.bf16 %v2518_v18  ;;  %v2479_v25 = vunpack.c.h.bf16 %v2518_v18 }
  0x1f   : > { %2718 = vpow2.f32 %v2352_v52  ;;  %v1123_v0 = vmul.f32 %v2470_v60, %v3230_v22  ;;  %v1124_v1 = vmul.f32 %v2471_v61, %v3230_v22  ;;  %v3286_v2 = vadd.f32 %v3237_v27, %v1121_v62 }
  0x20   : > { %2589 = vmatmul.mubr.msk.bf16.gmra.mxu0 %vm526_vm1, %v2704_v12  ;;  %2720 = vpow2.f32 %v2353_v53  ;;  %v3289_v3 = vadd.f32 %v3237_v27, %v1122_v63  ;;  %v1127_v29 = vmul.f32 %v2478_v21, %v3230_v22  ;;  %v1128_v36 = vmul.f32 %v2479_v25, %v3230_v22 }
  0x21   : > { %2605 = vmatmul.mubr.msk.bf16.gmra.mxu1 %vm526_vm1, %v2705_v13  ;;  %2592 = vmatprep.mubr.msk.bf16.mxu0 %vm526_vm1, %v2706_v14  ;;  %2722 = vpow2.f32 %v2354_v54  ;;  %v3297_v8 = vadd.f32 %v3237_v27, %v1123_v0  ;;  %v2356_v11 = vmul.f32 -1.442695, %v3286_v2  ;;  %v3303_v12 = vadd.f32 %v3237_v27, %v1124_v1  ;;  %v2517_v13 = vld [vmem:[%s3223_s28 + $0x30] sm:$0xff]  }
  0x22   : > { %2608 = vmatprep.mubr.msk.bf16.mxu1 %vm526_vm1, %v2707_v15  ;;  %2724 = vpow2.f32 %v2355_v55  ;;  %v2475_v20 = vunpack.c.h.bf16 %v2517_v13  ;;  %v3328_v41 = vadd.f32 %v3237_v27, %v1127_v29  ;;  %v3332_v45 = vadd.f32 %v3237_v27, %v1128_v36  ;;  %v2520_v55 = vld [vmem:[%s3223_s28 + $0x48] sm:$0xff]  }
  0x23   : > { %v2358_v23 = vmul.f32 -1.442695, %v3297_v8  ;;  %v2359_v26 = vmul.f32 -1.442695, %v3303_v12  ;;  %v2482_v54 = vunpack.c.l.bf16 %v2519_v46  ;;  %v2483_v57 = vunpack.c.h.bf16 %v2519_v46 }
  0x24   : > { %v1126_v28 = vmul.f32 %v2475_v20, %v3230_v22  ;;  %v2486_v58 = vunpack.c.l.bf16 %v2520_v55  ;;  %v2362_v59 = vmul.f32 -1.442695, %v3328_v41  ;;  %v2487_v61 = vunpack.c.h.bf16 %v2520_v55 }
  0x25   : > { %v1129_v60 = vmul.f32 %v2482_v54, %v3230_v22  ;;  %v2363_v62 = vmul.f32 -1.442695, %v3332_v45  ;;  %v1130_v63 = vmul.f32 %v2483_v57, %v3230_v22 }
  0x26   : > { %v3325_v38 = vadd.f32 %v3237_v27, %v1126_v28  ;;  %v1131_v0 = vmul.f32 %v2486_v58, %v3230_v22 }
  0x27   : > { %v3343_v1 = vadd.f32 %v3237_v27, %v1129_v60 }
  0x28   : > { %2593 = vmatmul.mubr.msk.bf16.gmra.mxu0 %vm526_vm1, %v2708_v16  ;;  %v2711_v4 = vpop.eup %2710  ;;  %v2357_v16 = vmul.f32 -1.442695, %v3289_v3  ;;  %v2361_v53 = vmul.f32 -1.442695, %v3325_v38 }
  0x29   : > { %2609 = vmatmul.mubr.msk.bf16.gmra.mxu1 %vm526_vm1, %v2709_v17  ;;  %v2713_v5 = vpop.eup %2712  ;;  %v1280_v7 = vadd.f32 1.0, %v2711_v4  ;;  %v2474_v17 = vunpack.c.l.bf16 %v2517_v13  ;;  %v1132_v4 = vmul.f32 %v2487_v61, %v3230_v22  ;;  %v2364_v13 = vmul.f32 -1.442695, %v3343_v1 }
  0x2a   : > { %v2715_v9 = vpop.eup %2714  ;;  %v1281_v10 = vadd.f32 1.0, %v2713_v5 }
  0x2b   : > { %v2717_v14 = vpop.eup %2716  ;;  %2726 = vrcp.f32 %v1280_v7  ;;  %v1282_v15 = vadd.f32 1.0, %v2715_v9  ;;  %v1125_v24 = vmul.f32 %v2474_v17, %v3230_v22  ;;  %v3347_v7 = vadd.f32 %v3237_v27, %v1130_v63 }
  0x2c   : > { %2728 = vrcp.f32 %v1281_v10  ;;  %v1283_v19 = vadd.f32 1.0, %v2717_v14  ;;  %v2719_v37 = vpop.eup %2718  ;;  %v3350_v9 = vadd.f32 %v3237_v27, %v1131_v0  ;;  %v3355_v14 = vadd.f32 %v3237_v27, %v1132_v4 }
  0x2d   : > { %2730 = vrcp.f32 %v1282_v15  ;;  %v3319_v35 = vadd.f32 %v3237_v27, %v1125_v24  ;;  %v2721_v39 = vpop.eup %2720  ;;  %v1284_v40 = vadd.f32 1.0, %v2719_v37  ;;  %v2365_v18 = vmul.f32 -1.442695, %v3347_v7  ;;  %v2522_v24 = vld [vmem:[%s3223_s28 + $0x58] sm:$0xff]  }
  0x2e   : > { %2732 = vrcp.f32 %v1283_v19  ;;  %v2723_v42 = vpop.eup %2722  ;;  %v1285_v43 = vadd.f32 1.0, %v2721_v39  ;;  %v2521_v19 = vld [vmem:[%s3223_s28 + $0x50] sm:$0xff]   ;;  %v2366_v21 = vmul.f32 -1.442695, %v3350_v9  ;;  %v2494_v37 = vunpack.c.l.bf16 %v2522_v24 }
  0x2f   : > { %2734 = vpow2.f32 %v2356_v11  ;;  %v2360_v44 = vmul.f32 -1.442695, %v3319_v35  ;;  %v2725_v47 = vpop.eup %2724  ;;  %v1286_v52 = vadd.f32 1.0, %v2723_v42  ;;  %v2491_v36 = vunpack.c.h.bf16 %v2521_v19 }
  0x30   : > { %2736 = vpow2.f32 %v2357_v16  ;;  %v1287_v56 = vadd.f32 1.0, %v2725_v47  ;;  %v1491_v16 = vsel %vm575_vm0, %v3294_v6, 0  ;;  %v2495_v46 = vunpack.c.h.bf16 %v2522_v24 }
  0x31   : > { %2738 = vpow2.f32 %v2358_v23  ;;  %2613 = vmatpush3.bf16.msra.mxu1 %v1491_v16  ;;  %v2367_v23 = vmul.f32 -1.442695, %v3355_v14  ;;  %v1135_v58 = vmul.f32 %v2494_v37, %v3230_v22 }
  0x32   : > { %2740 = vpow2.f32 %v2359_v26  ;;  %v1136_v61 = vmul.f32 %v2495_v46, %v3230_v22 }
  0x33   : > { %2742 = vrcp.f32 %v1284_v40  ;;  %v3388_v4 = vadd.f32 %v3237_v27, %v1135_v58 }
  0x34   : > { %2744 = vrcp.f32 %v1285_v43 }
  0x35   : > { %2746 = vrcp.f32 %v1286_v52  ;;  %v1703_v52 = vsel %vm575_vm0, %v3316_v34, 0 }
  0x36   : > { %2748 = vrcp.f32 %v1287_v56  ;;  %2647 = vmatpush3.bf16.msra.mxu0 %v1703_v52 }
  0x37   : > { %2750 = vpow2.f32 %v2360_v44 }
  0x38   : > { %v2727_v5 = vpop.eup %2726  ;;  %2752 = vpow2.f32 %v2361_v53 }
  0x39   : > { %v2729_v10 = vpop.eup %2728  ;;  %v1376_v11 = vmul.f32 %v2727_v5, %v3242_v30  ;;  %2754 = vpow2.f32 %v2362_v59 }
  0x3a   : > { %v2731_v15 = vpop.eup %2730  ;;  %v1377_v17 = vmul.f32 %v2729_v10, %v3245_v31  ;;  %2756 = vpow2.f32 %v2363_v62  ;;  %v2490_v31 = vunpack.c.l.bf16 %v2521_v19  ;;  %v2523_v62 = vld [vmem:[%s3223_s28 + $0x60] sm:$0xff]  }
  0x3b   : > { %v2733_v20 = vpop.eup %2732  ;;  %v1378_v30 = vmul.f32 %v2731_v15, %v3248_v32  ;;  %2758 = vpow2.f32 %v2364_v13  ;;  %v2498_v5 = vunpack.c.l.bf16 %v2523_v62 }
  0x3c   : > { %v2735_v25 = vpop.eup %2734  ;;  %v1425_v26 = vpack.c.bf16 %v1377_v17, %v1376_v11  ;;  %v1379_v6 = vmul.f32 %v2733_v20, %v3251_v33  ;;  %2760 = vpow2.f32 %v2365_v18  ;;  %v1133_v42 = vmul.f32 %v2490_v31, %v3230_v22 }
  0x3d   : > { %v2737_v28 = vpop.eup %2736  ;;  %v1288_v29 = vadd.f32 1.0, %v2735_v25  ;;  %2762 = vpow2.f32 %v2366_v21  ;;  %v1134_v33 = vmul.f32 %v2491_v36, %v3230_v22  ;;  %v3393_v17 = vadd.f32 %v3237_v27, %v1136_v61 }
  0x3e   : > { %v2739_v39 = vpop.eup %2738  ;;  %2614 = vmatprep.mubr.msk.bf16.mxu1 %vm526_vm1, %v1425_v26  ;;  %v1426_v32 = vpack.c.bf16 %v1379_v6, %v1378_v30  ;;  %v1289_v40 = vadd.f32 1.0, %v2737_v28  ;;  %2764 = vpow2.f32 %v2367_v23  ;;  %v3374_v54 = vadd.f32 %v3237_v27, %v1133_v42 }
  0x3f   : > { %v2741_v43 = vpop.eup %2740  ;;  %2766 = vrcp.f32 %v1288_v29  ;;  %v1290_v44 = vadd.f32 1.0, %v2739_v39  ;;  %v3378_v57 = vadd.f32 %v3237_v27, %v1134_v33  ;;  %v2499_v18 = vunpack.c.h.bf16 %v2523_v62 }
  0x40   : > { %v2743_v47 = vpop.eup %2742  ;;  %2615 = vmatmul.mubr.msk.bf16.vlgmr.msra.gmra.mxu1 %vm526_vm1, %v1426_v32  ;;  %2768 = vrcp.f32 %v1289_v40  ;;  %v1291_v53 = vadd.f32 1.0, %v2741_v43  ;;  %v2368_v60 = vmul.f32 -1.442695, %v3374_v54  ;;  %v2370_v30 = vmul.f32 -1.442695, %v3388_v4 }
  0x41   : > { %v2745_v55 = vpop.eup %2744  ;;  %v1380_v56 = vmul.f32 %v2743_v47, %v3264_v48  ;;  %2770 = vrcp.f32 %v1290_v44  ;;  %v2369_v48 = vmul.f32 -1.442695, %v3378_v57  ;;  %v1137_v21 = vmul.f32 %v2498_v5, %v3230_v22  ;;  %v2525_v44 = vld [vmem:[%s3223_s28 + $0x70] sm:$0xff]  }
  0x42   : > { %v2747_v34 = vpop.eup %2746  ;;  %v1381_v59 = vmul.f32 %v2745_v55, %v3267_v49  ;;  %2772 = vrcp.f32 %v1291_v53  ;;  %v2524_v49 = vld [vmem:[%s3223_s28 + $0x68] sm:$0xff]   ;;  %v1138_v24 = vmul.f32 %v2499_v18, %v3230_v22  ;;  %v2371_v42 = vmul.f32 -1.442695, %v3393_v17 }
  0x43   : > { %v2749_v63 = vpop.eup %2748  ;;  %v1382_v0 = vmul.f32 %v2747_v34, %v3270_v50  ;;  %2774 = vpow2.f32 %v2368_v60  ;;  %v2502_v25 = vunpack.c.l.bf16 %v2524_v49  ;;  %v3401_v31 = vadd.f32 %v3237_v27, %v1137_v21  ;;  %v2526_v34 = vld [vmem:[%s3223_s28 + $0x78] sm:$0xff]   ;;  %s2279_s28 = sshll.u32 %s4073_s21, 3 }
  0x44   : > { %v2751_v10 = vpop.eup %2750  ;;  %v1427_v11 = vpack.c.bf16 %v1381_v59, %v1380_v56  ;;  %v1383_v13 = vmul.f32 %v2749_v63, %v3273_v51  ;;  %2776 = vpow2.f32 %v2369_v48  ;;  %v2503_v28 = vunpack.c.h.bf16 %v2524_v49  ;;  %s3821_s30 = scalar_lea.vmem %s4071_s11, %s2279_s28 }
  0x45   : > { %v2753_v15 = vpop.eup %2752  ;;  %v1292_v16 = vadd.f32 1.0, %v2751_v10  ;;  %v3404_v37 = vadd.f32 %v3237_v27, %v1138_v24  ;;  %v1139_v39 = vmul.f32 %v2502_v25, %v3230_v22  ;;  %v2372_v47 = vmul.f32 -1.442695, %v3401_v31 }
  0x46   : > { %v2755_v50 = vpop.eup %2754  ;;  %2618 = vmatprep.mubr.msk.bf16.mxu1 %vm526_vm1, %v1427_v11  ;;  %v1428_v19 = vpack.c.bf16 %v1383_v13, %v1382_v0  ;;  %v1293_v20 = vadd.f32 1.0, %v2753_v15  ;;  %v1140_v43 = vmul.f32 %v2503_v28, %v3230_v22  ;;  %v2506_v58 = vunpack.c.l.bf16 %v2525_v44 }
  0x47   : > { %v2757_v23 = vpop.eup %2756  ;;  %2778 = vrcp.f32 %v1292_v16  ;;  %v1294_v51 = vadd.f32 1.0, %v2755_v50  ;;  %v3412_v52 = vadd.f32 %v3237_v27, %v1139_v39  ;;  %v2373_v56 = vmul.f32 -1.442695, %v3404_v37 }
  0x48   : > { %v2759_v26 = vpop.eup %2758  ;;  %2619 = vmatmul.mubr.msk.bf16.gmra.mxu1 %vm526_vm1, %v1428_v19  ;;  %2780 = vrcp.f32 %v1293_v20  ;;  %v1295_v6 = vadd.f32 1.0, %v2757_v23  ;;  %v3418_v61 = vadd.f32 %v3237_v27, %v1140_v43  ;;  %v2507_v62 = vunpack.c.h.bf16 %v2525_v44 }
  0x49   : > { %v2761_v29 = vpop.eup %2760  ;;  %2782 = vrcp.f32 %v1294_v51  ;;  %v1296_v36 = vadd.f32 1.0, %v2759_v26  ;;  %v2374_v48 = vmul.f32 -1.442695, %v3412_v52  ;;  %v1141_v5 = vmul.f32 %v2506_v58, %v3230_v22 }
  0x4a   : > { %v2763_v32 = vpop.eup %2762  ;;  %2784 = vrcp.f32 %v1295_v6  ;;  %v1297_v40 = vadd.f32 1.0, %v2761_v29  ;;  %v1142_v13 = vmul.f32 %v2507_v62, %v3230_v22  ;;  %v2511_v50 = vunpack.c.h.bf16 %v2526_v34 }
  0x4b   : > { %v2765_v33 = vpop.eup %2764  ;;  %2786 = vrcp.f32 %v1296_v36  ;;  %v1298_v46 = vadd.f32 1.0, %v2763_v32  ;;  %v3427_v16 = vadd.f32 %v3237_v27, %v1141_v5 }
  0x4c   : > { %v2767_v53 = vpop.eup %2766  ;;  %2788 = vrcp.f32 %v1297_v40  ;;  %v1299_v55 = vadd.f32 1.0, %v2765_v33  ;;  %v3430_v18 = vadd.f32 %v3237_v27, %v1142_v13  ;;  %v1144_v51 = vmul.f32 %v2511_v50, %v3230_v22 }
  0x4d   : > { %v2769_v59 = vpop.eup %2768  ;;  %v1384_v60 = vmul.f32 %v2767_v53, %v3286_v2  ;;  %2790 = vrcp.f32 %v1298_v46  ;;  %v2510_v2 = vunpack.c.l.bf16 %v2526_v34  ;;  %v2376_v23 = vmul.f32 -1.442695, %v3427_v16 }
  0x4e   : > { %v2771_v63 = vpop.eup %2770  ;;  %v1385_v0 = vmul.f32 %v2769_v59, %v3289_v3  ;;  %2792 = vrcp.f32 %v1299_v55  ;;  %v2377_v25 = vmul.f32 -1.442695, %v3430_v18  ;;  %v3444_v29 = vadd.f32 %v3237_v27, %v1144_v51 }
  0x4f   : > { %v2773_v10 = vpop.eup %2772  ;;  %v1386_v11 = vmul.f32 %v2771_v63, %v3297_v8  ;;  %2794 = vpow2.f32 %v2370_v30  ;;  %v1143_v19 = vmul.f32 %v2510_v2, %v3230_v22 }
  0x50   : > { %v1429_v49 = vpack.c.bf16 %v1385_v0, %v1384_v60  ;;  %v1387_v15 = vmul.f32 %v2773_v10, %v3303_v12  ;;  %2796 = vpow2.f32 %v2371_v42  ;;  %v2775_v3 = vpop.eup %2774  ;;  %v2375_v12 = vmul.f32 -1.442695, %v3418_v61 }
  0x51   : > { %2798 = vpow2.f32 %v2372_v47  ;;  %v2777_v8 = vpop.eup %2776  ;;  %v1300_v30 = vadd.f32 1.0, %v2775_v3  ;;  %v3440_v26 = vadd.f32 %v3237_v27, %v1143_v19  ;;  %v2379_v42 = vmul.f32 -1.442695, %v3444_v29 }
  0x52   : > { %2622 = vmatprep.mubr.msk.bf16.mxu1 %vm526_vm1, %v1429_v49  ;;  %v1430_v20 = vpack.c.bf16 %v1387_v15, %v1386_v11  ;;  %2800 = vpow2.f32 %v2373_v56  ;;  %v1301_v21 = vadd.f32 1.0, %v2777_v8 }
  0x53   : > { %2802 = vpow2.f32 %v2374_v48  ;;  %v2378_v22 = vmul.f32 -1.442695, %v3440_v26 }
  0x54   : > { %v2779_v24 = vpop.eup %2778  ;;  %2623 = vmatmul.mubr.msk.bf16.gmra.mxu1 %vm526_vm1, %v1430_v20  ;;  %2804 = vrcp.f32 %v1300_v30 }
  0x55   : > { %v2781_v6 = vpop.eup %2780  ;;  %v1388_v28 = vmul.f32 %v2779_v24, %v3319_v35  ;;  %2806 = vrcp.f32 %v1301_v21 }
  0x56   : > { %v2783_v36 = vpop.eup %2782  ;;  %v1389_v39 = vmul.f32 %v2781_v6, %v3325_v38  ;;  %2808 = vpow2.f32 %v2375_v12 }
  0x57   : > { %v2785_v32 = vpop.eup %2784  ;;  %v1390_v40 = vmul.f32 %v2783_v36, %v3328_v41  ;;  %2810 = vpow2.f32 %v2376_v23 }
  0x58   : > { %v2787_v43 = vpop.eup %2786  ;;  %v1431_v44 = vpack.c.bf16 %v1389_v39, %v1388_v28  ;;  %v1391_v35 = vmul.f32 %v2785_v32, %v3332_v45  ;;  %2812 = vpow2.f32 %v2377_v25 }
  0x59   : > { %v2789_v33 = vpop.eup %2788  ;;  %v1392_v27 = vmul.f32 %v2787_v43, %v3343_v1  ;;  %2814 = vpow2.f32 %v2378_v22 }
  0x5a   : > { %v2791_v46 = vpop.eup %2790  ;;  %2626 = vmatprep.mubr.msk.bf16.mxu1 %vm526_vm1, %v1431_v44  ;;  %v1432_v38 = vpack.c.bf16 %v1391_v35, %v1390_v40  ;;  %v1393_v47 = vmul.f32 %v2789_v33, %v3347_v7  ;;  %2816 = vpow2.f32 %v2379_v42 }
  0x5b   : > { %v2793_v41 = vpop.eup %2792  ;;  %v1394_v56 = vmul.f32 %v2791_v46, %v3350_v9 }
  0x5c   : > { %v2795_v53 = vpop.eup %2794  ;;  %2627 = vmatmul.mubr.msk.bf16.gmra.mxu1 %vm526_vm1, %v1432_v38  ;;  %v1433_v55 = vpack.c.bf16 %v1393_v47, %v1392_v27  ;;  %v1395_v45 = vmul.f32 %v2793_v41, %v3355_v14 }
  0x5d   : > { %v2797_v58 = vpop.eup %2796  ;;  %v1302_v34 = vadd.f32 1.0, %v2795_v53 }
  0x5e   : > { %v2799_v1 = vpop.eup %2798  ;;  %2630 = vmatprep.mubr.msk.bf16.mxu1 %vm526_vm1, %v1433_v55  ;;  %v1303_v59 = vadd.f32 1.0, %v2797_v58  ;;  %v1434_v63 = vpack.c.bf16 %v1395_v45, %v1394_v56 }
  0x5f   : > { %v2801_v60 = vpop.eup %2800  ;;  %2818 = vrcp.f32 %v1302_v34  ;;  %v1304_v62 = vadd.f32 1.0, %v2799_v1 }
  0x60   : > { %v2803_v7 = vpop.eup %2802  ;;  %2820 = vrcp.f32 %v1303_v59  ;;  %v1305_v0 = vadd.f32 1.0, %v2801_v60 }
  0x61   : > { %v2805_v48 = vpop.eup %2804  ;;  %2822 = vrcp.f32 %v1304_v62  ;;  %v1306_v5 = vadd.f32 1.0, %v2803_v7 }
  0x62   : > { %v2807_v10 = vpop.eup %2806  ;;  %v1396_v9 = vmul.f32 %v2805_v48, %v3374_v54  ;;  %2824 = vrcp.f32 %v1305_v0 }
  0x63   : > { %v2809_v14 = vpop.eup %2808  ;;  %v1397_v11 = vmul.f32 %v2807_v10, %v3378_v57  ;;  %2826 = vrcp.f32 %v1306_v5 }
  0x64   : > { %v2811_v13 = vpop.eup %2810  ;;  %2631 = vmatmul.mubr.msk.bf16.gmra.mxu1 %vm526_vm1, %v1434_v63  ;;  %v1307_v2 = vadd.f32 1.0, %v2809_v14 }
  0x65   : > { %v2813_v49 = vpop.eup %2812  ;;  %v1435_v15 = vpack.c.bf16 %v1397_v11, %v1396_v9  ;;  %v1308_v3 = vadd.f32 1.0, %v2811_v13 }
  0x66   : > { %v2815_v50 = vpop.eup %2814  ;;  %2828 = vrcp.f32 %v1307_v2  ;;  %v1309_v19 = vadd.f32 1.0, %v2813_v49 }
  0x67   : > { %v2817_v8 = vpop.eup %2816  ;;  %2634 = vmatprep.mubr.msk.bf16.mxu1 %vm526_vm1, %v1435_v15  ;;  %2830 = vrcp.f32 %v1308_v3  ;;  %v1310_v54 = vadd.f32 1.0, %v2815_v50 }
  0x68   : > { %2832 = vrcp.f32 %v1309_v19  ;;  %v1311_v20 = vadd.f32 1.0, %v2817_v8 }
  0x69   : > { %2834 = vrcp.f32 %v1310_v54 }
  0x6a   : > { %2836 = vrcp.f32 %v1311_v20 }
  0x6c   : > { %v2819_v57 = vpop.eup %2818 }
  0x6d   : > { %v2821_v30 = vpop.eup %2820  ;;  %v1398_v12 = vmul.f32 %v2819_v57, %v3388_v4 }
  0x6e   : > { %v2823_v21 = vpop.eup %2822  ;;  %v1399_v23 = vmul.f32 %v2821_v30, %v3393_v17 }
  0x6f   : > { %v2825_v51 = vpop.eup %2824  ;;  %v1400_v24 = vmul.f32 %v2823_v21, %v3401_v31 }
  0x70   : > { %v2827_v25 = vpop.eup %2826  ;;  %v1436_v6 = vpack.c.bf16 %v1399_v23, %v1398_v12  ;;  %v1401_v28 = vmul.f32 %v2825_v51, %v3404_v37 }
  0x71   : > { %v1402_v39 = vmul.f32 %v2827_v25, %v3412_v52 }
  0x72   : > { %2635 = vmatmul.mubr.msk.bf16.gmra.mxu1 %vm526_vm1, %v1436_v6  ;;  %v1437_v36 = vpack.c.bf16 %v1401_v28, %v1400_v24 }
  0x73   : > { %v2829_v22 = vpop.eup %2828 }
  0x74   : > { %v2831_v32 = vpop.eup %2830  ;;  %2638 = vmatprep.mubr.msk.bf16.mxu1 %vm526_vm1, %v1437_v36  ;;  %v1403_v4 = vmul.f32 %v2829_v22, %v3418_v61  ;;  %v3479_v61 = vld [vmem:[%s4063_s3] ss:$0 sm:$0xff] }
  0x75   : > { %v2833_v40 = vpop.eup %2832  ;;  %v1404_v17 = vmul.f32 %v2831_v32, %v3427_v16 }
  0x76   : > { %v2835_v42 = vpop.eup %2834  ;;  %v1438_v31 = vpack.c.bf16 %v1403_v4, %v1402_v39  ;;  %v1405_v43 = vmul.f32 %v2833_v40, %v3430_v18  ;;  %v3485_v18 = vld [vmem:[%s4064_s4] ss:$0 sm:$0xff] }
  0x77   : > { %v2837_v44 = vpop.eup %2836  ;;  %v1406_v37 = vmul.f32 %v2835_v42, %v3440_v26 }
  0x78   : > { %v1439_v35 = vpack.c.bf16 %v1405_v43, %v1404_v17  ;;  %v1407_v33 = vmul.f32 %v2837_v44, %v3444_v29 }
  0x7a   : > { %2639 = vmatmul.mubr.msk.bf16.gmra.mxu1 %vm526_vm1, %v1438_v31  ;;  %v1440_v52 = vpack.c.bf16 %v1407_v33, %v1406_v37 }
  0x7b   : > { %2642 = vmatprep.mubr.msk.bf16.mxu1 %vm526_vm1, %v1439_v35 }
  0x82   : > { %2643 = vmatmul.mubr.msk.bf16.gmra.mxu1 %vm526_vm1, %v1440_v52 }
  0xd0   : > { %v2582_v16 = vpop.f32.mrf.mxu0 }
  0xd1   : > { %v749_v26 = vmul.f32 %v2582_v16, %v3479_v61  ;;  %v2598_v29 = vpop.f32.mrf.mxu1 }
  0xd2   : > { %v613_v27 = vpop.f32.mrf.mxu0  ;;  %v765_v5 = vmul.f32 %v2598_v29, %v3479_v61 }
  0xd3   : > { %v3489_v46 = vadd.f32 %v3485_v18, %v749_v26  ;;  %v747_v38 = vmul.f32 %v3479_v61, %v613_v27  ;;  %v677_v47 = vpop.f32.mrf.mxu1 }
  0xd4   : > { %v2583_v41 = vpop.f32.mrf.mxu0  ;;  %v763_v10 = vmul.f32 %v3479_v61, %v677_v47  ;;  %v3525_v30 = vadd.f32 %v3485_v18, %v765_v5 }
  0xd5   : > { %v2316_v53 = vmul.f32 -1.442695, %v3489_v46  ;;  %v3494_v55 = vadd.f32 %v3485_v18, %v747_v38  ;;  %v750_v56 = vmul.f32 %v2583_v41, %v3479_v61  ;;  %v2599_v45 = vpop.f32.mrf.mxu1 }
  0xd6   : > { %v616_v58 = vpop.f32.mrf.mxu0  ;;  %v766_v49 = vmul.f32 %v2599_v45, %v3479_v61  ;;  %v3522_v20 = vadd.f32 %v3485_v18, %v763_v10  ;;  %v2332_v17 = vmul.f32 -1.442695, %v3525_v30 }
  0xd7   : > { %v2314_v34 = vmul.f32 -1.442695, %v3494_v55  ;;  %v3499_v1 = vadd.f32 %v3485_v18, %v750_v56  ;;  %v748_v59 = vmul.f32 %v3479_v61, %v616_v58  ;;  %v680_v60 = vpop.f32.mrf.mxu1  ;;  %2838 = vpow2.f32 %v2316_v53 }
  0xd8   : > { %v2586_v62 = vpop.f32.mrf.mxu0  ;;  %v764_v15 = vmul.f32 %v3479_v61, %v680_v60  ;;  %v3533_v24 = vadd.f32 %v3485_v18, %v766_v49  ;;  %v2330_v22 = vmul.f32 -1.442695, %v3522_v20 }
  0xd9   : > { %2840 = vpow2.f32 %v2314_v34  ;;  %v2317_v7 = vmul.f32 -1.442695, %v3499_v1  ;;  %v3504_v63 = vadd.f32 %v3485_v18, %v748_v59  ;;  %v753_v0 = vmul.f32 %v2586_v62, %v3479_v61  ;;  %v2602_v48 = vpop.f32.mrf.mxu1 }
  0xda   : > { %v629_v9 = vpop.f32.mrf.mxu0  ;;  %v3536_v6 = vadd.f32 %v3485_v18, %v764_v15  ;;  %v769_v32 = vmul.f32 %v2602_v48, %v3479_v61  ;;  %v2333_v44 = vmul.f32 -1.442695, %v3533_v24 }
  0xdb   : > { %2842 = vpow2.f32 %v2317_v7  ;;  %v2315_v14 = vmul.f32 -1.442695, %v3504_v63  ;;  %v3511_v11 = vadd.f32 %v3485_v18, %v753_v0  ;;  %v751_v13 = vmul.f32 %v3479_v61, %v629_v9  ;;  %v693_v2 = vpop.f32.mrf.mxu1 }
  0xdc   : > { %v2587_v3 = vpop.f32.mrf.mxu0  ;;  %v767_v42 = vmul.f32 %v3479_v61, %v693_v2  ;;  %v2331_v16 = vmul.f32 -1.442695, %v3536_v6  ;;  %v3558_v38 = vadd.f32 %v3485_v18, %v769_v32 }
  0xdd   : > { %2844 = vpow2.f32 %v2315_v14  ;;  %v2320_v50 = vmul.f32 -1.442695, %v3511_v11  ;;  %v3518_v19 = vadd.f32 %v3485_v18, %v751_v13  ;;  %v754_v8 = vmul.f32 %v2587_v3, %v3479_v61  ;;  %v2603_v54 = vpop.f32.mrf.mxu1 }
  0xde   : > { %v632_v57 = vpop.f32.mrf.mxu0  ;;  %v770_v37 = vmul.f32 %v2603_v54, %v3479_v61  ;;  %v3561_v53 = vadd.f32 %v3485_v18, %v767_v42  ;;  %v2336_v48 = vmul.f32 -1.442695, %v3558_v38 }
  0xdf   : > { %v2318_v12 = vmul.f32 -1.442695, %v3518_v19  ;;  %v3529_v21 = vadd.f32 %v3485_v18, %v754_v8  ;;  %v752_v23 = vmul.f32 %v3479_v61, %v632_v57  ;;  %v696_v51 = vpop.f32.mrf.mxu1  ;;  %2846 = vpow2.f32 %v2320_v50 }
  0xe0   : > { %v2590_v25 = vpop.f32.mrf.mxu0  ;;  %v768_v26 = vmul.f32 %v3479_v61, %v696_v51  ;;  %v3566_v34 = vadd.f32 %v3485_v18, %v770_v37  ;;  %v2334_v14 = vmul.f32 -1.442695, %v3561_v53 }
  0xe1   : > { %2848 = vpow2.f32 %v2318_v12  ;;  %v2321_v28 = vmul.f32 -1.442695, %v3529_v21  ;;  %v3540_v36 = vadd.f32 %v3485_v18, %v752_v23  ;;  %v2606_v39 = vpop.f32.mrf.mxu1  ;;  %v757_v13 = vmul.f32 %v2590_v25, %v3479_v61 }
  0xe2   : > { %v773_v4 = vmul.f32 %v2606_v39, %v3479_v61  ;;  %v645_v40 = vpop.f32.mrf.mxu0  ;;  %v3570_v62 = vadd.f32 %v3485_v18, %v768_v26  ;;  %v2337_v49 = vmul.f32 -1.442695, %v3566_v34 }
  0xe3   : > { %2850 = vpow2.f32 %v2321_v28  ;;  %v2319_v31 = vmul.f32 -1.442695, %v3540_v36  ;;  %v3548_v43 = vpop.f32.mrf.mxu1  ;;  %v755_v50 = vmul.f32 %v3479_v61, %v645_v40  ;;  %v3583_v23 = vadd.f32 %v3485_v18, %v757_v13 }
  0xe4   : > { %v3553_v35 = vadd.f32 %v3485_v18, %v773_v4  ;;  %v2591_v33 = vpop.f32.mrf.mxu0  ;;  %v2839_v52 = vpop.eup %2838  ;;  %v2335_v3 = vmul.f32 -1.442695, %v3570_v62 }
  0xe5   : > { %2852 = vpow2.f32 %v2319_v31  ;;  %v2607_v29 = vpop.f32.mrf.mxu1  ;;  %v916_v58 = vadd.f32 1.0, %v2839_v52  ;;  %v758_v51 = vmul.f32 %v2591_v33, %v3479_v61  ;;  %v3591_v40 = vadd.f32 %v3485_v18, %v755_v50 }
  0xe6   : > { %v2841_v27 = vpop.eup %2840  ;;  %2854 = vpow2.f32 %v2330_v22  ;;  %v648_v47 = vpop.f32.mrf.mxu0  ;;  %v774_v59 = vmul.f32 %v2607_v29, %v3479_v61 }
  0xe7   : > { %2856 = vpow2.f32 %v2332_v17  ;;  %v914_v41 = vadd.f32 1.0, %v2841_v27  ;;  %v3563_v56 = vpop.f32.mrf.mxu1  ;;  %v756_v17 = vmul.f32 %v3479_v61, %v648_v47  ;;  %v3600_v26 = vadd.f32 %v3485_v18, %v758_v51 }
  0xe8   : > { %v2843_v45 = vpop.eup %2842  ;;  %2858 = vpow2.f32 %v2333_v44  ;;  %v3574_v5 = vadd.f32 %v3485_v18, %v774_v59  ;;  %v2594_v10 = vpop.f32.mrf.mxu0  ;;  %v2340_v47 = vmul.f32 -1.442695, %v3553_v35 }
  0xe9   : > { %v917_v60 = vadd.f32 1.0, %v2843_v45  ;;  %2860 = vpow2.f32 %v2331_v16  ;;  %v2610_v7 = vpop.f32.mrf.mxu1  ;;  %v761_v31 = vmul.f32 %v2594_v10, %v3479_v61  ;;  %v2324_v16 = vmul.f32 -1.442695, %v3583_v23 }
  0xea   : > { %v2845_v0 = vpop.eup %2844  ;;  %2862 = vrcp.f32 %v914_v41  ;;  %v777_v54 = vmul.f32 %v2610_v7, %v3479_v61  ;;  %v661_v57 = vpop.f32.mrf.mxu0  ;;  %v3610_v59 = vadd.f32 %v3485_v18, %v756_v17  ;;  %v2341_v50 = vmul.f32 -1.442695, %v3574_v5 }
  0xeb   : > { %2864 = vrcp.f32 %v917_v60  ;;  %v915_v9 = vadd.f32 1.0, %v2845_v0  ;;  %v725_v2 = vpop.f32.mrf.mxu1  ;;  %v759_v60 = vmul.f32 %v3479_v61, %v661_v57 }
  0xec   : > { %2866 = vrcp.f32 %v916_v58  ;;  %v2847_v15 = vpop.eup %2846  ;;  %v3587_v22 = vadd.f32 %v3485_v18, %v777_v54  ;;  %v775_v32 = vmul.f32 %v3479_v61, %v725_v2  ;;  %v2595_v37 = vpop.f32.mrf.mxu0  ;;  %v2322_v58 = vmul.f32 -1.442695, %v3591_v40 }
  0xed   : > { %2868 = vrcp.f32 %v915_v9  ;;  %v2611_v25 = vpop.f32.mrf.mxu1  ;;  %v920_v39 = vadd.f32 1.0, %v2847_v15  ;;  %v2325_v2 = vmul.f32 -1.442695, %v3600_v26  ;;  %v2323_v57 = vmul.f32 -1.442695, %v3610_v59 }
  0xee   : > { %v2849_v8 = vpop.eup %2848  ;;  %2870 = vpow2.f32 %v2336_v48  ;;  %v3596_v44 = vadd.f32 %v3485_v18, %v775_v32  ;;  %v778_v41 = vmul.f32 %v2611_v25, %v3479_v61  ;;  %v3614_v48 = vadd.f32 %v3485_v18, %v761_v31  ;;  %v664_v9 = vpop.f32.mrf.mxu0 }
  0xef   : > { %v918_v12 = vadd.f32 1.0, %v2849_v8  ;;  %2872 = vpow2.f32 %v2334_v14  ;;  %v728_v29 = vpop.f32.mrf.mxu1  ;;  %v760_v51 = vmul.f32 %v3479_v61, %v664_v9 }
  0xf0   : > { %v2851_v28 = vpop.eup %2850  ;;  %2874 = vpow2.f32 %v2337_v49  ;;  %v3617_v10 = vadd.f32 %v3485_v18, %v778_v41  ;;  %v776_v14 = vmul.f32 %v3479_v61, %v728_v29  ;;  %v762_v49 = vmul.f32 %v2595_v37, %v3479_v61 }
  0xf1   : > { %v921_v4 = vadd.f32 1.0, %v2851_v28  ;;  %2876 = vpow2.f32 %v2335_v3  ;;  %v771_v3 = vmul.f32 %v3479_v61, %v3548_v43  ;;  %v2328_v43 = vmul.f32 -1.442695, %v3614_v48 }
  0xf2   : > { %v2853_v42 = vpop.eup %2852  ;;  %2878 = vrcp.f32 %v918_v12  ;;  %v3626_v8 = vadd.f32 %v3485_v18, %v776_v14  ;;  %v3630_v12 = vadd.f32 %v3485_v18, %v759_v60 }
  0xf3   : > { %v2855_v33 = vpop.eup %2854  ;;  %2880 = vrcp.f32 %v921_v4  ;;  %v919_v52 = vadd.f32 1.0, %v2853_v42  ;;  %v3640_v42 = vadd.f32 %v3485_v18, %v762_v49 }
  0xf4   : > { %v3602_v27 = vpop.eup %2856  ;;  %2882 = vrcp.f32 %v920_v39  ;;  %v930_v0 = vadd.f32 1.0, %v2855_v33  ;;  %v2343_v49 = vmul.f32 -1.442695, %v3626_v8 }
  0xf5   : > { %v3606_v45 = vpop.eup %2858  ;;  %2884 = vrcp.f32 %v919_v52 }
  0xf6   : > { %v2861_v7 = vpop.eup %2860  ;;  %2886 = vpow2.f32 %v2324_v16  ;;  %v2326_v16 = vmul.f32 -1.442695, %v3630_v12 }
  0xf7   : > { %v2863_v13 = vpop.eup %2862  ;;  %2888 = vpow2.f32 %v2340_v47  ;;  %v931_v39 = vadd.f32 1.0, %v2861_v7  ;;  %v2342_v47 = vmul.f32 -1.442695, %v3596_v44  ;;  %v2345_v7 = vmul.f32 -1.442695, %v3617_v10 }
  0xf8   : > { %v2865_v15 = vpop.eup %2864  ;;  %2890 = vpow2.f32 %v2322_v58  ;;  %v1010_v4 = vmul.f32 %v2863_v13, %v3494_v55  ;;  %v3650_v55 = vadd.f32 %v3485_v18, %v760_v51  ;;  %v2329_v58 = vmul.f32 -1.442695, %v3640_v42 }
  0xf9   : > { %v2867_v54 = vpop.eup %2866  ;;  %2892 = vrcp.f32 %v930_v0  ;;  %v1013_v28 = vmul.f32 %v2865_v15, %v3499_v1  ;;  %v2344_v1 = vmul.f32 -1.442695, %v3587_v22 }
  0xfa   : > { %v2869_v25 = vpop.eup %2868  ;;  %2894 = vpow2.f32 %v2325_v2  ;;  %v1012_v37 = vmul.f32 %v2867_v54, %v3489_v46  ;;  %v3656_v46 = vadd.f32 %v3485_v18, %v771_v3  ;;  %v2327_v9 = vmul.f32 -1.442695, %v3650_v55 }
  0xfb   : > { %v3635_v32 = vpop.eup %2870  ;;  %v1011_v17 = vmul.f32 %v2869_v25, %v3504_v63  ;;  %2896 = vpow2.f32 %v2341_v50  ;;  %v772_v2 = vmul.f32 %v3479_v61, %v3563_v56 }
  0xfc   : > { %v3642_v31 = vpop.eup %2872  ;;  %2898 = vpow2.f32 %v2323_v57  ;;  %v1409_v29 = vpack.c.bf16 %v1013_v28, %v1012_v37  ;;  %v2338_v50 = vmul.f32 -1.442695, %v3656_v46 }
  0xfd   : > { %v3646_v33 = vpop.eup %2874  ;;  %v1408_v52 = vpack.c.bf16 %v1011_v17, %v1010_v4  ;;  %2900 = vrcp.f32 %v931_v39  ;;  %v3672_v39 = vadd.f32 %v3485_v18, %v772_v2 }
  0xfe   : > { %v3652_v63 = vpop.eup %2876  ;;  %2902 = vpow2.f32 %v2328_v43 }
  0xff   : > { %v2879_v41 = vpop.eup %2878  ;;  %2648 = vmatprep.mubr.msk.bf16.mxu0 %vm526_vm1, %v1408_v52  ;;  %2904 = vpow2.f32 %v2344_v1  ;;  %v2339_v18 = vmul.f32 -1.442695, %v3672_v39 }
 0x100   : > { %v2881_v60 = vpop.eup %2880  ;;  %2649 = vmatmul.mubr.msk.bf16.vlgmr.msra.gmra.mxu0 %vm526_vm1, %v1409_v29  ;;  %2906 = vpow2.f32 %v2326_v16  ;;  %v1014_v15 = vmul.f32 %v2879_v41, %v3518_v19 }
 0x101   : > { %v2883_v0 = vpop.eup %2882  ;;  %v1017_v13 = vmul.f32 %v2881_v60, %v3529_v21  ;;  %2908 = vpow2.f32 %v2342_v47 }
 0x102   : > { %v2885_v14 = vpop.eup %2884  ;;  %2910 = vpow2.f32 %v2329_v58  ;;  %v1016_v57 = vmul.f32 %v2883_v0, %v3511_v11 }
 0x103   : > { %v1015_v3 = vmul.f32 %v2885_v14, %v3540_v36  ;;  %v2887_v54 = vpop.eup %2886  ;;  %2912 = vpow2.f32 %v2345_v7 }
 0x104   : > { %v2889_v51 = vpop.eup %2888  ;;  %v924_v21 = vadd.f32 1.0, %v2887_v54  ;;  %2914 = vpow2.f32 %v2327_v9  ;;  %v1411_v61 = vpack.c.bf16 %v1017_v13, %v1016_v57 }
 0x105   : > { %v1410_v25 = vpack.c.bf16 %v1015_v3, %v1014_v15  ;;  %v2891_v28 = vpop.eup %2890  ;;  %v940_v56 = vadd.f32 1.0, %v2889_v51  ;;  %2916 = vpow2.f32 %v2343_v49 }
 0x106   : > { %v3674_v19 = vpop.eup %2892  ;;  %v922_v36 = vadd.f32 1.0, %v2891_v28  ;;  %2918 = vpow2.f32 %v2338_v50  ;;  %v935_v28 = vadd.f32 1.0, %v3652_v63 }
 0x107   : > { %2652 = vmatprep.mubr.msk.bf16.mxu0 %vm526_vm1, %v1410_v25  ;;  %v2895_v43 = vpop.eup %2894  ;;  %2920 = vrcp.f32 %v924_v21  ;;  %v933_v25 = vadd.f32 1.0, %v3606_v45 }
 0x108   : > { %2653 = vmatmul.mubr.msk.bf16.gmra.mxu0 %vm526_vm1, %v1411_v61  ;;  %v2897_v11 = vpop.eup %2896  ;;  %2922 = vrcp.f32 %v940_v56  ;;  %v925_v4 = vadd.f32 1.0, %v2895_v43  ;;  %v932_v56 = vadd.f32 1.0, %v3602_v27  ;;  %v934_v43 = vadd.f32 1.0, %v3642_v31 }
 0x109   : > { %v2899_v17 = vpop.eup %2898  ;;  %2924 = vrcp.f32 %v922_v36  ;;  %v941_v37 = vadd.f32 1.0, %v2897_v11 }
 0x10a   : > { %v3679_v1 = vpop.eup %2900  ;;  %2926 = vrcp.f32 %v925_v4  ;;  %v923_v52 = vadd.f32 1.0, %v2899_v17 }
 0x10b   : > { %v2903_v16 = vpop.eup %2902  ;;  %2928 = vrcp.f32 %v941_v37 }
 0x10c   : > { %v2905_v29 = vpop.eup %2904  ;;  %2930 = vrcp.f32 %v923_v52  ;;  %v928_v47 = vadd.f32 1.0, %v2903_v16  ;;  %v936_v16 = vadd.f32 1.0, %v3635_v32 }
 0x10d   : > { %v2907_v41 = vpop.eup %2906  ;;  %2932 = vpow2.f32 %v2339_v18  ;;  %v944_v58 = vadd.f32 1.0, %v2905_v29  ;;  %v937_v29 = vadd.f32 1.0, %v3646_v33 }
 0x10e   : > { %v2909_v60 = vpop.eup %2908  ;;  %2934 = vrcp.f32 %v928_v47  ;;  %v926_v7 = vadd.f32 1.0, %v2907_v41 }
 0x10f   : > { %v2911_v0 = vpop.eup %2910  ;;  %2936 = vrcp.f32 %v944_v58  ;;  %v942_v9 = vadd.f32 1.0, %v2909_v60 }
 0x110   : > { %v2913_v14 = vpop.eup %2912  ;;  %2938 = vrcp.f32 %v926_v7  ;;  %v929_v13 = vadd.f32 1.0, %v2911_v0 }
 0x111   : > { %v2915_v2 = vpop.eup %2914  ;;  %2940 = vrcp.f32 %v942_v9  ;;  %v945_v49 = vadd.f32 1.0, %v2913_v14  ;;  %v1027_v9 = vmul.f32 %v3679_v1, %v3536_v6 }
 0x112   : > { %v2917_v15 = vpop.eup %2916  ;;  %2942 = vrcp.f32 %v929_v13  ;;  %v927_v3 = vadd.f32 1.0, %v2915_v2 }
 0x113   : > { %v2919_v50 = vpop.eup %2918  ;;  %2944 = vrcp.f32 %v945_v49  ;;  %v943_v54 = vadd.f32 1.0, %v2917_v15 }
 0x114   : > { %v2921_v57 = vpop.eup %2920  ;;  %2946 = vrcp.f32 %v927_v3  ;;  %v938_v58 = vadd.f32 1.0, %v2919_v50 }
 0x115   : > { %v2923_v51 = vpop.eup %2922  ;;  %2948 = vrcp.f32 %v943_v54  ;;  %v1020_v31 = vmul.f32 %v2921_v57, %v3583_v23 }
 0x116   : > { %v2925_v21 = vpop.eup %2924  ;;  %2950 = vrcp.f32 %v933_v25  ;;  %v3686_v4 = vmul.f32 %v2923_v51, %v3553_v35 }
 0x117   : > { %v2927_v61 = vpop.eup %2926  ;;  %2952 = vrcp.f32 %v935_v28  ;;  %v1018_v63 = vmul.f32 %v2925_v21, %v3591_v40 }
 0x118   : > { %v2929_v36 = vpop.eup %2928  ;;  %v1021_v17 = vmul.f32 %v2927_v61, %v3600_v26  ;;  %2954 = vrcp.f32 %v932_v56 }
 0x119   : > { %v2931_v11 = vpop.eup %2930  ;;  %v3690_v37 = vmul.f32 %v2929_v36, %v3574_v5  ;;  %2956 = vrcp.f32 %v934_v43 }
 0x11a   : > { %v2933_v45 = vpop.eup %2932  ;;  %v1019_v18 = vmul.f32 %v2931_v11, %v3610_v59  ;;  %v1413_v47 = vpack.c.bf16 %v1021_v17, %v1020_v31  ;;  %2958 = vrcp.f32 %v936_v16 }
 0x11b   : > { %v2935_v27 = vpop.eup %2934  ;;  %v1421_v52 = vpack.c.bf16 %v3690_v37, %v3686_v4  ;;  %v939_v40 = vadd.f32 1.0, %v2933_v45  ;;  %2960 = vrcp.f32 %v937_v29 }
 0x11c   : > { %v2937_v35 = vpop.eup %2936  ;;  %v1412_v26 = vpack.c.bf16 %v1019_v18, %v1018_v63  ;;  %v1024_v2 = vmul.f32 %v2935_v27, %v3614_v48  ;;  %v3745_v27 = vld [vmem:[%s4069_s9] ss:$0 sm:$0xff] }
 0x11d   : > { %v2939_v5 = vpop.eup %2938  ;;  %v1040_v32 = vmul.f32 %v2937_v35, %v3587_v22  ;;  %2962 = vrcp.f32 %v939_v40 }
 0x11e   : > { %v2941_v41 = vpop.eup %2940  ;;  %2656 = vmatprep.mubr.msk.bf16.mxu0 %vm526_vm1, %v1412_v26  ;;  %v1022_v14 = vmul.f32 %v2939_v5, %v3630_v12  ;;  %2964 = vrcp.f32 %v938_v58 }
 0x11f   : > { %v2943_v59 = vpop.eup %2942  ;;  %2657 = vmatmul.mubr.msk.bf16.gmra.mxu0 %vm526_vm1, %v1413_v47  ;;  %v1038_v49 = vmul.f32 %v2941_v41, %v3596_v44 }
 0x120   : > { %v2945_v23 = vpop.eup %2944  ;;  %v1025_v7 = vmul.f32 %v2943_v59, %v3640_v42  ;;  %v1026_v42 = vmul.f32 %v3674_v19, %v3522_v20 }
 0x121   : > { %v2947_v60 = vpop.eup %2946  ;;  %v1041_v0 = vmul.f32 %v2945_v23, %v3617_v10 }
 0x122   : > { %v2949_v33 = vpop.eup %2948  ;;  %v1023_v13 = vmul.f32 %v2947_v60, %v3650_v55  ;;  %v1415_v3 = vpack.c.bf16 %v1025_v7, %v1024_v2  ;;  %v1416_v1 = vpack.c.bf16 %v1027_v9, %v1026_v42 }
 0x123   : > { %v1423_v15 = vpack.c.bf16 %v1041_v0, %v1040_v32  ;;  %v1039_v22 = vmul.f32 %v2949_v33, %v3626_v8  ;;  %v2951_v6 = vpop.eup %2950 }
 0x124   : > { %v1414_v10 = vpack.c.bf16 %v1023_v13, %v1022_v14  ;;  %v2953_v12 = vpop.eup %2952  ;;  %v1029_v8 = vmul.f32 %v2951_v6, %v3533_v24 }
 0x125   : > { %v1422_v50 = vpack.c.bf16 %v1039_v22, %v1038_v49  ;;  %v2955_v48 = vpop.eup %2954  ;;  %v1031_v55 = vmul.f32 %v2953_v12, %v3570_v62 }
 0x126   : > { %2660 = vmatprep.mubr.msk.bf16.mxu0 %vm526_vm1, %v1414_v10  ;;  %v2957_v44 = vpop.eup %2956  ;;  %v1028_v20 = vmul.f32 %v2955_v48, %v3525_v30 }
 0x127   : > { %2661 = vmatmul.mubr.msk.bf16.gmra.mxu0 %vm526_vm1, %v1415_v3  ;;  %v1030_v19 = vmul.f32 %v2957_v44, %v3561_v53  ;;  %v2959_v54 = vpop.eup %2958 }
 0x128   : > { %2664 = vmatprep.mubr.msk.bf16.mxu0 %vm526_vm1, %v1416_v1  ;;  %v1417_v57 = vpack.c.bf16 %v1029_v8, %v1028_v20  ;;  %v2961_v51 = vpop.eup %2960  ;;  %v1032_v62 = vmul.f32 %v2959_v54, %v3558_v38 }
 0x129   : > { %v1418_v25 = vpack.c.bf16 %v1031_v55, %v1030_v19  ;;  %v1033_v61 = vmul.f32 %v2961_v51, %v3566_v34  ;;  %v2616_v34 = vpop.f32.mrf.mxu1 }
 0x12a   : > { %v2963_v21 = vpop.eup %2962 }
 0x12b   : > { %v2965_v28 = vpop.eup %2964  ;;  %v1035_v24 = vmul.f32 %v2963_v21, %v3672_v39  ;;  %v1419_v56 = vpack.c.bf16 %v1033_v61, %v1032_v62  ;;  %v1527_v39 = vpop.f32.mrf.mxu1 }
 0x12c   : > { %v1034_v30 = vmul.f32 %v2965_v28, %v3656_v46 }
 0x12d   : > { %v2617_v38 = vpop.f32.mrf.mxu1 }
 0x12e   : > { %v1420_v53 = vpack.c.bf16 %v1035_v24, %v1034_v30 }
 0x12f   : > { %2665 = vmatmul.mubr.msk.bf16.gmra.mxu0 %vm526_vm1, %v1417_v57  ;;  %v1530_v36 = vpop.f32.mrf.mxu1 }
 0x130   : > { %2668 = vmatprep.mubr.msk.bf16.mxu0 %vm526_vm1, %v1418_v25 }
 0x131   : > { %v2620_v46 = vpop.f32.mrf.mxu1 }
 0x133   : > { %v1543_v43 = vpop.f32.mrf.mxu1 }
 0x135   : > { %v2621_v11 = vpop.f32.mrf.mxu1 }
 0x137   : > { %2669 = vmatmul.mubr.msk.bf16.gmra.mxu0 %vm526_vm1, %v1419_v56  ;;  %v1546_v17 = vpop.f32.mrf.mxu1 }
 0x138   : > { %2672 = vmatprep.mubr.msk.bf16.mxu0 %vm526_vm1, %v1420_v53 }
 0x139   : > { %v3734_v45 = vpop.f32.mrf.mxu1 }
 0x13b   : > { %v3736_v63 = vpop.f32.mrf.mxu1 }
 0x13d   : > { %v3738_v18 = vpop.f32.mrf.mxu1 }
 0x13f   : > { %2673 = vmatmul.mubr.msk.bf16.gmra.mxu0 %vm526_vm1, %v1421_v52  ;;  %v3740_v4 = vpop.f32.mrf.mxu1  ;;  %v3750_v52 = vld [vmem:[%s4070_s10] ss:$0 sm:$0xff] }
 0x140   : > { %2676 = vmatprep.mubr.msk.bf16.mxu0 %vm526_vm1, %v1422_v50 }
 0x141   : > { %v3753_v5 = vpop.f32.mrf.mxu1 }
 0x143   : > { %v3764_v7 = vpop.f32.mrf.mxu1 }
 0x145   : > { %v3775_v42 = vpop.f32.mrf.mxu1 }
 0x147   : > { %2677 = vmatmul.mubr.msk.bf16.gmra.mxu0 %vm526_vm1, %v1423_v15  ;;  %v3787_v20 = vpop.f32.mrf.mxu1 }
 0x149   : > { %v3799_v28 = vpop.f32.mrf.mxu1 }
 0x14b   : > { %v3802_v30 = vpop.f32.mrf.mxu1 }
 0x1c0   : > { %v2650_v37 = vpop.f32.mrf.mxu0 }
 0x1c1   : > { %v1748_v31 = vadd.f32 %v2650_v37, %v2616_v34 }
 0x1c2   : > { %v1739_v35 = vpop.f32.mrf.mxu0 }
 0x1c3   : > { %v1875_v16 = vmul.f32 %v3745_v27, %v1748_v31  ;;  %v1740_v26 = vadd.f32 %v1739_v35, %v1527_v39 }
 0x1c4   : > { %v2651_v29 = vpop.f32.mrf.mxu0 }
 0x1c5   : > { %v3756_v47 = vadd.f32 %v3750_v52, %v1875_v16  ;;  %v1873_v41 = vmul.f32 %v3745_v27, %v1740_v26  ;;  %v1751_v40 = vadd.f32 %v2651_v29, %v2617_v38  ;;  %v3804_v38 = vpop.f32.mrf.mxu1 }
 0x1c6   : > { %v1742_v59 = vpop.f32.mrf.mxu0 }
 0x1c7   : > { %v2416_v23 = vmul.f32 -1.442695, %v3756_v47  ;;  %v3761_v58 = vadd.f32 %v3750_v52, %v1873_v41  ;;  %v1876_v60 = vmul.f32 %v3745_v27, %v1751_v40  ;;  %v1743_v32 = vadd.f32 %v1742_v59, %v1530_v36 }
 0x1c8   : > { %v2654_v0 = vpop.f32.mrf.mxu0 }
 0x1c9   : > { %2966 = vpow2.f32 %v2416_v23  ;;  %v2414_v33 = vmul.f32 -1.442695, %v3761_v58  ;;  %v3768_v9 = vadd.f32 %v3750_v52, %v1876_v60  ;;  %v1874_v14 = vmul.f32 %v3745_v27, %v1743_v32 }
 0x1ca   : > { %v1764_v13 = vadd.f32 %v2654_v0, %v2620_v46  ;;  %v1755_v2 = vpop.f32.mrf.mxu0 }
 0x1cb   : > { %2968 = vpow2.f32 %v2414_v33  ;;  %v2417_v49 = vmul.f32 -1.442695, %v3768_v9  ;;  %v3773_v15 = vadd.f32 %v3750_v52, %v1874_v14  ;;  %v1756_v22 = vadd.f32 %v1755_v2, %v1543_v43 }
 0x1cc   : > { %v1879_v10 = vmul.f32 %v3745_v27, %v1764_v13  ;;  %v2655_v3 = vpop.f32.mrf.mxu0 }
 0x1cd   : > { %2970 = vpow2.f32 %v2417_v49  ;;  %v2415_v50 = vmul.f32 -1.442695, %v3773_v15  ;;  %v1877_v6 = vmul.f32 %v3745_v27, %v1756_v22  ;;  %v1767_v1 = vadd.f32 %v2655_v3, %v2621_v11  ;;  %v3806_v11 = vpop.f32.mrf.mxu1 }
 0x1ce   : > { %v3781_v12 = vadd.f32 %v3750_v52, %v1879_v10  ;;  %v1758_v48 = vpop.f32.mrf.mxu0 }
 0x1cf   : > { %2972 = vpow2.f32 %v2415_v50  ;;  %v3784_v44 = vadd.f32 %v3750_v52, %v1877_v6  ;;  %v1880_v8 = vmul.f32 %v3745_v27, %v1767_v1  ;;  %v1759_v55 = vadd.f32 %v1758_v48, %v1546_v17  ;;  %v3812_v23 = vpop.f32.mrf.mxu1 }
 0x1d0   : > { %v2420_v19 = vmul.f32 -1.442695, %v3781_v12 }
 0x1d1   : > { %v2418_v54 = vmul.f32 -1.442695, %v3784_v44  ;;  %v3792_v57 = vadd.f32 %v3750_v52, %v1880_v8  ;;  %v1878_v51 = vmul.f32 %v3745_v27, %v1759_v55  ;;  %v3829_v10 = vpop.f32.mrf.mxu1 }
 0x1d2   : > { %2974 = vpow2.f32 %v2420_v19 }
 0x1d3   : > { %2976 = vpow2.f32 %v2418_v54  ;;  %v2421_v25 = vmul.f32 -1.442695, %v3792_v57  ;;  %v3797_v21 = vadd.f32 %v3750_v52, %v1878_v51 }
 0x1d5   : > { %2978 = vpow2.f32 %v2421_v25  ;;  %v2419_v61 = vmul.f32 -1.442695, %v3797_v21  ;;  %v3847_v25 = vpop.f32.mrf.mxu1 }
 0x1d6   : > { %v2967_v24 = vpop.eup %2966 }
 0x1d7   : > { %v2042_v62 = vadd.f32 1.0, %v2967_v24  ;;  %2980 = vpow2.f32 %v2419_v61 }
 0x1d8   : > { %v2969_v56 = vpop.eup %2968 }
 0x1d9   : > { %2982 = vrcp.f32 %v2042_v62  ;;  %v2040_v53 = vadd.f32 1.0, %v2969_v56 }
 0x1da   : > { %v2971_v34 = vpop.eup %2970 }
 0x1db   : > { %2984 = vrcp.f32 %v2040_v53  ;;  %v2043_v39 = vadd.f32 1.0, %v2971_v34 }
 0x1dc   : > { %v2973_v36 = vpop.eup %2972 }
 0x1dd   : > { %2986 = vrcp.f32 %v2043_v39  ;;  %v2041_v46 = vadd.f32 1.0, %v2973_v36 }
 0x1df   : > { %v2975_v43 = vpop.eup %2974  ;;  %2988 = vrcp.f32 %v2041_v46  ;;  %v2658_v31 = vpop.f32.mrf.mxu0 }
 0x1e0   : > { %v2977_v17 = vpop.eup %2976  ;;  %v2046_v37 = vadd.f32 1.0, %v2975_v43  ;;  %v1780_v16 = vadd.f32 %v2658_v31, %v3734_v45 }
 0x1e1   : > { %v2044_v35 = vadd.f32 1.0, %v2977_v17  ;;  %v1771_v29 = vpop.f32.mrf.mxu0 }
 0x1e2   : > { %v2979_v26 = vpop.eup %2978  ;;  %2990 = vrcp.f32 %v2046_v37  ;;  %v1883_v40 = vmul.f32 %v3745_v27, %v1780_v16  ;;  %v1772_v59 = vadd.f32 %v1771_v29, %v3736_v63  ;;  %v3870_v37 = vpop.f32.mrf.mxu1 }
 0x1e3   : > { %2992 = vrcp.f32 %v2044_v35  ;;  %v2047_v41 = vadd.f32 1.0, %v2979_v26  ;;  %v2659_v32 = vpop.f32.mrf.mxu0 }
 0x1e4   : > { %v2981_v60 = vpop.eup %2980  ;;  %v3815_v33 = vadd.f32 %v3750_v52, %v1883_v40  ;;  %v1881_v45 = vmul.f32 %v3745_v27, %v1772_v59  ;;  %v1783_v63 = vadd.f32 %v2659_v32, %v3738_v18  ;;  %v3887_v32 = vpop.f32.mrf.mxu1 }
 0x1e5   : > { %2994 = vrcp.f32 %v2047_v41  ;;  %v2045_v0 = vadd.f32 1.0, %v2981_v60  ;;  %v1774_v13 = vpop.f32.mrf.mxu0 }
 0x1e6   : > { %v2983_v14 = vpop.eup %2982  ;;  %v2424_v49 = vmul.f32 -1.442695, %v3815_v33  ;;  %v3827_v22 = vadd.f32 %v3750_v52, %v1881_v45  ;;  %v1884_v50 = vmul.f32 %v3745_v27, %v1783_v63  ;;  %v1775_v6 = vadd.f32 %v1774_v13, %v3740_v4 }
 0x1e7   : > { %v2138_v2 = vmul.f32 %v2983_v14, %v3756_v47  ;;  %2996 = vrcp.f32 %v2045_v0  ;;  %v2662_v1 = vpop.f32.mrf.mxu0 }
 0x1e8   : > { %v2985_v3 = vpop.eup %2984  ;;  %2998 = vpow2.f32 %v2424_v49  ;;  %v2422_v47 = vmul.f32 -1.442695, %v3827_v22  ;;  %v1796_v48 = vadd.f32 %v2662_v1, %v3753_v5  ;;  %v3839_v55 = vadd.f32 %v3750_v52, %v1884_v50 }
 0x1e9   : > { %2171 = vst.msk [vmem:[%s3821_s30 + $0x10] sm:$0xff] %vm2168_vm2, %v2138_v2  ;;  %v2136_v18 = vmul.f32 %v2985_v3, %v3761_v58  ;;  %v1882_v19 = vmul.f32 %v3745_v27, %v1775_v6  ;;  %v1787_v54 = vpop.f32.mrf.mxu0 }
 0x1ea   : > { %v2987_v8 = vpop.eup %2986  ;;  %3000 = vpow2.f32 %v2422_v47  ;;  %v1887_v58 = vmul.f32 %v3745_v27, %v1796_v48  ;;  %v1788_v51 = vadd.f32 %v1787_v54, %v3764_v7  ;;  %v2425_v61 = vmul.f32 -1.442695, %v3839_v55 }
 0x1eb   : > { %2169 = vst.msk [vmem:[%s3821_s30] sm:$0xff] %vm2168_vm2, %v2136_v18  ;;  %v2139_v4 = vmul.f32 %v2987_v8, %v3768_v9  ;;  %v3851_v24 = vadd.f32 %v3750_v52, %v1882_v19  ;;  %v2663_v62 = vpop.f32.mrf.mxu0  ;;  %v1623_v18 = vpop.f32.mrf.mxu1 }
 0x1ec   : > { %v2989_v5 = vpop.eup %2988  ;;  %v3857_v9 = vadd.f32 %v3750_v52, %v1887_v58  ;;  %v1885_v53 = vmul.f32 %v3745_v27, %v1788_v51  ;;  %v1799_v7 = vadd.f32 %v2663_v62, %v3775_v42  ;;  %3002 = vpow2.f32 %v2425_v61 }
 0x1ed   : > { %2172 = vst.msk [vmem:[%s3821_s30 + $0x18] sm:$0xff] %vm2168_vm2, %v2139_v4  ;;  %v2137_v56 = vmul.f32 %v2989_v5, %v3773_v15  ;;  %v2423_v34 = vmul.f32 -1.442695, %v3851_v24  ;;  %v1790_v39 = vpop.f32.mrf.mxu0  ;;  %v2641_v62 = vpop.f32.mrf.mxu1 }
 0x1ee   : > { %v2428_v46 = vmul.f32 -1.442695, %v3857_v9  ;;  %v3866_v43 = vadd.f32 %v3750_v52, %v1885_v53  ;;  %v1888_v15 = vmul.f32 %v3745_v27, %v1799_v7  ;;  %v1791_v17 = vadd.f32 %v1790_v39, %v3787_v20 }
 0x1ef   : > { %v2991_v36 = vpop.eup %2990  ;;  %2170 = vst.msk [vmem:[%s3821_s30 + $0x8] sm:$0xff] %vm2168_vm2, %v2137_v56  ;;  %3004 = vpow2.f32 %v2423_v34  ;;  %v2666_v35 = vpop.f32.mrf.mxu0 }
 0x1f0   : > { %v2993_v42 = vpop.eup %2992  ;;  %v2142_v31 = vmul.f32 %v2991_v36, %v3781_v12  ;;  %3006 = vpow2.f32 %v2428_v46  ;;  %v2426_v26 = vmul.f32 -1.442695, %v3866_v43  ;;  %v3876_v29 = vadd.f32 %v3750_v52, %v1888_v15 }
 0x1f1   : > { %v2140_v16 = vmul.f32 %v2993_v42, %v3784_v44  ;;  %v1886_v20 = vmul.f32 %v3745_v27, %v1791_v17  ;;  %v1812_v40 = vadd.f32 %v2666_v35, %v3799_v28  ;;  %v1803_v59 = vpop.f32.mrf.mxu0 }
 0x1f2   : > { %v2995_v41 = vpop.eup %2994  ;;  %2175 = vst.msk [vmem:[%s3821_s30 + $0x30] sm:$0xff] %vm2168_vm2, %v2142_v31  ;;  %3008 = vpow2.f32 %v2426_v26  ;;  %v2429_v44 = vmul.f32 -1.442695, %v3876_v29  ;;  %v1804_v60 = vadd.f32 %v1803_v59, %v3802_v30 }
 0x1f3   : > { %2173 = vst.msk [vmem:[%s3821_s30 + $0x20] sm:$0xff] %vm2168_vm2, %v2140_v16  ;;  %v2143_v12 = vmul.f32 %v2995_v41, %v3792_v57  ;;  %v3890_v45 = vadd.f32 %v3750_v52, %v1886_v20  ;;  %v1891_v14 = vmul.f32 %v3745_v27, %v1812_v40  ;;  %v2667_v28 = vpop.f32.mrf.mxu0  ;;  %v1626_v41 = vpop.f32.mrf.mxu1 }
 0x1f4   : > { %v2997_v0 = vpop.eup %2996  ;;  %3010 = vpow2.f32 %v2429_v44  ;;  %v1889_v57 = vmul.f32 %v3745_v27, %v1804_v60  ;;  %v1815_v13 = vadd.f32 %v2667_v28, %v3804_v38 }
 0x1f5   : > { %2176 = vst.msk [vmem:[%s3821_s30 + $0x38] sm:$0xff] %vm2168_vm2, %v2143_v12  ;;  %v2141_v63 = vmul.f32 %v2997_v0, %v3797_v21  ;;  %v2999_v2 = vpop.eup %2998  ;;  %v2427_v30 = vmul.f32 -1.442695, %v3890_v45  ;;  %v3900_v49 = vadd.f32 %v3750_v52, %v1891_v14  ;;  %v1806_v3 = vpop.f32.mrf.mxu0 }
 0x1f6   : > { %v2050_v50 = vadd.f32 1.0, %v2999_v2  ;;  %v3905_v6 = vadd.f32 %v3750_v52, %v1889_v57  ;;  %v1892_v21 = vmul.f32 %v3745_v27, %v1815_v13  ;;  %v1807_v1 = vadd.f32 %v1806_v3, %v3806_v11  ;;  %v2644_v57 = vpop.f32.mrf.mxu1 }
 0x1f7   : > { %2174 = vst.msk [vmem:[%s3821_s30 + $0x28] sm:$0xff] %vm2168_vm2, %v2141_v63  ;;  %v3001_v47 = vpop.eup %3000  ;;  %3012 = vpow2.f32 %v2427_v30  ;;  %v2432_v38 = vmul.f32 -1.442695, %v3900_v49  ;;  %v2670_v48 = vpop.f32.mrf.mxu0 }
 0x1f8   : > { %3014 = vrcp.f32 %v2050_v50  ;;  %v2048_v8 = vadd.f32 1.0, %v3001_v47  ;;  %v2430_v19 = vmul.f32 -1.442695, %v3905_v6  ;;  %v3912_v54 = vadd.f32 %v3750_v52, %v1892_v21 }
 0x1f9   : > { %3016 = vpow2.f32 %v2432_v38  ;;  %v1890_v4 = vmul.f32 %v3745_v27, %v1807_v1  ;;  %v1828_v58 = vadd.f32 %v2670_v48, %v3812_v23  ;;  %v1819_v51 = vpop.f32.mrf.mxu0  ;;  %v3003_v11 = vpop.eup %3002 }
 0x1fa   : > { %3018 = vrcp.f32 %v2048_v8  ;;  %v2433_v5 = vmul.f32 -1.442695, %v3912_v54  ;;  %v1820_v61 = vadd.f32 %v1819_v51, %v3829_v10  ;;  %v2051_v56 = vadd.f32 1.0, %v3003_v11 }
 0x1fb   : > { %3020 = vpow2.f32 %v2430_v19  ;;  %v3919_v53 = vadd.f32 %v3750_v52, %v1890_v4  ;;  %v1895_v7 = vmul.f32 %v3745_v27, %v1828_v58  ;;  %v2671_v34 = vpop.f32.mrf.mxu0  ;;  %v1639_v58 = vpop.f32.mrf.mxu1 }
 0x1fc   : > { %v3005_v39 = vpop.eup %3004  ;;  %3022 = vpow2.f32 %v2433_v5  ;;  %v1893_v23 = vmul.f32 %v3745_v27, %v1820_v61  ;;  %v1831_v36 = vadd.f32 %v2671_v34, %v3847_v25 }
 0x1fd   : > { %v3007_v46 = vpop.eup %3006  ;;  %3024 = vrcp.f32 %v2051_v56  ;;  %v2049_v15 = vadd.f32 1.0, %v3005_v39  ;;  %v2431_v10 = vmul.f32 -1.442695, %v3919_v53  ;;  %v3926_v17 = vadd.f32 %v3750_v52, %v1895_v7  ;;  %v1822_v42 = vpop.f32.mrf.mxu0 }
 0x1fe   : > { %v2054_v31 = vadd.f32 1.0, %v3007_v46  ;;  %v3929_v35 = vadd.f32 %v3750_v52, %v1893_v23  ;;  %v1896_v16 = vmul.f32 %v3745_v27, %v1831_v36  ;;  %v1823_v26 = vadd.f32 %v1822_v42, %v3870_v37 }
 0x1ff   : > { %v3009_v20 = vpop.eup %3008  ;;  %3026 = vrcp.f32 %v2049_v15  ;;  %v2436_v25 = vmul.f32 -1.442695, %v3926_v17  ;;  %v2674_v40 = vpop.f32.mrf.mxu0 }
 0x200   : > { %3028 = vrcp.f32 %v2054_v31  ;;  %v2052_v59 = vadd.f32 1.0, %v3009_v20  ;;  %v3935_v12 = vadd.f32 %v3750_v52, %v1896_v16  ;;  %v2434_v60 = vmul.f32 -1.442695, %v3929_v35  ;;  %v2645_v16 = vpop.f32.mrf.mxu1 }
 0x201   : > { %v3011_v44 = vpop.eup %3010  ;;  %3030 = vpow2.f32 %v2431_v10  ;;  %v1894_v0 = vmul.f32 %v3745_v27, %v1823_v26  ;;  %v1844_v14 = vadd.f32 %v2674_v40, %v3887_v32  ;;  %v1835_v37 = vpop.f32.mrf.mxu0 }
 0x202   : > { %3032 = vrcp.f32 %v2052_v59  ;;  %v2055_v28 = vadd.f32 1.0, %v3011_v44  ;;  %v2437_v63 = vmul.f32 -1.442695, %v3935_v12  ;;  %v1836_v13 = vadd.f32 %v1835_v37, %v1623_v18 }
 0x203   : > { %3034 = vpow2.f32 %v2436_v25  ;;  %v3942_v2 = vadd.f32 %v3750_v52, %v1894_v0  ;;  %v1899_v30 = vmul.f32 %v3745_v27, %v1844_v14  ;;  %v2675_v3 = vpop.f32.mrf.mxu0 }
 0x204   : > { %v3013_v50 = vpop.eup %3012  ;;  %3036 = vrcp.f32 %v2055_v28  ;;  %v1897_v21 = vmul.f32 %v3745_v27, %v1836_v13  ;;  %v1847_v1 = vadd.f32 %v2675_v3, %v2641_v62  ;;  %v1642_v13 = vpop.f32.mrf.mxu1 }
 0x205   : > { %v3015_v32 = vpop.eup %3014  ;;  %v2053_v47 = vadd.f32 1.0, %v3013_v50  ;;  %3038 = vpow2.f32 %v2434_v60  ;;  %v2435_v38 = vmul.f32 -1.442695, %v3942_v2  ;;  %v3948_v18 = vadd.f32 %v3750_v52, %v1899_v30  ;;  %v1838_v48 = vpop.f32.mrf.mxu0 }
 0x206   : > { %v3017_v8 = vpop.eup %3016  ;;  %v2146_v19 = vmul.f32 %v3015_v32, %v3815_v33  ;;  %3040 = vpow2.f32 %v2437_v63  ;;  %v3952_v4 = vadd.f32 %v3750_v52, %v1897_v21  ;;  %v1900_v51 = vmul.f32 %v3745_v27, %v1847_v1 }
 0x207   : > { %v3019_v11 = vpop.eup %3018  ;;  %3042 = vrcp.f32 %v2053_v47  ;;  %v2058_v5 = vadd.f32 1.0, %v3017_v8  ;;  %v2440_v61 = vmul.f32 -1.442695, %v3948_v18  ;;  %v1839_v62 = vadd.f32 %v1838_v48, %v1626_v41  ;;  %v2678_v56 = vpop.f32.mrf.mxu0 }
 0x208   : > { %v3021_v7 = vpop.eup %3020  ;;  %2179 = vst.msk [vmem:[%s3821_s30 + $0x50] sm:$0xff] %vm2168_vm2, %v2146_v19  ;;  %v2144_v33 = vmul.f32 %v3019_v11, %v3827_v22  ;;  %3044 = vpow2.f32 %v2435_v38  ;;  %v2438_v34 = vmul.f32 -1.442695, %v3952_v4  ;;  %v3961_v39 = vadd.f32 %v3750_v52, %v1900_v51 }
 0x209   : > { %v3023_v23 = vpop.eup %3022  ;;  %3046 = vrcp.f32 %v2058_v5  ;;  %v2056_v36 = vadd.f32 1.0, %v3021_v7  ;;  %v1898_v46 = vmul.f32 %v3745_v27, %v1839_v62  ;;  %v1860_v15 = vadd.f32 %v2678_v56, %v2644_v57  ;;  %v1851_v10 = vpop.f32.mrf.mxu0 }
 0x20a   : > { %v3025_v42 = vpop.eup %3024  ;;  %2177 = vst.msk [vmem:[%s3821_s30 + $0x40] sm:$0xff] %vm2168_vm2, %v2144_v33  ;;  %v2059_v31 = vadd.f32 1.0, %v3023_v23  ;;  %3048 = vpow2.f32 %v2440_v61  ;;  %v2441_v22 = vmul.f32 -1.442695, %v3961_v39  ;;  %v1852_v26 = vadd.f32 %v1851_v10, %v1639_v58 }
 0x20b   : > { %v2147_v41 = vmul.f32 %v3025_v42, %v3839_v55  ;;  %3050 = vrcp.f32 %v2056_v36  ;;  %v3969_v20 = vadd.f32 %v3750_v52, %v1898_v46  ;;  %v1903_v25 = vmul.f32 %v3745_v27, %v1860_v15  ;;  %v2679_v40 = vpop.f32.mrf.mxu0 }
 0x20c   : > { %v3027_v59 = vpop.eup %3026  ;;  %3052 = vrcp.f32 %v2059_v31  ;;  %v1901_v44 = vmul.f32 %v3745_v27, %v1852_v26  ;;  %v1863_v60 = vadd.f32 %v2679_v40, %v2645_v16 }
 0x20d   : > { %v3029_v0 = vpop.eup %3028  ;;  %2180 = vst.msk [vmem:[%s3821_s30 + $0x58] sm:$0xff] %vm2168_vm2, %v2147_v41  ;;  %v2145_v14 = vmul.f32 %v3027_v59, %v3851_v24  ;;  %3054 = vpow2.f32 %v2438_v34  ;;  %v2439_v55 = vmul.f32 -1.442695, %v3969_v20  ;;  %v3978_v37 = vadd.f32 %v3750_v52, %v1903_v25  ;;  %v1854_v28 = vpop.f32.mrf.mxu0 }
 0x20e   : > { %v3031_v63 = vpop.eup %3030  ;;  %v2150_v57 = vmul.f32 %v3029_v0, %v3857_v9  ;;  %3056 = vpow2.f32 %v2441_v22  ;;  %v3982_v30 = vadd.f32 %v3750_v52, %v1901_v44  ;;  %v1904_v3 = vmul.f32 %v3745_v27, %v1863_v60 }
 0x20f   : > { %v3033_v50 = vpop.eup %3032  ;;  %2178 = vst.msk [vmem:[%s3821_s30 + $0x48] sm:$0xff] %vm2168_vm2, %v2145_v14  ;;  %v2057_v24 = vadd.f32 1.0, %v3031_v63  ;;  %3058 = vpow2.f32 %v2439_v55  ;;  %v2444_v21 = vmul.f32 -1.442695, %v3978_v37  ;;  %v1855_v1 = vadd.f32 %v1854_v28, %v1642_v13 }
 0x210   : > { %v3035_v32 = vpop.eup %3034  ;;  %2183 = vst.msk [vmem:[%s3821_s30 + $0x70] sm:$0xff] %vm2168_vm2, %v2150_v57  ;;  %v2148_v9 = vmul.f32 %v3033_v50, %v3866_v43  ;;  %v2442_v47 = vmul.f32 -1.442695, %v3982_v30  ;;  %v3993_v38 = vadd.f32 %v3750_v52, %v1904_v3 }
 0x211   : > { %v3037_v48 = vpop.eup %3036  ;;  %3060 = vrcp.f32 %v2057_v24  ;;  %v2062_v8 = vadd.f32 1.0, %v3035_v32  ;;  %v1902_v19 = vmul.f32 %v3745_v27, %v1855_v1 }
 0x212   : > { %v3039_v58 = vpop.eup %3038  ;;  %2181 = vst.msk [vmem:[%s3821_s30 + $0x60] sm:$0xff] %vm2168_vm2, %v2148_v9  ;;  %v2151_v51 = vmul.f32 %v3037_v48, %v3876_v29  ;;  %3062 = vpow2.f32 %v2444_v21  ;;  %v2445_v5 = vmul.f32 -1.442695, %v3993_v38 }
 0x213   : > { %v3041_v11 = vpop.eup %3040  ;;  %3064 = vrcp.f32 %v2062_v8  ;;  %v2060_v43 = vadd.f32 1.0, %v3039_v58  ;;  %v4001_v61 = vadd.f32 %v3750_v52, %v1902_v19 }
 0x214   : > { %v3043_v62 = vpop.eup %3042  ;;  %2184 = vst.msk [vmem:[%s3821_s30 + $0x78] sm:$0xff] %vm2168_vm2, %v2151_v51  ;;  %v2063_v56 = vadd.f32 1.0, %v3041_v11  ;;  %3066 = vpow2.f32 %v2442_v47 }
 0x215   : > { %v3045_v27 = vpop.eup %3044  ;;  %v2149_v7 = vmul.f32 %v3043_v62, %v3890_v45  ;;  %3068 = vrcp.f32 %v2060_v43  ;;  %v2443_v29 = vmul.f32 -1.442695, %v4001_v61 }
 0x216   : > { %v3047_v33 = vpop.eup %3046  ;;  %3070 = vrcp.f32 %v2063_v56  ;;  %v2061_v34 = vadd.f32 1.0, %v3045_v27 }
 0x217   : > { %v3049_v23 = vpop.eup %3048  ;;  %2182 = vst.msk [vmem:[%s3821_s30 + $0x68] sm:$0xff] %vm2168_vm2, %v2149_v7  ;;  %v2154_v52 = vmul.f32 %v3047_v33, %v3900_v49  ;;  %3072 = vpow2.f32 %v2445_v5 }
 0x218   : > { %v3051_v36 = vpop.eup %3050  ;;  %3074 = vrcp.f32 %v2061_v34  ;;  %v2066_v46 = vadd.f32 1.0, %v3049_v23 }
 0x219   : > { %v3053_v15 = vpop.eup %3052  ;;  %2187 = vst.msk [vmem:[%s3821_s30 + $0x90] sm:$0xff] %vm2168_vm2, %v2154_v52  ;;  %v2152_v45 = vmul.f32 %v3051_v36, %v3905_v6  ;;  %3076 = vpow2.f32 %v2443_v29 }
 0x21a   : > { %v3055_v10 = vpop.eup %3054  ;;  %v2155_v42 = vmul.f32 %v3053_v15, %v3912_v54  ;;  %3078 = vrcp.f32 %v2066_v46 }
 0x21b   : > { %v3057_v31 = vpop.eup %3056  ;;  %2185 = vst.msk [vmem:[%s3821_s30 + $0x80] sm:$0xff] %vm2168_vm2, %v2152_v45  ;;  %v2064_v49 = vadd.f32 1.0, %v3055_v10 }
 0x21c   : > { %v3059_v22 = vpop.eup %3058  ;;  %2188 = vst.msk [vmem:[%s3821_s30 + $0x98] sm:$0xff] %vm2168_vm2, %v2155_v42  ;;  %v2067_v16 = vadd.f32 1.0, %v3057_v31 }
 0x21d   : > { %3080 = vrcp.f32 %v2064_v49  ;;  %v2065_v26 = vadd.f32 1.0, %v3059_v22 }
 0x21e   : > { %v3061_v41 = vpop.eup %3060  ;;  %3082 = vrcp.f32 %v2067_v16 }
 0x21f   : > { %v3063_v6 = vpop.eup %3062  ;;  %v2153_v25 = vmul.f32 %v3061_v41, %v3919_v53  ;;  %3084 = vrcp.f32 %v2065_v26 }
 0x220   : > { %v3065_v54 = vpop.eup %3064  ;;  %v2070_v40 = vadd.f32 1.0, %v3063_v6 }
 0x221   : > { %v3067_v59 = vpop.eup %3066  ;;  %2186 = vst.msk [vmem:[%s3821_s30 + $0x88] sm:$0xff] %vm2168_vm2, %v2153_v25  ;;  %v2158_v44 = vmul.f32 %v3065_v54, %v3926_v17 }
 0x222   : > { %v3069_v60 = vpop.eup %3068  ;;  %3086 = vrcp.f32 %v2070_v40  ;;  %v2068_v0 = vadd.f32 1.0, %v3067_v59 }
 0x223   : > { %v3071_v14 = vpop.eup %3070  ;;  %2191 = vst.msk [vmem:[%s3821_s30 + $0xb0] sm:$0xff] %vm2168_vm2, %v2158_v44  ;;  %v2156_v55 = vmul.f32 %v3069_v60, %v3929_v35 }
 0x224   : > { %v3073_v53 = vpop.eup %3072  ;;  %v2159_v28 = vmul.f32 %v3071_v14, %v3935_v12  ;;  %3088 = vrcp.f32 %v2068_v0 }
 0x225   : > { %v3075_v63 = vpop.eup %3074  ;;  %2189 = vst.msk [vmem:[%s3821_s30 + $0xa0] sm:$0xff] %vm2168_vm2, %v2156_v55  ;;  %v2071_v57 = vadd.f32 1.0, %v3073_v53 }
 0x226   : > { %v3077_v17 = vpop.eup %3076  ;;  %2192 = vst.msk [vmem:[%s3821_s30 + $0xb8] sm:$0xff] %vm2168_vm2, %v2159_v28  ;;  %v2157_v13 = vmul.f32 %v3075_v63, %v3942_v2 }
 0x227   : > { %v3079_v3 = vpop.eup %3078  ;;  %3090 = vrcp.f32 %v2071_v57  ;;  %v2069_v35 = vadd.f32 1.0, %v3077_v17 }
 0x228   : > { %2190 = vst.msk [vmem:[%s3821_s30 + $0xa8] sm:$0xff] %vm2168_vm2, %v2157_v13  ;;  %v2162_v12 = vmul.f32 %v3079_v3, %v3948_v18 }
 0x229   : > { %3092 = vrcp.f32 %v2069_v35 }
 0x22a   : > { %v3081_v50 = vpop.eup %3080  ;;  %2195 = vst.msk [vmem:[%s3821_s30 + $0xd0] sm:$0xff] %vm2168_vm2, %v2162_v12 }
 0x22b   : > { %v3083_v24 = vpop.eup %3082  ;;  %v2160_v21 = vmul.f32 %v3081_v50, %v3952_v4 }
 0x22c   : > { %v3085_v1 = vpop.eup %3084  ;;  %v2163_v2 = vmul.f32 %v3083_v24, %v3961_v39 }
 0x22d   : > { %2193 = vst.msk [vmem:[%s3821_s30 + $0xc0] sm:$0xff] %vm2168_vm2, %v2160_v21  ;;  %v2161_v32 = vmul.f32 %v3085_v1, %v3969_v20 }
 0x22e   : > { %2196 = vst.msk [vmem:[%s3821_s30 + $0xd8] sm:$0xff] %vm2168_vm2, %v2163_v2 }
 0x22f   : > { %v3087_v18 = vpop.eup %3086  ;;  %2194 = vst.msk [vmem:[%s3821_s30 + $0xc8] sm:$0xff] %vm2168_vm2, %v2161_v32 }
 0x230   : > { %v2166_v9 = vmul.f32 %v3087_v18, %v3978_v37 }
 0x231   : > { %v3089_v47 = vpop.eup %3088 }
 0x232   : > { %2199 = vst.msk [vmem:[%s3821_s30 + $0xf0] sm:$0xff] %vm2168_vm2, %v2166_v9  ;;  %v2164_v4 = vmul.f32 %v3089_v47, %v3982_v30 }
 0x234   : > { %v3091_v48 = vpop.eup %3090  ;;  %2197 = vst.msk [vmem:[%s3821_s30 + $0xe0] sm:$0xff] %vm2168_vm2, %v2164_v4 }
 0x235   : > { %v2167_v39 = vmul.f32 %v3091_v48, %v3993_v38 }
 0x236   : > { %v3093_v8 = vpop.eup %3092 }
 0x237   : > { %2200 = vst.msk [vmem:[%s3821_s30 + $0xf8] sm:$0xff] %vm2168_vm2, %v2167_v39  ;;  %v2165_v20 = vmul.f32 %v3093_v8, %v4001_v61 }
 0x239   : > { %2198 = vst.msk [vmem:[%s3821_s30 + $0xe8] sm:$0xff] %vm2168_vm2, %v2165_v20 }
 0x23a PF: > { %s21_s17 = sadd.s32 1, %s3100_s17  }
 0x23b   : > { %p18_p4 = scmp.ge.s32.totalorder %s21_s17, 4  }
 0x23d   :  { %20 = sbr.rel (!%p18_p4) target bundleno = 1 (0x1), region = 97 }

// kernel: bottleneck_csp_forward.3
= control target key start
LH: loop header
LB: loop body
LE: loop exit
PB: predicated region body
PF: predicated region fallthrough
CT: control target
= control target key end

     0   :  { %s1997_s21 = smov 0   ;;  %s2452_s0 = inlined_call_operand.vmem [shape: bf16[512,4], index: 0, kind: input, shape index: {}]   ;;  %s2453_s1 = inlined_call_operand.vmem [shape: bf16[4,4], index: 1, kind: input, shape index: {}]   ;;  %s2454_s2 = inlined_call_operand.vmem [shape: f32[1,4], index: 2, kind: input, shape index: {}]   ;;  %s2455_s3 = inlined_call_operand.vmem [shape: f32[1,4], index: 3, kind: input, shape index: {}]   ;;  %s2456_s4 = inlined_call_operand.vmem [shape: bf16[4,4], index: 4, kind: input, shape index: {}]   ;;  %s2457_s5 = inlined_call_operand.vmem [shape: bf16[512,4], index: 5, kind: output, shape index: {0}]   ;;  %s2458_s6 = inlined_call_operand.vmem [shape: bf16[512,4], index: 6, kind: output, shape index: {1}]  }
   0x1 LB: > { %s1475_s22 = sadd.s32 4294967295, %s1960_s21   ;;  %p1479_p0 = scmp.ge.s32.totalorder %s1960_s21, 1  ;;  %s1960_s21 = sphi %s1997_s21, %s17_s21  }
   0x2   : > { %p216_p1 = scmp.lt.s32.totalorder %s1960_s21, 3 }
   0x4   : > { %p217_p2 = pnand %p1479_p0, %p216_p1 }
   0x5   : > { %s1480_s25 = sshll.u32 (!%p217_p2), %s1475_s22, 5 }
   0x6   : > { %220 = sbr.rel (%p217_p2) target bundleno = 313 (0x139), region = 40  ;;  %p252_p3 = scmp.lt.s32.totalorder (!%p217_p2), %s1480_s25, 63 }
   0xb   : > { %v302_v0 = vld [vmem:[%s2453_s1] sm:$0x3]  ;;  %vm432_vm0 = vcmask 1041408   ;;  %s2460_s25 = smov (!%p252_p3, %s1480_s25), 63  ;;  %vm383_vm1 = vcmask 31744   ;;  %vm1027_vm2 = vcmask 27648  }
   0xc   : > { %1800 = vmatprep.subr.msk.bf16.mxu0 %vm432_vm0, %v302_v0  ;;  %v434_v1 = vsel %vm432_vm0, %v302_v0, 0  ;;  %v1060_v2 = vld [vmem:[%s2456_s4] sm:$0x3]  ;;  %s2011_s28 = sshll.u32 %s2460_s25, 2 }
   0xd   : > { %1733 = vmatpush3.bf16.msra.mxu0 %v434_v1  ;;  %1801 = vmatprep.subr.msk.bf16.mxu1 %vm432_vm0, %v1060_v2  ;;  %v1062_v3 = vsel %vm432_vm0, %v1060_v2, 0  ;;  %s2017_s7 = scalar_lea.vmem %s2452_s0, %s2011_s28  ;;  %v2070_v20 = vld [vmem:[%s2454_s2] ss:$0 sm:$0xff]  ;;  %s2081_s14 = scalar_lea.vmem %s2458_s6, %s2011_s28 }
   0xe   : > { %1767 = vmatpush3.bf16.msra.mxu1 %v1062_v3  ;;  %v1810_v4 = vld [vmem:[%s2017_s7] sm:$0xff]   ;;  %v1811_v5 = vld [vmem:[%s2017_s7 + $0x8] sm:$0xff]   ;;  %v1812_v6 = vld [vmem:[%s2017_s7 + $0x10] sm:$0xff]   ;;  %s2211_s17 = scalar_lea.vmem %s2457_s5, %s2011_s28 }
   0xf   : > { %1734 = vmatprep.mubr.msk.bf16.mxu0 %vm383_vm1, %v1810_v4  ;;  %1768 = vmatprep.mubr.msk.bf16.mxu1 %vm383_vm1, %v1810_v4  ;;  %v1813_v7 = vld [vmem:[%s2017_s7 + $0x18] sm:$0xff]   ;;  %v1814_v8 = vld [vmem:[%s2017_s7 + $0x20] sm:$0xff]   ;;  %v1815_v9 = vld [vmem:[%s2017_s7 + $0x28] sm:$0xff]  }
  0x10   : > { %1735 = vmatmul.mubr.msk.bf16.vlgmr.msra.gmra.mxu0 %vm383_vm1, %v1811_v5  ;;  %v1816_v10 = vld [vmem:[%s2017_s7 + $0x30] sm:$0xff]   ;;  %v1817_v11 = vld [vmem:[%s2017_s7 + $0x38] sm:$0xff]   ;;  %v1818_v12 = vld [vmem:[%s2017_s7 + $0x40] sm:$0xff]  }
  0x11   : > { %1769 = vmatmul.mubr.msk.bf16.vlgmr.msra.gmra.mxu1 %vm383_vm1, %v1811_v5  ;;  %1738 = vmatprep.mubr.msk.bf16.mxu0 %vm383_vm1, %v1812_v6  ;;  %v1819_v13 = vld [vmem:[%s2017_s7 + $0x48] sm:$0xff]   ;;  %v1820_v14 = vld [vmem:[%s2017_s7 + $0x50] sm:$0xff]   ;;  %v1821_v15 = vld [vmem:[%s2017_s7 + $0x58] sm:$0xff]  }
  0x12   : > { %1772 = vmatprep.mubr.msk.bf16.mxu1 %vm383_vm1, %v1812_v6  ;;  %v1822_v16 = vld [vmem:[%s2017_s7 + $0x60] sm:$0xff]   ;;  %v1823_v17 = vld [vmem:[%s2017_s7 + $0x68] sm:$0xff]   ;;  %v1824_v18 = vld [vmem:[%s2017_s7 + $0x70] sm:$0xff]  }
  0x13   : > { %v1825_v19 = vld [vmem:[%s2017_s7 + $0x78] sm:$0xff]   ;;  %v2075_v22 = vld [vmem:[%s2455_s3] ss:$0 sm:$0xff] }
  0x18   : > { %1739 = vmatmul.mubr.msk.bf16.gmra.mxu0 %vm383_vm1, %v1813_v7 }
  0x19   : > { %1773 = vmatmul.mubr.msk.bf16.gmra.mxu1 %vm383_vm1, %v1813_v7  ;;  %1742 = vmatprep.mubr.msk.bf16.mxu0 %vm383_vm1, %v1814_v8 }
  0x1a   : > { %1776 = vmatprep.mubr.msk.bf16.mxu1 %vm383_vm1, %v1814_v8 }
  0x20   : > { %1743 = vmatmul.mubr.msk.bf16.gmra.mxu0 %vm383_vm1, %v1815_v9 }
  0x21   : > { %1777 = vmatmul.mubr.msk.bf16.gmra.mxu1 %vm383_vm1, %v1815_v9  ;;  %1746 = vmatprep.mubr.msk.bf16.mxu0 %vm383_vm1, %v1816_v10 }
  0x22   : > { %1780 = vmatprep.mubr.msk.bf16.mxu1 %vm383_vm1, %v1816_v10 }
  0x28   : > { %1747 = vmatmul.mubr.msk.bf16.gmra.mxu0 %vm383_vm1, %v1817_v11 }
  0x29   : > { %1781 = vmatmul.mubr.msk.bf16.gmra.mxu1 %vm383_vm1, %v1817_v11  ;;  %1750 = vmatprep.mubr.msk.bf16.mxu0 %vm383_vm1, %v1818_v12 }
  0x2a   : > { %1784 = vmatprep.mubr.msk.bf16.mxu1 %vm383_vm1, %v1818_v12 }
  0x30   : > { %1751 = vmatmul.mubr.msk.bf16.gmra.mxu0 %vm383_vm1, %v1819_v13 }
  0x31   : > { %1785 = vmatmul.mubr.msk.bf16.gmra.mxu1 %vm383_vm1, %v1819_v13  ;;  %1754 = vmatprep.mubr.msk.bf16.mxu0 %vm383_vm1, %v1820_v14 }
  0x32   : > { %1788 = vmatprep.mubr.msk.bf16.mxu1 %vm383_vm1, %v1820_v14 }
  0x38   : > { %1755 = vmatmul.mubr.msk.bf16.gmra.mxu0 %vm383_vm1, %v1821_v15 }
  0x39   : > { %1789 = vmatmul.mubr.msk.bf16.gmra.mxu1 %vm383_vm1, %v1821_v15  ;;  %1758 = vmatprep.mubr.msk.bf16.mxu0 %vm383_vm1, %v1822_v16 }
  0x3a   : > { %1792 = vmatprep.mubr.msk.bf16.mxu1 %vm383_vm1, %v1822_v16 }
  0x40   : > { %1759 = vmatmul.mubr.msk.bf16.gmra.mxu0 %vm383_vm1, %v1823_v17 }
  0x41   : > { %1793 = vmatmul.mubr.msk.bf16.gmra.mxu1 %vm383_vm1, %v1823_v17  ;;  %1762 = vmatprep.mubr.msk.bf16.mxu0 %vm383_vm1, %v1824_v18 }
  0x42   : > { %1796 = vmatprep.mubr.msk.bf16.mxu1 %vm383_vm1, %v1824_v18 }
  0x48   : > { %1763 = vmatmul.mubr.msk.bf16.gmra.mxu0 %vm383_vm1, %v1825_v19 }
  0x49   : > { %1797 = vmatmul.mubr.msk.bf16.gmra.mxu1 %vm383_vm1, %v1825_v19 }
  0xd0   : > { %v1736_v21 = vpop.f32.mrf.mxu0 }
  0xd1   : > { %v1770_v23 = vpop.f32.mrf.mxu1  ;;  %v606_v24 = vmul.f32 %v1736_v21, %v2070_v20 }
  0xd2   : > { %v1668_v25 = vpack.c.bf16 %v1770_v23, %v1770_v23  ;;  %v470_v26 = vpop.f32.mrf.mxu0 }
  0xd3   : > { %v1098_v27 = vpop.f32.mrf.mxu1  ;;  %v2085_v28 = vadd.f32 %v2075_v22, %v606_v24  ;;  %v604_v29 = vmul.f32 %v2070_v20, %v470_v26 }
  0xd4   : > { %1355 = vst.msk [vmem:[%s2081_s14 + $0x8] sm:$0xf] %vm1027_vm2, %v1668_v25  ;;  %v1666_v30 = vpack.c.bf16 %v1098_v27, %v1098_v27  ;;  %v1737_v31 = vpop.f32.mrf.mxu0 }
  0xd5   : > { %v1771_v32 = vpop.f32.mrf.mxu1  ;;  %v1522_v33 = vmul.f32 -1.442695, %v2085_v28  ;;  %v2092_v34 = vadd.f32 %v2075_v22, %v604_v29  ;;  %v607_v35 = vmul.f32 %v1737_v31, %v2070_v20 }
  0xd6   : > { %1353 = vst.msk [vmem:[%s2081_s14] sm:$0xf] %vm1027_vm2, %v1666_v30  ;;  %v1669_v36 = vpack.c.bf16 %v1771_v32, %v1771_v32  ;;  %v473_v37 = vpop.f32.mrf.mxu0 }
  0xd7   : > { %v1101_v38 = vpop.f32.mrf.mxu1  ;;  %1826 = vpow2.f32 %v1522_v33  ;;  %v1520_v39 = vmul.f32 -1.442695, %v2092_v34  ;;  %v2099_v40 = vadd.f32 %v2075_v22, %v607_v35  ;;  %v605_v41 = vmul.f32 %v2070_v20, %v473_v37 }
  0xd8   : > { %1356 = vst.msk [vmem:[%s2081_s14 + $0xc] sm:$0xf] %vm1027_vm2, %v1669_v36  ;;  %v1740_v42 = vpop.f32.mrf.mxu0  ;;  %v1667_v43 = vpack.c.bf16 %v1101_v38, %v1101_v38 }
  0xd9   : > { %v1774_v44 = vpop.f32.mrf.mxu1  ;;  %1828 = vpow2.f32 %v1520_v39  ;;  %v1523_v45 = vmul.f32 -1.442695, %v2099_v40  ;;  %v2106_v46 = vadd.f32 %v2075_v22, %v605_v41  ;;  %v610_v47 = vmul.f32 %v1740_v42, %v2070_v20 }
  0xda   : > { %v486_v48 = vpop.f32.mrf.mxu0  ;;  %1354 = vst.msk [vmem:[%s2081_s14 + $0x4] sm:$0xf] %vm1027_vm2, %v1667_v43  ;;  %v1672_v49 = vpack.c.bf16 %v1774_v44, %v1774_v44 }
  0xdb   : > { %v1114_v50 = vpop.f32.mrf.mxu1  ;;  %1830 = vpow2.f32 %v1523_v45  ;;  %v1521_v51 = vmul.f32 -1.442695, %v2106_v46  ;;  %v2113_v52 = vadd.f32 %v2075_v22, %v610_v47  ;;  %v608_v53 = vmul.f32 %v2070_v20, %v486_v48 }
  0xdc   : > { %v1741_v54 = vpop.f32.mrf.mxu0  ;;  %1359 = vst.msk [vmem:[%s2081_s14 + $0x18] sm:$0xf] %vm1027_vm2, %v1672_v49  ;;  %v1670_v55 = vpack.c.bf16 %v1114_v50, %v1114_v50 }
  0xdd   : > { %v1775_v56 = vpop.f32.mrf.mxu1  ;;  %1832 = vpow2.f32 %v1521_v51  ;;  %v1526_v57 = vmul.f32 -1.442695, %v2113_v52  ;;  %v2120_v58 = vadd.f32 %v2075_v22, %v608_v53  ;;  %v611_v59 = vmul.f32 %v1741_v54, %v2070_v20 }
  0xde   : > { %v489_v60 = vpop.f32.mrf.mxu0  ;;  %1357 = vst.msk [vmem:[%s2081_s14 + $0x10] sm:$0xf] %vm1027_vm2, %v1670_v55  ;;  %v1673_v61 = vpack.c.bf16 %v1775_v56, %v1775_v56 }
  0xdf   : > { %v1117_v62 = vpop.f32.mrf.mxu1  ;;  %1834 = vpow2.f32 %v1526_v57  ;;  %v1524_v63 = vmul.f32 -1.442695, %v2120_v58  ;;  %v2127_v0 = vadd.f32 %v2075_v22, %v611_v59  ;;  %v609_v1 = vmul.f32 %v2070_v20, %v489_v60 }
  0xe0   : > { %v1744_v2 = vpop.f32.mrf.mxu0  ;;  %1360 = vst.msk [vmem:[%s2081_s14 + $0x1c] sm:$0xf] %vm1027_vm2, %v1673_v61  ;;  %v1671_v3 = vpack.c.bf16 %v1117_v62, %v1117_v62 }
  0xe1   : > { %v1778_v4 = vpop.f32.mrf.mxu1  ;;  %1836 = vpow2.f32 %v1524_v63  ;;  %v1527_v5 = vmul.f32 -1.442695, %v2127_v0  ;;  %v2134_v6 = vadd.f32 %v2075_v22, %v609_v1  ;;  %v614_v7 = vmul.f32 %v1744_v2, %v2070_v20 }
  0xe2   : > { %v502_v8 = vpop.f32.mrf.mxu0  ;;  %1358 = vst.msk [vmem:[%s2081_s14 + $0x14] sm:$0xf] %vm1027_vm2, %v1671_v3  ;;  %v1676_v9 = vpack.c.bf16 %v1778_v4, %v1778_v4 }
  0xe3   : > { %v1130_v10 = vpop.f32.mrf.mxu1  ;;  %1838 = vpow2.f32 %v1527_v5  ;;  %v1525_v11 = vmul.f32 -1.442695, %v2134_v6  ;;  %v2141_v12 = vadd.f32 %v2075_v22, %v614_v7  ;;  %v612_v13 = vmul.f32 %v2070_v20, %v502_v8 }
  0xe4   : > { %v1827_v14 = vpop.eup %1826  ;;  %v1745_v15 = vpop.f32.mrf.mxu0  ;;  %1363 = vst.msk [vmem:[%s2081_s14 + $0x28] sm:$0xf] %vm1027_vm2, %v1676_v9  ;;  %v1674_v16 = vpack.c.bf16 %v1130_v10, %v1130_v10 }
  0xe5   : > { %v1779_v17 = vpop.f32.mrf.mxu1  ;;  %v773_v18 = vadd.f32 1.0, %v1827_v14  ;;  %1840 = vpow2.f32 %v1525_v11  ;;  %v1530_v19 = vmul.f32 -1.442695, %v2141_v12  ;;  %v2148_v21 = vadd.f32 %v2075_v22, %v612_v13 }
  0xe6   : > { %v1829_v23 = vpop.eup %1828  ;;  %v615_v24 = vmul.f32 %v1745_v15, %v2070_v20  ;;  %v505_v25 = vpop.f32.mrf.mxu0  ;;  %1361 = vst.msk [vmem:[%s2081_s14 + $0x20] sm:$0xf] %vm1027_vm2, %v1674_v16  ;;  %v1677_v26 = vpack.c.bf16 %v1779_v17, %v1779_v17 }
  0xe7   : > { %v1133_v27 = vpop.f32.mrf.mxu1  ;;  %1842 = vrcp.f32 %v773_v18  ;;  %v771_v29 = vadd.f32 1.0, %v1829_v23  ;;  %v1528_v30 = vmul.f32 -1.442695, %v2148_v21  ;;  %v613_v31 = vmul.f32 %v2070_v20, %v505_v25 }
  0xe8   : > { %v1831_v32 = vpop.eup %1830  ;;  %1844 = vpow2.f32 %v1530_v19  ;;  %v2156_v33 = vadd.f32 %v2075_v22, %v615_v24  ;;  %v1748_v35 = vpop.f32.mrf.mxu0  ;;  %1364 = vst.msk [vmem:[%s2081_s14 + $0x2c] sm:$0xf] %vm1027_vm2, %v1677_v26  ;;  %v1675_v36 = vpack.c.bf16 %v1133_v27, %v1133_v27 }
  0xe9   : > { %v1782_v37 = vpop.f32.mrf.mxu1  ;;  %1846 = vrcp.f32 %v771_v29  ;;  %v774_v38 = vadd.f32 1.0, %v1831_v32  ;;  %v2161_v39 = vadd.f32 %v2075_v22, %v613_v31  ;;  %v618_v41 = vmul.f32 %v1748_v35, %v2070_v20 }
  0xea   : > { %v1833_v42 = vpop.eup %1832  ;;  %1848 = vpow2.f32 %v1528_v30  ;;  %v1531_v43 = vmul.f32 -1.442695, %v2156_v33  ;;  %v518_v44 = vpop.f32.mrf.mxu0  ;;  %1362 = vst.msk [vmem:[%s2081_s14 + $0x24] sm:$0xf] %vm1027_vm2, %v1675_v36  ;;  %v1680_v45 = vpack.c.bf16 %v1782_v37, %v1782_v37 }
  0xeb   : > { %v1146_v47 = vpop.f32.mrf.mxu1  ;;  %1850 = vrcp.f32 %v774_v38  ;;  %v772_v48 = vadd.f32 1.0, %v1833_v42  ;;  %v1529_v49 = vmul.f32 -1.442695, %v2161_v39  ;;  %v2169_v50 = vadd.f32 %v2075_v22, %v618_v41 }
  0xec   : > { %v1835_v51 = vpop.eup %1834  ;;  %1852 = vpow2.f32 %v1531_v43  ;;  %v616_v53 = vmul.f32 %v2070_v20, %v518_v44  ;;  %v1749_v54 = vpop.f32.mrf.mxu0  ;;  %1367 = vst.msk [vmem:[%s2081_s14 + $0x38] sm:$0xf] %vm1027_vm2, %v1680_v45  ;;  %v1678_v55 = vpack.c.bf16 %v1146_v47, %v1146_v47 }
  0xed   : > { %v1783_v56 = vpop.f32.mrf.mxu1  ;;  %1854 = vrcp.f32 %v772_v48  ;;  %v777_v57 = vadd.f32 1.0, %v1835_v51  ;;  %v1534_v59 = vmul.f32 -1.442695, %v2169_v50  ;;  %v619_v60 = vmul.f32 %v1749_v54, %v2070_v20 }
  0xee   : > { %v1837_v61 = vpop.eup %1836  ;;  %1856 = vpow2.f32 %v1529_v49  ;;  %v2177_v62 = vadd.f32 %v2075_v22, %v616_v53  ;;  %v521_v63 = vpop.f32.mrf.mxu0  ;;  %1365 = vst.msk [vmem:[%s2081_s14 + $0x30] sm:$0xf] %vm1027_vm2, %v1678_v55  ;;  %v1681_v1 = vpack.c.bf16 %v1783_v56, %v1783_v56 }
  0xef   : > { %v1149_v2 = vpop.f32.mrf.mxu1  ;;  %1858 = vrcp.f32 %v777_v57  ;;  %v775_v3 = vadd.f32 1.0, %v1837_v61  ;;  %v2182_v4 = vadd.f32 %v2075_v22, %v619_v60  ;;  %v617_v5 = vmul.f32 %v2070_v20, %v521_v63 }
  0xf0   : > { %v1839_v7 = vpop.eup %1838  ;;  %1860 = vpow2.f32 %v1534_v59  ;;  %v1532_v8 = vmul.f32 -1.442695, %v2177_v62  ;;  %v1752_v9 = vpop.f32.mrf.mxu0  ;;  %1368 = vst.msk [vmem:[%s2081_s14 + $0x3c] sm:$0xf] %vm1027_vm2, %v1681_v1  ;;  %v1679_v10 = vpack.c.bf16 %v1149_v2, %v1149_v2 }
  0xf1   : > { %v1786_v11 = vpop.f32.mrf.mxu1  ;;  %1862 = vrcp.f32 %v775_v3  ;;  %v778_v13 = vadd.f32 1.0, %v1839_v7  ;;  %v1535_v14 = vmul.f32 -1.442695, %v2182_v4  ;;  %v2190_v15 = vadd.f32 %v2075_v22, %v617_v5 }
  0xf2   : > { %v1841_v16 = vpop.eup %1840  ;;  %1864 = vpow2.f32 %v1532_v8  ;;  %v622_v17 = vmul.f32 %v1752_v9, %v2070_v20  ;;  %v534_v18 = vpop.f32.mrf.mxu0  ;;  %1366 = vst.msk [vmem:[%s2081_s14 + $0x34] sm:$0xf] %vm1027_vm2, %v1679_v10  ;;  %v1684_v19 = vpack.c.bf16 %v1786_v11, %v1786_v11 }
  0xf3   : > { %v1162_v23 = vpop.f32.mrf.mxu1  ;;  %1866 = vrcp.f32 %v778_v13  ;;  %v776_v24 = vadd.f32 1.0, %v1841_v16  ;;  %v1533_v25 = vmul.f32 -1.442695, %v2190_v15  ;;  %v620_v26 = vmul.f32 %v2070_v20, %v534_v18 }
  0xf4   : > { %v1843_v27 = vpop.eup %1842  ;;  %1868 = vpow2.f32 %v1535_v14  ;;  %v2198_v29 = vadd.f32 %v2075_v22, %v622_v17  ;;  %v1753_v30 = vpop.f32.mrf.mxu0  ;;  %1371 = vst.msk [vmem:[%s2081_s14 + $0x48] sm:$0xf] %vm1027_vm2, %v1684_v19  ;;  %v1682_v31 = vpack.c.bf16 %v1162_v23, %v1162_v23 }
  0xf5   : > { %v1787_v32 = vpop.f32.mrf.mxu1  ;;  %v1845_v35 = vpop.eup %1844  ;;  %v869_v36 = vmul.f32 %v1843_v27, %v2085_v28  ;;  %1870 = vrcp.f32 %v776_v24  ;;  %v2204_v37 = vadd.f32 %v2075_v22, %v620_v26  ;;  %v623_v38 = vmul.f32 %v1753_v30, %v2070_v20 }
  0xf6   : > { %v1847_v41 = vpop.eup %1846  ;;  %v781_v42 = vadd.f32 1.0, %v1845_v35  ;;  %1872 = vpow2.f32 %v1533_v25  ;;  %v1538_v43 = vmul.f32 -1.442695, %v2198_v29  ;;  %v537_v44 = vpop.f32.mrf.mxu0  ;;  %1369 = vst.msk [vmem:[%s2081_s14 + $0x40] sm:$0xf] %vm1027_vm2, %v1682_v31  ;;  %v1685_v28 = vpack.c.bf16 %v1787_v32, %v1787_v32 }
  0xf7   : > { %v1165_v45 = vpop.f32.mrf.mxu1  ;;  %v1849_v47 = vpop.eup %1848  ;;  %v1636_v48 = vpack.c.bf16 %v869_v36, %v869_v36  ;;  %v867_v49 = vmul.f32 %v1847_v41, %v2092_v34  ;;  %v1536_v51 = vmul.f32 -1.442695, %v2204_v37  ;;  %v2219_v53 = vadd.f32 %v2075_v22, %v623_v38 }
  0xf8   : > { %v1851_v54 = vpop.eup %1850  ;;  %1874 = vrcp.f32 %v781_v42  ;;  %v779_v55 = vadd.f32 1.0, %v1849_v47  ;;  %v621_v56 = vmul.f32 %v2070_v20, %v537_v44  ;;  %v1756_v57 = vpop.f32.mrf.mxu0  ;;  %1372 = vst.msk [vmem:[%s2081_s14 + $0x4c] sm:$0xf] %vm1027_vm2, %v1685_v28  ;;  %v1683_v59 = vpack.c.bf16 %v1165_v45, %v1165_v45 }
  0xf9   : > { %v2224_v60 = vpop.f32.mrf.mxu1  ;;  %v1853_v61 = vpop.eup %1852  ;;  %1030 = vst.msk [vmem:[%s2211_s17 + $0x8] sm:$0xf] %vm1027_vm2, %v1636_v48  ;;  %v1634_v34 = vpack.c.bf16 %v867_v49, %v867_v49  ;;  %v870_v63 = vmul.f32 %v1851_v54, %v2099_v40  ;;  %1876 = vpow2.f32 %v1538_v43  ;;  %v1539_v1 = vmul.f32 -1.442695, %v2219_v53 }
  0xfa   : > { %v1855_v2 = vpop.eup %1854  ;;  %1878 = vrcp.f32 %v779_v55  ;;  %v782_v3 = vadd.f32 1.0, %v1853_v61  ;;  %v2231_v5 = vadd.f32 %v2075_v22, %v621_v56  ;;  %v626_v7 = vmul.f32 %v1756_v57, %v2070_v20  ;;  %v550_v8 = vpop.f32.mrf.mxu0  ;;  %1370 = vst.msk [vmem:[%s2081_s14 + $0x44] sm:$0xf] %vm1027_vm2, %v1683_v59 }
  0xfb   : > { %v2236_v9 = vpop.f32.mrf.mxu1  ;;  %v1857_v10 = vpop.eup %1856  ;;  %1028 = vst.msk [vmem:[%s2211_s17] sm:$0xf] %vm1027_vm2, %v1634_v34  ;;  %v1637_v40 = vpack.c.bf16 %v870_v63, %v870_v63  ;;  %v868_v11 = vmul.f32 %v1855_v2, %v2106_v46  ;;  %1880 = vpow2.f32 %v1536_v51  ;;  %v624_v13 = vmul.f32 %v2070_v20, %v550_v8 }
  0xfc   : > { %v1859_v14 = vpop.eup %1858  ;;  %1882 = vrcp.f32 %v782_v3  ;;  %v780_v16 = vadd.f32 1.0, %v1857_v10  ;;  %v1537_v17 = vmul.f32 -1.442695, %v2231_v5  ;;  %v2244_v18 = vadd.f32 %v2075_v22, %v626_v7  ;;  %v1757_v19 = vpop.f32.mrf.mxu0 }
  0xfd   : > { %v2246_v23 = vpop.f32.mrf.mxu1  ;;  %v1861_v24 = vpop.eup %1860  ;;  %1031 = vst.msk [vmem:[%s2211_s17 + $0xc] sm:$0xf] %vm1027_vm2, %v1637_v40  ;;  %v1635_v25 = vpack.c.bf16 %v868_v11, %v868_v11  ;;  %v873_v46 = vmul.f32 %v1859_v14, %v2113_v52  ;;  %1884 = vpow2.f32 %v1539_v1  ;;  %v2252_v26 = vadd.f32 %v2075_v22, %v624_v13 }
  0xfe   : > { %v1863_v27 = vpop.eup %1862  ;;  %1886 = vrcp.f32 %v780_v16  ;;  %v785_v30 = vadd.f32 1.0, %v1861_v24  ;;  %v1542_v31 = vmul.f32 -1.442695, %v2244_v18  ;;  %v627_v32 = vmul.f32 %v1757_v19, %v2070_v20  ;;  %v553_v35 = vpop.f32.mrf.mxu0 }
  0xff   : > { %v2256_v36 = vpop.f32.mrf.mxu1  ;;  %v1865_v38 = vpop.eup %1864  ;;  %1029 = vst.msk [vmem:[%s2211_s17 + $0x4] sm:$0xf] %vm1027_vm2, %v1635_v25  ;;  %v1640_v41 = vpack.c.bf16 %v873_v46, %v873_v46  ;;  %v871_v52 = vmul.f32 %v1863_v27, %v2120_v58  ;;  %1888 = vpow2.f32 %v1537_v17  ;;  %v1540_v42 = vmul.f32 -1.442695, %v2252_v26 }
 0x100   : > { %v1867_v43 = vpop.eup %1866  ;;  %1890 = vrcp.f32 %v785_v30  ;;  %v783_v44 = vadd.f32 1.0, %v1865_v38  ;;  %v2263_v28 = vadd.f32 %v2075_v22, %v627_v32  ;;  %v625_v45 = vmul.f32 %v2070_v20, %v553_v35  ;;  %v1760_v47 = vpop.f32.mrf.mxu0 }
 0x101   : > { %v2266_v48 = vpop.f32.mrf.mxu1  ;;  %v1869_v49 = vpop.eup %1868  ;;  %1034 = vst.msk [vmem:[%s2211_s17 + $0x18] sm:$0xf] %vm1027_vm2, %v1640_v41  ;;  %v1638_v51 = vpack.c.bf16 %v871_v52, %v871_v52  ;;  %v874_v58 = vmul.f32 %v1867_v43, %v2127_v0  ;;  %1892 = vpow2.f32 %v1542_v31  ;;  %v630_v54 = vmul.f32 %v1760_v47, %v2070_v20 }
 0x102   : > { %v1871_v55 = vpop.eup %1870  ;;  %1894 = vrcp.f32 %v783_v44  ;;  %v786_v56 = vadd.f32 1.0, %v1869_v49  ;;  %v1543_v57 = vmul.f32 -1.442695, %v2263_v28  ;;  %v2274_v59 = vadd.f32 %v2075_v22, %v625_v45  ;;  %v566_v61 = vpop.f32.mrf.mxu0 }
 0x103   : > { %v2276_v34 = vpop.f32.mrf.mxu1  ;;  %v1873_v63 = vpop.eup %1872  ;;  %1032 = vst.msk [vmem:[%s2211_s17 + $0x10] sm:$0xf] %vm1027_vm2, %v1638_v51  ;;  %v1641_v1 = vpack.c.bf16 %v874_v58, %v874_v58  ;;  %v872_v0 = vmul.f32 %v1871_v55, %v2134_v6  ;;  %1896 = vpow2.f32 %v1540_v42  ;;  %v2282_v2 = vadd.f32 %v2075_v22, %v630_v54 }
 0x104   : > { %1898 = vrcp.f32 %v786_v56  ;;  %v784_v3 = vadd.f32 1.0, %v1873_v63  ;;  %v1541_v7 = vmul.f32 -1.442695, %v2274_v59  ;;  %v628_v8 = vmul.f32 %v2070_v20, %v566_v61  ;;  %v1761_v10 = vpop.f32.mrf.mxu0 }
 0x105   : > { %v2286_v40 = vpop.f32.mrf.mxu1  ;;  %v1875_v11 = vpop.eup %1874  ;;  %1035 = vst.msk [vmem:[%s2211_s17 + $0x1c] sm:$0xf] %vm1027_vm2, %v1641_v1  ;;  %v1639_v13 = vpack.c.bf16 %v872_v0, %v872_v0  ;;  %1900 = vpow2.f32 %v1543_v57  ;;  %v1546_v6 = vmul.f32 -1.442695, %v2282_v2  ;;  %v631_v14 = vmul.f32 %v1761_v10, %v2070_v20 }
 0x106   : > { %v1877_v16 = vpop.eup %1876  ;;  %v877_v17 = vmul.f32 %v1875_v11, %v2141_v12  ;;  %1902 = vrcp.f32 %v784_v3  ;;  %v2294_v19 = vadd.f32 %v2075_v22, %v628_v8  ;;  %v569_v24 = vpop.f32.mrf.mxu0  ;;  %v1688_v25 = vpack.c.bf16 %v2224_v60, %v2224_v60 }
 0x107   : > { %v2298_v46 = vpop.f32.mrf.mxu1  ;;  %v1879_v27 = vpop.eup %1878  ;;  %1033 = vst.msk [vmem:[%s2211_s17 + $0x14] sm:$0xf] %vm1027_vm2, %v1639_v13  ;;  %v789_v30 = vadd.f32 1.0, %v1877_v16  ;;  %1904 = vpow2.f32 %v1541_v7  ;;  %v2303_v31 = vadd.f32 %v2075_v22, %v631_v14  ;;  %v629_v12 = vmul.f32 %v2070_v20, %v569_v24 }
 0x108   : > { %v1881_v32 = vpop.eup %1880  ;;  %v1644_v35 = vpack.c.bf16 %v877_v17, %v877_v17  ;;  %v875_v38 = vmul.f32 %v1879_v27, %v2148_v21  ;;  %1906 = vpow2.f32 %v1546_v6  ;;  %v1544_v60 = vmul.f32 -1.442695, %v2294_v19  ;;  %v1764_v41 = vpop.f32.mrf.mxu0  ;;  %1375 = vst.msk [vmem:[%s2081_s14 + $0x58] sm:$0xf] %vm1027_vm2, %v1688_v25 }
 0x109   : > { %v1883_v52 = vpop.eup %1882  ;;  %1908 = vrcp.f32 %v789_v30  ;;  %v787_v42 = vadd.f32 1.0, %v1881_v32  ;;  %v1547_v43 = vmul.f32 -1.442695, %v2303_v31  ;;  %v2312_v44 = vadd.f32 %v2075_v22, %v629_v12  ;;  %v2318_v58 = vpop.f32.mrf.mxu1 }
 0x10a   : > { %v1885_v45 = vpop.eup %1884  ;;  %1038 = vst.msk [vmem:[%s2211_s17 + $0x28] sm:$0xf] %vm1027_vm2, %v1644_v35  ;;  %v1642_v47 = vpack.c.bf16 %v875_v38, %v875_v38  ;;  %v878_v21 = vmul.f32 %v1883_v52, %v2156_v33  ;;  %1910 = vpow2.f32 %v1544_v60  ;;  %v634_v49 = vmul.f32 %v1764_v41, %v2070_v20  ;;  %v582_v51 = vpop.f32.mrf.mxu0 }
 0x10b   : > { %v1887_v54 = vpop.eup %1886  ;;  %1912 = vrcp.f32 %v787_v42  ;;  %v790_v55 = vadd.f32 1.0, %v1885_v45  ;;  %v1545_v56 = vmul.f32 -1.442695, %v2312_v44  ;;  %v632_v57 = vmul.f32 %v2070_v20, %v582_v51  ;;  %v2336_v16 = vpop.f32.mrf.mxu1 }
 0x10c   : > { %v1889_v61 = vpop.eup %1888  ;;  %1036 = vst.msk [vmem:[%s2211_s17 + $0x20] sm:$0xf] %vm1027_vm2, %v1642_v47  ;;  %v1645_v63 = vpack.c.bf16 %v878_v21, %v878_v21  ;;  %v876_v33 = vmul.f32 %v1887_v54, %v2161_v39  ;;  %1914 = vpow2.f32 %v1547_v43  ;;  %v2326_v1 = vadd.f32 %v2075_v22, %v634_v49  ;;  %v1765_v0 = vpop.f32.mrf.mxu0 }
 0x10d   : > { %v1891_v3 = vpop.eup %1890  ;;  %1916 = vrcp.f32 %v790_v55  ;;  %v788_v7 = vadd.f32 1.0, %v1889_v61  ;;  %v2329_v8 = vadd.f32 %v2075_v22, %v632_v57  ;;  %v635_v10 = vmul.f32 %v1765_v0, %v2070_v20 }
 0x10e   : > { %v1893_v11 = vpop.eup %1892  ;;  %1039 = vst.msk [vmem:[%s2211_s17 + $0x2c] sm:$0xf] %vm1027_vm2, %v1645_v63  ;;  %v1643_v13 = vpack.c.bf16 %v876_v33, %v876_v33  ;;  %v881_v39 = vmul.f32 %v1891_v3, %v2169_v50  ;;  %1918 = vpow2.f32 %v1545_v56  ;;  %v1550_v6 = vmul.f32 -1.442695, %v2326_v1  ;;  %v585_v14 = vpop.f32.mrf.mxu0 }
 0x10f   : > { %v1895_v17 = vpop.eup %1894  ;;  %1920 = vrcp.f32 %v788_v7  ;;  %v793_v24 = vadd.f32 1.0, %v1893_v11  ;;  %v1548_v25 = vmul.f32 -1.442695, %v2329_v8  ;;  %v2340_v27 = vadd.f32 %v2075_v22, %v635_v10 }
 0x110   : > { %v1897_v30 = vpop.eup %1896  ;;  %1037 = vst.msk [vmem:[%s2211_s17 + $0x24] sm:$0xf] %vm1027_vm2, %v1643_v13  ;;  %v1648_v12 = vpack.c.bf16 %v881_v39, %v881_v39  ;;  %v879_v50 = vmul.f32 %v1895_v17, %v2177_v62  ;;  %1922 = vpow2.f32 %v1550_v6  ;;  %v633_v32 = vmul.f32 %v2070_v20, %v585_v14  ;;  %v1799_v20 = vpop.f32.mrf.mxu1 }
 0x111   : > { %v1899_v35 = vpop.eup %1898  ;;  %1924 = vrcp.f32 %v793_v24  ;;  %v791_v38 = vadd.f32 1.0, %v1897_v30  ;;  %v1551_v60 = vmul.f32 -1.442695, %v2340_v27  ;;  %v1686_v41 = vpack.c.bf16 %v2236_v9, %v2236_v9 }
 0x112   : > { %v1901_v52 = vpop.eup %1900  ;;  %1042 = vst.msk [vmem:[%s2211_s17 + $0x38] sm:$0xf] %vm1027_vm2, %v1648_v12  ;;  %v1646_v42 = vpack.c.bf16 %v879_v50, %v879_v50  ;;  %v882_v43 = vmul.f32 %v1899_v35, %v2182_v4  ;;  %1926 = vpow2.f32 %v1548_v25  ;;  %v2353_v62 = vadd.f32 %v2075_v22, %v633_v32  ;;  %v1213_v63 = vpop.f32.mrf.mxu1 }
 0x113   : > { %v1903_v45 = vpop.eup %1902  ;;  %1928 = vrcp.f32 %v791_v38  ;;  %v794_v47 = vadd.f32 1.0, %v1901_v52  ;;  %1373 = vst.msk [vmem:[%s2081_s14 + $0x50] sm:$0xf] %vm1027_vm2, %v1686_v41  ;;  %v1689_v9 = vpack.c.bf16 %v2246_v23, %v2246_v23  ;;  %v1687_v21 = vpack.c.bf16 %v2256_v36, %v2256_v36 }
 0x114   : > { %v1905_v4 = vpop.eup %1904  ;;  %1040 = vst.msk [vmem:[%s2211_s17 + $0x30] sm:$0xf] %vm1027_vm2, %v1646_v42  ;;  %v1649_v22 = vpack.c.bf16 %v882_v43, %v882_v43  ;;  %v880_v49 = vmul.f32 %v1903_v45, %v2190_v15  ;;  %1930 = vpow2.f32 %v1551_v60  ;;  %v1549_v51 = vmul.f32 -1.442695, %v2353_v62 }
 0x115   : > { %v1907_v54 = vpop.eup %1906  ;;  %1932 = vrcp.f32 %v794_v47  ;;  %v792_v55 = vadd.f32 1.0, %v1905_v4  ;;  %1376 = vst.msk [vmem:[%s2081_s14 + $0x5c] sm:$0xf] %vm1027_vm2, %v1689_v9  ;;  %1374 = vst.msk [vmem:[%s2081_s14 + $0x54] sm:$0xf] %vm1027_vm2, %v1687_v21  ;;  %v1692_v23 = vpack.c.bf16 %v2266_v48, %v2266_v48  ;;  %v1690_v36 = vpack.c.bf16 %v2276_v34, %v2276_v34 }
 0x116   : > { %v1909_v15 = vpop.eup %1908  ;;  %1043 = vst.msk [vmem:[%s2211_s17 + $0x3c] sm:$0xf] %vm1027_vm2, %v1649_v22  ;;  %v1647_v56 = vpack.c.bf16 %v880_v49, %v880_v49  ;;  %v797_v57 = vadd.f32 1.0, %v1907_v54  ;;  %1934 = vpow2.f32 %v1549_v51  ;;  %v1693_v61 = vpack.c.bf16 %v2286_v40, %v2286_v40 }
 0x117   : > { %v1911_v33 = vpop.eup %1910  ;;  %v885_v0 = vmul.f32 %v1909_v15, %v2198_v29  ;;  %1936 = vrcp.f32 %v792_v55  ;;  %1379 = vst.msk [vmem:[%s2081_s14 + $0x68] sm:$0xf] %vm1027_vm2, %v1692_v23  ;;  %1377 = vst.msk [vmem:[%s2081_s14 + $0x60] sm:$0xf] %vm1027_vm2, %v1690_v36  ;;  %v1691_v48 = vpack.c.bf16 %v2298_v46, %v2298_v46  ;;  %v1696_v34 = vpack.c.bf16 %v2318_v58, %v2318_v58 }
 0x118   : > { %v1913_v3 = vpop.eup %1912  ;;  %1041 = vst.msk [vmem:[%s2211_s17 + $0x34] sm:$0xf] %vm1027_vm2, %v1647_v56  ;;  %1938 = vrcp.f32 %v797_v57  ;;  %v795_v29 = vadd.f32 1.0, %v1911_v33  ;;  %1380 = vst.msk [vmem:[%s2081_s14 + $0x6c] sm:$0xf] %vm1027_vm2, %v1693_v61  ;;  %v1694_v40 = vpack.c.bf16 %v2336_v16, %v2336_v16  ;;  %v1697_v7 = vpack.c.bf16 %v1799_v20, %v1799_v20 }
 0x119   : > { %v1915_v10 = vpop.eup %1914  ;;  %v1652_v46 = vpack.c.bf16 %v885_v0, %v885_v0  ;;  %v883_v11 = vmul.f32 %v1913_v3, %v2204_v37  ;;  %1378 = vst.msk [vmem:[%s2081_s14 + $0x64] sm:$0xf] %vm1027_vm2, %v1691_v48  ;;  %1383 = vst.msk [vmem:[%s2081_s14 + $0x78] sm:$0xf] %vm1027_vm2, %v1696_v34  ;;  %v1695_v58 = vpack.c.bf16 %v1213_v63, %v1213_v63 }
 0x11a   : > { %v1917_v13 = vpop.eup %1916  ;;  %1940 = vrcp.f32 %v795_v29  ;;  %v798_v39 = vadd.f32 1.0, %v1915_v10  ;;  %1381 = vst.msk [vmem:[%s2081_s14 + $0x70] sm:$0xf] %vm1027_vm2, %v1694_v40  ;;  %1384 = vst.msk [vmem:[%s2081_s14 + $0x7c] sm:$0xf] %vm1027_vm2, %v1697_v7 }
 0x11b   : > { %v1919_v6 = vpop.eup %1918  ;;  %1046 = vst.msk [vmem:[%s2211_s17 + $0x48] sm:$0xf] %vm1027_vm2, %v1652_v46  ;;  %v1650_v14 = vpack.c.bf16 %v883_v11, %v883_v11  ;;  %v886_v37 = vmul.f32 %v1917_v13, %v2219_v53  ;;  %1382 = vst.msk [vmem:[%s2081_s14 + $0x74] sm:$0xf] %vm1027_vm2, %v1695_v58 }
 0x11c   : > { %v1921_v16 = vpop.eup %1920  ;;  %1942 = vrcp.f32 %v798_v39  ;;  %v796_v17 = vadd.f32 1.0, %v1919_v6 }
 0x11d   : > { %v1923_v24 = vpop.eup %1922  ;;  %1044 = vst.msk [vmem:[%s2211_s17 + $0x40] sm:$0xf] %vm1027_vm2, %v1650_v14  ;;  %v1653_v25 = vpack.c.bf16 %v886_v37, %v886_v37  ;;  %v884_v30 = vmul.f32 %v1921_v16, %v2231_v5 }
 0x11e   : > { %v1925_v12 = vpop.eup %1924  ;;  %1944 = vrcp.f32 %v796_v17  ;;  %v801_v50 = vadd.f32 1.0, %v1923_v24 }
 0x11f   : > { %v1927_v32 = vpop.eup %1926  ;;  %1047 = vst.msk [vmem:[%s2211_s17 + $0x4c] sm:$0xf] %vm1027_vm2, %v1653_v25  ;;  %v1651_v53 = vpack.c.bf16 %v884_v30, %v884_v30  ;;  %v889_v35 = vmul.f32 %v1925_v12, %v2244_v18 }
 0x120   : > { %v1929_v38 = vpop.eup %1928  ;;  %1946 = vrcp.f32 %v801_v50  ;;  %v799_v60 = vadd.f32 1.0, %v1927_v32 }
 0x121   : > { %v1931_v41 = vpop.eup %1930  ;;  %1045 = vst.msk [vmem:[%s2211_s17 + $0x44] sm:$0xf] %vm1027_vm2, %v1651_v53  ;;  %v1656_v52 = vpack.c.bf16 %v889_v35, %v889_v35  ;;  %v887_v5 = vmul.f32 %v1929_v38, %v2252_v26 }
 0x122   : > { %v1933_v42 = vpop.eup %1932  ;;  %1948 = vrcp.f32 %v799_v60  ;;  %v802_v43 = vadd.f32 1.0, %v1931_v41 }
 0x123   : > { %v1935_v20 = vpop.eup %1934  ;;  %1050 = vst.msk [vmem:[%s2211_s17 + $0x58] sm:$0xf] %vm1027_vm2, %v1656_v52  ;;  %v1654_v45 = vpack.c.bf16 %v887_v5, %v887_v5  ;;  %v890_v18 = vmul.f32 %v1933_v42, %v2263_v28 }
 0x124   : > { %v1937_v47 = vpop.eup %1936  ;;  %1950 = vrcp.f32 %v802_v43  ;;  %v800_v9 = vadd.f32 1.0, %v1935_v20 }
 0x125   : > { %v1939_v21 = vpop.eup %1938  ;;  %1048 = vst.msk [vmem:[%s2211_s17 + $0x50] sm:$0xf] %vm1027_vm2, %v1654_v45  ;;  %v1657_v26 = vpack.c.bf16 %v890_v18, %v890_v18  ;;  %v888_v4 = vmul.f32 %v1937_v47, %v2274_v59 }
 0x126   : > { %v893_v22 = vmul.f32 %v1939_v21, %v2282_v2  ;;  %1952 = vrcp.f32 %v800_v9 }
 0x127   : > { %v1941_v49 = vpop.eup %1940  ;;  %1051 = vst.msk [vmem:[%s2211_s17 + $0x5c] sm:$0xf] %vm1027_vm2, %v1657_v26  ;;  %v1655_v28 = vpack.c.bf16 %v888_v4, %v888_v4 }
 0x128   : > { %v1660_v51 = vpack.c.bf16 %v893_v22, %v893_v22  ;;  %v891_v54 = vmul.f32 %v1941_v49, %v2294_v19 }
 0x129   : > { %v1943_v55 = vpop.eup %1942  ;;  %1049 = vst.msk [vmem:[%s2211_s17 + $0x54] sm:$0xf] %vm1027_vm2, %v1655_v28 }
 0x12a   : > { %1054 = vst.msk [vmem:[%s2211_s17 + $0x68] sm:$0xf] %vm1027_vm2, %v1660_v51  ;;  %v1658_v23 = vpack.c.bf16 %v891_v54, %v891_v54  ;;  %v894_v59 = vmul.f32 %v1943_v55, %v2303_v31 }
 0x12b   : > { %v1945_v2 = vpop.eup %1944 }
 0x12c   : > { %1052 = vst.msk [vmem:[%s2211_s17 + $0x60] sm:$0xf] %vm1027_vm2, %v1658_v23  ;;  %v1661_v36 = vpack.c.bf16 %v894_v59, %v894_v59  ;;  %v892_v15 = vmul.f32 %v1945_v2, %v2312_v44 }
 0x12d   : > { %v1947_v56 = vpop.eup %1946 }
 0x12e   : > { %1055 = vst.msk [vmem:[%s2211_s17 + $0x6c] sm:$0xf] %vm1027_vm2, %v1661_v36  ;;  %v1659_v19 = vpack.c.bf16 %v892_v15, %v892_v15  ;;  %v897_v57 = vmul.f32 %v1947_v56, %v2326_v1 }
 0x12f   : > { %v1949_v61 = vpop.eup %1948 }
 0x130   : > { %1053 = vst.msk [vmem:[%s2211_s17 + $0x64] sm:$0xf] %vm1027_vm2, %v1659_v19  ;;  %v1664_v63 = vpack.c.bf16 %v897_v57, %v897_v57  ;;  %v895_v31 = vmul.f32 %v1949_v61, %v2329_v8 }
 0x131   : > { %v1951_v33 = vpop.eup %1950 }
 0x132   : > { %1058 = vst.msk [vmem:[%s2211_s17 + $0x78] sm:$0xf] %vm1027_vm2, %v1664_v63  ;;  %v1662_v0 = vpack.c.bf16 %v895_v31, %v895_v31  ;;  %v898_v44 = vmul.f32 %v1951_v33, %v2340_v27 }
 0x133   : > { %v1953_v48 = vpop.eup %1952 }
 0x134   : > { %1056 = vst.msk [vmem:[%s2211_s17 + $0x70] sm:$0xf] %vm1027_vm2, %v1662_v0  ;;  %v1665_v34 = vpack.c.bf16 %v898_v44, %v898_v44  ;;  %v896_v3 = vmul.f32 %v1953_v48, %v2353_v62 }
 0x136   : > { %1059 = vst.msk [vmem:[%s2211_s17 + $0x7c] sm:$0xf] %vm1027_vm2, %v1665_v34  ;;  %v1663_v1 = vpack.c.bf16 %v896_v3, %v896_v3 }
 0x138   : > { %1057 = vst.msk [vmem:[%s2211_s17 + $0x74] sm:$0xf] %vm1027_vm2, %v1663_v1 }
 0x139 PF: > { %s17_s21 = sadd.s32 1, %s1960_s21  }
 0x13a   : > { %p14_p4 = scmp.ge.s32.totalorder %s17_s21, 4  }
 0x13c   :  { %16 = sbr.rel (!%p14_p4) target bundleno = 1 (0x1), region = 82 }

// kernel: bottleneck_csp_forward.4
= control target key start
LH: loop header
LB: loop body
LE: loop exit
PB: predicated region body
PF: predicated region fallthrough
CT: control target
= control target key end

     0   :  { %s8277_s24 = smov 0   ;;  %s11350_s0 = inlined_call_operand.vmem [shape: bf16[2,256,4], index: 0, kind: input, shape index: {}]   ;;  %s11351_s1 = inlined_call_operand.vmem [shape: bf16[9,4,4], index: 1, kind: input, shape index: {}]   ;;  %s11352_s2 = inlined_call_operand.vmem [shape: f32[1,4], index: 2, kind: input, shape index: {}]   ;;  %s11353_s3 = inlined_call_operand.vmem [shape: f32[1,4], index: 3, kind: input, shape index: {}]   ;;  %s11354_s4 = inlined_call_operand.vmem [shape: bf16[9,4,4], index: 4, kind: input, shape index: {}]   ;;  %s11355_s5 = inlined_call_operand.vmem [shape: f32[1,4], index: 5, kind: input, shape index: {}]   ;;  %s11356_s6 = inlined_call_operand.vmem [shape: f32[1,4], index: 6, kind: input, shape index: {}]   ;;  %s11357_s7 = inlined_call_operand.vmem [shape: bf16[2,256,4], index: 7, kind: output, shape index: {}]  }
   0x1 LB: > { %s6499_s25 = sadd.s32 4294967295, %s8234_s24   ;;  %p6503_p0 = scmp.ge.s32.totalorder %s8234_s24, 1  ;;  %s8234_s24 = sphi %s8277_s24, %s17_s24  }
   0x2   : > { %p237_p1 = scmp.lt.s32.totalorder %s8234_s24, 3 }
   0x4   : > { %p238_p2 = pnand %p6503_p0, %p237_p1 }
   0x6   : > { %241 = sbr.rel (%p238_p2) target bundleno = 1145 (0x479), region = 48 }
   0xb   : > { %v6508_v0 = vld [vmem:[%s11351_s1 + $0x2] sm:$0x3]  ;;  %vm598_vm0 = vcmask 1041408   ;;  %v499_v1 = vld [vmem:[%s11351_s1] sm:$0x3]  ;;  %vm344_vm1 = vcmask 31744  }
   0xc   : > { %7945 = vmatprep.subr.msk.bf16.mxu0 %vm598_vm0, %v6508_v0  ;;  %v600_v2 = vsel %vm598_vm0, %v6508_v0, 0  ;;  %7946 = vmatprep.subr.msk.bf16.mxu1 %vm598_vm0, %v499_v1  ;;  %v812_v3 = vsel %vm598_vm0, %v499_v1, 0  ;;  %v8298_v4 = vld [vmem:[%s11351_s1 + $0x4] sm:$0x3]  ;;  %p8302_p3 = scmp.lt.s32.totalorder %s6499_s25, 1  ;;  %v8236_v5 = vmov 0.0  }
   0xd   : > { %7334 = vmatpush3.bf16.msra.mxu0 %v600_v2  ;;  %7368 = vmatpush3.bf16.msra.mxu1 %v812_v3  ;;  %346 = vst.msk [vmem:[#allocation2 + $0x8] sm:$0xff] %vm344_vm1, %v8236_v5  ;;  %347 = vst.msk [vmem:[#allocation2 + $0x10] sm:$0xff] %vm344_vm1, %v8236_v5  ;;  %v8417_v6 = vld [vmem:[%s11351_s1 + $0x6] sm:$0x3]  ;;  %vm348_vm2 = vcmask 24576   ;;  %v1074_v2 = vsel %vm598_vm0, %v8298_v4, 0 }
   0xe   : > { %345 = vst.msk [vmem:[#allocation2] sm:$0xff] %vm344_vm1, %v8236_v5  ;;  %350 = vst.msk [vmem:[#allocation2 + $0x20] sm:$0xff] %vm344_vm1, %v8236_v5  ;;  %7947 = vmatprep.subr.msk.bf16.mxu0 %vm598_vm0, %v8298_v4  ;;  %s11719_s25 = smov (!%p8302_p3, %s6499_s25), 1  ;;  %7948 = vmatprep.subr.msk.bf16.mxu1 %vm598_vm0, %v8417_v6  ;;  %vm6411_vm3 = vcmask 27648  }
   0xf   : > { %351 = vst.msk [vmem:[#allocation2 + $0x28] sm:$0xff] %vm344_vm1, %v8236_v5  ;;  %352 = vst.msk [vmem:[#allocation2 + $0x30] sm:$0xff] %vm344_vm1, %v8236_v5  ;;  %s6914_s12 = sshll.u32 %s11719_s25, 7 }
  0x10   : > { %354 = vst.msk [vmem:[#allocation2 + $0x40] sm:$0xff] %vm344_vm1, %v8236_v5  ;;  %355 = vst.msk [vmem:[#allocation2 + $0x48] sm:$0xff] %vm344_vm1, %v8236_v5  ;;  %s8471_s15 = scalar_lea.vmem %s11350_s0, %s6914_s12  ;;  %s11111_s14 = scalar_lea.vmem %s11357_s7, %s6914_s12 }
  0x11   : > { %356 = vst.msk [vmem:[#allocation2 + $0x50] sm:$0xff] %vm344_vm1, %v8236_v5  ;;  %358 = vst.msk [vmem:[#allocation2 + $0x60] sm:$0xff] %vm344_vm1, %v8236_v5  ;;  %v8474_v7 = vld [vmem:[%s8471_s15] sm:$0xff]   ;;  %v8477_v8 = vld [vmem:[%s8471_s15 + $0x8] sm:$0xff]  }
  0x12   : > { %359 = vst.msk [vmem:[#allocation2 + $0x68] sm:$0xff] %vm344_vm1, %v8236_v5  ;;  %360 = vst.msk [vmem:[#allocation2 + $0x70] sm:$0xff] %vm344_vm1, %v8236_v5  ;;  %v8480_v9 = vld [vmem:[%s8471_s15 + $0x10] sm:$0xff]   ;;  %v11388_v10 = vunpack.c.l.bf16 %v8474_v7  ;;  %v11386_v11 = vunpack.c.h.bf16 %v8474_v7  ;;  %v11389_v12 = vunpack.c.l.bf16 %v8477_v8  ;;  %v11387_v13 = vunpack.c.h.bf16 %v8477_v8  ;;  %v8487_v14 = vld [vmem:[%s8471_s15 + $0x18] sm:$0xff]  }
  0x13   : > { %362 = vst.msk [vmem:[#allocation2 + $0x80] sm:$0xff] %vm344_vm1, %v8236_v5  ;;  %363 = vst.msk [vmem:[#allocation2 + $0x88] sm:$0xff] %vm344_vm1, %v8236_v5  ;;  %v8490_v15 = vld [vmem:[%s8471_s15 + $0x20] sm:$0xff]   ;;  %v8493_v16 = vld [vmem:[%s8471_s15 + $0x28] sm:$0xff]   ;;  %v11384_v20 = vunpack.c.l.bf16 %v8480_v9  ;;  %v11382_v21 = vunpack.c.h.bf16 %v8480_v9  ;;  %v11385_v22 = vunpack.c.l.bf16 %v8487_v14  ;;  %v11383_v23 = vunpack.c.h.bf16 %v8487_v14 }
  0x14   : > { %364 = vst.msk [vmem:[#allocation2 + $0x90] sm:$0xff] %vm344_vm1, %v8236_v5  ;;  %366 = vst.msk [vmem:[#allocation2 + $0xa0] sm:$0xff] %vm344_vm1, %v8236_v5  ;;  %v500_v17 = vld [vmem:[#allocation2 + $0x8] sm:$0xff]  ;;  %v501_v18 = vld [vmem:[#allocation2 + $0x10] sm:$0xff]  ;;  %v11380_v26 = vunpack.c.l.bf16 %v8490_v15  ;;  %v11378_v27 = vunpack.c.h.bf16 %v8490_v15  ;;  %v11381_v28 = vunpack.c.l.bf16 %v8493_v16  ;;  %v11379_v32 = vunpack.c.h.bf16 %v8493_v16 }
  0x15   : > { %367 = vst.msk [vmem:[#allocation2 + $0xa8] sm:$0xff] %vm344_vm1, %v8236_v5  ;;  %368 = vst.msk [vmem:[#allocation2 + $0xb0] sm:$0xff] %vm344_vm1, %v8236_v5  ;;  %v451_v19 = vld [vmem:[#allocation2 + $0x7] sm:$0xff]  ;;  %v532_v24 = vpack.c.bf16 %v501_v18, %v500_v17  ;;  %v452_v25 = vld [vmem:[#allocation2 + $0xf] sm:$0xff] }
  0x16   : > { %370 = vst.msk [vmem:[#allocation2 + $0xc0] sm:$0xff] %vm344_vm1, %v8236_v5  ;;  %371 = vst.msk [vmem:[#allocation2 + $0xc8] sm:$0xff] %vm344_vm1, %v8236_v5  ;;  %v8515_v29 = vld [vmem:[%s8471_s15 + $0x30] sm:$0xff]   ;;  %v8518_v30 = vld [vmem:[%s8471_s15 + $0x38] sm:$0xff]   ;;  %v483_v31 = vpack.c.bf16 %v452_v25, %v451_v19  ;;  %v1368_v25 = vsel %vm598_vm0, %v8417_v6, 0 }
  0x17   : > { %372 = vst.msk [vmem:[#allocation2 + $0xd0] sm:$0xff] %vm344_vm1, %v8236_v5  ;;  %374 = vst.msk [vmem:[#allocation2 + $0xe0] sm:$0xff] %vm344_vm1, %v8236_v5  ;;  %v11376_v33 = vunpack.c.l.bf16 %v8515_v29  ;;  %v11374_v34 = vunpack.c.h.bf16 %v8515_v29  ;;  %v8536_v35 = vld [vmem:[%s8471_s15 + $0x40] sm:$0xff]   ;;  %v8539_v36 = vld [vmem:[%s8471_s15 + $0x48] sm:$0xff]   ;;  %7335 = vmatprep.mubr.msk.bf16.mxu0 %vm344_vm1, %v532_v24  ;;  %v11377_v38 = vunpack.c.l.bf16 %v8518_v30  ;;  %v11375_v39 = vunpack.c.h.bf16 %v8518_v30 }
  0x18   : > { %375 = vst.msk [vmem:[#allocation2 + $0xe8] sm:$0xff] %vm344_vm1, %v8236_v5  ;;  %376 = vst.msk [vmem:[#allocation2 + $0xf0] sm:$0xff] %vm344_vm1, %v8236_v5  ;;  %v8542_v37 = vld [vmem:[%s8471_s15 + $0x50] sm:$0xff]   ;;  %v11372_v40 = vunpack.c.l.bf16 %v8536_v35  ;;  %v11370_v41 = vunpack.c.h.bf16 %v8536_v35  ;;  %v8559_v42 = vld [vmem:[%s8471_s15 + $0x58] sm:$0xff]   ;;  %7369 = vmatprep.mubr.msk.bf16.mxu1 %vm344_vm1, %v483_v31  ;;  %v11373_v45 = vunpack.c.l.bf16 %v8539_v36  ;;  %v11371_v46 = vunpack.c.h.bf16 %v8539_v36 }
  0x19   : > { %378 = vst.msk [vmem:[#allocation2 + $0x100] sm:$0xff] %vm344_vm1, %v8236_v5  ;;  %379 = vst.msk [vmem:[#allocation2 + $0x108] sm:$0xff] %vm344_vm1, %v8236_v5  ;;  %v8562_v43 = vld [vmem:[%s8471_s15 + $0x60] sm:$0xff]   ;;  %v8565_v44 = vld [vmem:[%s8471_s15 + $0x68] sm:$0xff]   ;;  %v11368_v47 = vunpack.c.l.bf16 %v8542_v37  ;;  %v11366_v48 = vunpack.c.h.bf16 %v8542_v37  ;;  %v11369_v50 = vunpack.c.l.bf16 %v8559_v42  ;;  %v11367_v51 = vunpack.c.h.bf16 %v8559_v42 }
  0x1a   : > { %380 = vst.msk [vmem:[#allocation2 + $0x110] sm:$0xff] %vm344_vm1, %v8236_v5  ;;  %382 = vst.msk [vmem:[#allocation2 + $0x120] sm:$0xff] %vm344_vm1, %v8236_v5  ;;  %v8582_v49 = vld [vmem:[%s8471_s15 + $0x70] sm:$0xff]   ;;  %v11364_v52 = vunpack.c.l.bf16 %v8562_v43  ;;  %v11362_v53 = vunpack.c.h.bf16 %v8562_v43  ;;  %v8601_v54 = vld [vmem:[%s8471_s15 + $0x78] sm:$0xff]   ;;  %v11365_v55 = vunpack.c.l.bf16 %v8565_v44  ;;  %v11363_v56 = vunpack.c.h.bf16 %v8565_v44 }
  0x1b   : > { %383 = vst.msk [vmem:[#allocation2 + $0x128] sm:$0xff] %vm344_vm1, %v8236_v5  ;;  %384 = vst.msk [vmem:[#allocation2 + $0x130] sm:$0xff] %vm344_vm1, %v8236_v5  ;;  %v11360_v57 = vunpack.c.l.bf16 %v8582_v49  ;;  %v11358_v58 = vunpack.c.h.bf16 %v8582_v49  ;;  %v11361_v59 = vunpack.c.l.bf16 %v8601_v54  ;;  %v11359_v60 = vunpack.c.h.bf16 %v8601_v54  ;;  %v8668_v31 = vld [vmem:[%s11351_s1 + $0x8] sm:$0x3] }
  0x1c   : > { %386 = vst.msk [vmem:[#allocation2 + $0x140] sm:$0xff] %vm344_vm1, %v8236_v5  ;;  %387 = vst.msk [vmem:[#allocation2 + $0x148] sm:$0xff] %vm344_vm1, %v8236_v5 }
  0x1d   : > { %388 = vst.msk [vmem:[#allocation2 + $0x150] sm:$0xff] %vm344_vm1, %v8236_v5  ;;  %390 = vst.msk [vmem:[#allocation2 + $0x160] sm:$0xff] %vm344_vm1, %v8236_v5 }
  0x1e   : > { %391 = vst.msk [vmem:[#allocation2 + $0x168] sm:$0xff] %vm344_vm1, %v8236_v5  ;;  %392 = vst.msk [vmem:[#allocation2 + $0x170] sm:$0xff] %vm344_vm1, %v8236_v5 }
  0x1f   : > { %394 = vst.msk [vmem:[#allocation2 + $0x180] sm:$0xff] %vm344_vm1, %v8236_v5  ;;  %395 = vst.msk [vmem:[#allocation2 + $0x188] sm:$0xff] %vm344_vm1, %v8236_v5 }
  0x20   : > { %396 = vst.msk [vmem:[#allocation2 + $0x190] sm:$0xff] %vm344_vm1, %v8236_v5  ;;  %398 = vst.msk [vmem:[#allocation2 + $0x1a0] sm:$0xff] %vm344_vm1, %v8236_v5 }
  0x21   : > { %399 = vst.msk [vmem:[#allocation2 + $0x1a8] sm:$0xff] %vm344_vm1, %v8236_v5  ;;  %400 = vst.msk [vmem:[#allocation2 + $0x1b0] sm:$0xff] %vm344_vm1, %v8236_v5 }
  0x22   : > { %402 = vst.msk [vmem:[#allocation2 + $0x1c0] sm:$0xff] %vm344_vm1, %v8236_v5  ;;  %403 = vst.msk [vmem:[#allocation2 + $0x1c8] sm:$0xff] %vm344_vm1, %v8236_v5 }
  0x23   : > { %404 = vst.msk [vmem:[#allocation2 + $0x1d0] sm:$0xff] %vm344_vm1, %v8236_v5  ;;  %406 = vst.msk [vmem:[#allocation2 + $0x1e0] sm:$0xff] %vm344_vm1, %v8236_v5 }
  0x24   : > { %407 = vst.msk [vmem:[#allocation2 + $0x1e8] sm:$0xff] %vm344_vm1, %v8236_v5  ;;  %408 = vst.msk [vmem:[#allocation2 + $0x1f0] sm:$0xff] %vm344_vm1, %v8236_v5 }
  0x25   : > { %410 = vst.msk [vmem:[#allocation2 + $0x200] sm:$0xff] %vm344_vm1, %v8236_v5  ;;  %411 = vst.msk [vmem:[#allocation2 + $0x208] sm:$0xff] %vm344_vm1, %v8236_v5 }
  0x26   : > { %412 = vst.msk [vmem:[#allocation2 + $0x210] sm:$0xff] %vm344_vm1, %v8236_v5  ;;  %414 = vst.msk [vmem:[#allocation2 + $0x220] sm:$0xff] %vm344_vm1, %v8236_v5 }
  0x27   : > { %415 = vst.msk [vmem:[#allocation2 + $0x228] sm:$0xff] %vm344_vm1, %v8236_v5  ;;  %416 = vst.msk [vmem:[#allocation2 + $0x230] sm:$0xff] %vm344_vm1, %v8236_v5 }
  0x28   : > { %349 = vst.msk [vmem:[#allocation2 + $0x18] sm:$0x1] %vm348_vm2, %v8236_v5  ;;  %353 = vst.msk [vmem:[#allocation2 + $0x38] sm:$0x1] %vm348_vm2, %v8236_v5 }
  0x29   : > { %357 = vst.msk [vmem:[#allocation2 + $0x58] sm:$0x1] %vm348_vm2, %v8236_v5  ;;  %361 = vst.msk [vmem:[#allocation2 + $0x78] sm:$0x1] %vm348_vm2, %v8236_v5 }
  0x2a   : > { %365 = vst.msk [vmem:[#allocation2 + $0x98] sm:$0x1] %vm348_vm2, %v8236_v5  ;;  %369 = vst.msk [vmem:[#allocation2 + $0xb8] sm:$0x1] %vm348_vm2, %v8236_v5 }
  0x2b   : > { %373 = vst.msk [vmem:[#allocation2 + $0xd8] sm:$0x1] %vm348_vm2, %v8236_v5  ;;  %377 = vst.msk [vmem:[#allocation2 + $0xf8] sm:$0x1] %vm348_vm2, %v8236_v5 }
  0x2c   : > { %381 = vst.msk [vmem:[#allocation2 + $0x118] sm:$0x1] %vm348_vm2, %v8236_v5  ;;  %385 = vst.msk [vmem:[#allocation2 + $0x138] sm:$0x1] %vm348_vm2, %v8236_v5 }
  0x2d   : > { %389 = vst.msk [vmem:[#allocation2 + $0x158] sm:$0x1] %vm348_vm2, %v8236_v5  ;;  %393 = vst.msk [vmem:[#allocation2 + $0x178] sm:$0x1] %vm348_vm2, %v8236_v5 }
  0x2e   : > { %397 = vst.msk [vmem:[#allocation2 + $0x198] sm:$0x1] %vm348_vm2, %v8236_v5  ;;  %401 = vst.msk [vmem:[#allocation2 + $0x1b8] sm:$0x1] %vm348_vm2, %v8236_v5 }
  0x2f   : > { %405 = vst.msk [vmem:[#allocation2 + $0x1d8] sm:$0x1] %vm348_vm2, %v8236_v5  ;;  %409 = vst.msk [vmem:[#allocation2 + $0x1f8] sm:$0x1] %vm348_vm2, %v8236_v5 }
  0x30   : > { %413 = vst.msk [vmem:[#allocation2 + $0x218] sm:$0x1] %vm348_vm2, %v8236_v5  ;;  %417 = vst.msk [vmem:[#allocation2 + $0x238] sm:$0x1] %vm348_vm2, %v8236_v5 }
  0x31   : > { %11424 = vst [vmem:[#allocation3_spill] sm:$0xff] %v8474_v7  ;;  %11425 = vst [vmem:[#allocation4_spill] sm:$0xff] %v8477_v8 }
  0x32   : > { %11426 = vst [vmem:[#allocation5_spill] sm:$0xff] %v8480_v9  ;;  %11427 = vst [vmem:[#allocation6_spill] sm:$0xff] %v8487_v14 }
  0x33   : > { %11428 = vst [vmem:[#allocation7_spill] sm:$0xff] %v8490_v15  ;;  %11429 = vst [vmem:[#allocation8_spill] sm:$0xff] %v8493_v16 }
  0x34   : > { %419 = vst.msk [vmem:[#allocation2 + $0x28] sm:$0xff] %vm344_vm1, %v11388_v10  ;;  %420 = vst.msk [vmem:[#allocation2 + $0x30] sm:$0xff] %vm344_vm1, %v11386_v11 }
  0x35   : > { %421 = vst.msk [vmem:[#allocation2 + $0x48] sm:$0xff] %vm344_vm1, %v11389_v12  ;;  %422 = vst.msk [vmem:[#allocation2 + $0x50] sm:$0xff] %vm344_vm1, %v11387_v13 }
  0x36   : > { %11430 = vst [vmem:[#allocation9_spill] sm:$0xff] %v8515_v29  ;;  %11431 = vst [vmem:[#allocation10_spill] sm:$0xff] %v8518_v30 }
  0x37   : > { %423 = vst.msk [vmem:[#allocation2 + $0x68] sm:$0xff] %vm344_vm1, %v11384_v20  ;;  %424 = vst.msk [vmem:[#allocation2 + $0x70] sm:$0xff] %vm344_vm1, %v11382_v21  ;;  %v975_v21 = vld [vmem:[#allocation2 + $0x9] sm:$0xff] }
  0x38   : > { %425 = vst.msk [vmem:[#allocation2 + $0x88] sm:$0xff] %vm344_vm1, %v11385_v22  ;;  %426 = vst.msk [vmem:[#allocation2 + $0x90] sm:$0xff] %vm344_vm1, %v11383_v23 }
  0x39   : > { %11432 = vst [vmem:[#allocation11_spill] sm:$0xff] %v8536_v35  ;;  %11433 = vst [vmem:[#allocation12_spill] sm:$0xff] %v8539_v36 }
  0x3a   : > { %11434 = vst [vmem:[#allocation13_spill] sm:$0xff] %v8542_v37  ;;  %427 = vst.msk [vmem:[#allocation2 + $0xa8] sm:$0xff] %vm344_vm1, %v11380_v26 }
  0x3b   : > { %428 = vst.msk [vmem:[#allocation2 + $0xb0] sm:$0xff] %vm344_vm1, %v11378_v27  ;;  %429 = vst.msk [vmem:[#allocation2 + $0xc8] sm:$0xff] %vm344_vm1, %v11381_v28  ;;  %v502_v61 = vld [vmem:[#allocation2 + $0x28] sm:$0xff]  ;;  %v503_v62 = vld [vmem:[#allocation2 + $0x30] sm:$0xff] }
  0x3c   : > { %11435 = vst [vmem:[#allocation14_spill] sm:$0xff] %v8559_v42  ;;  %11436 = vst [vmem:[#allocation15_spill] sm:$0xff] %v8562_v43  ;;  %v453_v63 = vld [vmem:[#allocation2 + $0x27] sm:$0xff]  ;;  %v8645_v0 = vpack.c.bf16 %v503_v62, %v502_v61  ;;  %v454_v1 = vld [vmem:[#allocation2 + $0x2f] sm:$0xff] }
  0x3d   : > { %11437 = vst [vmem:[#allocation16_spill] sm:$0xff] %v8565_v44  ;;  %430 = vst.msk [vmem:[#allocation2 + $0xd0] sm:$0xff] %vm344_vm1, %v11379_v32  ;;  %v504_v3 = vld [vmem:[#allocation2 + $0x48] sm:$0xff]  ;;  %v505_v5 = vld [vmem:[#allocation2 + $0x50] sm:$0xff]  ;;  %v8655_v17 = vpack.c.bf16 %v454_v1, %v453_v63 }
  0x3e   : > { %431 = vst.msk [vmem:[#allocation2 + $0xe8] sm:$0xff] %vm344_vm1, %v11376_v33  ;;  %432 = vst.msk [vmem:[#allocation2 + $0xf0] sm:$0xff] %vm344_vm1, %v11374_v34  ;;  %v8657_v18 = vpack.c.bf16 %v505_v5, %v504_v3  ;;  %v455_v19 = vld [vmem:[#allocation2 + $0x47] sm:$0xff]  ;;  %v456_v24 = vld [vmem:[#allocation2 + $0x4f] sm:$0xff]  ;;  %7336 = vmatmul.mubr.msk.bf16.vlgmr.msra.gmra.mxu0 %vm344_vm1, %v8645_v0 }
  0x3f   : > { %11438 = vst [vmem:[#allocation17_spill] sm:$0xff] %v8582_v49  ;;  %433 = vst.msk [vmem:[#allocation2 + $0x108] sm:$0xff] %vm344_vm1, %v11377_v38  ;;  %v8661_v4 = vpack.c.bf16 %v456_v24, %v455_v19  ;;  %v8673_v61 = vld [vmem:[%s11351_s1 + $0xa] sm:$0x3]  ;;  %7370 = vmatmul.mubr.msk.bf16.vlgmr.msra.gmra.mxu1 %vm344_vm1, %v8655_v17  ;;  %7402 = vmatpush3.bf16.msra.mxu0 %v1074_v2  ;;  %v507_v63 = vld [vmem:[#allocation2 + $0x70] sm:$0xff] }
  0x40   : > { %434 = vst.msk [vmem:[#allocation2 + $0x110] sm:$0xff] %vm344_vm1, %v11375_v39  ;;  %435 = vst.msk [vmem:[#allocation2 + $0x128] sm:$0xff] %vm344_vm1, %v11372_v40  ;;  %v506_v62 = vld [vmem:[#allocation2 + $0x68] sm:$0xff]  ;;  %7339 = vmatprep.mubr.msk.bf16.mxu0 %vm344_vm1, %v8657_v18  ;;  %v509_v5 = vld [vmem:[#allocation2 + $0x90] sm:$0xff]  ;;  %7436 = vmatpush3.bf16.msra.mxu1 %v1368_v25 }
  0x41   : > { %436 = vst.msk [vmem:[#allocation2 + $0x130] sm:$0xff] %vm344_vm1, %v11370_v41  ;;  %11439 = vst [vmem:[#allocation18_spill] sm:$0xff] %v8601_v54  ;;  %v457_v1 = vld [vmem:[#allocation2 + $0x67] sm:$0xff]  ;;  %7373 = vmatprep.mubr.msk.bf16.mxu1 %vm344_vm1, %v8661_v4  ;;  %v458_v6 = vld [vmem:[#allocation2 + $0x6f] sm:$0xff]  ;;  %7949 = vmatprep.subr.msk.bf16.mxu0 %vm598_vm0, %v8668_v31 }
  0x42   : > { %437 = vst.msk [vmem:[#allocation2 + $0x148] sm:$0xff] %vm344_vm1, %v11373_v45  ;;  %438 = vst.msk [vmem:[#allocation2 + $0x150] sm:$0xff] %vm344_vm1, %v11371_v46  ;;  %v508_v3 = vld [vmem:[#allocation2 + $0x88] sm:$0xff]  ;;  %7950 = vmatprep.subr.msk.bf16.mxu1 %vm598_vm0, %v8673_v61  ;;  %v8687_v2 = vpack.c.bf16 %v458_v6, %v457_v1  ;;  %v980_v20 = vld [vmem:[#allocation2 + $0x51] sm:$0xff] }
  0x43   : > { %439 = vst.msk [vmem:[#allocation2 + $0x168] sm:$0xff] %vm344_vm1, %v11368_v47  ;;  %440 = vst.msk [vmem:[#allocation2 + $0x170] sm:$0xff] %vm344_vm1, %v11366_v48  ;;  %v459_v19 = vld [vmem:[#allocation2 + $0x87] sm:$0xff]  ;;  %v460_v24 = vld [vmem:[#allocation2 + $0x8f] sm:$0xff] }
  0x44   : > { %441 = vst.msk [vmem:[#allocation2 + $0x188] sm:$0xff] %vm344_vm1, %v11369_v50  ;;  %442 = vst.msk [vmem:[#allocation2 + $0x190] sm:$0xff] %vm344_vm1, %v11367_v51  ;;  %v510_v25 = vld [vmem:[#allocation2 + $0xa8] sm:$0xff] }
  0x45   : > { %443 = vst.msk [vmem:[#allocation2 + $0x1a8] sm:$0xff] %vm344_vm1, %v11364_v52  ;;  %444 = vst.msk [vmem:[#allocation2 + $0x1b0] sm:$0xff] %vm344_vm1, %v11362_v53  ;;  %v462_v1 = vld [vmem:[#allocation2 + $0xaf] sm:$0xff]  ;;  %v465_v48 = vld [vmem:[#allocation2 + $0xe7] sm:$0xff] }
  0x46   : > { %445 = vst.msk [vmem:[#allocation2 + $0x1c8] sm:$0xff] %vm344_vm1, %v11365_v55  ;;  %446 = vst.msk [vmem:[#allocation2 + $0x1d0] sm:$0xff] %vm344_vm1, %v11363_v56  ;;  %v512_v6 = vld [vmem:[#allocation2 + $0xc8] sm:$0xff]  ;;  %v515_v55 = vld [vmem:[#allocation2 + $0xf0] sm:$0xff] }
  0x47   : > { %447 = vst.msk [vmem:[#allocation2 + $0x1e8] sm:$0xff] %vm344_vm1, %v11360_v57  ;;  %448 = vst.msk [vmem:[#allocation2 + $0x1f0] sm:$0xff] %vm344_vm1, %v11358_v58  ;;  %v8683_v58 = vpack.c.bf16 %v507_v63, %v506_v62  ;;  %v8691_v57 = vpack.c.bf16 %v460_v24, %v459_v19  ;;  %7374 = vmatmul.mubr.msk.bf16.gmra.mxu1 %vm344_vm1, %v8687_v2  ;;  %v511_v62 = vld [vmem:[#allocation2 + $0xb0] sm:$0xff]  ;;  %v461_v63 = vld [vmem:[#allocation2 + $0xa7] sm:$0xff] }
  0x48   : > { %449 = vst.msk [vmem:[#allocation2 + $0x208] sm:$0xff] %vm344_vm1, %v11361_v59  ;;  %450 = vst.msk [vmem:[#allocation2 + $0x210] sm:$0xff] %vm344_vm1, %v11359_v60  ;;  %v8689_v60 = vpack.c.bf16 %v509_v5, %v508_v3  ;;  %v513_v3 = vld [vmem:[#allocation2 + $0xd0] sm:$0xff]  ;;  %v463_v5 = vld [vmem:[#allocation2 + $0xc7] sm:$0xff]  ;;  %v8701_v24 = vpack.c.bf16 %v511_v62, %v510_v25  ;;  %v8703_v59 = vpack.c.bf16 %v462_v1, %v461_v63 }
  0x49   : > { %7340 = vmatmul.mubr.msk.bf16.gmra.mxu0 %vm344_vm1, %v8683_v58  ;;  %7377 = vmatprep.mubr.msk.bf16.mxu1 %vm344_vm1, %v8691_v57  ;;  %v464_v19 = vld [vmem:[#allocation2 + $0xcf] sm:$0xff]  ;;  %v8705_v53 = vpack.c.bf16 %v513_v3, %v512_v6  ;;  %v467_v1 = vld [vmem:[#allocation2 + $0x107] sm:$0xff] }
  0x4a   : > { %7343 = vmatprep.mubr.msk.bf16.mxu0 %vm344_vm1, %v8689_v60  ;;  %v8707_v56 = vpack.c.bf16 %v464_v19, %v463_v5  ;;  %v514_v52 = vld [vmem:[#allocation2 + $0xe8] sm:$0xff]  ;;  %v517_v63 = vld [vmem:[#allocation2 + $0x110] sm:$0xff] }
  0x4b   : > { %v466_v25 = vld [vmem:[#allocation2 + $0xef] sm:$0xff]  ;;  %v8717_v3 = vpack.c.bf16 %v515_v55, %v514_v52  ;;  %v469_v41 = vld [vmem:[#allocation2 + $0x127] sm:$0xff] }
  0x4c   : > { %v516_v62 = vld [vmem:[#allocation2 + $0x108] sm:$0xff]  ;;  %v8719_v5 = vpack.c.bf16 %v466_v25, %v465_v48  ;;  %v519_v50 = vld [vmem:[#allocation2 + $0x130] sm:$0xff] }
  0x4d   : > { %v468_v6 = vld [vmem:[#allocation2 + $0x10f] sm:$0xff]  ;;  %v8721_v19 = vpack.c.bf16 %v517_v63, %v516_v62  ;;  %v471_v25 = vld [vmem:[#allocation2 + $0x147] sm:$0xff] }
  0x4e   : > { %v8723_v51 = vpack.c.bf16 %v468_v6, %v467_v1  ;;  %v518_v47 = vld [vmem:[#allocation2 + $0x128] sm:$0xff]  ;;  %v521_v55 = vld [vmem:[#allocation2 + $0x150] sm:$0xff] }
  0x4f   : > { %7378 = vmatmul.mubr.msk.bf16.gmra.mxu1 %vm344_vm1, %v8703_v59  ;;  %v470_v48 = vld [vmem:[#allocation2 + $0x12f] sm:$0xff]  ;;  %v8733_v63 = vpack.c.bf16 %v519_v50, %v518_v47  ;;  %v473_v34 = vld [vmem:[#allocation2 + $0x167] sm:$0xff] }
  0x50   : > { %7381 = vmatprep.mubr.msk.bf16.mxu1 %vm344_vm1, %v8707_v56  ;;  %v520_v52 = vld [vmem:[#allocation2 + $0x148] sm:$0xff]  ;;  %v8735_v1 = vpack.c.bf16 %v470_v48, %v469_v41  ;;  %v523_v45 = vld [vmem:[#allocation2 + $0x170] sm:$0xff] }
  0x51   : > { %7344 = vmatmul.mubr.msk.bf16.gmra.mxu0 %vm344_vm1, %v8701_v24  ;;  %v472_v62 = vld [vmem:[#allocation2 + $0x14f] sm:$0xff]  ;;  %v8737_v6 = vpack.c.bf16 %v521_v55, %v520_v52  ;;  %v475_v48 = vld [vmem:[#allocation2 + $0x187] sm:$0xff] }
  0x52   : > { %7347 = vmatprep.mubr.msk.bf16.mxu0 %vm344_vm1, %v8705_v53  ;;  %v8739_v46 = vpack.c.bf16 %v472_v62, %v471_v25  ;;  %v522_v40 = vld [vmem:[#allocation2 + $0x168] sm:$0xff]  ;;  %v525_v50 = vld [vmem:[#allocation2 + $0x190] sm:$0xff] }
  0x53   : > { %v474_v41 = vld [vmem:[#allocation2 + $0x16f] sm:$0xff]  ;;  %v8749_v55 = vpack.c.bf16 %v523_v45, %v522_v40  ;;  %v477_v27 = vld [vmem:[#allocation2 + $0x1a7] sm:$0xff] }
  0x54   : > { %v524_v47 = vld [vmem:[#allocation2 + $0x188] sm:$0xff]  ;;  %v8751_v25 = vpack.c.bf16 %v474_v41, %v473_v34  ;;  %v527_v38 = vld [vmem:[#allocation2 + $0x1b0] sm:$0xff] }
  0x55   : > { %v476_v52 = vld [vmem:[#allocation2 + $0x18f] sm:$0xff]  ;;  %v8753_v62 = vpack.c.bf16 %v525_v50, %v524_v47  ;;  %v479_v41 = vld [vmem:[#allocation2 + $0x1c7] sm:$0xff] }
  0x56   : > { %v8755_v39 = vpack.c.bf16 %v476_v52, %v475_v48  ;;  %v526_v33 = vld [vmem:[#allocation2 + $0x1a8] sm:$0xff]  ;;  %v529_v45 = vld [vmem:[#allocation2 + $0x1d0] sm:$0xff] }
  0x57   : > { %7382 = vmatmul.mubr.msk.bf16.gmra.mxu1 %vm344_vm1, %v8719_v5  ;;  %v478_v34 = vld [vmem:[#allocation2 + $0x1af] sm:$0xff]  ;;  %v8765_v50 = vpack.c.bf16 %v527_v38, %v526_v33 }
  0x58   : > { %7385 = vmatprep.mubr.msk.bf16.mxu1 %vm344_vm1, %v8723_v51  ;;  %v528_v40 = vld [vmem:[#allocation2 + $0x1c8] sm:$0xff]  ;;  %v8767_v48 = vpack.c.bf16 %v478_v34, %v477_v27  ;;  %v531_v28 = vld [vmem:[#allocation2 + $0x1f0] sm:$0xff] }
  0x59   : > { %7348 = vmatmul.mubr.msk.bf16.gmra.mxu0 %vm344_vm1, %v8717_v3  ;;  %v480_v47 = vld [vmem:[#allocation2 + $0x1cf] sm:$0xff]  ;;  %v8769_v52 = vpack.c.bf16 %v529_v45, %v528_v40  ;;  %v481_v27 = vld [vmem:[#allocation2 + $0x1e7] sm:$0xff] }
  0x5a   : > { %7351 = vmatprep.mubr.msk.bf16.mxu0 %vm344_vm1, %v8721_v19  ;;  %v8771_v32 = vpack.c.bf16 %v480_v47, %v479_v41  ;;  %v530_v26 = vld [vmem:[#allocation2 + $0x1e8] sm:$0xff]  ;;  %v976_v38 = vld [vmem:[#allocation2 + $0x11] sm:$0xff] }
  0x5b   : > { %v482_v33 = vld [vmem:[#allocation2 + $0x1ef] sm:$0xff]  ;;  %v8781_v34 = vpack.c.bf16 %v531_v28, %v530_v26  ;;  %v1007_v45 = vpack.c.bf16 %v976_v38, %v975_v21  ;;  %v1662_v21 = vsel %vm598_vm0, %v8668_v31, 0 }
  0x5c   : > { %v8783_v40 = vpack.c.bf16 %v482_v33, %v481_v27  ;;  %v977_v41 = vld [vmem:[#allocation2 + $0x29] sm:$0xff]  ;;  %v978_v47 = vld [vmem:[#allocation2 + $0x31] sm:$0xff]  ;;  %v1956_v27 = vsel %vm598_vm0, %v8673_v61, 0 }
  0x5d   : > { %v979_v23 = vld [vmem:[#allocation2 + $0x49] sm:$0xff]  ;;  %v8792_v26 = vpack.c.bf16 %v978_v47, %v977_v41  ;;  %v982_v38 = vld [vmem:[#allocation2 + $0x71] sm:$0xff] }
  0x5e   : > { %v8796_v28 = vpack.c.bf16 %v980_v20, %v979_v23  ;;  %v8805_v33 = vld [vmem:[%s11351_s1 + $0xc] sm:$0x3]  ;;  %v8812_v20 = vld [vmem:[%s11351_s1 + $0xe] sm:$0x3]  ;;  %v984_v31 = vld [vmem:[#allocation2 + $0x91] sm:$0xff] }
  0x5f   : > { %7386 = vmatmul.mubr.msk.bf16.gmra.mxu1 %vm344_vm1, %v8735_v1  ;;  %v983_v23 = vld [vmem:[#allocation2 + $0x89] sm:$0xff]  ;;  %v986_v47 = vld [vmem:[#allocation2 + $0xb1] sm:$0xff] }
  0x60   : > { %7389 = vmatprep.mubr.msk.bf16.mxu1 %vm344_vm1, %v8739_v46  ;;  %v985_v41 = vld [vmem:[#allocation2 + $0xa9] sm:$0xff]  ;;  %v992_v11 = vld [vmem:[#allocation2 + $0x111] sm:$0xff] }
  0x61   : > { %7352 = vmatmul.mubr.msk.bf16.gmra.mxu0 %vm344_vm1, %v8733_v63  ;;  %v991_v22 = vld [vmem:[#allocation2 + $0x109] sm:$0xff]  ;;  %v996_v10 = vld [vmem:[#allocation2 + $0x151] sm:$0xff] }
  0x62   : > { %7355 = vmatprep.mubr.msk.bf16.mxu0 %vm344_vm1, %v8737_v6  ;;  %v995_v13 = vld [vmem:[#allocation2 + $0x149] sm:$0xff]  ;;  %v1000_v49 = vld [vmem:[#allocation2 + $0x191] sm:$0xff] }
  0x63   : > { %v999_v12 = vld [vmem:[#allocation2 + $0x189] sm:$0xff] }
  0x64   : > { %v1019_v43 = vpack.c.bf16 %v1000_v49, %v999_v12  ;;  %v1005_v12 = vld [vmem:[#allocation2 + $0x1e9] sm:$0xff]  ;;  %v1006_v49 = vld [vmem:[#allocation2 + $0x1f1] sm:$0xff] }
  0x65   : > { %v1022_v42 = vpack.c.bf16 %v1006_v49, %v1005_v12 }
  0x67   : > { %7390 = vmatmul.mubr.msk.bf16.gmra.mxu1 %vm344_vm1, %v8751_v25 }
  0x68   : > { %7393 = vmatprep.mubr.msk.bf16.mxu1 %vm344_vm1, %v8755_v39 }
  0x69   : > { %7356 = vmatmul.mubr.msk.bf16.gmra.mxu0 %vm344_vm1, %v8749_v55 }
  0x6a   : > { %7359 = vmatprep.mubr.msk.bf16.mxu0 %vm344_vm1, %v8753_v62 }
  0x6f   : > { %7394 = vmatmul.mubr.msk.bf16.gmra.mxu1 %vm344_vm1, %v8767_v48 }
  0x70   : > { %7397 = vmatprep.mubr.msk.bf16.mxu1 %vm344_vm1, %v8771_v32 }
  0x71   : > { %7360 = vmatmul.mubr.msk.bf16.gmra.mxu0 %vm344_vm1, %v8765_v50 }
  0x72   : > { %7363 = vmatprep.mubr.msk.bf16.mxu0 %vm344_vm1, %v8769_v52 }
  0x77   : > { %7398 = vmatmul.mubr.msk.bf16.gmra.mxu1 %vm344_vm1, %v8783_v40 }
  0x78   : > { %7437 = vmatprep.mubr.msk.bf16.mxu1 %vm344_vm1, %v8655_v17  ;;  %v981_v17 = vld [vmem:[#allocation2 + $0x69] sm:$0xff] }
  0x79   : > { %7364 = vmatmul.mubr.msk.bf16.gmra.mxu0 %vm344_vm1, %v8781_v34  ;;  %v8820_v61 = vpack.c.bf16 %v982_v38, %v981_v17  ;;  %v8834_v17 = vpack.c.bf16 %v986_v47, %v985_v41  ;;  %v8848_v47 = vpack.c.bf16 %v992_v11, %v991_v22  ;;  %v1017_v11 = vpack.c.bf16 %v996_v10, %v995_v13  ;;  %v997_v22 = vld [vmem:[#allocation2 + $0x169] sm:$0xff]  ;;  %v1002_v13 = vld [vmem:[#allocation2 + $0x1b1] sm:$0xff] }
  0x7a   : > { %7403 = vmatprep.mubr.msk.bf16.mxu0 %vm344_vm1, %v1007_v45  ;;  %v8824_v45 = vpack.c.bf16 %v984_v31, %v983_v23  ;;  %v989_v23 = vld [vmem:[#allocation2 + $0xe9] sm:$0xff]  ;;  %v990_v31 = vld [vmem:[#allocation2 + $0xf1] sm:$0xff] }
  0x7b   : > { %v8846_v41 = vpack.c.bf16 %v990_v31, %v989_v23  ;;  %v998_v31 = vld [vmem:[#allocation2 + $0x171] sm:$0xff]  ;;  %v1001_v10 = vld [vmem:[#allocation2 + $0x1a9] sm:$0xff] }
  0x7c   : > { %v1018_v54 = vpack.c.bf16 %v998_v31, %v997_v22  ;;  %v1020_v44 = vpack.c.bf16 %v1002_v13, %v1001_v10  ;;  %v1299_v22 = vld [vmem:[#allocation2 + $0x207] sm:$0xff]  ;;  %v1300_v31 = vld [vmem:[#allocation2 + $0x20f] sm:$0xff]  ;;  %v2251_v10 = vsel %vm598_vm0, %v8805_v33, 0  ;;  %v2545_v13 = vsel %vm598_vm0, %v8812_v20, 0 }
  0x7d   : > { %v8879_v35 = vpack.c.bf16 %v1300_v31, %v1299_v22 }
  0x7f   : > { %7438 = vmatmul.mubr.msk.bf16.vlgmr.msra.gmra.mxu1 %vm344_vm1, %v8661_v4 }
  0x80   : > { %7441 = vmatprep.mubr.msk.bf16.mxu1 %vm344_vm1, %v8687_v2  ;;  %7504 = vmatpush3.bf16.msra.mxu1 %v1956_v27  ;;  %v988_v27 = vld [vmem:[#allocation2 + $0xd1] sm:$0xff] }
  0x81   : > { %7404 = vmatmul.mubr.msk.bf16.vlgmr.msra.gmra.mxu0 %vm344_vm1, %v8792_v26  ;;  %7952 = vmatprep.subr.msk.bf16.mxu1 %vm598_vm0, %v8812_v20 }
  0x82   : > { %7470 = vmatpush3.bf16.msra.mxu0 %v1662_v21  ;;  %7407 = vmatprep.mubr.msk.bf16.mxu0 %vm344_vm1, %v8796_v28  ;;  %v987_v21 = vld [vmem:[#allocation2 + $0xc9] sm:$0xff] }
  0x83   : > { %7951 = vmatprep.subr.msk.bf16.mxu0 %vm598_vm0, %v8805_v33  ;;  %v8836_v38 = vpack.c.bf16 %v988_v27, %v987_v21  ;;  %v993_v21 = vld [vmem:[#allocation2 + $0x129] sm:$0xff]  ;;  %v994_v27 = vld [vmem:[#allocation2 + $0x131] sm:$0xff] }
  0x84   : > { %v8858_v23 = vpack.c.bf16 %v994_v27, %v993_v21  ;;  %v1003_v21 = vld [vmem:[#allocation2 + $0x1c9] sm:$0xff]  ;;  %v1004_v27 = vld [vmem:[#allocation2 + $0x1d1] sm:$0xff] }
  0x85   : > { %v1021_v37 = vpack.c.bf16 %v1004_v27, %v1003_v21  ;;  %v6643_v21 = vld [vmem:[%s11351_s1 + $0x10] sm:$0x3] }
  0x86   : > { %v1888_v33 = vld [vmem:[#allocation2 + $0x211] sm:$0xff] }
  0x87   : > { %7442 = vmatmul.mubr.msk.bf16.gmra.mxu1 %vm344_vm1, %v8691_v57 }
  0x88   : > { %7445 = vmatprep.mubr.msk.bf16.mxu1 %vm344_vm1, %v8703_v59 }
  0x89   : > { %7408 = vmatmul.mubr.msk.bf16.gmra.mxu0 %vm344_vm1, %v8820_v61 }
  0x8a   : > { %7411 = vmatprep.mubr.msk.bf16.mxu0 %vm344_vm1, %v8824_v45 }
  0x8f   : > { %7446 = vmatmul.mubr.msk.bf16.gmra.mxu1 %vm344_vm1, %v8707_v56 }
  0x90   : > { %7449 = vmatprep.mubr.msk.bf16.mxu1 %vm344_vm1, %v8719_v5 }
  0x91   : > { %7412 = vmatmul.mubr.msk.bf16.gmra.mxu0 %vm344_vm1, %v8834_v17 }
  0x92   : > { %7415 = vmatprep.mubr.msk.bf16.mxu0 %vm344_vm1, %v8836_v38 }
  0x97   : > { %7450 = vmatmul.mubr.msk.bf16.gmra.mxu1 %vm344_vm1, %v8723_v51 }
  0x98   : > { %7453 = vmatprep.mubr.msk.bf16.mxu1 %vm344_vm1, %v8735_v1 }
  0x99   : > { %7416 = vmatmul.mubr.msk.bf16.gmra.mxu0 %vm344_vm1, %v8846_v41 }
  0x9a   : > { %7419 = vmatprep.mubr.msk.bf16.mxu0 %vm344_vm1, %v8848_v47 }
  0x9f   : > { %7454 = vmatmul.mubr.msk.bf16.gmra.mxu1 %vm344_vm1, %v8739_v46 }
  0xa0   : > { %7457 = vmatprep.mubr.msk.bf16.mxu1 %vm344_vm1, %v8751_v25 }
  0xa1   : > { %7420 = vmatmul.mubr.msk.bf16.gmra.mxu0 %vm344_vm1, %v8858_v23 }
  0xa2   : > { %7423 = vmatprep.mubr.msk.bf16.mxu0 %vm344_vm1, %v1017_v11 }
  0xa7   : > { %7458 = vmatmul.mubr.msk.bf16.gmra.mxu1 %vm344_vm1, %v8755_v39 }
  0xa8   : > { %7461 = vmatprep.mubr.msk.bf16.mxu1 %vm344_vm1, %v8767_v48 }
  0xa9   : > { %7424 = vmatmul.mubr.msk.bf16.gmra.mxu0 %vm344_vm1, %v1018_v54 }
  0xaa   : > { %7427 = vmatprep.mubr.msk.bf16.mxu0 %vm344_vm1, %v1019_v43 }
  0xaf   : > { %7462 = vmatmul.mubr.msk.bf16.gmra.mxu1 %vm344_vm1, %v8771_v32 }
  0xb0   : > { %7465 = vmatprep.mubr.msk.bf16.mxu1 %vm344_vm1, %v8783_v40 }
  0xb1   : > { %7428 = vmatmul.mubr.msk.bf16.gmra.mxu0 %vm344_vm1, %v1020_v44 }
  0xb2   : > { %7431 = vmatprep.mubr.msk.bf16.mxu0 %vm344_vm1, %v1021_v37 }
  0xb7   : > { %7466 = vmatmul.mubr.msk.bf16.gmra.mxu1 %vm344_vm1, %v8879_v35 }
  0xb8   : > { %7505 = vmatprep.mubr.msk.bf16.mxu1 %vm344_vm1, %v8792_v26  ;;  %v1887_v26 = vld [vmem:[#allocation2 + $0x209] sm:$0xff] }
  0xb9   : > { %7432 = vmatmul.mubr.msk.bf16.gmra.mxu0 %vm344_vm1, %v1022_v42  ;;  %v8948_v20 = vpack.c.bf16 %v1888_v33, %v1887_v26 }
  0xba   : > { %7471 = vmatprep.mubr.msk.bf16.mxu0 %vm344_vm1, %v8645_v0  ;;  %v1593_v0 = vld [vmem:[#allocation2 + $0x208] sm:$0xff] }
  0xbf   : > { %7506 = vmatmul.mubr.msk.bf16.vlgmr.msra.gmra.mxu1 %vm344_vm1, %v8796_v28 }
  0xc0   : > { %7509 = vmatprep.mubr.msk.bf16.mxu1 %vm344_vm1, %v8820_v61  ;;  %7572 = vmatpush3.bf16.msra.mxu1 %v2545_v13 }
  0xc1   : > { %7472 = vmatmul.mubr.msk.bf16.vlgmr.msra.gmra.mxu0 %vm344_vm1, %v8657_v18 }
  0xc2   : > { %7538 = vmatpush3.bf16.msra.mxu0 %v2251_v10  ;;  %7475 = vmatprep.mubr.msk.bf16.mxu0 %vm344_vm1, %v8683_v58 }
  0xc3   : > { %7953 = vmatprep.subr.msk.bf16.mxu0 %vm598_vm0, %v6643_v21 }
  0xc7   : > { %7510 = vmatmul.mubr.msk.bf16.gmra.mxu1 %vm344_vm1, %v8824_v45 }
  0xc8   : > { %7513 = vmatprep.mubr.msk.bf16.mxu1 %vm344_vm1, %v8834_v17 }
  0xc9   : > { %7476 = vmatmul.mubr.msk.bf16.gmra.mxu0 %vm344_vm1, %v8689_v60 }
  0xca   : > { %7479 = vmatprep.mubr.msk.bf16.mxu0 %vm344_vm1, %v8701_v24 }
  0xcf   : > { %7514 = vmatmul.mubr.msk.bf16.gmra.mxu1 %vm344_vm1, %v8836_v38 }
  0xd0   : > { %7517 = vmatprep.mubr.msk.bf16.mxu1 %vm344_vm1, %v8846_v41 }
  0xd1   : > { %7480 = vmatmul.mubr.msk.bf16.gmra.mxu0 %vm344_vm1, %v8705_v53 }
  0xd2   : > { %7483 = vmatprep.mubr.msk.bf16.mxu0 %vm344_vm1, %v8717_v3 }
  0xd7   : > { %7518 = vmatmul.mubr.msk.bf16.gmra.mxu1 %vm344_vm1, %v8848_v47 }
  0xd8   : > { %7521 = vmatprep.mubr.msk.bf16.mxu1 %vm344_vm1, %v8858_v23 }
  0xd9   : > { %7484 = vmatmul.mubr.msk.bf16.gmra.mxu0 %vm344_vm1, %v8721_v19 }
  0xda   : > { %7487 = vmatprep.mubr.msk.bf16.mxu0 %vm344_vm1, %v8733_v63 }
  0xdf   : > { %7522 = vmatmul.mubr.msk.bf16.gmra.mxu1 %vm344_vm1, %v1017_v11 }
  0xe0   : > { %7525 = vmatprep.mubr.msk.bf16.mxu1 %vm344_vm1, %v1018_v54  ;;  %v1594_v54 = vld [vmem:[#allocation2 + $0x210] sm:$0xff] }
  0xe1   : > { %7488 = vmatmul.mubr.msk.bf16.gmra.mxu0 %vm344_vm1, %v8737_v6 }
  0xe2   : > { %7491 = vmatprep.mubr.msk.bf16.mxu0 %vm344_vm1, %v8749_v55 }
  0xe7   : > { %7526 = vmatmul.mubr.msk.bf16.gmra.mxu1 %vm344_vm1, %v1019_v43  ;;  %v8946_v43 = vpack.c.bf16 %v1594_v54, %v1593_v0 }
  0xe8   : > { %7529 = vmatprep.mubr.msk.bf16.mxu1 %vm344_vm1, %v1020_v44 }
  0xe9   : > { %7492 = vmatmul.mubr.msk.bf16.gmra.mxu0 %vm344_vm1, %v8753_v62 }
  0xea   : > { %7495 = vmatprep.mubr.msk.bf16.mxu0 %vm344_vm1, %v8765_v50 }
  0xef   : > { %7530 = vmatmul.mubr.msk.bf16.gmra.mxu1 %vm344_vm1, %v1021_v37  ;;  %v2839_v37 = vsel %vm598_vm0, %v6643_v21, 0 }
  0xf0   : > { %7533 = vmatprep.mubr.msk.bf16.mxu1 %vm344_vm1, %v1022_v42 }
  0xf1   : > { %7496 = vmatmul.mubr.msk.bf16.gmra.mxu0 %vm344_vm1, %v8769_v52 }
  0xf2   : > { %7499 = vmatprep.mubr.msk.bf16.mxu0 %vm344_vm1, %v8781_v34 }
  0xf7   : > { %7534 = vmatmul.mubr.msk.bf16.gmra.mxu1 %vm344_vm1, %v8948_v20 }
  0xf8   : > { %7573 = vmatprep.mubr.msk.bf16.mxu1 %vm344_vm1, %v8657_v18 }
  0xf9   : > { %7500 = vmatmul.mubr.msk.bf16.gmra.mxu0 %vm344_vm1, %v8946_v43 }
  0xfa   : > { %7539 = vmatprep.mubr.msk.bf16.mxu0 %vm344_vm1, %v8661_v4 }
  0xfe   : > { %v7337_v42 = vpop.f32.mrf.mxu0 }
  0xff   : > { %v7371_v44 = vpop.f32.mrf.mxu1  ;;  %7574 = vmatmul.mubr.msk.bf16.vlgmr.msra.gmra.mxu1 %vm344_vm1, %v8683_v58 }
 0x100   : > { %v8963_v11 = vadd.f32 %v7371_v44, %v7337_v42  ;;  %v636_v27 = vpop.f32.mrf.mxu0  ;;  %7577 = vmatprep.mubr.msk.bf16.mxu1 %vm344_vm1, %v8689_v60 }
 0x101   : > { %7540 = vmatmul.mubr.msk.bf16.vlgmr.msra.gmra.mxu0 %vm344_vm1, %v8687_v2  ;;  %v848_v18 = vpop.f32.mrf.mxu1 }
 0x102   : > { %7606 = vmatpush3.bf16.msra.mxu0 %v2839_v37  ;;  %7543 = vmatprep.mubr.msk.bf16.mxu0 %vm344_vm1, %v8691_v57  ;;  %v8969_v4 = vadd.f32 %v848_v18, %v636_v27  ;;  %v7338_v12 = vpop.f32.mrf.mxu0 }
 0x103   : > { %v7372_v49 = vpop.f32.mrf.mxu1 }
 0x104   : > { %v8971_v2 = vadd.f32 %v7372_v49, %v7338_v12  ;;  %v639_v22 = vpop.f32.mrf.mxu0 }
 0x105   : > { %v851_v31 = vpop.f32.mrf.mxu1 }
 0x106   : > { %v8973_v10 = vadd.f32 %v851_v31, %v639_v22 }
 0x107   : > { %v7375_v13 = vpop.f32.mrf.mxu1  ;;  %7578 = vmatmul.mubr.msk.bf16.gmra.mxu1 %vm344_vm1, %v8701_v24 }
 0x108   : > { %7581 = vmatprep.mubr.msk.bf16.mxu1 %vm344_vm1, %v8705_v53 }
 0x109   : > { %v7341_v58 = vpop.f32.mrf.mxu0  ;;  %7544 = vmatmul.mubr.msk.bf16.gmra.mxu0 %vm344_vm1, %v8703_v59  ;;  %v864_v21 = vpop.f32.mrf.mxu1 }
 0x10a   : > { %7547 = vmatprep.mubr.msk.bf16.mxu0 %vm344_vm1, %v8707_v56  ;;  %v8981_v57 = vadd.f32 %v7375_v13, %v7341_v58 }
 0x10b   : > { %v652_v60 = vpop.f32.mrf.mxu0  ;;  %v7376_v26 = vpop.f32.mrf.mxu1 }
 0x10c   : > { %v8985_v0 = vadd.f32 %v864_v21, %v652_v60 }
 0x10d   : > { %v7342_v54 = vpop.f32.mrf.mxu0  ;;  %v867_v37 = vpop.f32.mrf.mxu1 }
 0x10e   : > { %v8987_v33 = vadd.f32 %v7376_v26, %v7342_v54 }
 0x10f   : > { %v655_v59 = vpop.f32.mrf.mxu0  ;;  %v7379_v56 = vpop.f32.mrf.mxu1  ;;  %7582 = vmatmul.mubr.msk.bf16.gmra.mxu1 %vm344_vm1, %v8717_v3 }
 0x110   : > { %v8989_v42 = vadd.f32 %v867_v37, %v655_v59  ;;  %7585 = vmatprep.mubr.msk.bf16.mxu1 %vm344_vm1, %v8721_v19 }
 0x111   : > { %v7345_v24 = vpop.f32.mrf.mxu0  ;;  %7548 = vmatmul.mubr.msk.bf16.gmra.mxu0 %vm344_vm1, %v8719_v5  ;;  %v880_v27 = vpop.f32.mrf.mxu1 }
 0x112   : > { %7551 = vmatprep.mubr.msk.bf16.mxu0 %vm344_vm1, %v8723_v51  ;;  %v8997_v53 = vadd.f32 %v7379_v56, %v7345_v24 }
 0x113   : > { %v668_v44 = vpop.f32.mrf.mxu0  ;;  %v7380_v49 = vpop.f32.mrf.mxu1 }
 0x114   : > { %v9001_v18 = vadd.f32 %v880_v27, %v668_v44 }
 0x115   : > { %v7346_v12 = vpop.f32.mrf.mxu0  ;;  %v883_v31 = vpop.f32.mrf.mxu1 }
 0x116   : > { %v9003_v22 = vadd.f32 %v7380_v49, %v7346_v12 }
 0x117   : > { %v671_v5 = vpop.f32.mrf.mxu0  ;;  %v7383_v51 = vpop.f32.mrf.mxu1  ;;  %7586 = vmatmul.mubr.msk.bf16.gmra.mxu1 %vm344_vm1, %v8733_v63 }
 0x118   : > { %v9005_v58 = vadd.f32 %v883_v31, %v671_v5  ;;  %7589 = vmatprep.mubr.msk.bf16.mxu1 %vm344_vm1, %v8737_v6 }
 0x119   : > { %v7349_v3 = vpop.f32.mrf.mxu0  ;;  %7552 = vmatmul.mubr.msk.bf16.gmra.mxu0 %vm344_vm1, %v8735_v1  ;;  %v896_v60 = vpop.f32.mrf.mxu1 }
 0x11a   : > { %7555 = vmatprep.mubr.msk.bf16.mxu0 %vm344_vm1, %v8739_v46  ;;  %v9013_v19 = vadd.f32 %v7383_v51, %v7349_v3 }
 0x11b   : > { %v684_v13 = vpop.f32.mrf.mxu0  ;;  %v7384_v26 = vpop.f32.mrf.mxu1 }
 0x11c   : > { %v9017_v21 = vadd.f32 %v896_v60, %v684_v13 }
 0x11d   : > { %v7350_v54 = vpop.f32.mrf.mxu0  ;;  %v899_v37 = vpop.f32.mrf.mxu1 }
 0x11e   : > { %v9019_v59 = vadd.f32 %v7384_v26, %v7350_v54 }
 0x11f   : > { %v687_v1 = vpop.f32.mrf.mxu0  ;;  %v7387_v46 = vpop.f32.mrf.mxu1  ;;  %7590 = vmatmul.mubr.msk.bf16.gmra.mxu1 %vm344_vm1, %v8749_v55 }
 0x120   : > { %v9021_v24 = vadd.f32 %v899_v37, %v687_v1  ;;  %7593 = vmatprep.mubr.msk.bf16.mxu1 %vm344_vm1, %v8753_v62  ;;  %v2183_v37 = vld [vmem:[#allocation2 + $0x22f] sm:$0xff] }
 0x121   : > { %v7353_v63 = vpop.f32.mrf.mxu0  ;;  %7556 = vmatmul.mubr.msk.bf16.gmra.mxu0 %vm344_vm1, %v8751_v25  ;;  %v912_v44 = vpop.f32.mrf.mxu1 }
 0x122   : > { %7559 = vmatprep.mubr.msk.bf16.mxu0 %vm344_vm1, %v8755_v39  ;;  %v9029_v6 = vadd.f32 %v7387_v46, %v7353_v63 }
 0x123   : > { %v700_v56 = vpop.f32.mrf.mxu0  ;;  %v7388_v49 = vpop.f32.mrf.mxu1 }
 0x124   : > { %v9033_v27 = vadd.f32 %v912_v44, %v700_v56  ;;  %v2476_v56 = vld [vmem:[#allocation2 + $0x228] sm:$0xff]  ;;  %v2477_v44 = vld [vmem:[#allocation2 + $0x230] sm:$0xff] }
 0x125   : > { %v7354_v12 = vpop.f32.mrf.mxu0  ;;  %v9039_v31 = vpop.f32.mrf.mxu1 }
 0x126   : > { %v9035_v5 = vadd.f32 %v7388_v49, %v7354_v12 }
 0x127   : > { %v9037_v25 = vpop.f32.mrf.mxu0  ;;  %v7391_v39 = vpop.f32.mrf.mxu1  ;;  %7594 = vmatmul.mubr.msk.bf16.gmra.mxu1 %vm344_vm1, %v8765_v50 }
 0x128   : > { %7597 = vmatprep.mubr.msk.bf16.mxu1 %vm344_vm1, %v8769_v52  ;;  %v2182_v52 = vld [vmem:[#allocation2 + $0x227] sm:$0xff] }
 0x129   : > { %v7357_v55 = vpop.f32.mrf.mxu0  ;;  %7560 = vmatmul.mubr.msk.bf16.gmra.mxu0 %vm344_vm1, %v8767_v48  ;;  %v928_v51 = vpop.f32.mrf.mxu1 }
 0x12a   : > { %7563 = vmatprep.mubr.msk.bf16.mxu0 %vm344_vm1, %v8771_v32  ;;  %v9047_v62 = vadd.f32 %v7391_v39, %v7357_v55  ;;  %v2199_v55 = vpack.c.bf16 %v2183_v37, %v2182_v52 }
 0x12b   : > { %v716_v3 = vpop.f32.mrf.mxu0  ;;  %v7392_v54 = vpop.f32.mrf.mxu1 }
 0x12c   : > { %v9051_v13 = vadd.f32 %v928_v51, %v716_v3 }
 0x12d   : > { %v7358_v60 = vpop.f32.mrf.mxu0  ;;  %v9057_v1 = vpop.f32.mrf.mxu1 }
 0x12e   : > { %v9053_v26 = vadd.f32 %v7392_v54, %v7358_v60 }
 0x12f   : > { %v9055_v48 = vpop.f32.mrf.mxu0  ;;  %v7395_v32 = vpop.f32.mrf.mxu1  ;;  %7598 = vmatmul.mubr.msk.bf16.gmra.mxu1 %vm344_vm1, %v8781_v34  ;;  %v2493_v34 = vpack.c.bf16 %v2477_v44, %v2476_v56 }
 0x130   : > { %7601 = vmatprep.mubr.msk.bf16.mxu1 %vm344_vm1, %v8946_v43 }
 0x131   : > { %v7361_v50 = vpop.f32.mrf.mxu0  ;;  %7564 = vmatmul.mubr.msk.bf16.gmra.mxu0 %vm344_vm1, %v8783_v40  ;;  %v944_v12 = vpop.f32.mrf.mxu1 }
 0x132   : > { %7567 = vmatprep.mubr.msk.bf16.mxu0 %vm344_vm1, %v8879_v35  ;;  %v9065_v63 = vadd.f32 %v7395_v32, %v7361_v50 }
 0x133   : > { %v732_v46 = vpop.f32.mrf.mxu0  ;;  %v7396_v39 = vpop.f32.mrf.mxu1 }
 0x134   : > { %v9069_v49 = vadd.f32 %v944_v12, %v732_v46 }
 0x135   : > { %v7362_v40 = vpop.f32.mrf.mxu0  ;;  %v9075_v51 = vpop.f32.mrf.mxu1 }
 0x136   : > { %v9071_v3 = vadd.f32 %v7396_v39, %v7362_v40 }
 0x137   : > { %v9073_v35 = vpop.f32.mrf.mxu0  ;;  %v7399_v54 = vpop.f32.mrf.mxu1  ;;  %7602 = vmatmul.mubr.msk.bf16.gmra.mxu1 %vm344_vm1, %v2493_v34 }
 0x139   : > { %v7365_v60 = vpop.f32.mrf.mxu0  ;;  %7568 = vmatmul.mubr.msk.bf16.gmra.mxu0 %vm344_vm1, %v2199_v55  ;;  %v960_v32 = vpop.f32.mrf.mxu1 }
 0x13a   : > { %7607 = vmatprep.mubr.msk.bf16.mxu0 %vm344_vm1, %v8796_v28  ;;  %v9081_v43 = vadd.f32 %v7399_v54, %v7365_v60 }
 0x13b   : > { %v748_v50 = vpop.f32.mrf.mxu0  ;;  %v7400_v46 = vpop.f32.mrf.mxu1 }
 0x13c   : > { %v9083_v52 = vadd.f32 %v960_v32, %v748_v50 }
 0x13d   : > { %v7366_v37 = vpop.f32.mrf.mxu0  ;;  %v9089_v12 = vpop.f32.mrf.mxu1 }
 0x13e   : > { %v9085_v56 = vadd.f32 %v7400_v46, %v7366_v37 }
 0x13f   : > { %v9087_v44 = vpop.f32.mrf.mxu0  ;;  %v7439_v55 = vpop.f32.mrf.mxu1 }
 0x141   : > { %v7405_v40 = vpop.f32.mrf.mxu0  ;;  %7608 = vmatmul.mubr.msk.bf16.vlgmr.msra.gmra.mxu0 %vm344_vm1, %v8820_v61  ;;  %v1404_v54 = vpop.f32.mrf.mxu1 }
 0x142   : > { %v1239_v28 = vadd.f32 %v7405_v40, %v8963_v11  ;;  %7611 = vmatprep.mubr.msk.bf16.mxu0 %vm344_vm1, %v8824_v45 }
 0x143   : > { %v1110_v39 = vpop.f32.mrf.mxu0  ;;  %v7440_v46 = vpop.f32.mrf.mxu1 }
 0x144   : > { %v1237_v34 = vadd.f32 %v1110_v39, %v8969_v4  ;;  %v9097_v60 = vadd.f32 %v7439_v55, %v1239_v28 }
 0x145   : > { %v7406_v50 = vpop.f32.mrf.mxu0  ;;  %v9107_v40 = vpop.f32.mrf.mxu1 }
 0x146   : > { %v1240_v32 = vadd.f32 %v7406_v50, %v8971_v2  ;;  %v9100_v37 = vadd.f32 %v1404_v54, %v1237_v34 }
 0x147   : > { %v1113_v36 = vpop.f32.mrf.mxu0  ;;  %v7443_v28 = vpop.f32.mrf.mxu1 }
 0x148   : > { %v9103_v61 = vadd.f32 %v1113_v36, %v8973_v10  ;;  %v9105_v11 = vadd.f32 %v7440_v46, %v1240_v32 }
 0x149   : > { %v7409_v45 = vpop.f32.mrf.mxu0  ;;  %7612 = vmatmul.mubr.msk.bf16.gmra.mxu0 %vm344_vm1, %v8834_v17  ;;  %v1420_v36 = vpop.f32.mrf.mxu1 }
 0x14a   : > { %v1243_v4 = vadd.f32 %v7409_v45, %v8981_v57  ;;  %7615 = vmatprep.mubr.msk.bf16.mxu0 %vm344_vm1, %v8836_v38 }
 0x14b   : > { %v1126_v2 = vpop.f32.mrf.mxu0  ;;  %v7444_v50 = vpop.f32.mrf.mxu1 }
 0x14c   : > { %v1241_v55 = vadd.f32 %v1126_v2, %v8985_v0  ;;  %v9115_v39 = vadd.f32 %v7443_v28, %v1243_v4  ;;  %v2756_v4 = vld [vmem:[#allocation2 + $0x149] sm:$0xff]  ;;  %v2757_v28 = vld [vmem:[#allocation2 + $0x151] sm:$0xff] }
 0x14d   : > { %v7410_v10 = vpop.f32.mrf.mxu0  ;;  %v9125_v46 = vpop.f32.mrf.mxu1 }
 0x14e   : > { %v1244_v34 = vadd.f32 %v7410_v10, %v8987_v33  ;;  %v9118_v54 = vadd.f32 %v1420_v36, %v1241_v55 }
 0x14f   : > { %v1129_v32 = vpop.f32.mrf.mxu0  ;;  %v7447_v45 = vpop.f32.mrf.mxu1 }
 0x150   : > { %v9121_v17 = vadd.f32 %v1129_v32, %v8989_v42  ;;  %v9123_v57 = vadd.f32 %v7444_v50, %v1244_v34  ;;  %v2780_v50 = vpack.c.bf16 %v2757_v28, %v2756_v4  ;;  %v2760_v4 = vld [vmem:[#allocation2 + $0x189] sm:$0xff]  ;;  %v2761_v28 = vld [vmem:[#allocation2 + $0x191] sm:$0xff] }
 0x151   : > { %v7413_v38 = vpop.f32.mrf.mxu0  ;;  %7616 = vmatmul.mubr.msk.bf16.gmra.mxu0 %vm344_vm1, %v8846_v41  ;;  %v1436_v55 = vpop.f32.mrf.mxu1 }
 0x152   : > { %v1247_v0 = vadd.f32 %v7413_v38, %v8997_v53  ;;  %7619 = vmatprep.mubr.msk.bf16.mxu0 %vm344_vm1, %v8848_v47 }
 0x153   : > { %v1142_v33 = vpop.f32.mrf.mxu0  ;;  %v7448_v41 = vpop.f32.mrf.mxu1 }
 0x154   : > { %v1245_v42 = vadd.f32 %v1142_v33, %v9001_v18  ;;  %v9133_v2 = vadd.f32 %v7447_v45, %v1247_v0  ;;  %v2759_v45 = vld [vmem:[#allocation2 + $0x171] sm:$0xff] }
 0x155   : > { %v7414_v36 = vpop.f32.mrf.mxu0  ;;  %v9143_v38 = vpop.f32.mrf.mxu1 }
 0x156   : > { %v1248_v10 = vadd.f32 %v7414_v36, %v9003_v22  ;;  %v9136_v34 = vadd.f32 %v1436_v55, %v1245_v42  ;;  %v2758_v22 = vld [vmem:[#allocation2 + $0x169] sm:$0xff] }
 0x157   : > { %v1145_v53 = vpop.f32.mrf.mxu0  ;;  %v7451_v0 = vpop.f32.mrf.mxu1 }
 0x158   : > { %v9139_v32 = vadd.f32 %v1145_v53, %v9005_v58  ;;  %v9141_v47 = vadd.f32 %v7448_v41, %v1248_v10  ;;  %v2781_v10 = vpack.c.bf16 %v2759_v45, %v2758_v22  ;;  %v2763_v22 = vld [vmem:[#allocation2 + $0x1b1] sm:$0xff] }
 0x159   : > { %v7417_v29 = vpop.f32.mrf.mxu0  ;;  %7620 = vmatmul.mubr.msk.bf16.gmra.mxu0 %vm344_vm1, %v8858_v23  ;;  %v1452_v55 = vpop.f32.mrf.mxu1 }
 0x15a   : > { %v1251_v18 = vadd.f32 %v7417_v29, %v9013_v19  ;;  %7623 = vmatprep.mubr.msk.bf16.mxu0 %vm344_vm1, %v2780_v50  ;;  %v2782_v19 = vpack.c.bf16 %v2761_v28, %v2760_v4  ;;  %v2765_v4 = vld [vmem:[#allocation2 + $0x1d1] sm:$0xff] }
 0x15b   : > { %v1158_v33 = vpop.f32.mrf.mxu0  ;;  %v7452_v29 = vpop.f32.mrf.mxu1 }
 0x15c   : > { %v1249_v58 = vadd.f32 %v1158_v33, %v9017_v21  ;;  %v9150_v42 = vadd.f32 %v7451_v0, %v1251_v18  ;;  %v2764_v33 = vld [vmem:[#allocation2 + $0x1c9] sm:$0xff] }
 0x15d   : > { %v7418_v36 = vpop.f32.mrf.mxu0  ;;  %v9160_v15 = vpop.f32.mrf.mxu1 }
 0x15e   : > { %v1252_v41 = vadd.f32 %v7418_v36, %v9019_v59  ;;  %v9153_v23 = vadd.f32 %v1452_v55, %v1249_v58  ;;  %v2762_v59 = vld [vmem:[#allocation2 + $0x1a9] sm:$0xff] }
 0x15f   : > { %v1161_v53 = vpop.f32.mrf.mxu0  ;;  %v7455_v0 = vpop.f32.mrf.mxu1  ;;  %v2783_v36 = vpack.c.bf16 %v2763_v22, %v2762_v59 }
 0x160   : > { %v9156_v50 = vadd.f32 %v1161_v53, %v9021_v24  ;;  %v9158_v30 = vadd.f32 %v7452_v29, %v1252_v41  ;;  %v2784_v29 = vpack.c.bf16 %v2765_v4, %v2764_v33 }
 0x161   : > { %v7421_v21 = vpop.f32.mrf.mxu0  ;;  %7624 = vmatmul.mubr.msk.bf16.gmra.mxu0 %vm344_vm1, %v2781_v10  ;;  %v1468_v58 = vpop.f32.mrf.mxu1 }
 0x162   : > { %v1255_v18 = vadd.f32 %v7421_v21, %v9029_v6  ;;  %7627 = vmatprep.mubr.msk.bf16.mxu0 %vm344_vm1, %v2782_v19 }
 0x163   : > { %v1174_v45 = vpop.f32.mrf.mxu0  ;;  %v7456_v6 = vpop.f32.mrf.mxu1 }
 0x164   : > { %v1253_v24 = vadd.f32 %v1174_v45, %v9033_v27  ;;  %v9166_v28 = vadd.f32 %v7455_v0, %v1255_v18  ;;  %v2766_v0 = vld [vmem:[#allocation2 + $0x1e9] sm:$0xff] }
 0x165   : > { %v7422_v55 = vpop.f32.mrf.mxu0  ;;  %v9175_v21 = vpop.f32.mrf.mxu1 }
 0x166   : > { %v1256_v41 = vadd.f32 %v7422_v55, %v9035_v5  ;;  %v9169_v10 = vadd.f32 %v1468_v58, %v1253_v24  ;;  %v2767_v5 = vld [vmem:[#allocation2 + $0x1f1] sm:$0xff] }
 0x167   : > { %v9171_v53 = vpop.f32.mrf.mxu0  ;;  %v7459_v18 = vpop.f32.mrf.mxu1  ;;  %v2785_v24 = vpack.c.bf16 %v2767_v5, %v2766_v0 }
 0x168   : > { %v9173_v19 = vadd.f32 %v7456_v6, %v1256_v41 }
 0x169   : > { %v7425_v16 = vpop.f32.mrf.mxu0  ;;  %7628 = vmatmul.mubr.msk.bf16.gmra.mxu0 %vm344_vm1, %v2783_v36  ;;  %v1484_v33 = vpop.f32.mrf.mxu1 }
 0x16a   : > { %v1259_v27 = vadd.f32 %v7425_v16, %v9047_v62  ;;  %7631 = vmatprep.mubr.msk.bf16.mxu0 %vm344_vm1, %v2784_v29 }
 0x16b   : > { %v1190_v59 = vpop.f32.mrf.mxu0  ;;  %v7460_v36 = vpop.f32.mrf.mxu1 }
 0x16c   : > { %v1257_v22 = vadd.f32 %v1190_v59, %v9051_v13  ;;  %v9181_v45 = vadd.f32 %v7459_v18, %v1259_v27  ;;  %v2770_v27 = vld [vmem:[#allocation2 + $0x229] sm:$0xff] }
 0x16d   : > { %v7426_v4 = vpop.f32.mrf.mxu0  ;;  %v9190_v62 = vpop.f32.mrf.mxu1 }
 0x16e   : > { %v1260_v58 = vadd.f32 %v7426_v4, %v9053_v26  ;;  %v9184_v55 = vadd.f32 %v1484_v33, %v1257_v22  ;;  %v2771_v26 = vld [vmem:[#allocation2 + $0x231] sm:$0xff] }
 0x16f   : > { %v9186_v41 = vpop.f32.mrf.mxu0  ;;  %v7463_v29 = vpop.f32.mrf.mxu1  ;;  %v2787_v33 = vpack.c.bf16 %v2771_v26, %v2770_v27 }
 0x170   : > { %v9188_v16 = vadd.f32 %v7460_v36, %v1260_v58 }
 0x171   : > { %v7429_v6 = vpop.f32.mrf.mxu0  ;;  %7632 = vmatmul.mubr.msk.bf16.gmra.mxu0 %vm344_vm1, %v2785_v24  ;;  %v1500_v59 = vpop.f32.mrf.mxu1 }
 0x172   : > { %v1263_v13 = vadd.f32 %v7429_v6, %v9065_v63  ;;  %7635 = vmatprep.mubr.msk.bf16.mxu0 %vm344_vm1, %v8948_v20 }
 0x173   : > { %v1206_v18 = vpop.f32.mrf.mxu0  ;;  %v7464_v24 = vpop.f32.mrf.mxu1 }
 0x174   : > { %v1261_v0 = vadd.f32 %v1206_v18, %v9069_v49  ;;  %v9197_v5 = vadd.f32 %v7463_v29, %v1263_v13  ;;  %v6694_v29 = vld [vmem:[%s11354_s4 + $0x2] sm:$0x3] }
 0x175   : > { %v7430_v22 = vpop.f32.mrf.mxu0  ;;  %v9206_v20 = vpop.f32.mrf.mxu1  ;;  %7954 = vmatprep.subr.msk.bf16.mxu1 %vm598_vm0, %v6694_v29  ;;  %v3516_v27 = vsel %vm598_vm0, %v6694_v29, 0 }
 0x176   : > { %v1264_v4 = vadd.f32 %v7430_v22, %v9071_v3  ;;  %v9200_v58 = vadd.f32 %v1500_v59, %v1261_v0  ;;  %7640 = vmatpush3.bf16.msra.mxu1 %v3516_v27 }
 0x177   : > { %v9202_v63 = vpop.f32.mrf.mxu0  ;;  %v7467_v13 = vpop.f32.mrf.mxu1 }
 0x178   : > { %v9204_v36 = vadd.f32 %v7464_v24, %v1264_v4 }
 0x179   : > { %v7433_v6 = vpop.f32.mrf.mxu0  ;;  %7636 = vmatmul.mubr.msk.bf16.gmra.mxu0 %vm344_vm1, %v2787_v33  ;;  %v1516_v0 = vpop.f32.mrf.mxu1 }
 0x17a   : > { %v1267_v49 = vadd.f32 %v7433_v6, %v9081_v43 }
 0x17b   : > { %v1222_v3 = vpop.f32.mrf.mxu0  ;;  %v7468_v33 = vpop.f32.mrf.mxu1 }
 0x17c   : > { %v1265_v26 = vadd.f32 %v1222_v3, %v9083_v52  ;;  %v9216_v18 = vadd.f32 %v7467_v13, %v1267_v49 }
 0x17d   : > { %v7434_v59 = vpop.f32.mrf.mxu0  ;;  %v9225_v6 = vpop.f32.mrf.mxu1 }
 0x17e   : > { %v1268_v22 = vadd.f32 %v7434_v59, %v9085_v56  ;;  %v9219_v43 = vadd.f32 %v1516_v0, %v1265_v26 }
 0x17f   : > { %v9221_v4 = vpop.f32.mrf.mxu0  ;;  %v9230_v52 = vpop.f32.mrf.mxu1 }
 0x180   : > { %v9223_v24 = vadd.f32 %v7468_v33, %v1268_v22 }
 0x181   : > { %v7473_v9 = vpop.f32.mrf.mxu0  ;;  %v9235_v56 = vpop.f32.mrf.mxu1 }
 0x182   : > { %v9228_v29 = vadd.f32 %v7473_v9, %v9097_v60 }
 0x183   : > { %v1698_v49 = vpop.f32.mrf.mxu0  ;;  %v9240_v26 = vpop.f32.mrf.mxu1 }
 0x184   : > { %v9233_v13 = vadd.f32 %v1698_v49, %v9100_v37 }
 0x185   : > { %v7474_v3 = vpop.f32.mrf.mxu0  ;;  %v9244_v59 = vpop.f32.mrf.mxu1 }
 0x186   : > { %v9238_v27 = vadd.f32 %v7474_v3, %v9105_v11 }
 0x187   : > { %v9242_v0 = vpop.f32.mrf.mxu0  ;;  %v9249_v22 = vpop.f32.mrf.mxu1 }
 0x188   : > { %11440 = vst [vmem:[#allocation19_spill] sm:$0xff] %v9249_v22 }
 0x189   : > { %v7477_v9 = vpop.f32.mrf.mxu0  ;;  %v9254_v49 = vpop.f32.mrf.mxu1 }
 0x18a   : > { %v9247_v60 = vadd.f32 %v7477_v9, %v9115_v39  ;;  %11441 = vst [vmem:[#allocation20_spill] sm:$0xff] %v9254_v49 }
 0x18b   : > { %v1714_v37 = vpop.f32.mrf.mxu0  ;;  %v9259_v14 = vpop.f32.mrf.mxu1 }
 0x18c   : > { %v9252_v33 = vadd.f32 %v1714_v37, %v9118_v54  ;;  %11443 = vst [vmem:[#allocation22_spill] sm:$0xff] %v9259_v14 }
 0x18d   : > { %v7478_v11 = vpop.f32.mrf.mxu0  ;;  %v9263_v8 = vpop.f32.mrf.mxu1 }
 0x18e   : > { %v9257_v3 = vadd.f32 %v7478_v11, %v9123_v57  ;;  %11444 = vst [vmem:[#allocation23_spill] sm:$0xff] %v9263_v8 }
 0x18f   : > { %v9261_v7 = vpop.f32.mrf.mxu0  ;;  %v9268_v22 = vpop.f32.mrf.mxu1 }
 0x190   : > { %11442 = vst [vmem:[#allocation21_spill] sm:$0xff] %v9257_v3  ;;  %11445 = vst [vmem:[#allocation24_spill] sm:$0xff] %v9268_v22 }
 0x191   : > { %v7481_v39 = vpop.f32.mrf.mxu0  ;;  %v9273_v49 = vpop.f32.mrf.mxu1 }
 0x192   : > { %v9266_v9 = vadd.f32 %v7481_v39, %v9133_v2  ;;  %11446 = vst [vmem:[#allocation25_spill] sm:$0xff] %v9273_v49 }
 0x193   : > { %v1730_v54 = vpop.f32.mrf.mxu0  ;;  %v9278_v14 = vpop.f32.mrf.mxu1 }
 0x194   : > { %v9271_v37 = vadd.f32 %v1730_v54, %v9136_v34  ;;  %11448 = vst [vmem:[#allocation27_spill] sm:$0xff] %v9278_v14 }
 0x195   : > { %v7482_v57 = vpop.f32.mrf.mxu0  ;;  %v9282_v8 = vpop.f32.mrf.mxu1 }
 0x196   : > { %v9276_v11 = vadd.f32 %v7482_v57, %v9141_v47  ;;  %11449 = vst [vmem:[#allocation28_spill] sm:$0xff] %v9282_v8 }
 0x197   : > { %v9280_v3 = vpop.f32.mrf.mxu0  ;;  %v9287_v22 = vpop.f32.mrf.mxu1 }
 0x198   : > { %11447 = vst [vmem:[#allocation26_spill] sm:$0xff] %v9276_v11  ;;  %11450 = vst [vmem:[#allocation29_spill] sm:$0xff] %v9287_v22 }
 0x199   : > { %v7485_v2 = vpop.f32.mrf.mxu0  ;;  %v9292_v49 = vpop.f32.mrf.mxu1 }
 0x19a   : > { %v9285_v39 = vadd.f32 %v7485_v2, %v9150_v42  ;;  %11451 = vst [vmem:[#allocation30_spill] sm:$0xff] %v9292_v49 }
 0x19b   : > { %v1746_v34 = vpop.f32.mrf.mxu0  ;;  %v9297_v14 = vpop.f32.mrf.mxu1 }
 0x19c   : > { %v9290_v54 = vadd.f32 %v1746_v34, %v9153_v23  ;;  %11453 = vst [vmem:[#allocation32_spill] sm:$0xff] %v9297_v14 }
 0x19d   : > { %v7486_v47 = vpop.f32.mrf.mxu0  ;;  %v9301_v8 = vpop.f32.mrf.mxu1 }
 0x19e   : > { %v9295_v57 = vadd.f32 %v7486_v47, %v9158_v30  ;;  %11454 = vst [vmem:[#allocation33_spill] sm:$0xff] %v9301_v8 }
 0x19f   : > { %v9299_v11 = vpop.f32.mrf.mxu0  ;;  %v9306_v22 = vpop.f32.mrf.mxu1 }
 0x1a0   : > { %11452 = vst [vmem:[#allocation31_spill] sm:$0xff] %v9295_v57  ;;  %11455 = vst [vmem:[#allocation34_spill] sm:$0xff] %v9306_v22 }
 0x1a1   : > { %v7489_v42 = vpop.f32.mrf.mxu0  ;;  %v9311_v49 = vpop.f32.mrf.mxu1 }
 0x1a2   : > { %v9304_v2 = vadd.f32 %v7489_v42, %v9166_v28  ;;  %11456 = vst [vmem:[#allocation35_spill] sm:$0xff] %v9311_v49 }
 0x1a3   : > { %v1762_v23 = vpop.f32.mrf.mxu0  ;;  %v9316_v14 = vpop.f32.mrf.mxu1 }
 0x1a4   : > { %v9309_v34 = vadd.f32 %v1762_v23, %v9169_v10  ;;  %11458 = vst [vmem:[#allocation37_spill] sm:$0xff] %v9316_v14 }
 0x1a5   : > { %v7490_v30 = vpop.f32.mrf.mxu0  ;;  %v9320_v8 = vpop.f32.mrf.mxu1 }
 0x1a6   : > { %v9314_v47 = vadd.f32 %v7490_v30, %v9173_v19  ;;  %11459 = vst [vmem:[#allocation38_spill] sm:$0xff] %v9320_v8 }
 0x1a7   : > { %v9318_v57 = vpop.f32.mrf.mxu0  ;;  %v9325_v22 = vpop.f32.mrf.mxu1 }
 0x1a8   : > { %11457 = vst [vmem:[#allocation36_spill] sm:$0xff] %v9314_v47  ;;  %11460 = vst [vmem:[#allocation39_spill] sm:$0xff] %v9325_v22 }
 0x1a9   : > { %v7493_v28 = vpop.f32.mrf.mxu0  ;;  %v9330_v49 = vpop.f32.mrf.mxu1 }
 0x1aa   : > { %v9323_v42 = vadd.f32 %v7493_v28, %v9181_v45  ;;  %11462 = vst [vmem:[#allocation41_spill] sm:$0xff] %v9330_v49 }
 0x1ab   : > { %v1778_v10 = vpop.f32.mrf.mxu0  ;;  %v9335_v14 = vpop.f32.mrf.mxu1 }
 0x1ac   : > { %v9328_v23 = vadd.f32 %v1778_v10, %v9184_v55  ;;  %11464 = vst [vmem:[#allocation43_spill] sm:$0xff] %v9335_v14 }
 0x1ad   : > { %v7494_v19 = vpop.f32.mrf.mxu0  ;;  %v9339_v8 = vpop.f32.mrf.mxu1 }
 0x1ae   : > { %11461 = vst [vmem:[#allocation40_spill] sm:$0xff] %v9328_v23  ;;  %v9333_v30 = vadd.f32 %v7494_v19, %v9188_v16  ;;  %11465 = vst [vmem:[#allocation44_spill] sm:$0xff] %v9339_v8 }
 0x1af   : > { %v9337_v47 = vpop.f32.mrf.mxu0  ;;  %v9344_v22 = vpop.f32.mrf.mxu1 }
 0x1b0   : > { %11463 = vst [vmem:[#allocation42_spill] sm:$0xff] %v9333_v30  ;;  %11467 = vst [vmem:[#allocation46_spill] sm:$0xff] %v9344_v22 }
 0x1b1   : > { %v7497_v45 = vpop.f32.mrf.mxu0  ;;  %v9349_v49 = vpop.f32.mrf.mxu1 }
 0x1b2   : > { %v9342_v28 = vadd.f32 %v7497_v45, %v9197_v5  ;;  %11469 = vst [vmem:[#allocation48_spill] sm:$0xff] %v9349_v49  ;;  %v3416_v5 = vld [vmem:[%s11354_s4] sm:$0x3]  ;;  %v3418_v49 = vld [vmem:[#allocation2 + $0x10] sm:$0xff] }
 0x1b3   : > { %v1794_v55 = vpop.f32.mrf.mxu0  ;;  %v9354_v14 = vpop.f32.mrf.mxu1  ;;  %7955 = vmatprep.subr.msk.bf16.mxu0 %vm598_vm0, %v3416_v5 }
 0x1b4   : > { %11466 = vst [vmem:[#allocation45_spill] sm:$0xff] %v9342_v28  ;;  %v9347_v10 = vadd.f32 %v1794_v55, %v9200_v58  ;;  %11471 = vst [vmem:[#allocation50_spill] sm:$0xff] %v9354_v14  ;;  %v3728_v58 = vsel %vm598_vm0, %v3416_v5, 0  ;;  %v3417_v55 = vld [vmem:[#allocation2 + $0x8] sm:$0xff] }
 0x1b5   : > { %v7498_v16 = vpop.f32.mrf.mxu0  ;;  %v9358_v8 = vpop.f32.mrf.mxu1  ;;  %7674 = vmatpush3.bf16.msra.mxu0 %v3728_v58  ;;  %v3449_v14 = vpack.c.bf16 %v3418_v49, %v3417_v55 }
 0x1b6   : > { %11468 = vst [vmem:[#allocation47_spill] sm:$0xff] %v9347_v10  ;;  %v9352_v19 = vadd.f32 %v7498_v16, %v9204_v36  ;;  %11472 = vst [vmem:[#allocation51_spill] sm:$0xff] %v9358_v8  ;;  %v3368_v10 = vld [vmem:[#allocation2 + $0x7] sm:$0xff]  ;;  %v3369_v8 = vld [vmem:[#allocation2 + $0xf] sm:$0xff] }
 0x1b7   : > { %v9356_v30 = vpop.f32.mrf.mxu0  ;;  %v9368_v16 = vpop.f32.mrf.mxu1  ;;  %v3400_v22 = vpack.c.bf16 %v3369_v8, %v3368_v10  ;;  %7641 = vmatprep.mubr.msk.bf16.mxu1 %vm344_vm1, %v3449_v14 }
 0x1b8   : > { %11470 = vst [vmem:[#allocation49_spill] sm:$0xff] %v9352_v19  ;;  %11474 = vst [vmem:[#allocation53_spill] sm:$0xff] %v9368_v16 }
 0x1b9   : > { %v7501_v45 = vpop.f32.mrf.mxu0  ;;  %v9373_v23 = vpop.f32.mrf.mxu1  ;;  %7675 = vmatprep.mubr.msk.bf16.mxu0 %vm344_vm1, %v3400_v22 }
 0x1ba   : > { %v9366_v36 = vadd.f32 %v7501_v45, %v9216_v18  ;;  %11476 = vst [vmem:[#allocation55_spill] sm:$0xff] %v9373_v23 }
 0x1bb   : > { %v1810_v19 = vpop.f32.mrf.mxu0  ;;  %v9380_v45 = vpop.f32.mrf.mxu1 }
 0x1bc   : > { %11473 = vst [vmem:[#allocation52_spill] sm:$0xff] %v9366_v36  ;;  %v9371_v28 = vadd.f32 %v1810_v19, %v9219_v43  ;;  %11478 = vst [vmem:[#allocation57_spill] sm:$0xff] %v9380_v45 }
 0x1bd   : > { %v7502_v5 = vpop.f32.mrf.mxu0  ;;  %v9384_v49 = vpop.f32.mrf.mxu1 }
 0x1be   : > { %11475 = vst [vmem:[#allocation54_spill] sm:$0xff] %v9371_v28  ;;  %v9378_v18 = vadd.f32 %v7502_v5, %v9223_v24  ;;  %11479 = vst [vmem:[#allocation58_spill] sm:$0xff] %v9384_v49 }
 0x1bf   : > { %v9382_v58 = vpop.f32.mrf.mxu0  ;;  %v9388_v43 = vpop.f32.mrf.mxu1 }
 0x1c0   : > { %11477 = vst [vmem:[#allocation56_spill] sm:$0xff] %v9378_v18  ;;  %11480 = vst [vmem:[#allocation59_spill] sm:$0xff] %v9388_v43 }
 0x1c1   : > { %v9386_v8 = vpop.f32.mrf.mxu0  ;;  %v9392_v19 = vpop.f32.mrf.mxu1 }
 0x1c2   : > { %11481 = vst [vmem:[#allocation60_spill] sm:$0xff] %v9392_v19 }
 0x1c3   : > { %v9390_v10 = vpop.f32.mrf.mxu0  ;;  %v9396_v22 = vpop.f32.mrf.mxu1 }
 0x1c4   : > { %11482 = vst [vmem:[#allocation61_spill] sm:$0xff] %v9396_v22 }
 0x1c5   : > { %v9394_v14 = vpop.f32.mrf.mxu0  ;;  %v9400_v55 = vpop.f32.mrf.mxu1 }
 0x1c6   : > { %11483 = vst [vmem:[#allocation62_spill] sm:$0xff] %v9400_v55 }
 0x1c7   : > { %v9398_v24 = vpop.f32.mrf.mxu0  ;;  %v9404_v45 = vpop.f32.mrf.mxu1 }
 0x1c8   : > { %11484 = vst [vmem:[#allocation63_spill] sm:$0xff] %v9404_v45 }
 0x1c9   : > { %v9402_v5 = vpop.f32.mrf.mxu0  ;;  %v9408_v18 = vpop.f32.mrf.mxu1 }
 0x1ca   : > { %11486 = vst [vmem:[#allocation65_spill] sm:$0xff] %v9408_v18 }
 0x1cb   : > { %v9406_v49 = vpop.f32.mrf.mxu0  ;;  %v9412_v23 = vpop.f32.mrf.mxu1 }
 0x1cc   : > { %11485 = vst [vmem:[#allocation64_spill] sm:$0xff] %v9406_v49  ;;  %11488 = vst [vmem:[#allocation67_spill] sm:$0xff] %v9412_v23 }
 0x1cd   : > { %v9410_v43 = vpop.f32.mrf.mxu0  ;;  %v9416_v28 = vpop.f32.mrf.mxu1 }
 0x1ce   : > { %11487 = vst [vmem:[#allocation66_spill] sm:$0xff] %v9410_v43  ;;  %11490 = vst [vmem:[#allocation69_spill] sm:$0xff] %v9416_v28 }
 0x1cf   : > { %v9414_v19 = vpop.f32.mrf.mxu0  ;;  %v9420_v16 = vpop.f32.mrf.mxu1 }
 0x1d0   : > { %11489 = vst [vmem:[#allocation68_spill] sm:$0xff] %v9414_v19  ;;  %11492 = vst [vmem:[#allocation71_spill] sm:$0xff] %v9420_v16 }
 0x1d1   : > { %v9418_v22 = vpop.f32.mrf.mxu0  ;;  %v9424_v36 = vpop.f32.mrf.mxu1 }
 0x1d2   : > { %11491 = vst [vmem:[#allocation70_spill] sm:$0xff] %v9418_v22  ;;  %11494 = vst [vmem:[#allocation73_spill] sm:$0xff] %v9424_v36 }
 0x1d3   : > { %v9422_v55 = vpop.f32.mrf.mxu0  ;;  %v9428_v49 = vpop.f32.mrf.mxu1 }
 0x1d4   : > { %11493 = vst [vmem:[#allocation72_spill] sm:$0xff] %v9422_v55  ;;  %11496 = vst [vmem:[#allocation75_spill] sm:$0xff] %v9428_v49 }
 0x1d5   : > { %v9426_v45 = vpop.f32.mrf.mxu0  ;;  %v9432_v43 = vpop.f32.mrf.mxu1 }
 0x1d6   : > { %11495 = vst [vmem:[#allocation74_spill] sm:$0xff] %v9426_v45  ;;  %11498 = vst [vmem:[#allocation77_spill] sm:$0xff] %v9432_v43  ;;  %v9457_v43 = vld [vmem:[%s11354_s4 + $0x4] sm:$0x3] }
 0x1d7   : > { %v9430_v18 = vpop.f32.mrf.mxu0  ;;  %v9438_v28 = vpop.f32.mrf.mxu1  ;;  %11507 = vst [vmem:[#allocation86_spill] sm:$0xff] %v9457_v43  ;;  %7956 = vmatprep.subr.msk.bf16.mxu1 %vm598_vm0, %v9457_v43  ;;  %v948_v43 = vadd.f32 %v9075_v51, %v9073_v35 }
 0x1d8   : > { %11497 = vst [vmem:[#allocation76_spill] sm:$0xff] %v9430_v18  ;;  %11499 = vst [vmem:[#allocation78_spill] sm:$0xff] %v9438_v28 }
 0x1d9   : > { %v9434_v23 = vpop.f32.mrf.mxu0  ;;  %v9444_v55 = vpop.f32.mrf.mxu1 }
 0x1da   : > { %11502 = vst [vmem:[#allocation81_spill] sm:$0xff] %v9444_v55 }
 0x1db   : > { %v9436_v19 = vpop.f32.mrf.mxu0  ;;  %v9450_v49 = vpop.f32.mrf.mxu1 }
 0x1dc   : > { %11505 = vst [vmem:[#allocation84_spill] sm:$0xff] %v9450_v49 }
 0x1dd   : > { %v9440_v22 = vpop.f32.mrf.mxu0 }
 0x1de   : > { %11500 = vst [vmem:[#allocation79_spill] sm:$0xff] %v9440_v22  ;;  %v932_v22 = vadd.f32 %v9057_v1, %v9055_v48  ;;  %v1536_v48 = vadd.f32 %v9125_v46, %v9121_v17 }
 0x1df   : > { %v9442_v16 = vpop.f32.mrf.mxu0 }
 0x1e0   : > { %11501 = vst [vmem:[#allocation80_spill] sm:$0xff] %v9442_v16  ;;  %v9463_v16 = vpop.f32.mrf.mxu1 }
 0x1e1   : > { %v9446_v36 = vpop.f32.mrf.mxu0  ;;  %11509 = vst [vmem:[#allocation88_spill] sm:$0xff] %v9463_v16 }
 0x1e2   : > { %11503 = vst [vmem:[#allocation82_spill] sm:$0xff] %v9446_v36 }
 0x1e3   : > { %v9448_v45 = vpop.f32.mrf.mxu0 }
 0x1e4   : > { %11504 = vst [vmem:[#allocation83_spill] sm:$0xff] %v9448_v45  ;;  %v9469_v45 = vpop.f32.mrf.mxu1 }
 0x1e5   : > { %v9452_v18 = vpop.f32.mrf.mxu0 }
 0x1e6   : > { %11506 = vst [vmem:[#allocation85_spill] sm:$0xff] %v9452_v18  ;;  %v916_v18 = vadd.f32 %v9039_v31, %v9037_v25  ;;  %v1262_v25 = vadd.f32 %v9202_v63, %v948_v43  ;;  %v9488_v31 = vpop.f32.mrf.mxu1 }
 0x1e7   : > { %v9461_v28 = vpop.f32.mrf.mxu0 }
 0x1e8   : > { %11508 = vst [vmem:[#allocation87_spill] sm:$0xff] %v9461_v28  ;;  %v964_v28 = vadd.f32 %v9089_v12, %v9087_v44  ;;  %v1540_v44 = vadd.f32 %v9143_v38, %v9139_v32  ;;  %v1830_v12 = vadd.f32 %v9261_v7, %v1536_v48  ;;  %v1556_v46 = vadd.f32 %v9206_v20, %v1262_v25  ;;  %v11523_v25 = vld [vmem:[#allocation29_spill] sm:$0xff]  ;;  %v11524_v48 = vld [vmem:[#allocation30_spill] sm:$0xff] }
 0x1e9   : > { %v9465_v55 = vpop.f32.mrf.mxu0  ;;  %v2121_v32 = vadd.f32 %v9230_v52, %v9228_v29  ;;  %v2119_v7 = vadd.f32 %v9235_v56, %v9233_v13  ;;  %v11515_v52 = vld [vmem:[#allocation21_spill] sm:$0xff]  ;;  %v11517_v56 = vld [vmem:[#allocation23_spill] sm:$0xff] }
 0x1ea   : > { %11510 = vst [vmem:[#allocation89_spill] sm:$0xff] %v9465_v55  ;;  %v1254_v55 = vadd.f32 %v9171_v53, %v916_v18  ;;  %v1266_v1 = vadd.f32 %v9221_v4, %v964_v28  ;;  %v1834_v38 = vadd.f32 %v9280_v3, %v1540_v44  ;;  %v2124_v3 = vadd.f32 %v11517_v56, %v1830_v12  ;;  %v11520_v18 = vld [vmem:[#allocation26_spill] sm:$0xff] }
 0x1eb   : > { %v9467_v36 = vpop.f32.mrf.mxu0 }
 0x1ec   : > { %11511 = vst [vmem:[#allocation90_spill] sm:$0xff] %v9467_v36  ;;  %v1532_v36 = vadd.f32 %v9107_v40, %v9103_v61  ;;  %v1544_v40 = vadd.f32 %v9160_v15, %v9156_v50  ;;  %v1548_v53 = vadd.f32 %v9175_v21, %v1254_v55  ;;  %v1560_v63 = vadd.f32 %v9225_v6, %v1266_v1  ;;  %v11513_v21 = vld [vmem:[#allocation19_spill] sm:$0xff]  ;;  %v11514_v6 = vld [vmem:[#allocation20_spill] sm:$0xff] }
 0x1ed   : > { %v9471_v49 = vpop.f32.mrf.mxu0  ;;  %v2122_v15 = vadd.f32 %v9240_v26, %v9238_v27  ;;  %v2123_v29 = vadd.f32 %v11514_v6, %v9252_v33  ;;  %v11518_v27 = vld [vmem:[#allocation24_spill] sm:$0xff]  ;;  %v11525_v1 = vld [vmem:[#allocation31_spill] sm:$0xff]  ;;  %v11531_v6 = vld [vmem:[#allocation37_spill] sm:$0xff] }
 0x1ee   : > { %11512 = vst [vmem:[#allocation91_spill] sm:$0xff] %v9471_v49  ;;  %v1258_v49 = vadd.f32 %v9186_v41, %v932_v22  ;;  %v1826_v51 = vadd.f32 %v9242_v0, %v1532_v36  ;;  %v9506_v41 = vpop.f32.mrf.mxu1  ;;  %v1838_v20 = vadd.f32 %v9299_v11, %v1544_v40  ;;  %v11516_v0 = vld [vmem:[#allocation22_spill] sm:$0xff]  ;;  %v1842_v28 = vadd.f32 %v9318_v57, %v1548_v53  ;;  %v11521_v11 = vld [vmem:[#allocation27_spill] sm:$0xff]  ;;  %v11522_v57 = vld [vmem:[#allocation28_spill] sm:$0xff] }
 0x1ef   : > { %v9481_v16 = vpop.f32.mrf.mxu0  ;;  %v2126_v13 = vadd.f32 %v11516_v0, %v11515_v52  ;;  %v2129_v26 = vadd.f32 %v11518_v27, %v9266_v9  ;;  %v9542_v22 = vld [vmem:[%s11354_s4 + $0x6] sm:$0x3]  ;;  %v2128_v55 = vadd.f32 %v11522_v57, %v1834_v38  ;;  %v2133_v9 = vadd.f32 %v11523_v25, %v9285_v39  ;;  %v11528_v53 = vld [vmem:[#allocation34_spill] sm:$0xff] }
 0x1f0   : > { %v1552_v17 = vadd.f32 %v9190_v62, %v1258_v49  ;;  %v2120_v50 = vadd.f32 %v9244_v59, %v1826_v51  ;;  %v2125_v62 = vadd.f32 %v11513_v21, %v9247_v60  ;;  %v11519_v59 = vld [vmem:[#allocation25_spill] sm:$0xff]  ;;  %v2130_v49 = vadd.f32 %v11521_v11, %v11520_v18  ;;  %v9537_v43 = vpop.f32.mrf.mxu1  ;;  %v11526_v51 = vld [vmem:[#allocation32_spill] sm:$0xff]  ;;  %7957 = vmatprep.subr.msk.bf16.mxu0 %vm598_vm0, %v9542_v22  ;;  %v11529_v38 = vld [vmem:[#allocation35_spill] sm:$0xff] }
 0x1f1   : > { %v9493_v35 = vpop.f32.mrf.mxu0  ;;  %v2127_v60 = vadd.f32 %v11519_v59, %v9271_v37  ;;  %v2131_v37 = vadd.f32 %v11524_v48, %v9290_v54  ;;  %v2134_v44 = vadd.f32 %v11526_v51, %v11525_v1  ;;  %v9562_v39 = vadd.f32 %v11529_v38, %v9309_v34  ;;  %v11530_v21 = vld [vmem:[#allocation36_spill] sm:$0xff]  ;;  %v11532_v0 = vld [vmem:[#allocation38_spill] sm:$0xff]  ;;  %v11533_v27 = vld [vmem:[#allocation39_spill] sm:$0xff] }
 0x1f2   : > { %v1846_v33 = vadd.f32 %v9337_v47, %v1552_v17  ;;  %v11527_v47 = vld [vmem:[#allocation33_spill] sm:$0xff]  ;;  %v9558_v17 = vadd.f32 %v11528_v53, %v9304_v2  ;;  %v1850_v54 = vadd.f32 %v9356_v30, %v1556_v46  ;;  %v9567_v52 = vadd.f32 %v11531_v6, %v11530_v21  ;;  %v11534_v59 = vld [vmem:[#allocation40_spill] sm:$0xff]  ;;  %v11536_v34 = vld [vmem:[#allocation42_spill] sm:$0xff]  ;;  %v9591_v1 = vpop.f32.mrf.mxu1 }
 0x1f3   : > { %v9499_v61 = vpop.f32.mrf.mxu0  ;;  %v2132_v40 = vadd.f32 %v11527_v47, %v1838_v20  ;;  %v9570_v56 = vadd.f32 %v11532_v0, %v1842_v28  ;;  %v9574_v20 = vadd.f32 %v11533_v27, %v9323_v42  ;;  %v11535_v2 = vld [vmem:[#allocation41_spill] sm:$0xff]  ;;  %v11537_v57 = vld [vmem:[#allocation43_spill] sm:$0xff]  ;;  %v11538_v46 = vld [vmem:[#allocation44_spill] sm:$0xff]  ;;  %v1854_v28 = vadd.f32 %v9382_v58, %v1560_v63 }
 0x1f4   : > { %v9578_v18 = vadd.f32 %v11535_v2, %v11534_v59  ;;  %v9584_v30 = vadd.f32 %v11537_v57, %v11536_v34  ;;  %v9587_v25 = vadd.f32 %v11538_v46, %v1846_v33  ;;  %v2416_v48 = vadd.f32 %v9386_v8, %v2121_v32  ;;  %v11539_v42 = vld [vmem:[#allocation45_spill] sm:$0xff]  ;;  %v11540_v51 = vld [vmem:[#allocation46_spill] sm:$0xff]  ;;  %v11541_v53 = vld [vmem:[#allocation47_spill] sm:$0xff] }
 0x1f5   : > { %v9514_v4 = vpop.f32.mrf.mxu0  ;;  %v9595_v47 = vadd.f32 %v11540_v51, %v11539_v42  ;;  %v11542_v38 = vld [vmem:[#allocation48_spill] sm:$0xff]  ;;  %v2414_v6 = vadd.f32 %v9390_v10, %v2119_v7  ;;  %v2417_v0 = vadd.f32 %v9394_v14, %v2122_v15  ;;  %v11544_v27 = vld [vmem:[#allocation49_spill] sm:$0xff]  ;;  %v11545_v58 = vld [vmem:[#allocation50_spill] sm:$0xff]  ;;  %v2415_v59 = vadd.f32 %v9398_v24, %v2120_v50 }
 0x1f6   : > { %v9599_v21 = vadd.f32 %v11542_v38, %v11541_v53  ;;  %v9607_v63 = vadd.f32 %v11545_v58, %v11544_v27  ;;  %v11546_v8 = vld [vmem:[#allocation51_spill] sm:$0xff]  ;;  %v2420_v2 = vadd.f32 %v9402_v5, %v2125_v62  ;;  %v11547_v34 = vld [vmem:[#allocation52_spill] sm:$0xff]  ;;  %v11548_v57 = vld [vmem:[#allocation53_spill] sm:$0xff] }
 0x1f7   : > { %v9528_v36 = vpop.f32.mrf.mxu0  ;;  %v9610_v32 = vadd.f32 %v11546_v8, %v1850_v54  ;;  %v9616_v46 = vadd.f32 %v11548_v57, %v11547_v34  ;;  %v11549_v10 = vld [vmem:[#allocation54_spill] sm:$0xff]  ;;  %v11550_v7 = vld [vmem:[#allocation55_spill] sm:$0xff]  ;;  %v11551_v15 = vld [vmem:[#allocation56_spill] sm:$0xff]  ;;  %v9635_v57 = vpop.f32.mrf.mxu1 }
 0x1f8   : > { %v9620_v14 = vadd.f32 %v11550_v7, %v11549_v10  ;;  %v11552_v42 = vld [vmem:[#allocation57_spill] sm:$0xff]  ;;  %v11554_v53 = vld [vmem:[#allocation64_spill] sm:$0xff]  ;;  %v11556_v27 = vld [vmem:[#allocation58_spill] sm:$0xff] }
 0x1f9   : > { %v9551_v12 = vpop.f32.mrf.mxu0  ;;  %v9624_v51 = vadd.f32 %v11552_v42, %v11551_v15  ;;  %v2418_v38 = vadd.f32 %v11554_v53, %v2123_v29  ;;  %v9630_v24 = vadd.f32 %v11556_v27, %v1854_v28  ;;  %v11558_v5 = vld [vmem:[#allocation59_spill] sm:$0xff]  ;;  %v11559_v62 = vld [vmem:[#allocation66_spill] sm:$0xff]  ;;  %v11560_v8 = vld [vmem:[#allocation68_spill] sm:$0xff] }
 0x1fa   : > { %v2710_v50 = vadd.f32 %v11558_v5, %v2416_v48  ;;  %v2421_v58 = vadd.f32 %v11559_v62, %v2126_v13  ;;  %v2419_v34 = vadd.f32 %v11560_v8, %v2124_v3  ;;  %v11561_v10 = vld [vmem:[#allocation60_spill] sm:$0xff]  ;;  %v11563_v42 = vld [vmem:[#allocation70_spill] sm:$0xff]  ;;  %v9644_v28 = vld [vmem:[%s11352_s2] ss:$0 sm:$0xff] }
 0x1fb   : > { %v9580_v11 = vpop.f32.mrf.mxu0  ;;  %11553 = vst [vmem:[#allocation20_spill] sm:$0xff] %v9624_v51  ;;  %11557 = vst [vmem:[#allocation22_spill] sm:$0xff] %v9630_v24  ;;  %v2708_v7 = vadd.f32 %v11561_v10, %v2414_v6  ;;  %v2424_v51 = vadd.f32 %v11563_v42, %v2129_v26  ;;  %v11564_v29 = vld [vmem:[#allocation72_spill] sm:$0xff]  ;;  %v11565_v48 = vld [vmem:[#allocation62_spill] sm:$0xff]  ;;  %v2428_v26 = vadd.f32 %v9434_v23, %v2133_v9 }
 0x1fc   : > { %v2422_v53 = vadd.f32 %v11564_v29, %v2127_v60  ;;  %v2709_v13 = vadd.f32 %v11565_v48, %v2415_v59  ;;  %v11566_v27 = vld [vmem:[#allocation63_spill] sm:$0xff]  ;;  %v11567_v5 = vld [vmem:[#allocation74_spill] sm:$0xff]  ;;  %v11568_v6 = vld [vmem:[#allocation65_spill] sm:$0xff]  ;;  %v2426_v60 = vadd.f32 %v9436_v19, %v2131_v37 }
 0x1fd   : > { %v9603_v33 = vpop.f32.mrf.mxu0  ;;  %v2714_v3 = vadd.f32 %v11566_v27, %v2420_v2  ;;  %v2425_v62 = vadd.f32 %v11567_v5, %v2130_v49  ;;  %v2712_v10 = vadd.f32 %v11568_v6, %v2418_v38  ;;  %v9656_v42 = vld [vmem:[%s11353_s3] ss:$0 sm:$0xff]  ;;  %v11571_v2 = vld [vmem:[#allocation69_spill] sm:$0xff]  ;;  %v9660_v49 = vpop.f32.mrf.mxu1  ;;  %v11575_v5 = vld [vmem:[#allocation80_spill] sm:$0xff] }
 0x1fe   : > { %11543 = vst [vmem:[#allocation19_spill] sm:$0xff] %v9603_v33  ;;  %v11562_v33 = vld [vmem:[#allocation61_spill] sm:$0xff]  ;;  %v11570_v59 = vld [vmem:[#allocation67_spill] sm:$0xff]  ;;  %v2713_v27 = vadd.f32 %v11571_v2, %v2419_v34  ;;  %v2427_v6 = vadd.f32 %v11575_v5, %v2132_v40  ;;  %v11580_v40 = vld [vmem:[#allocation82_spill] sm:$0xff] }
 0x1ff   : > { %v9627_v54 = vpop.f32.mrf.mxu0  ;;  %v2711_v15 = vadd.f32 %v11562_v33, %v2417_v0  ;;  %v11569_v0 = vld [vmem:[#allocation76_spill] sm:$0xff]  ;;  %v2715_v48 = vadd.f32 %v11570_v59, %v2421_v58  ;;  %v11573_v23 = vld [vmem:[#allocation73_spill] sm:$0xff]  ;;  %v11574_v9 = vld [vmem:[#allocation79_spill] sm:$0xff] }
 0x200   : > { %11555 = vst [vmem:[#allocation21_spill] sm:$0xff] %v9627_v54  ;;  %v2423_v33 = vadd.f32 %v11569_v0, %v2128_v55  ;;  %v11572_v55 = vld [vmem:[#allocation71_spill] sm:$0xff]  ;;  %v9667_v19 = vadd.f32 %v11573_v23, %v2422_v53  ;;  %v2429_v37 = vadd.f32 %v11574_v9, %v2134_v44  ;;  %v11578_v59 = vld [vmem:[#allocation78_spill] sm:$0xff]  ;;  %v11579_v2 = vld [vmem:[#allocation81_spill] sm:$0xff] }
 0x201   : > { %v7609_v54 = vpop.f32.mrf.mxu0  ;;  %v11576_v24 = vld [vmem:[#allocation75_spill] sm:$0xff]  ;;  %v9682_v53 = vadd.f32 %v11578_v59, %v2428_v26  ;;  %v9685_v44 = vadd.f32 %v11579_v2, %v2426_v60  ;;  %v11581_v23 = vld [vmem:[#allocation84_spill] sm:$0xff] }
 0x202   : > { %v3004_v8 = vadd.f32 %v7609_v54, %v2710_v50  ;;  %v9664_v50 = vadd.f32 %v11572_v55, %v2424_v51  ;;  %v9672_v58 = vadd.f32 %v11576_v24, %v2425_v62  ;;  %v2432_v55 = vadd.f32 %v11580_v40, %v9558_v17  ;;  %v9689_v62 = vpop.f32.mrf.mxu1  ;;  %v11582_v9 = vld [vmem:[#allocation88_spill] sm:$0xff]  ;;  %v11583_v5 = vld [vmem:[#allocation83_spill] sm:$0xff] }
 0x203   : > { %v2875_v29 = vpop.f32.mrf.mxu0  ;;  %v9697_v26 = vadd.f32 %v11581_v23, %v2429_v37  ;;  %v9700_v60 = vadd.f32 %v11582_v9, %v2427_v6  ;;  %v2430_v17 = vadd.f32 %v11583_v5, %v9562_v39  ;;  %v11585_v6 = vld [vmem:[#allocation87_spill] sm:$0xff]  ;;  %v11586_v39 = vld [vmem:[#allocation89_spill] sm:$0xff] }
 0x204   : > { %v3043_v38 = vmul.f32 %v9644_v28, %v3004_v8  ;;  %v3002_v54 = vadd.f32 %v2875_v29, %v2708_v7  ;;  %v11577_v29 = vld [vmem:[#allocation77_spill] sm:$0xff]  ;;  %v9712_v37 = vadd.f32 %v9469_v45, %v2432_v55  ;;  %v2436_v40 = vadd.f32 %v11586_v39, %v9574_v20  ;;  %v7599_v23 = vpop.f32.mrf.mxu1  ;;  %v11587_v20 = vld [vmem:[#allocation86_spill] sm:$0xff] }
 0x205   : > { %v7610_v0 = vpop.f32.mrf.mxu0  ;;  %v9679_v51 = vadd.f32 %v11577_v29, %v2423_v33 }
 0x206   : > { %v9675_v34 = vadd.f32 %v9656_v42, %v3043_v38  ;;  %v3041_v8 = vmul.f32 %v9644_v28, %v3002_v54  ;;  %v3005_v7 = vadd.f32 %v7610_v0, %v2711_v15  ;;  %v11584_v0 = vld [vmem:[#allocation85_spill] sm:$0xff] }
 0x207   : > { %v2878_v24 = vpop.f32.mrf.mxu0  ;;  %v2433_v29 = vadd.f32 %v11584_v0, %v9567_v52 }
 0x208   : > { %v6664_v38 = vmul.f32 -1.442695, %v9675_v34  ;;  %v9693_v54 = vadd.f32 %v9656_v42, %v3041_v8  ;;  %v3044_v15 = vmul.f32 %v9644_v28, %v3005_v7  ;;  %v3003_v33 = vadd.f32 %v2878_v24, %v2709_v13 }
 0x209   : > { %v7613_v59 = vpop.f32.mrf.mxu0  ;;  %v2431_v7 = vadd.f32 %v11585_v6, %v9570_v56  ;;  %v9726_v45 = vadd.f32 %v9506_v41, %v2433_v29 }
 0x20a   : > { %7972 = vpow2.f32 %v6664_v38  ;;  %v6662_v8 = vmul.f32 -1.442695, %v9693_v54  ;;  %v9708_v2 = vadd.f32 %v9656_v42, %v3044_v15  ;;  %v3042_v13 = vmul.f32 %v9644_v28, %v3003_v33 }
 0x20b   : > { %v3008_v24 = vadd.f32 %v7613_v59, %v2714_v3  ;;  %v2891_v52 = vpop.f32.mrf.mxu0  ;;  %v9723_v33 = vadd.f32 %v9488_v31, %v2430_v17  ;;  %v9731_v3 = vsel %vm598_vm0, %v11587_v20, 0  ;;  %v11588_v31 = vld [vmem:[#allocation90_spill] sm:$0xff]  ;;  %v9741_v17 = vadd.f32 %v9591_v1, %v2436_v40 }
 0x20c   : > { %7974 = vpow2.f32 %v6662_v8  ;;  %v6665_v38 = vmul.f32 -1.442695, %v9708_v2  ;;  %v9720_v15 = vadd.f32 %v9656_v42, %v3042_v13  ;;  %v3006_v9 = vadd.f32 %v2891_v52, %v2712_v10  ;;  %v2677_v13 = vpop.f32.mrf.mxu1 }
 0x20d   : > { %v3047_v56 = vmul.f32 %v9644_v28, %v3008_v24  ;;  %v7614_v55 = vpop.f32.mrf.mxu0  ;;  %v9736_v10 = vadd.f32 %v9537_v43, %v2431_v7  ;;  %v2434_v41 = vadd.f32 %v11588_v31, %v9578_v18  ;;  %v11589_v43 = vld [vmem:[#allocation91_spill] sm:$0xff]  ;;  %v2435_v18 = vadd.f32 %v9481_v16, %v9587_v25 }
 0x20e   : > { %7976 = vpow2.f32 %v6665_v38  ;;  %v6663_v5 = vmul.f32 -1.442695, %v9720_v15  ;;  %v3045_v0 = vmul.f32 %v9644_v28, %v3006_v9  ;;  %v3009_v59 = vadd.f32 %v7614_v55, %v2715_v48 }
 0x20f   : > { %v9744_v29 = vadd.f32 %v9656_v42, %v3047_v56  ;;  %v2894_v8 = vpop.f32.mrf.mxu0  ;;  %v2437_v7 = vadd.f32 %v11589_v43, %v9584_v30  ;;  %v2440_v1 = vadd.f32 %v9493_v35, %v9595_v47  ;;  %v9764_v30 = vadd.f32 %v9635_v57, %v2434_v41  ;;  %v7600_v47 = vpop.f32.mrf.mxu1 }
 0x210   : > { %7978 = vpow2.f32 %v6663_v5  ;;  %v9747_v6 = vadd.f32 %v9656_v42, %v3045_v0  ;;  %v3048_v48 = vmul.f32 %v9644_v28, %v3009_v59  ;;  %v3007_v39 = vadd.f32 %v2894_v8, %v2713_v27 }
 0x211   : > { %v6668_v40 = vmul.f32 -1.442695, %v9744_v29  ;;  %v7617_v24 = vpop.f32.mrf.mxu0  ;;  %v2438_v16 = vadd.f32 %v9499_v61, %v9599_v21  ;;  %v2441_v35 = vadd.f32 %v9514_v4, %v9607_v63  ;;  %v9776_v57 = vadd.f32 %v9660_v49, %v2437_v7  ;;  %v2680_v41 = vpop.f32.mrf.mxu1 }
 0x212   : > { %v6666_v52 = vmul.f32 -1.442695, %v9747_v6  ;;  %v9759_v38 = vadd.f32 %v9656_v42, %v3048_v48  ;;  %v3046_v9 = vmul.f32 %v9644_v28, %v3007_v39  ;;  %v3012_v27 = vadd.f32 %v7617_v24, %v9664_v50 }
 0x213   : > { %7980 = vpow2.f32 %v6668_v40  ;;  %v2907_v25 = vpop.f32.mrf.mxu0  ;;  %v9779_v20 = vadd.f32 %v9689_v62, %v2435_v18  ;;  %v9781_v61 = vadd.f32 %v7599_v23, %v2440_v1  ;;  %v9789_v31 = vadd.f32 %v2677_v13, %v2438_v16 }
 0x214   : > { %7982 = vpow2.f32 %v6666_v52  ;;  %v6669_v56 = vmul.f32 -1.442695, %v9759_v38  ;;  %v9772_v55 = vadd.f32 %v9656_v42, %v3046_v9  ;;  %v3051_v50 = vmul.f32 %v9644_v28, %v3012_v27  ;;  %v7603_v9 = vpop.f32.mrf.mxu1 }
 0x215   : > { %v3010_v4 = vadd.f32 %v2907_v25, %v9667_v19  ;;  %v7618_v21 = vpop.f32.mrf.mxu0  ;;  %v2439_v49 = vadd.f32 %v9528_v36, %v9610_v32  ;;  %v9793_v62 = vadd.f32 %v7600_v47, %v2441_v35  ;;  %v9806_v7 = vsel %vm598_vm0, %v9542_v22, 0 }
 0x216   : > { %7984 = vpow2.f32 %v6669_v56  ;;  %v6667_v63 = vmul.f32 -1.442695, %v9772_v55  ;;  %v9786_v5 = vadd.f32 %v9656_v42, %v3051_v50  ;;  %v3013_v0 = vadd.f32 %v7618_v21, %v9672_v58 }
 0x217   : > { %v7973_v59 = vpop.eup %7972  ;;  %v3049_v23 = vmul.f32 %v9644_v28, %v3010_v4  ;;  %v2910_v19 = vpop.f32.mrf.mxu0  ;;  %v2444_v58 = vadd.f32 %v9551_v12, %v9616_v46  ;;  %v9812_v52 = vadd.f32 %v2680_v41, %v2439_v49 }
 0x218   : > { %v3210_v8 = vadd.f32 1.0, %v7973_v59  ;;  %7986 = vpow2.f32 %v6667_v63  ;;  %v6672_v48 = vmul.f32 -1.442695, %v9786_v5  ;;  %v3052_v39 = vmul.f32 %v9644_v28, %v3013_v0  ;;  %v2693_v49 = vpop.f32.mrf.mxu1 }
 0x219   : > { %v7975_v43 = vpop.eup %7974  ;;  %v9801_v13 = vadd.f32 %v9656_v42, %v3049_v23  ;;  %v3011_v36 = vadd.f32 %v2910_v19, %v9679_v51  ;;  %v7621_v32 = vpop.f32.mrf.mxu0  ;;  %v9828_v63 = vadd.f32 %v7603_v9, %v2444_v58 }
 0x21a   : > { %7988 = vrcp.f32 %v3210_v8  ;;  %v3208_v18 = vadd.f32 1.0, %v7975_v43  ;;  %v9809_v1 = vadd.f32 %v9656_v42, %v3052_v39  ;;  %v3016_v40 = vadd.f32 %v7621_v32, %v9682_v53  ;;  %v11590_v8 = vld [vmem:[#allocation20_spill] sm:$0xff] }
 0x21b   : > { %v7977_v24 = vpop.eup %7976  ;;  %7990 = vpow2.f32 %v6672_v48  ;;  %v6670_v12 = vmul.f32 -1.442695, %v9801_v13  ;;  %v3050_v46 = vmul.f32 %v9644_v28, %v3011_v36  ;;  %v2923_v51 = vpop.f32.mrf.mxu0  ;;  %v2442_v53 = vadd.f32 %v9580_v11, %v9620_v14 }
 0x21c   : > { %7992 = vrcp.f32 %v3208_v18  ;;  %v3211_v22 = vadd.f32 1.0, %v7977_v24  ;;  %v6673_v27 = vmul.f32 -1.442695, %v9809_v1  ;;  %v3055_v16 = vmul.f32 %v9644_v28, %v3016_v40 }
 0x21d   : > { %v7979_v35 = vpop.eup %7978  ;;  %7994 = vpow2.f32 %v6670_v12  ;;  %v9821_v25 = vadd.f32 %v9656_v42, %v3050_v46  ;;  %v3014_v47 = vadd.f32 %v2923_v51, %v9685_v44  ;;  %v7622_v56 = vpop.f32.mrf.mxu0  ;;  %v9844_v24 = vadd.f32 %v2693_v49, %v2442_v53 }
 0x21e   : > { %7996 = vrcp.f32 %v3211_v22  ;;  %v3209_v50 = vadd.f32 1.0, %v7979_v35  ;;  %v9825_v4 = vadd.f32 %v9656_v42, %v3055_v16  ;;  %v3017_v21 = vadd.f32 %v7622_v56, %v9697_v26  ;;  %v11591_v26 = vld [vmem:[#allocation19_spill] sm:$0xff]  ;;  %v7604_v51 = vpop.f32.mrf.mxu1  ;;  %v11592_v35 = vld [vmem:[#allocation22_spill] sm:$0xff] }
 0x21f   : > { %7998 = vpow2.f32 %v6673_v27  ;;  %v6671_v0 = vmul.f32 -1.442695, %v9821_v25  ;;  %v3053_v11 = vmul.f32 %v9644_v28, %v3014_v47  ;;  %v2926_v14 = vpop.f32.mrf.mxu0  ;;  %v2445_v48 = vadd.f32 %v11591_v26, %v11590_v8  ;;  %v11593_v47 = vld [vmem:[#allocation21_spill] sm:$0xff] }
 0x220   : > { %v7981_v59 = vpop.eup %7980  ;;  %8000 = vrcp.f32 %v3209_v50  ;;  %v6676_v44 = vmul.f32 -1.442695, %v9825_v4  ;;  %v3056_v23 = vmul.f32 %v9644_v28, %v3017_v21  ;;  %v3015_v19 = vadd.f32 %v2926_v14, %v9700_v60 }
 0x221   : > { %v7983_v41 = vpop.eup %7982  ;;  %v3214_v39 = vadd.f32 1.0, %v7981_v59  ;;  %8002 = vpow2.f32 %v6671_v0  ;;  %v9838_v43 = vadd.f32 %v9656_v42, %v3053_v11  ;;  %v7625_v58 = vpop.f32.mrf.mxu0  ;;  %v2443_v56 = vadd.f32 %v11593_v47, %v11592_v35 }
 0x222   : > { %v3212_v36 = vadd.f32 1.0, %v7983_v41  ;;  %8004 = vpow2.f32 %v6676_v44  ;;  %v9841_v32 = vadd.f32 %v9656_v42, %v3056_v23  ;;  %v3054_v18 = vmul.f32 %v9644_v28, %v3015_v19  ;;  %v2696_v41 = vpop.f32.mrf.mxu1 }
 0x223   : > { %v7985_v40 = vpop.eup %7984  ;;  %8006 = vrcp.f32 %v3214_v39  ;;  %v6674_v60 = vmul.f32 -1.442695, %v9838_v43  ;;  %v3020_v12 = vadd.f32 %v7625_v58, %v9712_v37  ;;  %v2939_v46 = vpop.f32.mrf.mxu0  ;;  %v9858_v59 = vadd.f32 %v7604_v51, %v2445_v48 }
 0x224   : > { %8008 = vrcp.f32 %v3212_v36  ;;  %v3215_v9 = vadd.f32 1.0, %v7985_v40  ;;  %v6677_v22 = vmul.f32 -1.442695, %v9841_v32  ;;  %v9850_v27 = vadd.f32 %v9656_v42, %v3054_v18 }
 0x225   : > { %v7987_v16 = vpop.eup %7986  ;;  %8010 = vpow2.f32 %v6674_v60  ;;  %v3059_v53 = vmul.f32 %v9644_v28, %v3020_v12  ;;  %v3018_v50 = vadd.f32 %v2939_v46, %v9723_v33  ;;  %v7626_v21 = vpop.f32.mrf.mxu0  ;;  %v9878_v46 = vadd.f32 %v2696_v41, %v2443_v56 }
 0x226   : > { %8012 = vrcp.f32 %v3215_v9  ;;  %v3213_v37 = vadd.f32 1.0, %v7987_v16  ;;  %v6675_v0 = vmul.f32 -1.442695, %v9850_v27  ;;  %v3021_v11 = vadd.f32 %v7626_v21, %v9726_v45 }
 0x227   : > { %v7989_v14 = vpop.eup %7988  ;;  %8014 = vpow2.f32 %v6677_v22  ;;  %v9861_v49 = vadd.f32 %v9656_v42, %v3059_v53  ;;  %v3057_v44 = vmul.f32 %v9644_v28, %v3018_v50  ;;  %v2942_v23 = vpop.f32.mrf.mxu0 }
 0x228   : > { %v7991_v19 = vpop.eup %7990  ;;  %v3306_v33 = vmul.f32 %v7989_v14, %v9675_v34  ;;  %8016 = vrcp.f32 %v3213_v37  ;;  %v3060_v8 = vmul.f32 %v9644_v28, %v3021_v11  ;;  %v3019_v26 = vadd.f32 %v2942_v23, %v9736_v10 }
 0x229   : > { %v7993_v45 = vpop.eup %7992  ;;  %v3218_v39 = vadd.f32 1.0, %v7991_v19  ;;  %8018 = vpow2.f32 %v6675_v0  ;;  %v6680_v48 = vmul.f32 -1.442695, %v9861_v49  ;;  %v9869_v58 = vadd.f32 %v9656_v42, %v3057_v44  ;;  %v7629_v36 = vpop.f32.mrf.mxu0 }
 0x22a   : > { %v7995_v18 = vpop.eup %7994  ;;  %3338 = vst.msk [vmem:[#allocation2 + $0x48] sm:$0xff] %vm344_vm1, %v3306_v33  ;;  %v3304_v40 = vmul.f32 %v7993_v45, %v9693_v54  ;;  %v9874_v34 = vadd.f32 %v9656_v42, %v3060_v8  ;;  %v3058_v60 = vmul.f32 %v9644_v28, %v3019_v26  ;;  %v3024_v10 = vadd.f32 %v7629_v36, %v9741_v17 }
 0x22b   : > { %v7997_v12 = vpop.eup %7996  ;;  %8020 = vrcp.f32 %v3218_v39  ;;  %v3216_v51 = vadd.f32 1.0, %v7995_v18  ;;  %v6678_v9 = vmul.f32 -1.442695, %v9869_v58  ;;  %v2955_v22 = vpop.f32.mrf.mxu0 }
 0x22c   : > { %v7999_v16 = vpop.eup %7998  ;;  %3336 = vst.msk [vmem:[#allocation2 + $0x28] sm:$0xff] %vm344_vm1, %v3304_v40  ;;  %v3307_v54 = vmul.f32 %v7997_v12, %v9708_v2  ;;  %8022 = vpow2.f32 %v6680_v48  ;;  %v6681_v35 = vmul.f32 -1.442695, %v9874_v34  ;;  %v9885_v47 = vadd.f32 %v9656_v42, %v3058_v60 }
 0x22d   : > { %v8001_v17 = vpop.eup %8000  ;;  %8024 = vrcp.f32 %v3216_v51  ;;  %v3219_v56 = vadd.f32 1.0, %v7999_v16  ;;  %v3063_v53 = vmul.f32 %v9644_v28, %v3024_v10  ;;  %v3022_v50 = vadd.f32 %v2955_v22, %v9764_v30  ;;  %v7630_v21 = vpop.f32.mrf.mxu0 }
 0x22e   : > { %v8003_v37 = vpop.eup %8002  ;;  %3339 = vst.msk [vmem:[#allocation2 + $0x50] sm:$0xff] %vm344_vm1, %v3307_v54  ;;  %v3305_v0 = vmul.f32 %v8001_v17, %v9720_v15  ;;  %8026 = vpow2.f32 %v6678_v9  ;;  %v6679_v2 = vmul.f32 -1.442695, %v9885_v47  ;;  %v3025_v11 = vadd.f32 %v7630_v21, %v9776_v57 }
 0x22f   : > { %v8005_v14 = vpop.eup %8004  ;;  %8028 = vrcp.f32 %v3219_v56  ;;  %v3217_v44 = vadd.f32 1.0, %v8003_v37  ;;  %v9894_v23 = vadd.f32 %v9656_v42, %v3063_v53  ;;  %v3061_v19 = vmul.f32 %v9644_v28, %v3022_v50  ;;  %v2958_v30 = vpop.f32.mrf.mxu0 }
 0x230   : > { %v8007_v41 = vpop.eup %8006  ;;  %3337 = vst.msk [vmem:[#allocation2 + $0x30] sm:$0xff] %vm344_vm1, %v3305_v0  ;;  %v3222_v33 = vadd.f32 1.0, %v8005_v14  ;;  %8030 = vpow2.f32 %v6681_v35  ;;  %v3064_v15 = vmul.f32 %v9644_v28, %v3025_v11  ;;  %v3023_v8 = vadd.f32 %v2958_v30, %v9779_v20 }
 0x231   : > { %v8009_v26 = vpop.eup %8008  ;;  %v3310_v57 = vmul.f32 %v8007_v41, %v9744_v29  ;;  %8032 = vrcp.f32 %v3217_v44  ;;  %v6684_v45 = vmul.f32 -1.442695, %v9894_v23  ;;  %v9903_v39 = vadd.f32 %v9656_v42, %v3061_v19  ;;  %v7633_v48 = vpop.f32.mrf.mxu0 }
 0x232   : > { %v8011_v36 = vpop.eup %8010  ;;  %v3308_v18 = vmul.f32 %v8009_v26, %v9747_v6  ;;  %8034 = vrcp.f32 %v3222_v33  ;;  %v9907_v40 = vadd.f32 %v9656_v42, %v3064_v15  ;;  %v3062_v60 = vmul.f32 %v9644_v28, %v3023_v8  ;;  %v9942_v26 = vld [vmem:[%s11354_s4 + $0x8] sm:$0x3] }
 0x233   : > { %v8013_v20 = vpop.eup %8012  ;;  %3342 = vst.msk [vmem:[#allocation2 + $0x88] sm:$0xff] %vm344_vm1, %v3310_v57  ;;  %v3220_v29 = vadd.f32 1.0, %v8011_v36  ;;  %8036 = vpow2.f32 %v6679_v2  ;;  %v6682_v10 = vmul.f32 -1.442695, %v9903_v39  ;;  %v3028_v12 = vadd.f32 %v7633_v48, %v9781_v61  ;;  %v2971_v51 = vpop.f32.mrf.mxu0 }
 0x234   : > { %v8015_v9 = vpop.eup %8014  ;;  %3340 = vst.msk [vmem:[#allocation2 + $0x68] sm:$0xff] %vm344_vm1, %v3308_v18  ;;  %v3311_v6 = vmul.f32 %v8013_v20, %v9759_v38  ;;  %8038 = vpow2.f32 %v6684_v45  ;;  %v6685_v22 = vmul.f32 -1.442695, %v9907_v40  ;;  %v9917_v16 = vadd.f32 %v9656_v42, %v3062_v60 }
 0x235   : > { %v8017_v54 = vpop.eup %8016  ;;  %8040 = vrcp.f32 %v3220_v29  ;;  %v3223_v35 = vadd.f32 1.0, %v8015_v9  ;;  %v3067_v17 = vmul.f32 %v9644_v28, %v3028_v12  ;;  %v3026_v56 = vadd.f32 %v2971_v51, %v9789_v31  ;;  %v7634_v61 = vpop.f32.mrf.mxu0  ;;  %v3419_v31 = vld [vmem:[#allocation2 + $0x28] sm:$0xff] }
 0x236   : > { %v8019_v53 = vpop.eup %8018  ;;  %3343 = vst.msk [vmem:[#allocation2 + $0x90] sm:$0xff] %vm344_vm1, %v3311_v6  ;;  %v3309_v50 = vmul.f32 %v8017_v54, %v9772_v55  ;;  %8042 = vpow2.f32 %v6682_v10  ;;  %v6683_v38 = vmul.f32 -1.442695, %v9917_v16  ;;  %v3029_v21 = vadd.f32 %v7634_v61, %v9793_v62  ;;  %v3370_v6 = vld [vmem:[#allocation2 + $0x27] sm:$0xff] }
 0x237   : > { %8044 = vrcp.f32 %v3223_v35  ;;  %v3221_v37 = vadd.f32 1.0, %v8019_v53  ;;  %v9926_v0 = vadd.f32 %v9656_v42, %v3067_v17  ;;  %v3065_v2 = vmul.f32 %v9644_v28, %v3026_v56  ;;  %v2974_v11 = vpop.f32.mrf.mxu0  ;;  %v3420_v14 = vld [vmem:[#allocation2 + $0x30] sm:$0xff] }
 0x238   : > { %v8021_v44 = vpop.eup %8020  ;;  %3341 = vst.msk [vmem:[#allocation2 + $0x70] sm:$0xff] %vm344_vm1, %v3309_v50  ;;  %8046 = vpow2.f32 %v6685_v22  ;;  %v3068_v55 = vmul.f32 %v9644_v28, %v3029_v21  ;;  %v3027_v19 = vadd.f32 %v2974_v11, %v9812_v52  ;;  %v9932_v30 = vpack.c.bf16 %v3420_v14, %v3419_v31  ;;  %v3371_v48 = vld [vmem:[#allocation2 + $0x2f] sm:$0xff]  ;;  %v9971_v21 = vld [vmem:[%s11354_s4 + $0xa] sm:$0x3] }
 0x239   : > { %v8023_v62 = vpop.eup %8022  ;;  %v3314_v41 = vmul.f32 %v8021_v44, %v9786_v5  ;;  %8048 = vrcp.f32 %v3221_v37  ;;  %v6688_v33 = vmul.f32 -1.442695, %v9926_v0  ;;  %v9937_v15 = vadd.f32 %v9656_v42, %v3065_v2  ;;  %v7637_v8 = vpop.f32.mrf.mxu0  ;;  %v3422_v22 = vld [vmem:[#allocation2 + $0x50] sm:$0xff] }
 0x23a   : > { %v8025_v57 = vpop.eup %8024  ;;  %v3226_v45 = vadd.f32 1.0, %v8023_v62  ;;  %8050 = vpow2.f32 %v6683_v38  ;;  %v9945_v52 = vadd.f32 %v9656_v42, %v3068_v55  ;;  %v3066_v5 = vmul.f32 %v9644_v28, %v3027_v19  ;;  %7642 = vmatmul.mubr.msk.bf16.vlgmr.msra.gmra.mxu1 %vm344_vm1, %v9932_v30  ;;  %v3373_v35 = vld [vmem:[#allocation2 + $0x4f] sm:$0xff] }
 0x23b   : > { %v8027_v36 = vpop.eup %8026  ;;  %3346 = vst.msk [vmem:[#allocation2 + $0xc8] sm:$0xff] %vm344_vm1, %v3314_v41  ;;  %v3312_v18 = vmul.f32 %v8025_v57, %v9801_v13  ;;  %8052 = vpow2.f32 %v6688_v33  ;;  %v6686_v60 = vmul.f32 -1.442695, %v9937_v15  ;;  %v3032_v20 = vadd.f32 %v7637_v8, %v9828_v63  ;;  %7708 = vmatpush3.bf16.msra.mxu1 %v9731_v3  ;;  %v2987_v29 = vpop.f32.mrf.mxu0  ;;  %v3421_v38 = vld [vmem:[#allocation2 + $0x48] sm:$0xff] }
 0x23c   : > { %v8029_v10 = vpop.eup %8028  ;;  %8054 = vrcp.f32 %v3226_v45  ;;  %v3224_v12 = vadd.f32 1.0, %v8027_v36  ;;  %v6689_v51 = vmul.f32 -1.442695, %v9945_v52  ;;  %v9957_v9 = vadd.f32 %v9656_v42, %v3066_v5  ;;  %7958 = vmatprep.subr.msk.bf16.mxu1 %vm598_vm0, %v9942_v26  ;;  %v3423_v57 = vld [vmem:[#allocation2 + $0x68] sm:$0xff] }
 0x23d   : > { %v8031_v13 = vpop.eup %8030  ;;  %3344 = vst.msk [vmem:[#allocation2 + $0xa8] sm:$0xff] %vm344_vm1, %v3312_v18  ;;  %v3315_v63 = vmul.f32 %v8029_v10, %v9809_v1  ;;  %8056 = vpow2.f32 %v6686_v60  ;;  %v3071_v3 = vmul.f32 %v9644_v28, %v3032_v20  ;;  %v9964_v54 = vpack.c.bf16 %v3371_v48, %v3370_v6  ;;  %v7638_v17 = vpop.f32.mrf.mxu0  ;;  %v3374_v18 = vld [vmem:[#allocation2 + $0x67] sm:$0xff] }
 0x23e   : > { %v8033_v56 = vpop.eup %8032  ;;  %8058 = vrcp.f32 %v3224_v12  ;;  %v3227_v61 = vadd.f32 1.0, %v8031_v13  ;;  %v6687_v53 = vmul.f32 -1.442695, %v9957_v9  ;;  %v3030_v50 = vadd.f32 %v2987_v29, %v9844_v24  ;;  %v3372_v24 = vld [vmem:[#allocation2 + $0x47] sm:$0xff]  ;;  %v3377_v12 = vld [vmem:[#allocation2 + $0x8f] sm:$0xff] }
 0x23f   : > { %v8035_v1 = vpop.eup %8034  ;;  %3347 = vst.msk [vmem:[#allocation2 + $0xd0] sm:$0xff] %vm344_vm1, %v3315_v63  ;;  %v3313_v37 = vmul.f32 %v8033_v56, %v9821_v25  ;;  %8060 = vpow2.f32 %v6689_v51  ;;  %v9976_v2 = vadd.f32 %v9656_v42, %v3071_v3  ;;  %7676 = vmatmul.mubr.msk.bf16.vlgmr.msra.gmra.mxu0 %vm344_vm1, %v9964_v54  ;;  %v9980_v11 = vpack.c.bf16 %v3422_v22, %v3421_v38  ;;  %v2990_v31 = vpop.f32.mrf.mxu0  ;;  %v3424_v14 = vld [vmem:[#allocation2 + $0x70] sm:$0xff]  ;;  %v3425_v13 = vld [vmem:[#allocation2 + $0x88] sm:$0xff] }
 0x240   : > { %v8037_v44 = vpop.eup %8036  ;;  %v3318_v55 = vmul.f32 %v8035_v1, %v9825_v4  ;;  %8062 = vrcp.f32 %v3227_v61  ;;  %v3069_v19 = vmul.f32 %v9644_v28, %v3030_v50  ;;  %v9984_v62 = vpack.c.bf16 %v3373_v35, %v3372_v24  ;;  %v3375_v25 = vld [vmem:[#allocation2 + $0x6f] sm:$0xff]  ;;  %7742 = vmatpush3.bf16.msra.mxu0 %v9806_v7 }
 0x241   : > { %v8039_v41 = vpop.eup %8038  ;;  %3345 = vst.msk [vmem:[#allocation2 + $0xb0] sm:$0xff] %vm344_vm1, %v3313_v37  ;;  %v3225_v33 = vadd.f32 1.0, %v8037_v44  ;;  %8064 = vpow2.f32 %v6687_v53  ;;  %v6692_v8 = vmul.f32 -1.442695, %v9976_v2  ;;  %7645 = vmatprep.mubr.msk.bf16.mxu1 %vm344_vm1, %v9980_v11  ;;  %v3033_v4 = vadd.f32 %v7638_v17, %v9858_v59  ;;  %7959 = vmatprep.subr.msk.bf16.mxu0 %vm598_vm0, %v9971_v21  ;;  %v3426_v59 = vld [vmem:[#allocation2 + $0x90] sm:$0xff]  ;;  %v3376_v17 = vld [vmem:[#allocation2 + $0x87] sm:$0xff] }
 0x242   : > { %v8041_v45 = vpop.eup %8040  ;;  %3350 = vst.msk [vmem:[#allocation2 + $0x108] sm:$0xff] %vm344_vm1, %v3318_v55  ;;  %v3230_v7 = vadd.f32 1.0, %v8039_v41  ;;  %v9996_v5 = vadd.f32 %v9656_v42, %v3069_v19  ;;  %7679 = vmatprep.mubr.msk.bf16.mxu0 %vm344_vm1, %v9984_v62  ;;  %v3031_v48 = vadd.f32 %v2990_v31, %v9878_v46  ;;  %v10001_v36 = vpack.c.bf16 %v3424_v14, %v3423_v57 }
 0x243   : > { %v8043_v60 = vpop.eup %8042  ;;  %v3316_v20 = vmul.f32 %v8041_v45, %v9838_v43  ;;  %8066 = vrcp.f32 %v3225_v33  ;;  %v3072_v29 = vmul.f32 %v9644_v28, %v3033_v4  ;;  %v10005_v10 = vpack.c.bf16 %v3375_v25, %v3374_v18 }
 0x244   : > { %v8045_v51 = vpop.eup %8044  ;;  %8068 = vrcp.f32 %v3230_v7  ;;  %v3228_v6 = vadd.f32 1.0, %v8043_v60  ;;  %v6690_v22 = vmul.f32 -1.442695, %v9996_v5  ;;  %v3070_v46 = vmul.f32 %v9644_v28, %v3031_v48  ;;  %7646 = vmatmul.mubr.msk.bf16.gmra.mxu1 %vm344_vm1, %v10001_v36  ;;  %v3427_v1 = vld [vmem:[#allocation2 + $0xa8] sm:$0xff] }
 0x245   : > { %v8047_v63 = vpop.eup %8046  ;;  %3348 = vst.msk [vmem:[#allocation2 + $0xe8] sm:$0xff] %vm344_vm1, %v3316_v20  ;;  %v3319_v43 = vmul.f32 %v8045_v51, %v9841_v32  ;;  %8070 = vpow2.f32 %v6692_v8  ;;  %v10014_v3 = vadd.f32 %v9656_v42, %v3072_v29  ;;  %v10016_v35 = vpack.c.bf16 %v3426_v59, %v3425_v13  ;;  %v3378_v33 = vld [vmem:[#allocation2 + $0xa7] sm:$0xff] }
 0x246   : > { %v8049_v56 = vpop.eup %8048  ;;  %8072 = vrcp.f32 %v3228_v6  ;;  %v3231_v61 = vadd.f32 1.0, %v8047_v63  ;;  %v10019_v28 = vadd.f32 %v9656_v42, %v3070_v46  ;;  %v10021_v53 = vpack.c.bf16 %v3377_v12, %v3376_v17  ;;  %v3430_v14 = vld [vmem:[#allocation2 + $0xd0] sm:$0xff]  ;;  %v3429_v8 = vld [vmem:[#allocation2 + $0xc8] sm:$0xff] }
 0x247   : > { %v8051_v50 = vpop.eup %8050  ;;  %3351 = vst.msk [vmem:[#allocation2 + $0x110] sm:$0xff] %vm344_vm1, %v3319_v43  ;;  %v3317_v32 = vmul.f32 %v8049_v56, %v9850_v27  ;;  %8074 = vpow2.f32 %v6690_v22  ;;  %v6693_v38 = vmul.f32 -1.442695, %v10014_v3  ;;  %7680 = vmatmul.mubr.msk.bf16.gmra.mxu0 %vm344_vm1, %v10005_v10  ;;  %7649 = vmatprep.mubr.msk.bf16.mxu1 %vm344_vm1, %v10016_v35  ;;  %v10039_v7 = vpack.c.bf16 %v3430_v14, %v3429_v8  ;;  %v3381_v48 = vld [vmem:[#allocation2 + $0xcf] sm:$0xff]  ;;  %v3380_v20 = vld [vmem:[#allocation2 + $0xc7] sm:$0xff] }
 0x248   : > { %v8053_v37 = vpop.eup %8052  ;;  %8076 = vrcp.f32 %v3231_v61  ;;  %v3229_v42 = vadd.f32 1.0, %v8051_v50  ;;  %v6691_v24 = vmul.f32 -1.442695, %v10019_v28  ;;  %7683 = vmatprep.mubr.msk.bf16.mxu0 %vm344_vm1, %v10021_v53  ;;  %v3428_v31 = vld [vmem:[#allocation2 + $0xb0] sm:$0xff]  ;;  %v10049_v51 = vpack.c.bf16 %v3381_v48, %v3380_v20 }
 0x249   : > { %v3379_v27 = vld [vmem:[#allocation2 + $0xaf] sm:$0xff]  ;;  %v8055_v44 = vpop.eup %8054  ;;  %3349 = vst.msk [vmem:[#allocation2 + $0xf0] sm:$0xff] %vm344_vm1, %v3317_v32  ;;  %v3234_v55 = vadd.f32 1.0, %v8053_v37  ;;  %8078 = vpow2.f32 %v6693_v38  ;;  %v10034_v19 = vpack.c.bf16 %v3428_v31, %v3427_v1  ;;  %v3384_v14 = vld [vmem:[#allocation2 + $0x107] sm:$0xff] }
 0x24a   : > { %v8057_v25 = vpop.eup %8056  ;;  %v3322_v41 = vmul.f32 %v8055_v44, %v9861_v49  ;;  %8080 = vrcp.f32 %v3229_v42  ;;  %v10037_v45 = vpack.c.bf16 %v3379_v27, %v3378_v33  ;;  %v3433_v32 = vld [vmem:[#allocation2 + $0x108] sm:$0xff] }
 0x24b   : > { %v8059_v4 = vpop.eup %8058  ;;  %8082 = vrcp.f32 %v3234_v55  ;;  %v3232_v57 = vadd.f32 1.0, %v8057_v25 }
 0x24c   : > { %v8061_v18 = vpop.eup %8060  ;;  %3354 = vst.msk [vmem:[#allocation2 + $0x148] sm:$0xff] %vm344_vm1, %v3322_v41  ;;  %v3320_v59 = vmul.f32 %v8059_v4, %v9869_v58  ;;  %8084 = vpow2.f32 %v6691_v24  ;;  %7650 = vmatmul.mubr.msk.bf16.gmra.mxu1 %vm344_vm1, %v10034_v19  ;;  %v3431_v6 = vld [vmem:[#allocation2 + $0xe8] sm:$0xff] }
 0x24d   : > { %v8063_v49 = vpop.eup %8062  ;;  %8086 = vrcp.f32 %v3232_v57  ;;  %v3235_v60 = vadd.f32 1.0, %v8061_v18  ;;  %7653 = vmatprep.mubr.msk.bf16.mxu1 %vm344_vm1, %v10039_v7  ;;  %v3382_v50 = vld [vmem:[#allocation2 + $0xe7] sm:$0xff] }
 0x24e   : > { %v8065_v29 = vpop.eup %8064  ;;  %3352 = vst.msk [vmem:[#allocation2 + $0x128] sm:$0xff] %vm344_vm1, %v3320_v59  ;;  %v3323_v12 = vmul.f32 %v8063_v49, %v9874_v34  ;;  %v3434_v63 = vld [vmem:[#allocation2 + $0x110] sm:$0xff] }
 0x24f   : > { %8088 = vrcp.f32 %v3235_v60  ;;  %v3233_v58 = vadd.f32 1.0, %v8065_v29  ;;  %7684 = vmatmul.mubr.msk.bf16.gmra.mxu0 %vm344_vm1, %v10037_v45  ;;  %v10063_v42 = vpack.c.bf16 %v3434_v63, %v3433_v32  ;;  %v3385_v24 = vld [vmem:[#allocation2 + $0x10f] sm:$0xff] }
 0x250   : > { %v8067_v22 = vpop.eup %8066  ;;  %3355 = vst.msk [vmem:[#allocation2 + $0x150] sm:$0xff] %vm344_vm1, %v3323_v12  ;;  %7687 = vmatprep.mubr.msk.bf16.mxu0 %vm344_vm1, %v10049_v51  ;;  %v3432_v46 = vld [vmem:[#allocation2 + $0xf0] sm:$0xff]  ;;  %v10073_v25 = vpack.c.bf16 %v3385_v24, %v3384_v14 }
 0x251   : > { %v3383_v13 = vld [vmem:[#allocation2 + $0xef] sm:$0xff]  ;;  %v8069_v43 = vpop.eup %8068  ;;  %v3321_v34 = vmul.f32 %v8067_v22, %v9885_v47  ;;  %8090 = vrcp.f32 %v3233_v58  ;;  %v10057_v17 = vpack.c.bf16 %v3432_v46, %v3431_v6 }
 0x252   : > { %v8071_v56 = vpop.eup %8070  ;;  %v3326_v61 = vmul.f32 %v8069_v43, %v9894_v23  ;;  %v10061_v37 = vpack.c.bf16 %v3383_v13, %v3382_v50 }
 0x253   : > { %v8073_v38 = vpop.eup %8072  ;;  %3353 = vst.msk [vmem:[#allocation2 + $0x130] sm:$0xff] %vm344_vm1, %v3321_v34  ;;  %v3238_v1 = vadd.f32 1.0, %v8071_v56  ;;  %v3437_v58 = vld [vmem:[#allocation2 + $0x148] sm:$0xff] }
 0x254   : > { %v8075_v31 = vpop.eup %8074  ;;  %3358 = vst.msk [vmem:[#allocation2 + $0x188] sm:$0xff] %vm344_vm1, %v3326_v61  ;;  %v3324_v47 = vmul.f32 %v8073_v38, %v9903_v39  ;;  %7654 = vmatmul.mubr.msk.bf16.gmra.mxu1 %vm344_vm1, %v10057_v17  ;;  %v3388_v13 = vld [vmem:[#allocation2 + $0x147] sm:$0xff] }
 0x255   : > { %v8077_v23 = vpop.eup %8076  ;;  %8092 = vrcp.f32 %v3238_v1  ;;  %v3236_v27 = vadd.f32 1.0, %v8075_v31  ;;  %7657 = vmatprep.mubr.msk.bf16.mxu1 %vm344_vm1, %v10063_v42  ;;  %v3386_v60 = vld [vmem:[#allocation2 + $0x127] sm:$0xff] }
 0x256   : > { %v8079_v44 = vpop.eup %8078  ;;  %3356 = vst.msk [vmem:[#allocation2 + $0x168] sm:$0xff] %vm344_vm1, %v3324_v47  ;;  %v3327_v55 = vmul.f32 %v8077_v23, %v9907_v40  ;;  %v3435_v40 = vld [vmem:[#allocation2 + $0x128] sm:$0xff] }
 0x257   : > { %v8081_v41 = vpop.eup %8080  ;;  %8094 = vrcp.f32 %v3236_v27  ;;  %v3239_v39 = vadd.f32 1.0, %v8079_v44  ;;  %7688 = vmatmul.mubr.msk.bf16.gmra.mxu0 %vm344_vm1, %v10061_v37  ;;  %v3438_v48 = vld [vmem:[#allocation2 + $0x150] sm:$0xff] }
 0x258   : > { %v8083_v33 = vpop.eup %8082  ;;  %3359 = vst.msk [vmem:[#allocation2 + $0x190] sm:$0xff] %vm344_vm1, %v3327_v55  ;;  %v3325_v8 = vmul.f32 %v8081_v41, %v9917_v16  ;;  %7691 = vmatprep.mubr.msk.bf16.mxu0 %vm344_vm1, %v10073_v25  ;;  %v10089_v22 = vpack.c.bf16 %v3438_v48, %v3437_v58 }
 0x259   : > { %v8085_v4 = vpop.eup %8084  ;;  %v3330_v57 = vmul.f32 %v8083_v33, %v9926_v0  ;;  %8096 = vrcp.f32 %v3239_v39  ;;  %v3389_v0 = vld [vmem:[#allocation2 + $0x14f] sm:$0xff] }
 0x25a   : > { %v8087_v18 = vpop.eup %8086  ;;  %3357 = vst.msk [vmem:[#allocation2 + $0x170] sm:$0xff] %vm344_vm1, %v3325_v8  ;;  %v3237_v59 = vadd.f32 1.0, %v8085_v4  ;;  %v3436_v49 = vld [vmem:[#allocation2 + $0x130] sm:$0xff] }
 0x25b   : > { %v3387_v20 = vld [vmem:[#allocation2 + $0x12f] sm:$0xff]  ;;  %3362 = vst.msk [vmem:[#allocation2 + $0x1c8] sm:$0xff] %vm344_vm1, %v3330_v57  ;;  %v3328_v16 = vmul.f32 %v8087_v18, %v9937_v15  ;;  %v10085_v29 = vpack.c.bf16 %v3436_v49, %v3435_v40  ;;  %v10097_v15 = vpack.c.bf16 %v3389_v0, %v3388_v13  ;;  %v3392_v14 = vld [vmem:[#allocation2 + $0x187] sm:$0xff] }
 0x25c   : > { %v10087_v12 = vpack.c.bf16 %v3387_v20, %v3386_v60  ;;  %v8089_v6 = vpop.eup %8088  ;;  %8098 = vrcp.f32 %v3237_v59  ;;  %v3892_v20 = vld [vmem:[#allocation2 + $0x11] sm:$0xff] }
 0x25d   : > { %3360 = vst.msk [vmem:[#allocation2 + $0x1a8] sm:$0xff] %vm344_vm1, %v3328_v16  ;;  %v3331_v46 = vmul.f32 %v8089_v6, %v9945_v52  ;;  %7658 = vmatmul.mubr.msk.bf16.gmra.mxu1 %vm344_vm1, %v10085_v29  ;;  %v3439_v52 = vld [vmem:[#allocation2 + $0x168] sm:$0xff] }
 0x25e   : > { %v8091_v63 = vpop.eup %8090  ;;  %7661 = vmatprep.mubr.msk.bf16.mxu1 %vm344_vm1, %v10089_v22  ;;  %v3390_v38 = vld [vmem:[#allocation2 + $0x167] sm:$0xff] }
 0x25f   : > { %3363 = vst.msk [vmem:[#allocation2 + $0x1d0] sm:$0xff] %vm344_vm1, %v3331_v46  ;;  %v3329_v43 = vmul.f32 %v8091_v63, %v9957_v9  ;;  %7692 = vmatmul.mubr.msk.bf16.gmra.mxu0 %vm344_vm1, %v10087_v12  ;;  %v3442_v61 = vld [vmem:[#allocation2 + $0x190] sm:$0xff]  ;;  %v3441_v9 = vld [vmem:[#allocation2 + $0x188] sm:$0xff] }
 0x260   : > { %7695 = vmatprep.mubr.msk.bf16.mxu0 %vm344_vm1, %v10097_v15  ;;  %v3393_v31 = vld [vmem:[#allocation2 + $0x18f] sm:$0xff]  ;;  %v10111_v23 = vpack.c.bf16 %v3442_v61, %v3441_v9 }
 0x261   : > { %3361 = vst.msk [vmem:[#allocation2 + $0x1b0] sm:$0xff] %vm344_vm1, %v3329_v43  ;;  %v3440_v34 = vld [vmem:[#allocation2 + $0x170] sm:$0xff] }
 0x262   : > { %v3391_v56 = vld [vmem:[#allocation2 + $0x16f] sm:$0xff]  ;;  %v8093_v50 = vpop.eup %8092  ;;  %v10106_v32 = vpack.c.bf16 %v3440_v34, %v3439_v52  ;;  %v3396_v49 = vld [vmem:[#allocation2 + $0x1c7] sm:$0xff] }
 0x263   : > { %v3334_v1 = vmul.f32 %v8093_v50, %v9976_v2  ;;  %v10109_v24 = vpack.c.bf16 %v3391_v56, %v3390_v38  ;;  %v10119_v2 = vpack.c.bf16 %v3393_v31, %v3392_v14  ;;  %v3893_v43 = vld [vmem:[#allocation2 + $0x29] sm:$0xff]  ;;  %v3894_v52 = vld [vmem:[#allocation2 + $0x31] sm:$0xff]  ;;  %v4578_v50 = vsel %vm598_vm0, %v9942_v26, 0 }
 0x264   : > { %v8095_v47 = vpop.eup %8094  ;;  %v3394_v40 = vld [vmem:[#allocation2 + $0x1a7] sm:$0xff]  ;;  %v3896_v56 = vld [vmem:[#allocation2 + $0x51] sm:$0xff]  ;;  %v10157_v61 = vpack.c.bf16 %v3894_v52, %v3893_v43 }
 0x265   : > { %3366 = vst.msk [vmem:[#allocation2 + $0x208] sm:$0xff] %vm344_vm1, %v3334_v1  ;;  %v3332_v27 = vmul.f32 %v8095_v47, %v9996_v5  ;;  %7662 = vmatmul.mubr.msk.bf16.gmra.mxu1 %vm344_vm1, %v10106_v32  ;;  %v3443_v5 = vld [vmem:[#allocation2 + $0x1a8] sm:$0xff]  ;;  %v4872_v1 = vsel %vm598_vm0, %v9971_v21, 0  ;;  %v3898_v9 = vld [vmem:[#allocation2 + $0x71] sm:$0xff] }
 0x266   : > { %v8097_v44 = vpop.eup %8096  ;;  %7665 = vmatprep.mubr.msk.bf16.mxu1 %vm344_vm1, %v10111_v23  ;;  %v3446_v4 = vld [vmem:[#allocation2 + $0x1d0] sm:$0xff]  ;;  %v10177_v26 = vld [vmem:[%s11354_s4 + $0xe] sm:$0x3] }
 0x267   : > { %3364 = vst.msk [vmem:[#allocation2 + $0x1e8] sm:$0xff] %vm344_vm1, %v3332_v27  ;;  %v3335_v55 = vmul.f32 %v8097_v44, %v10014_v3  ;;  %7696 = vmatmul.mubr.msk.bf16.gmra.mxu0 %vm344_vm1, %v10109_v24  ;;  %v3445_v3 = vld [vmem:[#allocation2 + $0x1c8] sm:$0xff]  ;;  %v3900_v47 = vld [vmem:[#allocation2 + $0x91] sm:$0xff] }
 0x268   : > { %7699 = vmatprep.mubr.msk.bf16.mxu0 %vm344_vm1, %v10119_v2  ;;  %v3444_v41 = vld [vmem:[#allocation2 + $0x1b0] sm:$0xff]  ;;  %v10134_v59 = vpack.c.bf16 %v3446_v4, %v3445_v3 }
 0x269   : > { %v3395_v39 = vld [vmem:[#allocation2 + $0x1af] sm:$0xff]  ;;  %v8099_v33 = vpop.eup %8098  ;;  %3367 = vst.msk [vmem:[#allocation2 + $0x210] sm:$0xff] %vm344_vm1, %v3335_v55  ;;  %v10128_v8 = vpack.c.bf16 %v3444_v41, %v3443_v5 }
 0x26a   : > { %v3333_v57 = vmul.f32 %v8099_v33, %v10019_v28  ;;  %v10131_v48 = vpack.c.bf16 %v3395_v39, %v3394_v40  ;;  %v3397_v18 = vld [vmem:[#allocation2 + $0x1cf] sm:$0xff] }
 0x26b   : > { %v10140_v60 = vpack.c.bf16 %v3397_v18, %v3396_v49  ;;  %v3891_v28 = vld [vmem:[#allocation2 + $0x9] sm:$0xff]  ;;  %v3902_v55 = vld [vmem:[#allocation2 + $0xb1] sm:$0xff] }
 0x26c   : > { %3365 = vst.msk [vmem:[#allocation2 + $0x1f0] sm:$0xff] %vm344_vm1, %v3333_v57  ;;  %v3923_v46 = vpack.c.bf16 %v3892_v20, %v3891_v28  ;;  %v3895_v34 = vld [vmem:[#allocation2 + $0x49] sm:$0xff]  ;;  %v3904_v41 = vld [vmem:[#allocation2 + $0xd1] sm:$0xff] }
 0x26d   : > { %7666 = vmatmul.mubr.msk.bf16.gmra.mxu1 %vm344_vm1, %v10128_v8  ;;  %v10163_v38 = vpack.c.bf16 %v3896_v56, %v3895_v34  ;;  %v3897_v21 = vld [vmem:[#allocation2 + $0x69] sm:$0xff]  ;;  %v3906_v57 = vld [vmem:[#allocation2 + $0xf1] sm:$0xff] }
 0x26e   : > { %7669 = vmatprep.mubr.msk.bf16.mxu1 %vm344_vm1, %v10134_v59  ;;  %v3447_v16 = vld [vmem:[#allocation2 + $0x1e8] sm:$0xff]  ;;  %v10187_v27 = vpack.c.bf16 %v3898_v9, %v3897_v21  ;;  %v3908_v3 = vld [vmem:[#allocation2 + $0x111] sm:$0xff] }
 0x26f   : > { %7700 = vmatmul.mubr.msk.bf16.gmra.mxu0 %vm344_vm1, %v10131_v48  ;;  %v3398_v0 = vld [vmem:[#allocation2 + $0x1e7] sm:$0xff]  ;;  %v3910_v20 = vld [vmem:[#allocation2 + $0x131] sm:$0xff] }
 0x270   : > { %7703 = vmatprep.mubr.msk.bf16.mxu0 %vm344_vm1, %v10140_v60  ;;  %v3899_v31 = vld [vmem:[#allocation2 + $0x89] sm:$0xff]  ;;  %v3914_v43 = vld [vmem:[#allocation2 + $0x171] sm:$0xff] }
 0x271   : > { %v10189_v14 = vpack.c.bf16 %v3900_v47, %v3899_v31  ;;  %v3901_v44 = vld [vmem:[#allocation2 + $0xa9] sm:$0xff]  ;;  %v3916_v34 = vld [vmem:[#allocation2 + $0x191] sm:$0xff] }
 0x272   : > { %v3903_v5 = vld [vmem:[#allocation2 + $0xc9] sm:$0xff]  ;;  %v10199_v39 = vpack.c.bf16 %v3902_v55, %v3901_v44  ;;  %v3918_v21 = vld [vmem:[#allocation2 + $0x1b1] sm:$0xff] }
 0x273   : > { %v3448_v58 = vld [vmem:[#allocation2 + $0x1f0] sm:$0xff]  ;;  %v10201_v33 = vpack.c.bf16 %v3904_v41, %v3903_v5 }
 0x274   : > { %v3399_v6 = vld [vmem:[#allocation2 + $0x1ef] sm:$0xff]  ;;  %v10146_v13 = vpack.c.bf16 %v3448_v58, %v3447_v16 }
 0x275   : > { %v10148_v63 = vpack.c.bf16 %v3399_v6, %v3398_v0  ;;  %v3905_v4 = vld [vmem:[#allocation2 + $0xe9] sm:$0xff]  ;;  %v3912_v58 = vld [vmem:[#allocation2 + $0x151] sm:$0xff] }
 0x276   : > { %7670 = vmatmul.mubr.msk.bf16.gmra.mxu1 %vm344_vm1, %v10146_v13  ;;  %v3907_v40 = vld [vmem:[#allocation2 + $0x109] sm:$0xff]  ;;  %v10211_v18 = vpack.c.bf16 %v3906_v57, %v3905_v4  ;;  %v3920_v31 = vld [vmem:[#allocation2 + $0x1d1] sm:$0xff] }
 0x277   : > { %7704 = vmatmul.mubr.msk.bf16.gmra.mxu0 %vm344_vm1, %v10148_v63  ;;  %7709 = vmatprep.mubr.msk.bf16.mxu1 %vm344_vm1, %v3923_v46  ;;  %v10213_v49 = vpack.c.bf16 %v3908_v3, %v3907_v40  ;;  %v3909_v28 = vld [vmem:[#allocation2 + $0x129] sm:$0xff]  ;;  %v3922_v5 = vld [vmem:[#allocation2 + $0x1f1] sm:$0xff] }
 0x278   : > { %7743 = vmatprep.mubr.msk.bf16.mxu0 %vm344_vm1, %v9964_v54  ;;  %v10170_v54 = vld [vmem:[%s11354_s4 + $0xc] sm:$0x3]  ;;  %v10223_v0 = vpack.c.bf16 %v3910_v20, %v3909_v28  ;;  %v4216_v41 = vld [vmem:[#allocation2 + $0x20f] sm:$0xff]  ;;  %v5460_v28 = vsel %vm598_vm0, %v10177_v26, 0 }
 0x279   : > { %v3911_v16 = vld [vmem:[#allocation2 + $0x149] sm:$0xff]  ;;  %v5166_v3 = vsel %vm598_vm0, %v10170_v54, 0 }
 0x27a   : > { %v10225_v6 = vpack.c.bf16 %v3912_v58, %v3911_v16  ;;  %v3913_v46 = vld [vmem:[#allocation2 + $0x169] sm:$0xff] }
 0x27b   : > { %v3915_v52 = vld [vmem:[#allocation2 + $0x189] sm:$0xff]  ;;  %v10235_v56 = vpack.c.bf16 %v3914_v43, %v3913_v46 }
 0x27c   : > { %v3919_v9 = vld [vmem:[#allocation2 + $0x1c9] sm:$0xff] }
 0x27d   : > { %v3937_v44 = vpack.c.bf16 %v3920_v31, %v3919_v9  ;;  %v3921_v55 = vld [vmem:[#allocation2 + $0x1e9] sm:$0xff] }
 0x27e   : > { %7710 = vmatmul.mubr.msk.bf16.vlgmr.msra.gmra.mxu1 %vm344_vm1, %v10157_v61  ;;  %v3938_v4 = vpack.c.bf16 %v3922_v5, %v3921_v55  ;;  %v4215_v57 = vld [vmem:[#allocation2 + $0x207] sm:$0xff]  ;;  %v6829_v20 = vld [vmem:[%s11354_s4 + $0x10] sm:$0x3] }
 0x27f   : > { %7744 = vmatmul.mubr.msk.bf16.vlgmr.msra.gmra.mxu0 %vm344_vm1, %v9984_v62  ;;  %7776 = vmatpush3.bf16.msra.mxu1 %v4578_v50  ;;  %v10237_v50 = vpack.c.bf16 %v3916_v34, %v3915_v52  ;;  %v10253_v40 = vpack.c.bf16 %v4216_v41, %v4215_v57  ;;  %v5754_v43 = vsel %vm598_vm0, %v6829_v20, 0 }
 0x280   : > { %7713 = vmatprep.mubr.msk.bf16.mxu1 %vm344_vm1, %v10163_v38  ;;  %7747 = vmatprep.mubr.msk.bf16.mxu0 %vm344_vm1, %v10005_v10 }
 0x281   : > { %7810 = vmatpush3.bf16.msra.mxu0 %v4872_v1  ;;  %7960 = vmatprep.subr.msk.bf16.mxu1 %vm598_vm0, %v10170_v54  ;;  %v3917_v1 = vld [vmem:[#allocation2 + $0x1a9] sm:$0xff]  ;;  %v4804_v54 = vld [vmem:[#allocation2 + $0x211] sm:$0xff] }
 0x282   : > { %7961 = vmatprep.subr.msk.bf16.mxu0 %vm598_vm0, %v10177_v26  ;;  %v3936_v47 = vpack.c.bf16 %v3918_v21, %v3917_v1  ;;  %v4509_v26 = vld [vmem:[#allocation2 + $0x208] sm:$0xff] }
 0x286   : > { %7714 = vmatmul.mubr.msk.bf16.gmra.mxu1 %vm344_vm1, %v10187_v27 }
 0x287   : > { %7748 = vmatmul.mubr.msk.bf16.gmra.mxu0 %vm344_vm1, %v10021_v53  ;;  %7717 = vmatprep.mubr.msk.bf16.mxu1 %vm344_vm1, %v10189_v14 }
 0x288   : > { %7751 = vmatprep.mubr.msk.bf16.mxu0 %vm344_vm1, %v10037_v45 }
 0x28e   : > { %7718 = vmatmul.mubr.msk.bf16.gmra.mxu1 %vm344_vm1, %v10199_v39 }
 0x28f   : > { %7752 = vmatmul.mubr.msk.bf16.gmra.mxu0 %vm344_vm1, %v10049_v51  ;;  %7721 = vmatprep.mubr.msk.bf16.mxu1 %vm344_vm1, %v10201_v33 }
 0x290   : > { %7755 = vmatprep.mubr.msk.bf16.mxu0 %vm344_vm1, %v10061_v37 }
 0x296   : > { %7722 = vmatmul.mubr.msk.bf16.gmra.mxu1 %vm344_vm1, %v10211_v18 }
 0x297   : > { %7756 = vmatmul.mubr.msk.bf16.gmra.mxu0 %vm344_vm1, %v10073_v25  ;;  %7725 = vmatprep.mubr.msk.bf16.mxu1 %vm344_vm1, %v10213_v49 }
 0x298   : > { %7759 = vmatprep.mubr.msk.bf16.mxu0 %vm344_vm1, %v10087_v12 }
 0x29e   : > { %7726 = vmatmul.mubr.msk.bf16.gmra.mxu1 %vm344_vm1, %v10223_v0 }
 0x29f   : > { %7760 = vmatmul.mubr.msk.bf16.gmra.mxu0 %vm344_vm1, %v10097_v15  ;;  %7729 = vmatprep.mubr.msk.bf16.mxu1 %vm344_vm1, %v10225_v6 }
 0x2a0   : > { %7763 = vmatprep.mubr.msk.bf16.mxu0 %vm344_vm1, %v10109_v24 }
 0x2a6   : > { %7730 = vmatmul.mubr.msk.bf16.gmra.mxu1 %vm344_vm1, %v10235_v56 }
 0x2a7   : > { %7764 = vmatmul.mubr.msk.bf16.gmra.mxu0 %vm344_vm1, %v10119_v2  ;;  %7733 = vmatprep.mubr.msk.bf16.mxu1 %vm344_vm1, %v10237_v50 }
 0x2a8   : > { %7767 = vmatprep.mubr.msk.bf16.mxu0 %vm344_vm1, %v10131_v48 }
 0x2ae   : > { %7734 = vmatmul.mubr.msk.bf16.gmra.mxu1 %vm344_vm1, %v3936_v47 }
 0x2af   : > { %7768 = vmatmul.mubr.msk.bf16.gmra.mxu0 %vm344_vm1, %v10140_v60  ;;  %7737 = vmatprep.mubr.msk.bf16.mxu1 %vm344_vm1, %v3937_v44 }
 0x2b0   : > { %7771 = vmatprep.mubr.msk.bf16.mxu0 %vm344_vm1, %v10148_v63 }
 0x2b6   : > { %7738 = vmatmul.mubr.msk.bf16.gmra.mxu1 %vm344_vm1, %v3938_v4 }
 0x2b7   : > { %7772 = vmatmul.mubr.msk.bf16.gmra.mxu0 %vm344_vm1, %v10253_v40  ;;  %7777 = vmatprep.mubr.msk.bf16.mxu1 %vm344_vm1, %v9932_v30  ;;  %v4510_v30 = vld [vmem:[#allocation2 + $0x210] sm:$0xff] }
 0x2b8   : > { %7811 = vmatprep.mubr.msk.bf16.mxu0 %vm344_vm1, %v10157_v61  ;;  %v4803_v61 = vld [vmem:[#allocation2 + $0x209] sm:$0xff]  ;;  %v10323_v16 = vpack.c.bf16 %v4510_v30, %v4509_v26 }
 0x2b9   : > { %v10325_v58 = vpack.c.bf16 %v4804_v54, %v4803_v61 }
 0x2be   : > { %7778 = vmatmul.mubr.msk.bf16.vlgmr.msra.gmra.mxu1 %vm344_vm1, %v9980_v11 }
 0x2bf   : > { %7812 = vmatmul.mubr.msk.bf16.vlgmr.msra.gmra.mxu0 %vm344_vm1, %v10163_v38  ;;  %7844 = vmatpush3.bf16.msra.mxu1 %v5166_v3 }
 0x2c0   : > { %7781 = vmatprep.mubr.msk.bf16.mxu1 %vm344_vm1, %v10001_v36  ;;  %7815 = vmatprep.mubr.msk.bf16.mxu0 %vm344_vm1, %v10187_v27 }
 0x2c1   : > { %7878 = vmatpush3.bf16.msra.mxu0 %v5460_v28  ;;  %7962 = vmatprep.subr.msk.bf16.mxu1 %vm598_vm0, %v6829_v20 }
 0x2c6   : > { %7782 = vmatmul.mubr.msk.bf16.gmra.mxu1 %vm344_vm1, %v10016_v35 }
 0x2c7   : > { %7816 = vmatmul.mubr.msk.bf16.gmra.mxu0 %vm344_vm1, %v10189_v14  ;;  %7785 = vmatprep.mubr.msk.bf16.mxu1 %vm344_vm1, %v10034_v19 }
 0x2c8   : > { %7819 = vmatprep.mubr.msk.bf16.mxu0 %vm344_vm1, %v10199_v39 }
 0x2ce   : > { %7786 = vmatmul.mubr.msk.bf16.gmra.mxu1 %vm344_vm1, %v10039_v7 }
 0x2cf   : > { %7820 = vmatmul.mubr.msk.bf16.gmra.mxu0 %vm344_vm1, %v10201_v33  ;;  %7789 = vmatprep.mubr.msk.bf16.mxu1 %vm344_vm1, %v10057_v17 }
 0x2d0   : > { %7823 = vmatprep.mubr.msk.bf16.mxu0 %vm344_vm1, %v10211_v18 }
 0x2d6   : > { %7790 = vmatmul.mubr.msk.bf16.gmra.mxu1 %vm344_vm1, %v10063_v42 }
 0x2d7   : > { %7824 = vmatmul.mubr.msk.bf16.gmra.mxu0 %vm344_vm1, %v10213_v49  ;;  %7793 = vmatprep.mubr.msk.bf16.mxu1 %vm344_vm1, %v10085_v29 }
 0x2d8   : > { %7827 = vmatprep.mubr.msk.bf16.mxu0 %vm344_vm1, %v10223_v0 }
 0x2de   : > { %7794 = vmatmul.mubr.msk.bf16.gmra.mxu1 %vm344_vm1, %v10089_v22 }
 0x2df   : > { %7828 = vmatmul.mubr.msk.bf16.gmra.mxu0 %vm344_vm1, %v10225_v6  ;;  %7797 = vmatprep.mubr.msk.bf16.mxu1 %vm344_vm1, %v10106_v32 }
 0x2e0   : > { %7831 = vmatprep.mubr.msk.bf16.mxu0 %vm344_vm1, %v10235_v56 }
 0x2e6   : > { %7798 = vmatmul.mubr.msk.bf16.gmra.mxu1 %vm344_vm1, %v10111_v23 }
 0x2e7   : > { %7832 = vmatmul.mubr.msk.bf16.gmra.mxu0 %vm344_vm1, %v10237_v50  ;;  %7801 = vmatprep.mubr.msk.bf16.mxu1 %vm344_vm1, %v10128_v8 }
 0x2e8   : > { %7835 = vmatprep.mubr.msk.bf16.mxu0 %vm344_vm1, %v3936_v47 }
 0x2ee   : > { %7802 = vmatmul.mubr.msk.bf16.gmra.mxu1 %vm344_vm1, %v10134_v59 }
 0x2ef   : > { %7836 = vmatmul.mubr.msk.bf16.gmra.mxu0 %vm344_vm1, %v3937_v44  ;;  %7805 = vmatprep.mubr.msk.bf16.mxu1 %vm344_vm1, %v10146_v13 }
 0x2f0   : > { %7839 = vmatprep.mubr.msk.bf16.mxu0 %vm344_vm1, %v3938_v4 }
 0x2f6   : > { %7806 = vmatmul.mubr.msk.bf16.gmra.mxu1 %vm344_vm1, %v10323_v16 }
 0x2f7   : > { %7840 = vmatmul.mubr.msk.bf16.gmra.mxu0 %vm344_vm1, %v10325_v58  ;;  %7845 = vmatprep.mubr.msk.bf16.mxu1 %vm344_vm1, %v9984_v62 }
 0x2f8   : > { %7879 = vmatprep.mubr.msk.bf16.mxu0 %vm344_vm1, %v9980_v11 }
 0x2fa   : > { %v7643_v46 = vpop.f32.mrf.mxu1 }
 0x2fc   : > { %v3552_v52 = vpop.f32.mrf.mxu1 }
 0x2fe   : > { %7846 = vmatmul.mubr.msk.bf16.vlgmr.msra.gmra.mxu1 %vm344_vm1, %v10005_v10  ;;  %v7644_v34 = vpop.f32.mrf.mxu1 }
 0x2ff   : > { %v7677_v1 = vpop.f32.mrf.mxu0  ;;  %7880 = vmatmul.mubr.msk.bf16.vlgmr.msra.gmra.mxu0 %vm344_vm1, %v10001_v36  ;;  %7912 = vmatpush3.bf16.msra.mxu1 %v5754_v43 }
 0x300   : > { %v10340_v21 = vadd.f32 %v7677_v1, %v7643_v46  ;;  %7849 = vmatprep.mubr.msk.bf16.mxu1 %vm344_vm1, %v10021_v53  ;;  %7883 = vmatprep.mubr.msk.bf16.mxu0 %vm344_vm1, %v10016_v35  ;;  %v3555_v11 = vpop.f32.mrf.mxu1 }
 0x301   : > { %v3764_v62 = vpop.f32.mrf.mxu0 }
 0x302   : > { %v10346_v9 = vadd.f32 %v3764_v62, %v3552_v52 }
 0x303   : > { %v7678_v31 = vpop.f32.mrf.mxu0 }
 0x304   : > { %v10348_v10 = vadd.f32 %v7678_v31, %v7644_v34  ;;  %v7647_v47 = vpop.f32.mrf.mxu1 }
 0x305   : > { %v3767_v44 = vpop.f32.mrf.mxu0 }
 0x306   : > { %v10350_v55 = vadd.f32 %v3767_v44, %v3555_v11  ;;  %7850 = vmatmul.mubr.msk.bf16.gmra.mxu1 %vm344_vm1, %v10037_v45  ;;  %v3568_v36 = vpop.f32.mrf.mxu1 }
 0x307   : > { %v7681_v5 = vpop.f32.mrf.mxu0  ;;  %7884 = vmatmul.mubr.msk.bf16.gmra.mxu0 %vm344_vm1, %v10034_v19  ;;  %7853 = vmatprep.mubr.msk.bf16.mxu1 %vm344_vm1, %v10049_v51 }
 0x308   : > { %v10358_v35 = vadd.f32 %v7681_v5, %v7647_v47  ;;  %7887 = vmatprep.mubr.msk.bf16.mxu0 %vm344_vm1, %v10039_v7  ;;  %v7648_v53 = vpop.f32.mrf.mxu1 }
 0x309   : > { %v3780_v41 = vpop.f32.mrf.mxu0 }
 0x30a   : > { %v10362_v4 = vadd.f32 %v3780_v41, %v3568_v36  ;;  %v3571_v57 = vpop.f32.mrf.mxu1 }
 0x30b   : > { %v7682_v3 = vpop.f32.mrf.mxu0 }
 0x30c   : > { %v10364_v45 = vadd.f32 %v7682_v3, %v7648_v53  ;;  %v7651_v28 = vpop.f32.mrf.mxu1 }
 0x30d   : > { %v3783_v20 = vpop.f32.mrf.mxu0 }
 0x30e   : > { %v10366_v30 = vadd.f32 %v3783_v20, %v3571_v57  ;;  %7854 = vmatmul.mubr.msk.bf16.gmra.mxu1 %vm344_vm1, %v10061_v37  ;;  %v3584_v19 = vpop.f32.mrf.mxu1 }
 0x30f   : > { %v7685_v51 = vpop.f32.mrf.mxu0  ;;  %7888 = vmatmul.mubr.msk.bf16.gmra.mxu0 %vm344_vm1, %v10057_v17  ;;  %7857 = vmatprep.mubr.msk.bf16.mxu1 %vm344_vm1, %v10073_v25 }
 0x310   : > { %v10374_v7 = vadd.f32 %v7685_v51, %v7651_v28  ;;  %7891 = vmatprep.mubr.msk.bf16.mxu0 %vm344_vm1, %v10063_v42  ;;  %v7652_v61 = vpop.f32.mrf.mxu1 }
 0x311   : > { %v3796_v54 = vpop.f32.mrf.mxu0 }
 0x312   : > { %v10378_v26 = vadd.f32 %v3796_v54, %v3584_v19  ;;  %v3587_v46 = vpop.f32.mrf.mxu1 }
 0x313   : > { %v7686_v43 = vpop.f32.mrf.mxu0 }
 0x314   : > { %v10380_v37 = vadd.f32 %v7686_v43, %v7652_v61  ;;  %v7655_v52 = vpop.f32.mrf.mxu1 }
 0x315   : > { %v3799_v34 = vpop.f32.mrf.mxu0 }
 0x316   : > { %v10382_v1 = vadd.f32 %v3799_v34, %v3587_v46  ;;  %7858 = vmatmul.mubr.msk.bf16.gmra.mxu1 %vm344_vm1, %v10087_v12  ;;  %v3600_v17 = vpop.f32.mrf.mxu1 }
 0x317   : > { %v7689_v25 = vpop.f32.mrf.mxu0  ;;  %7892 = vmatmul.mubr.msk.bf16.gmra.mxu0 %vm344_vm1, %v10085_v29  ;;  %7861 = vmatprep.mubr.msk.bf16.mxu1 %vm344_vm1, %v10097_v15 }
 0x318   : > { %v10390_v42 = vadd.f32 %v7689_v25, %v7655_v52  ;;  %7895 = vmatprep.mubr.msk.bf16.mxu0 %vm344_vm1, %v10089_v22  ;;  %v7656_v11 = vpop.f32.mrf.mxu1 }
 0x319   : > { %v3812_v62 = vpop.f32.mrf.mxu0 }
 0x31a   : > { %v10394_v31 = vadd.f32 %v3812_v62, %v3600_v17  ;;  %v3603_v47 = vpop.f32.mrf.mxu1  ;;  %v5098_v62 = vld [vmem:[#allocation2 + $0x22f] sm:$0xff] }
 0x31b   : > { %v7690_v44 = vpop.f32.mrf.mxu0 }
 0x31c   : > { %v10396_v12 = vadd.f32 %v7690_v44, %v7656_v11  ;;  %v5097_v11 = vld [vmem:[#allocation2 + $0x227] sm:$0xff] }
 0x31d   : > { %v3815_v36 = vpop.f32.mrf.mxu0  ;;  %v7659_v5 = vpop.f32.mrf.mxu1  ;;  %v5391_v44 = vld [vmem:[#allocation2 + $0x228] sm:$0xff] }
 0x31e   : > { %v10398_v53 = vadd.f32 %v3815_v36, %v3603_v47  ;;  %7862 = vmatmul.mubr.msk.bf16.gmra.mxu1 %vm344_vm1, %v10109_v24  ;;  %v5392_v36 = vld [vmem:[#allocation2 + $0x230] sm:$0xff] }
 0x31f   : > { %v7693_v29 = vpop.f32.mrf.mxu0  ;;  %7896 = vmatmul.mubr.msk.bf16.gmra.mxu0 %vm344_vm1, %v10106_v32  ;;  %7865 = vmatprep.mubr.msk.bf16.mxu1 %vm344_vm1, %v10119_v2  ;;  %v3616_v22 = vpop.f32.mrf.mxu1 }
 0x320   : > { %v10406_v15 = vadd.f32 %v7693_v29, %v7659_v5  ;;  %7899 = vmatprep.mubr.msk.bf16.mxu0 %vm344_vm1, %v10111_v23 }
 0x321   : > { %v3828_v41 = vpop.f32.mrf.mxu0  ;;  %v7660_v57 = vpop.f32.mrf.mxu1 }
 0x322   : > { %v10410_v3 = vadd.f32 %v3828_v41, %v3616_v22  ;;  %v5114_v22 = vpack.c.bf16 %v5098_v62, %v5097_v11 }
 0x323   : > { %v7694_v28 = vpop.f32.mrf.mxu0  ;;  %v3619_v20 = vpop.f32.mrf.mxu1 }
 0x324   : > { %v10412_v24 = vadd.f32 %v7694_v28, %v7660_v57  ;;  %v5408_v57 = vpack.c.bf16 %v5392_v36, %v5391_v44 }
 0x325   : > { %v3831_v19 = vpop.f32.mrf.mxu0  ;;  %v7663_v51 = vpop.f32.mrf.mxu1 }
 0x326   : > { %v10414_v32 = vadd.f32 %v3831_v19, %v3619_v20  ;;  %7866 = vmatmul.mubr.msk.bf16.gmra.mxu1 %vm344_vm1, %v10131_v48 }
 0x327   : > { %v7697_v2 = vpop.f32.mrf.mxu0  ;;  %7900 = vmatmul.mubr.msk.bf16.gmra.mxu0 %vm344_vm1, %v10128_v8  ;;  %7869 = vmatprep.mubr.msk.bf16.mxu1 %vm344_vm1, %v10140_v60  ;;  %v3632_v23 = vpop.f32.mrf.mxu1 }
 0x328   : > { %v10422_v61 = vadd.f32 %v7697_v2, %v7663_v51  ;;  %7903 = vmatprep.mubr.msk.bf16.mxu0 %vm344_vm1, %v10134_v59 }
 0x329   : > { %v3844_v54 = vpop.f32.mrf.mxu0  ;;  %v7664_v46 = vpop.f32.mrf.mxu1 }
 0x32a   : > { %v10426_v43 = vadd.f32 %v3844_v54, %v3632_v23 }
 0x32b   : > { %v7698_v52 = vpop.f32.mrf.mxu0  ;;  %v3635_v34 = vpop.f32.mrf.mxu1 }
 0x32c   : > { %v10428_v48 = vadd.f32 %v7698_v52, %v7664_v46 }
 0x32d   : > { %v3847_v17 = vpop.f32.mrf.mxu0  ;;  %v7667_v25 = vpop.f32.mrf.mxu1 }
 0x32e   : > { %v10430_v8 = vadd.f32 %v3847_v17, %v3635_v34  ;;  %7870 = vmatmul.mubr.msk.bf16.gmra.mxu1 %vm344_vm1, %v10148_v63 }
 0x32f   : > { %v7701_v60 = vpop.f32.mrf.mxu0  ;;  %7904 = vmatmul.mubr.msk.bf16.gmra.mxu0 %vm344_vm1, %v10146_v13  ;;  %7873 = vmatprep.mubr.msk.bf16.mxu1 %vm344_vm1, %v10253_v40  ;;  %v3648_v59 = vpop.f32.mrf.mxu1 }
 0x330   : > { %v10438_v47 = vadd.f32 %v7701_v60, %v7667_v25  ;;  %7907 = vmatprep.mubr.msk.bf16.mxu0 %vm344_vm1, %v10323_v16 }
 0x331   : > { %v3860_v5 = vpop.f32.mrf.mxu0  ;;  %v7668_v29 = vpop.f32.mrf.mxu1 }
 0x332   : > { %v10442_v63 = vadd.f32 %v3860_v5, %v3648_v59 }
 0x333   : > { %v7702_v41 = vpop.f32.mrf.mxu0  ;;  %v3651_v13 = vpop.f32.mrf.mxu1 }
 0x334   : > { %v10444_v28 = vadd.f32 %v7702_v41, %v7668_v29 }
 0x335   : > { %v3863_v40 = vpop.f32.mrf.mxu0 }
 0x336   : > { %v10446_v20 = vadd.f32 %v3863_v40, %v3651_v13  ;;  %v7671_v19 = vpop.f32.mrf.mxu1  ;;  %7874 = vmatmul.mubr.msk.bf16.gmra.mxu1 %vm344_vm1, %v5114_v22 }
 0x337   : > { %v7705_v51 = vpop.f32.mrf.mxu0  ;;  %7913 = vmatprep.mubr.msk.bf16.mxu1 %vm344_vm1, %v10163_v38  ;;  %7908 = vmatmul.mubr.msk.bf16.gmra.mxu0 %vm344_vm1, %v5408_v57 }
 0x338   : > { %v10452_v16 = vadd.f32 %v7705_v51, %v7671_v19  ;;  %v3664_v2 = vpop.f32.mrf.mxu1 }
 0x339   : > { %v3876_v23 = vpop.f32.mrf.mxu0 }
 0x33a   : > { %v10454_v54 = vadd.f32 %v3876_v23, %v3664_v2  ;;  %v7672_v46 = vpop.f32.mrf.mxu1 }
 0x33b   : > { %v7706_v52 = vpop.f32.mrf.mxu0 }
 0x33c   : > { %v10456_v34 = vadd.f32 %v7706_v52, %v7672_v46  ;;  %v3667_v17 = vpop.f32.mrf.mxu1 }
 0x33d   : > { %v3879_v25 = vpop.f32.mrf.mxu0 }
 0x33e   : > { %v10458_v60 = vadd.f32 %v3879_v25, %v3667_v17  ;;  %v7711_v59 = vpop.f32.mrf.mxu1  ;;  %7914 = vmatmul.mubr.msk.bf16.vlgmr.msra.gmra.mxu1 %vm344_vm1, %v10187_v27 }
 0x33f   : > { %v4155_v38 = vadd.f32 %v7711_v59, %v10340_v21  ;;  %v7745_v11 = vpop.f32.mrf.mxu0  ;;  %7917 = vmatprep.mubr.msk.bf16.mxu1 %vm344_vm1, %v10189_v14 }
 0x340   : > { %v4026_v62 = vpop.f32.mrf.mxu1 }
 0x341   : > { %v10465_v44 = vadd.f32 %v7745_v11, %v4155_v38  ;;  %v4153_v36 = vadd.f32 %v4026_v62, %v10346_v9  ;;  %v4320_v5 = vpop.f32.mrf.mxu0 }
 0x342   : > { %v7712_v29 = vpop.f32.mrf.mxu1 }
 0x343   : > { %v10468_v22 = vadd.f32 %v4320_v5, %v4153_v36  ;;  %v4156_v41 = vadd.f32 %v7712_v29, %v10348_v10  ;;  %v7746_v13 = vpop.f32.mrf.mxu0 }
 0x344   : > { %v4029_v57 = vpop.f32.mrf.mxu1 }
 0x345   : > { %v10471_v27 = vadd.f32 %v7746_v13, %v4156_v41  ;;  %v4154_v21 = vadd.f32 %v4029_v57, %v10350_v55  ;;  %v4323_v40 = vpop.f32.mrf.mxu0 }
 0x346   : > { %v7715_v19 = vpop.f32.mrf.mxu1  ;;  %7918 = vmatmul.mubr.msk.bf16.gmra.mxu1 %vm344_vm1, %v10199_v39 }
 0x347   : > { %v10476_v14 = vadd.f32 %v4323_v40, %v4154_v21  ;;  %v4159_v9 = vadd.f32 %v7715_v19, %v10358_v35  ;;  %v7749_v51 = vpop.f32.mrf.mxu0  ;;  %7921 = vmatprep.mubr.msk.bf16.mxu1 %vm344_vm1, %v10201_v33 }
 0x348   : > { %v4042_v10 = vpop.f32.mrf.mxu1 }
 0x349   : > { %v10481_v2 = vadd.f32 %v7749_v51, %v4159_v9  ;;  %v4157_v23 = vadd.f32 %v4042_v10, %v10362_v4  ;;  %v4336_v46 = vpop.f32.mrf.mxu0 }
 0x34a   : > { %v7716_v55 = vpop.f32.mrf.mxu1 }
 0x34b   : > { %v10484_v52 = vadd.f32 %v4336_v46, %v4157_v23  ;;  %v4160_v17 = vadd.f32 %v7716_v55, %v10364_v45  ;;  %v7750_v39 = vpop.f32.mrf.mxu0 }
 0x34c   : > { %v4045_v25 = vpop.f32.mrf.mxu1 }
 0x34d   : > { %v10487_v59 = vadd.f32 %v7750_v39, %v4160_v17  ;;  %v4158_v35 = vadd.f32 %v4045_v25, %v10366_v30  ;;  %v4339_v38 = vpop.f32.mrf.mxu0 }
 0x34e   : > { %v7719_v11 = vpop.f32.mrf.mxu1  ;;  %7922 = vmatmul.mubr.msk.bf16.gmra.mxu1 %vm344_vm1, %v10211_v18 }
 0x34f   : > { %v10492_v33 = vadd.f32 %v4339_v38, %v4158_v35  ;;  %v4163_v4 = vadd.f32 %v7719_v11, %v10374_v7  ;;  %v7753_v62 = vpop.f32.mrf.mxu0  ;;  %7925 = vmatprep.mubr.msk.bf16.mxu1 %vm344_vm1, %v10213_v49 }
 0x350   : > { %v4058_v45 = vpop.f32.mrf.mxu1 }
 0x351   : > { %v10497_v36 = vadd.f32 %v7753_v62, %v4163_v4  ;;  %v4161_v5 = vadd.f32 %v4058_v45, %v10378_v26  ;;  %v4352_v29 = vpop.f32.mrf.mxu0  ;;  %v5678_v45 = vld [vmem:[#allocation2 + $0x1b1] sm:$0xff] }
 0x352   : > { %v7720_v30 = vpop.f32.mrf.mxu1 }
 0x353   : > { %v10500_v41 = vadd.f32 %v4352_v29, %v4161_v5  ;;  %v4164_v13 = vadd.f32 %v7720_v30, %v10380_v37  ;;  %v7754_v18 = vpop.f32.mrf.mxu0  ;;  %v5679_v29 = vld [vmem:[#allocation2 + $0x1c9] sm:$0xff]  ;;  %v5680_v30 = vld [vmem:[#allocation2 + $0x1d1] sm:$0xff] }
 0x354   : > { %v4061_v57 = vpop.f32.mrf.mxu1 }
 0x355   : > { %v10503_v21 = vadd.f32 %v7754_v18, %v4164_v13  ;;  %v4162_v7 = vadd.f32 %v4061_v57, %v10382_v1  ;;  %v4355_v40 = vpop.f32.mrf.mxu0 }
 0x356   : > { %v7723_v19 = vpop.f32.mrf.mxu1  ;;  %7926 = vmatmul.mubr.msk.bf16.gmra.mxu1 %vm344_vm1, %v10223_v0 }
 0x357   : > { %v10508_v49 = vadd.f32 %v4355_v40, %v4162_v7  ;;  %v4167_v26 = vadd.f32 %v7723_v19, %v10390_v42  ;;  %v7757_v9 = vpop.f32.mrf.mxu0  ;;  %7929 = vmatprep.mubr.msk.bf16.mxu1 %vm344_vm1, %v10225_v6  ;;  %v5699_v19 = vpack.c.bf16 %v5680_v30, %v5679_v29 }
 0x358   : > { %v4074_v37 = vpop.f32.mrf.mxu1 }
 0x359   : > { %v10513_v51 = vadd.f32 %v7757_v9, %v4167_v26  ;;  %v4165_v10 = vadd.f32 %v4074_v37, %v10394_v31  ;;  %v4368_v23 = vpop.f32.mrf.mxu0 }
 0x35a   : > { %v7724_v1 = vpop.f32.mrf.mxu1 }
 0x35b   : > { %v10516_v46 = vadd.f32 %v4368_v23, %v4165_v10  ;;  %v4168_v55 = vadd.f32 %v7724_v1, %v10396_v12  ;;  %v7758_v0 = vpop.f32.mrf.mxu0 }
 0x35c   : > { %v4077_v17 = vpop.f32.mrf.mxu1 }
 0x35d   : > { %v10519_v39 = vadd.f32 %v7758_v0, %v4168_v55  ;;  %v4166_v42 = vadd.f32 %v4077_v17, %v10398_v53  ;;  %v4371_v25 = vpop.f32.mrf.mxu0  ;;  %v5677_v53 = vld [vmem:[#allocation2 + $0x1a9] sm:$0xff] }
 0x35e   : > { %v7727_v35 = vpop.f32.mrf.mxu1  ;;  %7930 = vmatmul.mubr.msk.bf16.gmra.mxu1 %vm344_vm1, %v10235_v56  ;;  %v5698_v57 = vpack.c.bf16 %v5678_v45, %v5677_v53  ;;  %v5681_v55 = vld [vmem:[#allocation2 + $0x1e9] sm:$0xff]  ;;  %v5686_v45 = vld [vmem:[#allocation2 + $0x231] sm:$0xff] }
 0x35f   : > { %v10524_v6 = vadd.f32 %v4371_v25, %v4166_v42  ;;  %v4171_v31 = vadd.f32 %v7727_v35, %v10406_v15  ;;  %v7761_v38 = vpop.f32.mrf.mxu0  ;;  %7933 = vmatprep.mubr.msk.bf16.mxu1 %vm344_vm1, %v10237_v50 }
 0x360   : > { %v4090_v12 = vpop.f32.mrf.mxu1 }
 0x361   : > { %v10529_v11 = vadd.f32 %v7761_v38, %v4171_v31  ;;  %v4169_v4 = vadd.f32 %v4090_v12, %v10410_v3  ;;  %v4384_v62 = vpop.f32.mrf.mxu0 }
 0x362   : > { %v7728_v5 = vpop.f32.mrf.mxu1 }
 0x363   : > { %v10532_v56 = vadd.f32 %v4384_v62, %v4169_v4  ;;  %v4172_v13 = vadd.f32 %v7728_v5, %v10412_v24  ;;  %v7762_v15 = vpop.f32.mrf.mxu0 }
 0x364   : > { %v4093_v18 = vpop.f32.mrf.mxu1 }
 0x365   : > { %v10535_v7 = vadd.f32 %v7762_v15, %v4172_v13  ;;  %v4170_v50 = vadd.f32 %v4093_v18, %v10414_v32  ;;  %v4387_v40 = vpop.f32.mrf.mxu0  ;;  %v5682_v32 = vld [vmem:[#allocation2 + $0x1f1] sm:$0xff] }
 0x366   : > { %v7731_v3 = vpop.f32.mrf.mxu1  ;;  %7934 = vmatmul.mubr.msk.bf16.gmra.mxu1 %vm344_vm1, %v5698_v57  ;;  %v5700_v31 = vpack.c.bf16 %v5682_v32, %v5681_v55 }
 0x367   : > { %v10539_v26 = vadd.f32 %v4387_v40, %v4170_v50  ;;  %v4175_v9 = vadd.f32 %v7731_v3, %v10422_v61  ;;  %v7765_v37 = vpop.f32.mrf.mxu0  ;;  %7937 = vmatprep.mubr.msk.bf16.mxu1 %vm344_vm1, %v5699_v19 }
 0x368   : > { %v4106_v24 = vpop.f32.mrf.mxu1 }
 0x369   : > { %v10543_v10 = vadd.f32 %v7765_v37, %v4175_v9  ;;  %v4173_v23 = vadd.f32 %v4106_v24, %v10426_v43  ;;  %v4400_v1 = vpop.f32.mrf.mxu0 }
 0x36a   : > { %v7732_v0 = vpop.f32.mrf.mxu1 }
 0x36b   : > { %v10546_v17 = vadd.f32 %v4400_v1, %v4173_v23  ;;  %v4176_v42 = vadd.f32 %v7732_v0, %v10428_v48  ;;  %v7766_v25 = vpop.f32.mrf.mxu0  ;;  %v5685_v48 = vld [vmem:[#allocation2 + $0x229] sm:$0xff] }
 0x36c   : > { %v4109_v35 = vpop.f32.mrf.mxu1  ;;  %v5702_v15 = vpack.c.bf16 %v5686_v45, %v5685_v48 }
 0x36d   : > { %v10549_v61 = vadd.f32 %v7766_v25, %v4176_v42  ;;  %v4174_v38 = vadd.f32 %v4109_v35, %v10430_v8  ;;  %v4403_v12 = vpop.f32.mrf.mxu0 }
 0x36e   : > { %v7735_v4 = vpop.f32.mrf.mxu1  ;;  %7938 = vmatmul.mubr.msk.bf16.gmra.mxu1 %vm344_vm1, %v5700_v31 }
 0x36f   : > { %v10553_v43 = vadd.f32 %v4403_v12, %v4174_v38  ;;  %v4179_v62 = vadd.f32 %v7735_v4, %v10438_v47  ;;  %v7769_v53 = vpop.f32.mrf.mxu0  ;;  %7941 = vmatprep.mubr.msk.bf16.mxu1 %vm344_vm1, %v10325_v58 }
 0x370   : > { %v4122_v5 = vpop.f32.mrf.mxu1 }
 0x371   : > { %v10558_v29 = vadd.f32 %v7769_v53, %v4179_v62  ;;  %v4177_v30 = vadd.f32 %v4122_v5, %v10442_v63  ;;  %v4416_v8 = vpop.f32.mrf.mxu0 }
 0x372   : > { %v7736_v13 = vpop.f32.mrf.mxu1 }
 0x373   : > { %v10561_v18 = vadd.f32 %v4416_v8, %v4177_v30  ;;  %v4180_v57 = vadd.f32 %v7736_v13, %v10444_v28  ;;  %v7770_v50 = vpop.f32.mrf.mxu0 }
 0x374   : > { %v4125_v47 = vpop.f32.mrf.mxu1 }
 0x375   : > { %v10564_v40 = vadd.f32 %v7770_v50, %v4180_v57  ;;  %v4178_v58 = vadd.f32 %v4125_v47, %v10446_v20  ;;  %v4419_v19 = vpop.f32.mrf.mxu0 }
 0x376   : > { %v7739_v3 = vpop.f32.mrf.mxu1  ;;  %7942 = vmatmul.mubr.msk.bf16.gmra.mxu1 %vm344_vm1, %v5702_v15 }
 0x377   : > { %v10568_v9 = vadd.f32 %v4419_v19, %v4178_v58  ;;  %v4183_v63 = vadd.f32 %v7739_v3, %v10452_v16  ;;  %v7773_v37 = vpop.f32.mrf.mxu0 }
 0x378   : > { %v4138_v24 = vpop.f32.mrf.mxu1 }
 0x379   : > { %v10571_v23 = vadd.f32 %v7773_v37, %v4183_v63  ;;  %v4181_v28 = vadd.f32 %v4138_v24, %v10454_v54  ;;  %v4432_v1 = vpop.f32.mrf.mxu0 }
 0x37a   : > { %v7740_v55 = vpop.f32.mrf.mxu1 }
 0x37b   : > { %v10574_v32 = vadd.f32 %v4432_v1, %v4181_v28  ;;  %v4184_v20 = vadd.f32 %v7740_v55, %v10456_v34  ;;  %v7774_v0 = vpop.f32.mrf.mxu0 }
 0x37c   : > { %v4141_v42 = vpop.f32.mrf.mxu1 }
 0x37d   : > { %v10577_v25 = vadd.f32 %v7774_v0, %v4184_v20  ;;  %v4182_v35 = vadd.f32 %v4141_v42, %v10458_v60  ;;  %v4435_v31 = vpop.f32.mrf.mxu0 }
 0x37e   : > { %v7779_v16 = vpop.f32.mrf.mxu1 }
 0x37f   : > { %v10580_v38 = vadd.f32 %v4435_v31, %v4182_v35  ;;  %v10583_v12 = vadd.f32 %v7779_v16, %v10465_v44  ;;  %v10585_v54 = vpop.f32.mrf.mxu0 }
 0x380   : > { %v4614_v4 = vpop.f32.mrf.mxu1 }
 0x381   : > { %v10588_v62 = vadd.f32 %v4614_v4, %v10468_v22  ;;  %v10590_v34 = vpop.f32.mrf.mxu0 }
 0x382   : > { %v7780_v53 = vpop.f32.mrf.mxu1 }
 0x383   : > { %v10593_v48 = vadd.f32 %v7780_v53, %v10471_v27  ;;  %v10595_v60 = vpop.f32.mrf.mxu0 }
 0x384   : > { %v4617_v45 = vpop.f32.mrf.mxu1 }
 0x385   : > { %v10598_v5 = vadd.f32 %v4617_v45, %v10476_v14  ;;  %v10600_v44 = vpop.f32.mrf.mxu0 }
 0x386   : > { %v7783_v30 = vpop.f32.mrf.mxu1 }
 0x387   : > { %v10603_v8 = vadd.f32 %v7783_v30, %v10481_v2  ;;  %v10605_v22 = vpop.f32.mrf.mxu0 }
 0x388   : > { %v4630_v13 = vpop.f32.mrf.mxu1 }
 0x389   : > { %v10608_v15 = vadd.f32 %v4630_v13, %v10484_v52  ;;  %v10610_v27 = vpop.f32.mrf.mxu0 }
 0x38a   : > { %v7784_v57 = vpop.f32.mrf.mxu1 }
 0x38b   : > { %v10613_v50 = vadd.f32 %v7784_v57, %v10487_v59  ;;  %v10615_v14 = vpop.f32.mrf.mxu0 }
 0x38c   : > { %v4633_v47 = vpop.f32.mrf.mxu1 }
 0x38d   : > { %v10618_v58 = vadd.f32 %v4633_v47, %v10492_v33  ;;  %v10620_v2 = vpop.f32.mrf.mxu0 }
 0x38e   : > { %v7787_v19 = vpop.f32.mrf.mxu1 }
 0x38f   : > { %v10623_v3 = vadd.f32 %v7787_v19, %v10497_v36  ;;  %v10625_v52 = vpop.f32.mrf.mxu0 }
 0x390   : > { %v4646_v63 = vpop.f32.mrf.mxu1 }
 0x391   : > { %v10628_v37 = vadd.f32 %v4646_v63, %v10500_v41  ;;  %v10630_v59 = vpop.f32.mrf.mxu0 }
 0x392   : > { %v7788_v24 = vpop.f32.mrf.mxu1 }
 0x393   : > { %v10633_v28 = vadd.f32 %v7788_v24, %v10503_v21  ;;  %v10635_v33 = vpop.f32.mrf.mxu0 }
 0x394   : > { %v4649_v1 = vpop.f32.mrf.mxu1 }
 0x395   : > { %v10638_v55 = vadd.f32 %v4649_v1, %v10508_v49  ;;  %v10640_v36 = vpop.f32.mrf.mxu0 }
 0x396   : > { %v7791_v20 = vpop.f32.mrf.mxu1 }
 0x397   : > { %v10643_v0 = vadd.f32 %v7791_v20, %v10513_v51  ;;  %v10645_v41 = vpop.f32.mrf.mxu0 }
 0x398   : > { %v4662_v42 = vpop.f32.mrf.mxu1 }
 0x399   : > { %v10648_v35 = vadd.f32 %v4662_v42, %v10516_v46  ;;  %v10650_v21 = vpop.f32.mrf.mxu0 }
 0x39a   : > { %v7792_v31 = vpop.f32.mrf.mxu1 }
 0x39b   : > { %v10653_v16 = vadd.f32 %v7792_v31, %v10519_v39  ;;  %v10655_v49 = vpop.f32.mrf.mxu0 }
 0x39c   : > { %v4665_v4 = vpop.f32.mrf.mxu1 }
 0x39d   : > { %v10658_v53 = vadd.f32 %v4665_v4, %v10524_v6  ;;  %v10660_v51 = vpop.f32.mrf.mxu0 }
 0x39e   : > { %v7795_v45 = vpop.f32.mrf.mxu1 }
 0x39f   : > { %v10663_v30 = vadd.f32 %v7795_v45, %v10529_v11  ;;  %v10665_v46 = vpop.f32.mrf.mxu0 }
 0x3a0   : > { %11595 = vst [vmem:[#allocation24_spill] sm:$0xff] %v10665_v46  ;;  %v4678_v13 = vpop.f32.mrf.mxu1 }
 0x3a1   : > { %11594 = vst [vmem:[#allocation23_spill] sm:$0xff] %v10663_v30  ;;  %v10668_v57 = vadd.f32 %v4678_v13, %v10532_v56  ;;  %v10670_v39 = vpop.f32.mrf.mxu0 }
 0x3a2   : > { %11597 = vst [vmem:[#allocation26_spill] sm:$0xff] %v10670_v39  ;;  %v7796_v47 = vpop.f32.mrf.mxu1 }
 0x3a3   : > { %11596 = vst [vmem:[#allocation25_spill] sm:$0xff] %v10668_v57  ;;  %v10673_v19 = vadd.f32 %v7796_v47, %v10535_v7  ;;  %v10675_v6 = vpop.f32.mrf.mxu0 }
 0x3a4   : > { %11599 = vst [vmem:[#allocation28_spill] sm:$0xff] %v10675_v6  ;;  %v4681_v63 = vpop.f32.mrf.mxu1 }
 0x3a5   : > { %11598 = vst [vmem:[#allocation27_spill] sm:$0xff] %v10673_v19  ;;  %v10678_v24 = vadd.f32 %v4681_v63, %v10539_v26  ;;  %v10680_v11 = vpop.f32.mrf.mxu0 }
 0x3a6   : > { %11601 = vst [vmem:[#allocation30_spill] sm:$0xff] %v10680_v11  ;;  %v7799_v1 = vpop.f32.mrf.mxu1 }
 0x3a7   : > { %11600 = vst [vmem:[#allocation29_spill] sm:$0xff] %v10678_v24  ;;  %v4763_v20 = vadd.f32 %v7799_v1, %v10543_v10  ;;  %v7833_v42 = vpop.f32.mrf.mxu0 }
 0x3a8   : > { %v4694_v56 = vpop.f32.mrf.mxu1 }
 0x3a9   : > { %v10683_v31 = vadd.f32 %v7833_v42, %v4763_v20  ;;  %v4761_v4 = vadd.f32 %v4694_v56, %v10546_v17  ;;  %v4988_v45 = vpop.f32.mrf.mxu0 }
 0x3aa   : > { %v7800_v7 = vpop.f32.mrf.mxu1 }
 0x3ab   : > { %v10686_v13 = vadd.f32 %v4988_v45, %v4761_v4  ;;  %v4764_v47 = vadd.f32 %v7800_v7, %v10549_v61  ;;  %v7834_v6 = vpop.f32.mrf.mxu0 }
 0x3ac   : > { %v4697_v26 = vpop.f32.mrf.mxu1 }
 0x3ad   : > { %v10689_v63 = vadd.f32 %v7834_v6, %v4764_v47  ;;  %v4762_v11 = vadd.f32 %v4697_v26, %v10553_v43  ;;  %v4991_v24 = vpop.f32.mrf.mxu0 }
 0x3ae   : > { %v7803_v10 = vpop.f32.mrf.mxu1 }
 0x3af   : > { %v10692_v1 = vadd.f32 %v4991_v24, %v4762_v11  ;;  %v4767_v20 = vadd.f32 %v7803_v10, %v10558_v29  ;;  %v7837_v42 = vpop.f32.mrf.mxu0 }
 0x3b0   : > { %v4710_v17 = vpop.f32.mrf.mxu1 }
 0x3b1   : > { %v10695_v56 = vadd.f32 %v7837_v42, %v4767_v20  ;;  %v4765_v4 = vadd.f32 %v4710_v17, %v10561_v18  ;;  %v5004_v45 = vpop.f32.mrf.mxu0 }
 0x3b2   : > { %v7804_v61 = vpop.f32.mrf.mxu1 }
 0x3b3   : > { %v10698_v7 = vadd.f32 %v5004_v45, %v4765_v4  ;;  %v4768_v6 = vadd.f32 %v7804_v61, %v10564_v40  ;;  %v7838_v47 = vpop.f32.mrf.mxu0 }
 0x3b4   : > { %v4713_v43 = vpop.f32.mrf.mxu1 }
 0x3b5   : > { %v10701_v26 = vadd.f32 %v7838_v47, %v4768_v6  ;;  %v4766_v24 = vadd.f32 %v4713_v43, %v10568_v9  ;;  %v5007_v11 = vpop.f32.mrf.mxu0 }
 0x3b6   : > { %v7807_v29 = vpop.f32.mrf.mxu1 }
 0x3b7   : > { %v10704_v10 = vadd.f32 %v5007_v11, %v4766_v24  ;;  %v4771_v20 = vadd.f32 %v7807_v29, %v10571_v23  ;;  %v7841_v42 = vpop.f32.mrf.mxu0 }
 0x3b8   : > { %v4726_v18 = vpop.f32.mrf.mxu1 }
 0x3b9   : > { %v10707_v17 = vadd.f32 %v7841_v42, %v4771_v20  ;;  %v4769_v4 = vadd.f32 %v4726_v18, %v10574_v32  ;;  %v5020_v45 = vpop.f32.mrf.mxu0 }
 0x3ba   : > { %v7808_v40 = vpop.f32.mrf.mxu1 }
 0x3bb   : > { %v10710_v61 = vadd.f32 %v5020_v45, %v4769_v4  ;;  %v4772_v6 = vadd.f32 %v7808_v40, %v10577_v25  ;;  %v7842_v47 = vpop.f32.mrf.mxu0 }
 0x3bc   : > { %v4729_v9 = vpop.f32.mrf.mxu1 }
 0x3bd   : > { %v10713_v43 = vadd.f32 %v7842_v47, %v4772_v6  ;;  %v4770_v24 = vadd.f32 %v4729_v9, %v10580_v38  ;;  %v5023_v11 = vpop.f32.mrf.mxu0 }
 0x3be   : > { %v10716_v23 = vpop.f32.mrf.mxu1 }
 0x3bf   : > { %v10718_v29 = vadd.f32 %v5023_v11, %v4770_v24  ;;  %v10720_v20 = vpop.f32.mrf.mxu0 }
 0x3c0   : > { %v10722_v32 = vpop.f32.mrf.mxu1 }
 0x3c1   : > { %v10724_v42 = vpop.f32.mrf.mxu0 }
 0x3c2   : > { %v10726_v18 = vpop.f32.mrf.mxu1 }
 0x3c3   : > { %v10728_v25 = vpop.f32.mrf.mxu0 }
 0x3c4   : > { %11602 = vst [vmem:[#allocation31_spill] sm:$0xff] %v10728_v25  ;;  %v10730_v4 = vpop.f32.mrf.mxu1 }
 0x3c5   : > { %v10732_v45 = vpop.f32.mrf.mxu0 }
 0x3c6   : > { %11603 = vst [vmem:[#allocation32_spill] sm:$0xff] %v10732_v45  ;;  %v10734_v38 = vpop.f32.mrf.mxu1 }
 0x3c7   : > { %v10736_v40 = vpop.f32.mrf.mxu0 }
 0x3c8   : > { %11604 = vst [vmem:[#allocation33_spill] sm:$0xff] %v10736_v40  ;;  %v10738_v6 = vpop.f32.mrf.mxu1 }
 0x3c9   : > { %v10740_v47 = vpop.f32.mrf.mxu0 }
 0x3ca   : > { %11605 = vst [vmem:[#allocation34_spill] sm:$0xff] %v10740_v47  ;;  %v10742_v9 = vpop.f32.mrf.mxu1 }
 0x3cb   : > { %11606 = vst [vmem:[#allocation35_spill] sm:$0xff] %v10742_v9  ;;  %v10744_v24 = vpop.f32.mrf.mxu0 }
 0x3cc   : > { %11607 = vst [vmem:[#allocation36_spill] sm:$0xff] %v10744_v24  ;;  %v10746_v11 = vpop.f32.mrf.mxu1 }
 0x3cd   : > { %11608 = vst [vmem:[#allocation37_spill] sm:$0xff] %v10746_v11  ;;  %v10748_v19 = vpop.f32.mrf.mxu0 }
 0x3ce   : > { %11609 = vst [vmem:[#allocation38_spill] sm:$0xff] %v10748_v19  ;;  %v10750_v25 = vpop.f32.mrf.mxu1 }
 0x3cf   : > { %11610 = vst [vmem:[#allocation39_spill] sm:$0xff] %v10750_v25  ;;  %v10752_v39 = vpop.f32.mrf.mxu0 }
 0x3d0   : > { %11611 = vst [vmem:[#allocation40_spill] sm:$0xff] %v10752_v39  ;;  %v10754_v45 = vpop.f32.mrf.mxu1 }
 0x3d1   : > { %11612 = vst [vmem:[#allocation41_spill] sm:$0xff] %v10754_v45  ;;  %v10756_v57 = vpop.f32.mrf.mxu0 }
 0x3d2   : > { %11613 = vst [vmem:[#allocation42_spill] sm:$0xff] %v10756_v57  ;;  %v10758_v40 = vpop.f32.mrf.mxu1 }
 0x3d3   : > { %11614 = vst [vmem:[#allocation43_spill] sm:$0xff] %v10758_v40  ;;  %v10760_v46 = vpop.f32.mrf.mxu0 }
 0x3d4   : > { %11615 = vst [vmem:[#allocation44_spill] sm:$0xff] %v10760_v46  ;;  %v10762_v47 = vpop.f32.mrf.mxu1 }
 0x3d5   : > { %11616 = vst [vmem:[#allocation45_spill] sm:$0xff] %v10762_v47  ;;  %v10764_v9 = vpop.f32.mrf.mxu0 }
 0x3d6   : > { %11617 = vst [vmem:[#allocation46_spill] sm:$0xff] %v10764_v9  ;;  %v10766_v24 = vpop.f32.mrf.mxu1 }
 0x3d7   : > { %11618 = vst [vmem:[#allocation47_spill] sm:$0xff] %v10766_v24  ;;  %v10768_v11 = vpop.f32.mrf.mxu0 }
 0x3d8   : > { %11619 = vst [vmem:[#allocation48_spill] sm:$0xff] %v10768_v11  ;;  %v10770_v19 = vpop.f32.mrf.mxu1 }
 0x3d9   : > { %11620 = vst [vmem:[#allocation49_spill] sm:$0xff] %v10770_v19  ;;  %v10774_v39 = vpop.f32.mrf.mxu0 }
 0x3da   : > { %v10772_v25 = vpop.f32.mrf.mxu1  ;;  %11622 = vst [vmem:[#allocation51_spill] sm:$0xff] %v10774_v39 }
 0x3db   : > { %11621 = vst [vmem:[#allocation50_spill] sm:$0xff] %v10772_v25  ;;  %v10780_v40 = vpop.f32.mrf.mxu0 }
 0x3dc   : > { %v10776_v45 = vpop.f32.mrf.mxu1  ;;  %11625 = vst [vmem:[#allocation54_spill] sm:$0xff] %v10780_v40 }
 0x3dd   : > { %11623 = vst [vmem:[#allocation52_spill] sm:$0xff] %v10776_v45  ;;  %v10786_v9 = vpop.f32.mrf.mxu0 }
 0x3de   : > { %v10778_v57 = vpop.f32.mrf.mxu1  ;;  %11628 = vst [vmem:[#allocation57_spill] sm:$0xff] %v10786_v9 }
 0x3df   : > { %11624 = vst [vmem:[#allocation53_spill] sm:$0xff] %v10778_v57  ;;  %v10790_v19 = vpop.f32.mrf.mxu0 }
 0x3e0   : > { %v10782_v46 = vpop.f32.mrf.mxu1 }
 0x3e1   : > { %11626 = vst [vmem:[#allocation55_spill] sm:$0xff] %v10782_v46  ;;  %v10798_v40 = vpop.f32.mrf.mxu0 }
 0x3e2   : > { %v10784_v47 = vpop.f32.mrf.mxu1 }
 0x3e3   : > { %11627 = vst [vmem:[#allocation56_spill] sm:$0xff] %v10784_v47  ;;  %v10806_v30 = vpop.f32.mrf.mxu0 }
 0x3e4   : > { %v10788_v24 = vpop.f32.mrf.mxu1 }
 0x3e5   : > { %11629 = vst [vmem:[#allocation64_spill] sm:$0xff] %v10788_v24 }
 0x3e6   : > { %v7867_v11 = vpop.f32.mrf.mxu1 }
 0x3e7   : > { %v10793_v25 = vadd.f32 %v7867_v11, %v10683_v31 }
 0x3e8   : > { %v5282_v39 = vpop.f32.mrf.mxu1 }
 0x3e9   : > { %v10796_v45 = vadd.f32 %v5282_v39, %v10686_v13 }
 0x3ea   : > { %v7868_v57 = vpop.f32.mrf.mxu1 }
 0x3eb   : > { %11630 = vst [vmem:[#allocation58_spill] sm:$0xff] %v10796_v45  ;;  %v10801_v46 = vadd.f32 %v7868_v57, %v10689_v63  ;;  %v10814_v45 = vpop.f32.mrf.mxu0 }
 0x3ec   : > { %v5285_v47 = vpop.f32.mrf.mxu1 }
 0x3ed   : > { %v10804_v9 = vadd.f32 %v5285_v47, %v10692_v1 }
 0x3ee   : > { %v7871_v24 = vpop.f32.mrf.mxu1 }
 0x3ef   : > { %11631 = vst [vmem:[#allocation59_spill] sm:$0xff] %v10804_v9  ;;  %v10809_v31 = vadd.f32 %v7871_v24, %v10695_v56  ;;  %v5037_v9 = vadd.f32 %v10585_v54, %v10583_v12  ;;  %v10824_v56 = vpop.f32.mrf.mxu0  ;;  %v5036_v12 = vadd.f32 %v10600_v44, %v10598_v5  ;;  %v5041_v54 = vadd.f32 %v10605_v22, %v10603_v8 }
 0x3f0   : > { %v5298_v11 = vpop.f32.mrf.mxu1  ;;  %v5043_v5 = vadd.f32 %v10630_v59, %v10628_v37  ;;  %v5046_v44 = vadd.f32 %v10635_v33, %v10633_v28  ;;  %v5044_v22 = vadd.f32 %v10640_v36, %v10638_v55  ;;  %v10875_v37 = vld [vmem:[%s11355_s5] ss:$0 sm:$0xff]  ;;  %v10879_v59 = vadd.f32 %v10655_v49, %v10653_v16 }
 0x3f1   : > { %v10812_v39 = vadd.f32 %v5298_v11, %v10698_v7  ;;  %v5035_v11 = vadd.f32 %v10590_v34, %v10588_v62  ;;  %v5042_v62 = vadd.f32 %v10615_v14, %v10613_v50  ;;  %v5049_v14 = vadd.f32 %v10645_v41, %v10643_v0  ;;  %v11632_v41 = vld [vmem:[#allocation23_spill] sm:$0xff] }
 0x3f2   : > { %v7872_v13 = vpop.f32.mrf.mxu1  ;;  %v5048_v0 = vadd.f32 %v10660_v51, %v10658_v53  ;;  %v10897_v49 = vld [vmem:[%s11356_s6] ss:$0 sm:$0xff] }
 0x3f3   : > { %v10817_v57 = vadd.f32 %v7872_v13, %v10701_v26  ;;  %v5331_v26 = vadd.f32 %v10716_v23, %v5037_v9  ;;  %v5329_v34 = vadd.f32 %v10722_v32, %v5035_v11  ;;  %v11636_v32 = vld [vmem:[#allocation35_spill] sm:$0xff] }
 0x3f4   : > { %v5301_v63 = vpop.f32.mrf.mxu1  ;;  %v5336_v16 = vadd.f32 %v11636_v32, %v5042_v62 }
 0x3f5   : > { %v10820_v1 = vadd.f32 %v5301_v63, %v10704_v10  ;;  %v5038_v10 = vadd.f32 %v10595_v60, %v10593_v48  ;;  %v5039_v63 = vadd.f32 %v10610_v27, %v10608_v15  ;;  %v5040_v48 = vadd.f32 %v10620_v2, %v10618_v58 }
 0x3f6   : > { %v7875_v47 = vpop.f32.mrf.mxu1  ;;  %v5045_v60 = vadd.f32 %v10625_v52, %v10623_v3  ;;  %v5625_v15 = vadd.f32 %v10720_v20, %v5331_v26  ;;  %v5047_v58 = vadd.f32 %v10650_v21, %v10648_v35  ;;  %v5330_v2 = vadd.f32 %v10730_v4, %v5036_v12  ;;  %v11633_v35 = vld [vmem:[#allocation24_spill] sm:$0xff]  ;;  %v11643_v12 = vld [vmem:[#allocation33_spill] sm:$0xff] }
 0x3f7   : > { %v10827_v24 = vadd.f32 %v7875_v47, %v10707_v17  ;;  %v5332_v27 = vadd.f32 %v10726_v18, %v5038_v10  ;;  %v5335_v3 = vadd.f32 %v10734_v38, %v5041_v54  ;;  %v5623_v28 = vadd.f32 %v10724_v42, %v5329_v34  ;;  %v11637_v18 = vld [vmem:[#allocation27_spill] sm:$0xff]  ;;  %v11638_v4 = vld [vmem:[#allocation28_spill] sm:$0xff]  ;;  %v11640_v47 = vld [vmem:[#allocation29_spill] sm:$0xff] }
 0x3f8   : > { %v5314_v7 = vpop.f32.mrf.mxu1  ;;  %v5333_v33 = vadd.f32 %v10738_v6, %v5039_v63  ;;  %v5053_v21 = vadd.f32 %v11633_v35, %v11632_v41  ;;  %v5054_v38 = vadd.f32 %v11638_v4, %v11637_v18  ;;  %v11639_v6 = vld [vmem:[#allocation31_spill] sm:$0xff]  ;;  %v11642_v26 = vld [vmem:[#allocation32_spill] sm:$0xff]  ;;  %v11645_v34 = vld [vmem:[#allocation34_spill] sm:$0xff] }
 0x3f9   : > { %v10833_v13 = vadd.f32 %v5314_v7, %v10710_v61  ;;  %v10846_v61 = vpop.f32.mrf.mxu0  ;;  %v5626_v53 = vadd.f32 %v11639_v6, %v5332_v27  ;;  %v11641_v7 = vld [vmem:[#allocation30_spill] sm:$0xff]  ;;  %v5624_v10 = vadd.f32 %v11642_v26, %v5330_v2  ;;  %v5629_v54 = vadd.f32 %v11643_v12, %v5335_v3  ;;  %v11647_v35 = vld [vmem:[#allocation39_spill] sm:$0xff]  ;;  %v11648_v2 = vld [vmem:[#allocation41_spill] sm:$0xff] }
 0x3fa   : > { %v7876_v17 = vpop.f32.mrf.mxu1  ;;  %v5052_v11 = vadd.f32 %v11641_v7, %v11640_v47  ;;  %v11649_v3 = vld [vmem:[#allocation43_spill] sm:$0xff]  ;;  %v11650_v6 = vld [vmem:[#allocation38_spill] sm:$0xff] }
 0x3fb   : > { %v10849_v23 = vadd.f32 %v7876_v17, %v10713_v43  ;;  %v10883_v55 = vpop.f32.mrf.mxu0  ;;  %v11634_v43 = vld [vmem:[#allocation25_spill] sm:$0xff]  ;;  %v5340_v32 = vadd.f32 %v11649_v3, %v5046_v44 }
 0x3fc   : > { %v5317_v8 = vpop.f32.mrf.mxu1  ;;  %v11644_v17 = vld [vmem:[#allocation37_spill] sm:$0xff] }
 0x3fd   : > { %v10864_v50 = vadd.f32 %v5317_v8, %v10718_v29  ;;  %v11635_v29 = vld [vmem:[#allocation26_spill] sm:$0xff]  ;;  %v5334_v63 = vadd.f32 %v11644_v17, %v5040_v48  ;;  %v5627_v8 = vadd.f32 %v11645_v34, %v5333_v33 }
 0x3fe   : > { %v7915_v52 = vpop.f32.mrf.mxu1  ;;  %v10891_v20 = vadd.f32 %v11635_v29, %v11634_v43  ;;  %v5339_v43 = vadd.f32 %v11647_v35, %v5045_v60  ;;  %v5337_v29 = vadd.f32 %v11648_v2, %v5043_v5  ;;  %v11653_v60 = vld [vmem:[#allocation49_spill] sm:$0xff]  ;;  %v11657_v2 = vld [vmem:[#allocation46_spill] sm:$0xff] }
 0x3ff   : > { %v5919_v36 = vadd.f32 %v7915_v52, %v5625_v15  ;;  %v10909_v15 = vpop.f32.mrf.mxu0  ;;  %v5341_v7 = vadd.f32 %v11653_v60, %v5047_v58  ;;  %v11662_v60 = vld [vmem:[#allocation53_spill] sm:$0xff] }
 0x400   : > { %v5790_v42 = vpop.f32.mrf.mxu1 }
 0x401   : > { %v5958_v51 = vmul.f32 %v10875_v37, %v5919_v36  ;;  %v5917_v9 = vadd.f32 %v5790_v42, %v5623_v28  ;;  %v11646_v36 = vld [vmem:[#allocation36_spill] sm:$0xff]  ;;  %v10928_v26 = vpop.f32.mrf.mxu0 }
 0x402   : > { %v7916_v62 = vpop.f32.mrf.mxu1  ;;  %v5630_v41 = vadd.f32 %v11646_v36, %v5336_v16  ;;  %v11652_v16 = vld [vmem:[#allocation47_spill] sm:$0xff] }
 0x403   : > { %v10912_v52 = vadd.f32 %v10897_v49, %v5958_v51  ;;  %v5956_v27 = vmul.f32 %v10875_v37, %v5917_v9  ;;  %v5920_v28 = vadd.f32 %v7916_v62, %v5626_v53  ;;  %v5628_v51 = vadd.f32 %v11650_v6, %v5334_v63  ;;  %v11651_v53 = vld [vmem:[#allocation45_spill] sm:$0xff]  ;;  %v11655_v63 = vld [vmem:[#allocation42_spill] sm:$0xff] }
 0x404   : > { %v5793_v48 = vpop.f32.mrf.mxu1  ;;  %v5338_v9 = vadd.f32 %v11651_v53, %v5044_v22  ;;  %v5343_v47 = vadd.f32 %v11652_v16, %v5049_v14  ;;  %v5631_v34 = vadd.f32 %v11655_v63, %v5337_v29  ;;  %v11656_v22 = vld [vmem:[#allocation44_spill] sm:$0xff]  ;;  %v11660_v53 = vld [vmem:[#allocation50_spill] sm:$0xff] }
 0x405   : > { %v6850_v42 = vmul.f32 -1.442695, %v10912_v52  ;;  %v10921_v33 = vadd.f32 %v10897_v49, %v5956_v27  ;;  %v5959_v18 = vmul.f32 %v10875_v37, %v5920_v28  ;;  %v5918_v4 = vadd.f32 %v5793_v48, %v5624_v10  ;;  %v11654_v10 = vld [vmem:[#allocation40_spill] sm:$0xff] }
 0x406   : > { %v7919_v5 = vpop.f32.mrf.mxu1  ;;  %v5633_v62 = vadd.f32 %v11654_v10, %v5339_v43  ;;  %v5634_v27 = vadd.f32 %v11656_v22, %v5340_v32  ;;  %v10943_v3 = vadd.f32 %v11657_v2, %v5338_v9  ;;  %v11658_v48 = vld [vmem:[#allocation48_spill] sm:$0xff]  ;;  %v11659_v43 = vld [vmem:[#allocation51_spill] sm:$0xff]  ;;  %v10952_v32 = vpop.f32.mrf.mxu0  ;;  %v5344_v9 = vadd.f32 %v11660_v53, %v10879_v59 }
 0x407   : > { %8100 = vpow2.f32 %v6850_v42  ;;  %v6848_v44 = vmul.f32 -1.442695, %v10921_v33  ;;  %v10932_v12 = vadd.f32 %v10897_v49, %v5959_v18  ;;  %v5957_v17 = vmul.f32 %v10875_v37, %v5918_v4  ;;  %v11661_v16 = vld [vmem:[#allocation52_spill] sm:$0xff] }
 0x408   : > { %v5923_v14 = vadd.f32 %v7919_v5, %v5629_v54  ;;  %v5806_v28 = vpop.f32.mrf.mxu1  ;;  %v10946_v42 = vadd.f32 %v11658_v48, %v5343_v47  ;;  %v10949_v18 = vadd.f32 %v11659_v43, %v5341_v7  ;;  %v5342_v47 = vadd.f32 %v11661_v16, %v5048_v0 }
 0x409   : > { %8102 = vpow2.f32 %v6848_v44  ;;  %v6851_v58 = vmul.f32 -1.442695, %v10932_v12  ;;  %v10940_v36 = vadd.f32 %v10897_v49, %v5957_v17  ;;  %v5921_v35 = vadd.f32 %v5806_v28, %v5627_v8  ;;  %v11665_v28 = vld [vmem:[#allocation64_spill] sm:$0xff] }
 0x40a   : > { %v5962_v29 = vmul.f32 %v10875_v37, %v5923_v14  ;;  %v7920_v54 = vpop.f32.mrf.mxu1  ;;  %v5347_v5 = vadd.f32 %v11662_v60, %v5053_v21  ;;  %v11664_v14 = vld [vmem:[#allocation56_spill] sm:$0xff]  ;;  %v5346_v0 = vadd.f32 %v11665_v28, %v5052_v11 }
 0x40b   : > { %8104 = vpow2.f32 %v6851_v58  ;;  %v6849_v4 = vmul.f32 -1.442695, %v10940_v36  ;;  %v5960_v6 = vmul.f32 %v10875_v37, %v5921_v35  ;;  %v5924_v8 = vadd.f32 %v7920_v54, %v5630_v41  ;;  %v11663_v41 = vld [vmem:[#allocation55_spill] sm:$0xff]  ;;  %v7906_v35 = vpop.f32.mrf.mxu0 }
 0x40c   : > { %v10961_v7 = vadd.f32 %v10897_v49, %v5962_v29  ;;  %v5809_v44 = vpop.f32.mrf.mxu1  ;;  %v5345_v22 = vadd.f32 %v11663_v41, %v10891_v20  ;;  %v5348_v59 = vadd.f32 %v11664_v14, %v5054_v38  ;;  %v10982_v38 = vadd.f32 %v10790_v19, %v5347_v5 }
 0x40d   : > { %8106 = vpow2.f32 %v6849_v4  ;;  %v10964_v17 = vadd.f32 %v10897_v49, %v5960_v6  ;;  %v5963_v10 = vmul.f32 %v10875_v37, %v5924_v8  ;;  %v5922_v63 = vadd.f32 %v5809_v44, %v5628_v51  ;;  %v11666_v51 = vld [vmem:[#allocation54_spill] sm:$0xff]  ;;  %v11667_v4 = vld [vmem:[#allocation57_spill] sm:$0xff]  ;;  %v5595_v60 = vpop.f32.mrf.mxu0 }
 0x40e   : > { %v6854_v21 = vmul.f32 -1.442695, %v10961_v7  ;;  %v7923_v58 = vpop.f32.mrf.mxu1  ;;  %v5638_v54 = vadd.f32 %v11666_v51, %v5344_v9  ;;  %v10979_v20 = vadd.f32 %v11667_v4, %v5342_v47  ;;  %v10993_v9 = vadd.f32 %v10806_v30, %v5348_v59  ;;  %v11668_v30 = vld [vmem:[#allocation58_spill] sm:$0xff] }
 0x40f   : > { %v6852_v2 = vmul.f32 -1.442695, %v10964_v17  ;;  %v10974_v48 = vadd.f32 %v10897_v49, %v5963_v10  ;;  %v5961_v43 = vmul.f32 %v10875_v37, %v5922_v63  ;;  %v5927_v29 = vadd.f32 %v7923_v58, %v5633_v62  ;;  %v7909_v14 = vpop.f32.mrf.mxu0 }
 0x410   : > { %8108 = vpow2.f32 %v6854_v21  ;;  %v5822_v11 = vpop.f32.mrf.mxu1  ;;  %v10990_v62 = vadd.f32 %v10798_v40, %v5345_v22  ;;  %v10996_v16 = vadd.f32 %v10814_v45, %v5346_v0  ;;  %v11004_v40 = vadd.f32 %v10824_v56, %v10793_v25  ;;  %v11669_v56 = vld [vmem:[#allocation59_spill] sm:$0xff] }
 0x411   : > { %8110 = vpow2.f32 %v6852_v2  ;;  %v6855_v6 = vmul.f32 -1.442695, %v10974_v48  ;;  %v10986_v8 = vadd.f32 %v10897_v49, %v5961_v43  ;;  %v5966_v53 = vmul.f32 %v10875_v37, %v5927_v29 }
 0x412   : > { %v5925_v19 = vadd.f32 %v5822_v11, %v5631_v34  ;;  %v7924_v47 = vpop.f32.mrf.mxu1  ;;  %v11008_v41 = vadd.f32 %v10846_v61, %v11668_v30  ;;  %v11012_v45 = vadd.f32 %v10883_v55, %v10801_v46  ;;  %v11019_v0 = vadd.f32 %v10909_v15, %v11669_v56 }
 0x413   : > { %8112 = vpow2.f32 %v6855_v6  ;;  %v6853_v5 = vmul.f32 -1.442695, %v10986_v8  ;;  %v11000_v44 = vadd.f32 %v10897_v49, %v5966_v53  ;;  %v5928_v10 = vadd.f32 %v7924_v47, %v5634_v27 }
 0x414   : > { %v8101_v63 = vpop.eup %8100  ;;  %v5964_v34 = vmul.f32 %v10875_v37, %v5925_v19  ;;  %v5825_v22 = vpop.f32.mrf.mxu1  ;;  %v11023_v61 = vadd.f32 %v10928_v26, %v10809_v31  ;;  %v11035_v15 = vadd.f32 %v10952_v32, %v10812_v39 }
 0x415   : > { %v6125_v59 = vadd.f32 1.0, %v8101_v63  ;;  %8114 = vpow2.f32 %v6853_v5  ;;  %v6858_v27 = vmul.f32 -1.442695, %v11000_v44  ;;  %v5967_v28 = vmul.f32 %v10875_v37, %v5928_v10 }
 0x416   : > { %v8103_v25 = vpop.eup %8102  ;;  %v11026_v46 = vadd.f32 %v10897_v49, %v5964_v34  ;;  %v5926_v55 = vadd.f32 %v5825_v22, %v10943_v3  ;;  %v7927_v21 = vpop.f32.mrf.mxu1  ;;  %v11052_v63 = vadd.f32 %v5595_v60, %v10820_v1 }
 0x417   : > { %8116 = vrcp.f32 %v6125_v59  ;;  %v6123_v58 = vadd.f32 1.0, %v8103_v25  ;;  %v11030_v2 = vadd.f32 %v10897_v49, %v5967_v28  ;;  %v5931_v43 = vadd.f32 %v7927_v21, %v10946_v42  ;;  %v5608_v3 = vpop.f32.mrf.mxu0 }
 0x418   : > { %v8105_v29 = vpop.eup %8104  ;;  %8118 = vpow2.f32 %v6858_v27  ;;  %v6856_v31 = vmul.f32 -1.442695, %v11026_v46  ;;  %v5965_v26 = vmul.f32 %v10875_v37, %v5926_v55  ;;  %v5838_v51 = vpop.f32.mrf.mxu1  ;;  %v11042_v42 = vadd.f32 %v7906_v35, %v10817_v57 }
 0x419   : > { %8120 = vrcp.f32 %v6123_v58  ;;  %v6126_v4 = vadd.f32 1.0, %v8105_v29  ;;  %v6859_v11 = vmul.f32 -1.442695, %v11030_v2  ;;  %v5970_v6 = vmul.f32 %v10875_v37, %v5931_v43  ;;  %v7910_v22 = vpop.f32.mrf.mxu0 }
 0x41a   : > { %v8107_v53 = vpop.eup %8106  ;;  %8122 = vpow2.f32 %v6856_v31  ;;  %v11045_v39 = vadd.f32 %v10897_v49, %v5965_v26  ;;  %v5929_v32 = vadd.f32 %v5838_v51, %v10949_v18  ;;  %v7928_v19 = vpop.f32.mrf.mxu1 }
 0x41b   : > { %8124 = vrcp.f32 %v6126_v4  ;;  %v6124_v47 = vadd.f32 1.0, %v8107_v53  ;;  %v11049_v5 = vadd.f32 %v10897_v49, %v5970_v6  ;;  %v5932_v10 = vadd.f32 %v7928_v19, %v5638_v54  ;;  %v5611_v29 = vpop.f32.mrf.mxu0 }
 0x41c   : > { %8126 = vpow2.f32 %v6859_v11  ;;  %v6857_v57 = vmul.f32 -1.442695, %v11045_v39  ;;  %v5968_v35 = vmul.f32 %v10875_v37, %v5929_v32  ;;  %v5841_v30 = vpop.f32.mrf.mxu1  ;;  %v11060_v54 = vadd.f32 %v7909_v14, %v10827_v24 }
 0x41d   : > { %v8109_v34 = vpop.eup %8108  ;;  %8128 = vrcp.f32 %v6124_v47  ;;  %v6862_v18 = vmul.f32 -1.442695, %v11049_v5  ;;  %v5971_v59 = vmul.f32 %v10875_v37, %v5932_v10  ;;  %v5930_v27 = vadd.f32 %v5841_v30, %v10979_v20 }
 0x41e   : > { %v8111_v28 = vpop.eup %8110  ;;  %v6129_v1 = vadd.f32 1.0, %v8109_v34  ;;  %8130 = vpow2.f32 %v6857_v57  ;;  %v11063_v60 = vadd.f32 %v10897_v49, %v5968_v35  ;;  %v7931_v25 = vpop.f32.mrf.mxu1  ;;  %v11070_v20 = vadd.f32 %v5608_v3, %v10833_v13 }
 0x41f   : > { %v6127_v56 = vadd.f32 1.0, %v8111_v28  ;;  %8132 = vpow2.f32 %v6862_v18  ;;  %v11066_v55 = vadd.f32 %v10897_v49, %v5971_v59  ;;  %v5969_v21 = vmul.f32 %v10875_v37, %v5930_v27  ;;  %v11670_v28 = vld [vmem:[#allocation4_spill] sm:$0xff] }
 0x420   : > { %v8113_v58 = vpop.eup %8112  ;;  %8134 = vrcp.f32 %v6129_v1  ;;  %v6860_v24 = vmul.f32 -1.442695, %v11063_v60  ;;  %v5935_v14 = vadd.f32 %v7931_v25, %v10982_v38  ;;  %v5854_v43 = vpop.f32.mrf.mxu1  ;;  %v11079_v11 = vadd.f32 %v7910_v22, %v10849_v23 }
 0x421   : > { %8136 = vrcp.f32 %v6127_v56  ;;  %v6130_v31 = vadd.f32 1.0, %v8113_v58  ;;  %v6863_v26 = vmul.f32 -1.442695, %v11066_v55  ;;  %v11076_v51 = vadd.f32 %v10897_v49, %v5969_v21 }
 0x422   : > { %v8115_v4 = vpop.eup %8114  ;;  %8138 = vpow2.f32 %v6860_v24  ;;  %v5974_v13 = vmul.f32 %v10875_v37, %v5935_v14  ;;  %v5933_v3 = vadd.f32 %v5854_v43, %v10990_v62  ;;  %v7932_v6 = vpop.f32.mrf.mxu1  ;;  %v11086_v47 = vadd.f32 %v5611_v29, %v10864_v50 }
 0x423   : > { %8140 = vrcp.f32 %v6130_v31  ;;  %v6128_v38 = vadd.f32 1.0, %v8115_v4  ;;  %v6861_v53 = vmul.f32 -1.442695, %v11076_v51  ;;  %v5936_v32 = vadd.f32 %v7932_v6, %v10993_v9  ;;  %v11672_v31 = vld [vmem:[#allocation3_spill] sm:$0xff] }
 0x424   : > { %v8117_v19 = vpop.eup %8116  ;;  %8142 = vpow2.f32 %v6863_v26  ;;  %v11089_v23 = vadd.f32 %v10897_v49, %v5974_v13  ;;  %v5972_v10 = vmul.f32 %v10875_v37, %v5933_v3  ;;  %v5857_v57 = vpop.f32.mrf.mxu1  ;;  %v11671_v1 = vunpack.c.l.bf16 %v11670_v28 }
 0x425   : > { %v8119_v35 = vpop.eup %8118  ;;  %v6221_v62 = vmul.f32 %v8117_v19, %v10912_v52  ;;  %8144 = vrcp.f32 %v6128_v38  ;;  %v5975_v30 = vmul.f32 %v10875_v37, %v5936_v32  ;;  %v5934_v9 = vadd.f32 %v5857_v57, %v10996_v16 }
 0x426   : > { %v8121_v34 = vpop.eup %8120  ;;  %v6133_v22 = vadd.f32 1.0, %v8119_v35  ;;  %8146 = vpow2.f32 %v6861_v53  ;;  %v6866_v50 = vmul.f32 -1.442695, %v11089_v23  ;;  %v11097_v18 = vadd.f32 %v10897_v49, %v5972_v10  ;;  %v7935_v59 = vpop.f32.mrf.mxu1 }
 0x427   : > { %v8123_v27 = vpop.eup %8122  ;;  %v6253_v25 = vadd.f32 %v11671_v1, %v6221_v62  ;;  %v6219_v52 = vmul.f32 %v8121_v34, %v10921_v33  ;;  %v11103_v56 = vadd.f32 %v10897_v49, %v5975_v30  ;;  %v5973_v16 = vmul.f32 %v10875_v37, %v5934_v9 }
 0x428   : > { %v8125_v21 = vpop.eup %8124  ;;  %8148 = vrcp.f32 %v6133_v22  ;;  %v6131_v58 = vadd.f32 1.0, %v8123_v27  ;;  %v6864_v24 = vmul.f32 -1.442695, %v11097_v18  ;;  %v5939_v14 = vadd.f32 %v7935_v59, %v11004_v40  ;;  %v5870_v33 = vpop.f32.mrf.mxu1 }
 0x429   : > { %v8127_v43 = vpop.eup %8126  ;;  %v6918_v29 = vpack.c.bf16 %v6253_v25, %v6253_v25  ;;  %v11673_v26 = vunpack.c.l.bf16 %v11672_v31  ;;  %v6222_v13 = vmul.f32 %v8125_v21, %v10932_v12  ;;  %8150 = vpow2.f32 %v6866_v50 }
 0x42a   : > { %v8129_v3 = vpop.eup %8128  ;;  %8152 = vrcp.f32 %v6131_v58  ;;  %v6134_v6 = vadd.f32 1.0, %v8127_v43  ;;  %v6867_v38 = vmul.f32 -1.442695, %v11103_v56  ;;  %v11120_v53 = vadd.f32 %v10897_v49, %v5973_v16  ;;  %v7936_v32 = vpop.f32.mrf.mxu1 }
 0x42b   : > { %v6251_v4 = vadd.f32 %v11673_v26, %v6219_v52  ;;  %v8131_v40 = vpop.eup %8130  ;;  %6414 = vst.msk [vmem:[%s11111_s14 + $0x8] sm:$0xf] %vm6411_vm3, %v6918_v29  ;;  %v11674_v10 = vunpack.c.h.bf16 %v11670_v28  ;;  %v6220_v12 = vmul.f32 %v8129_v3, %v10940_v36  ;;  %8154 = vpow2.f32 %v6864_v24  ;;  %v11676_v29 = vld [vmem:[#allocation6_spill] sm:$0xff] }
 0x42c   : > { %v8133_v35 = vpop.eup %8132  ;;  %8156 = vrcp.f32 %v6134_v6  ;;  %v6132_v62 = vadd.f32 1.0, %v8131_v40  ;;  %v6865_v30 = vmul.f32 -1.442695, %v11120_v53  ;;  %v5978_v9 = vmul.f32 %v10875_v37, %v5939_v14  ;;  %v5873_v34 = vpop.f32.mrf.mxu1 }
 0x42d   : > { %v6916_v19 = vpack.c.bf16 %v6251_v4, %v6251_v4  ;;  %v6254_v57 = vadd.f32 %v11674_v10, %v6222_v13  ;;  %v8135_v22 = vpop.eup %8134  ;;  %v11675_v59 = vunpack.c.h.bf16 %v11672_v31  ;;  %v6137_v28 = vadd.f32 1.0, %v8133_v35 }
 0x42e   : > { %8158 = vpow2.f32 %v6867_v38  ;;  %v8137_v36 = vpop.eup %8136  ;;  %v6225_v1 = vmul.f32 %v8135_v22, %v10961_v7  ;;  %v11135_v25 = vadd.f32 %v10897_v49, %v5978_v9  ;;  %v5937_v52 = vadd.f32 %v5870_v33, %v11008_v41  ;;  %v7939_v16 = vpop.f32.mrf.mxu1  ;;  %v11678_v33 = vld [vmem:[#allocation5_spill] sm:$0xff] }
 0x42f   : > { %6412 = vst.msk [vmem:[%s11111_s14] sm:$0xf] %vm6411_vm3, %v6916_v19  ;;  %v6919_v50 = vpack.c.bf16 %v6254_v57, %v6254_v57  ;;  %v6252_v27 = vadd.f32 %v11675_v59, %v6220_v12  ;;  %8160 = vrcp.f32 %v6132_v62  ;;  %v8139_v21 = vpop.eup %8138  ;;  %v6223_v24 = vmul.f32 %v8137_v36, %v10964_v17 }
 0x430   : > { %8162 = vrcp.f32 %v6137_v28  ;;  %v5940_v14 = vadd.f32 %v7936_v32, %v11012_v45  ;;  %v8141_v43 = vpop.eup %8140  ;;  %v11677_v7 = vunpack.c.l.bf16 %v11676_v29  ;;  %v6135_v26 = vadd.f32 1.0, %v8139_v21  ;;  %v5886_v13 = vpop.f32.mrf.mxu1 }
 0x431   : > { %6415 = vst.msk [vmem:[%s11111_s14 + $0xc] sm:$0xf] %vm6411_vm3, %v6919_v50  ;;  %v6917_v58 = vpack.c.bf16 %v6252_v27, %v6252_v27  ;;  %8164 = vpow2.f32 %v6865_v30  ;;  %v6870_v4 = vmul.f32 -1.442695, %v11135_v25  ;;  %v8143_v41 = vpop.eup %8142  ;;  %v11679_v3 = vunpack.c.l.bf16 %v11678_v33 }
 0x432   : > { %v6257_v31 = vadd.f32 %v11677_v7, %v6225_v1  ;;  %v6226_v17 = vmul.f32 %v8141_v43, %v10974_v48  ;;  %v5976_v45 = vmul.f32 %v10875_v37, %v5937_v52  ;;  %v5979_v38 = vmul.f32 %v10875_v37, %v5940_v14  ;;  %v8145_v32 = vpop.eup %8144  ;;  %v7940_v57 = vpop.f32.mrf.mxu1 }
 0x433   : > { %6413 = vst.msk [vmem:[%s11111_s14 + $0x4] sm:$0xf] %vm6411_vm3, %v6917_v58  ;;  %v6255_v6 = vadd.f32 %v11679_v3, %v6223_v24  ;;  %8166 = vrcp.f32 %v6135_v26  ;;  %v6138_v19 = vadd.f32 1.0, %v8143_v41  ;;  %v5938_v10 = vadd.f32 %v5873_v34, %v11019_v0  ;;  %v8147_v12 = vpop.eup %8146 }
 0x434   : > { %v6922_v40 = vpack.c.bf16 %v6257_v31, %v6257_v31  ;;  %v11680_v62 = vunpack.c.h.bf16 %v11676_v29  ;;  %v6224_v9 = vmul.f32 %v8145_v32, %v10986_v8  ;;  %8168 = vpow2.f32 %v6870_v4  ;;  %v5889_v0 = vpop.f32.mrf.mxu1  ;;  %v11684_v32 = vld [vmem:[#allocation7_spill] sm:$0xff] }
 0x435   : > { %v6920_v35 = vpack.c.bf16 %v6255_v6, %v6255_v6  ;;  %8170 = vrcp.f32 %v6138_v19  ;;  %v6136_v48 = vadd.f32 1.0, %v8147_v12  ;;  %v11159_v22 = vadd.f32 %v10897_v49, %v5976_v45  ;;  %v8149_v34 = vpop.eup %8148 }
 0x436   : > { %v6258_v30 = vadd.f32 %v11680_v62, %v6226_v17  ;;  %6418 = vst.msk [vmem:[%s11111_s14 + $0x18] sm:$0xf] %vm6411_vm3, %v6922_v40  ;;  %v11162_v50 = vadd.f32 %v10897_v49, %v5979_v38  ;;  %v11681_v27 = vunpack.c.h.bf16 %v11678_v33  ;;  %v5977_v28 = vmul.f32 %v10875_v37, %v5938_v10  ;;  %v8151_v1 = vpop.eup %8150  ;;  %v7943_v41 = vpop.f32.mrf.mxu1 }
 0x437   : > { %6416 = vst.msk [vmem:[%s11111_s14 + $0x10] sm:$0xf] %vm6411_vm3, %v6920_v35  ;;  %v5943_v36 = vadd.f32 %v7939_v16, %v11023_v61  ;;  %v6229_v52 = vmul.f32 %v8149_v34, %v11000_v44  ;;  %8172 = vrcp.f32 %v6136_v48  ;;  %v6868_v21 = vmul.f32 -1.442695, %v11159_v22  ;;  %v8153_v24 = vpop.eup %8152  ;;  %v11682_v16 = vld [vmem:[#allocation8_spill] sm:$0xff] }
 0x438   : > { %v6923_v59 = vpack.c.bf16 %v6258_v30, %v6258_v30  ;;  %v6256_v8 = vadd.f32 %v11681_v27, %v6224_v9  ;;  %v6871_v58 = vmul.f32 -1.442695, %v11162_v50  ;;  %v6141_v43 = vadd.f32 1.0, %v8151_v1  ;;  %v8155_v61 = vpop.eup %8154 }
 0x439   : > { %v11176_v29 = vadd.f32 %v10897_v49, %v5977_v28  ;;  %v5982_v7 = vmul.f32 %v10875_v37, %v5943_v36  ;;  %v11683_v31 = vunpack.c.l.bf16 %v11682_v16  ;;  %v6227_v26 = vmul.f32 %v8153_v24, %v11026_v46  ;;  %v8157_v33 = vpop.eup %8156 }
 0x43a   : > { %6419 = vst.msk [vmem:[%s11111_s14 + $0x1c] sm:$0xf] %vm6411_vm3, %v6923_v59  ;;  %v6921_v14 = vpack.c.bf16 %v6256_v8, %v6256_v8  ;;  %8174 = vpow2.f32 %v6868_v21  ;;  %v5941_v4 = vadd.f32 %v5886_v13, %v11035_v15  ;;  %v6139_v3 = vadd.f32 1.0, %v8155_v61  ;;  %v11688_v21 = vld [vmem:[#allocation10_spill] sm:$0xff] }
 0x43b   : > { %v6261_v44 = vadd.f32 %v11683_v31, %v6229_v52  ;;  %8176 = vrcp.f32 %v6141_v43  ;;  %v6869_v6 = vmul.f32 -1.442695, %v11176_v29  ;;  %v11187_v17 = vadd.f32 %v10897_v49, %v5982_v7  ;;  %v8159_v45 = vpop.eup %8158 }
 0x43c   : > { %6417 = vst.msk [vmem:[%s11111_s14 + $0x14] sm:$0xf] %vm6411_vm3, %v6921_v14  ;;  %v11685_v40 = vunpack.c.l.bf16 %v11684_v32  ;;  %v6230_v19 = vmul.f32 %v8157_v33, %v11030_v2  ;;  %8178 = vpow2.f32 %v6871_v58  ;;  %v8161_v15 = vpop.eup %8160  ;;  %v6142_v13 = vadd.f32 1.0, %v8159_v45  ;;  %v5902_v2 = vpop.f32.mrf.mxu1 }
 0x43d   : > { %v6926_v38 = vpack.c.bf16 %v6261_v44, %v6261_v44  ;;  %8180 = vrcp.f32 %v6139_v3  ;;  %v6874_v10 = vmul.f32 -1.442695, %v11187_v17  ;;  %v5980_v12 = vmul.f32 %v10875_v37, %v5941_v4  ;;  %v8163_v35 = vpop.eup %8162 }
 0x43e   : > { %v6259_v46 = vadd.f32 %v11685_v40, %v6227_v26  ;;  %v11686_v30 = vunpack.c.h.bf16 %v11682_v16  ;;  %v6228_v48 = vmul.f32 %v8161_v15, %v11045_v39  ;;  %8182 = vpow2.f32 %v6869_v6  ;;  %v8165_v34 = vpop.eup %8164  ;;  %v7944_v16 = vpop.f32.mrf.mxu1 }
 0x43f   : > { %6422 = vst.msk [vmem:[%s11111_s14 + $0x28] sm:$0xf] %vm6411_vm3, %v6926_v38  ;;  %v6233_v59 = vmul.f32 %v8163_v35, %v11049_v5  ;;  %8184 = vrcp.f32 %v6142_v13  ;;  %v11201_v27 = vadd.f32 %v10897_v49, %v5980_v12  ;;  %v5944_v8 = vadd.f32 %v7940_v57, %v11042_v42 }
 0x440   : > { %v6924_v62 = vpack.c.bf16 %v6259_v46, %v6259_v46  ;;  %v6262_v9 = vadd.f32 %v11686_v30, %v6230_v19  ;;  %v11687_v36 = vunpack.c.h.bf16 %v11684_v32  ;;  %v6140_v52 = vadd.f32 1.0, %v8165_v34  ;;  %v8167_v39 = vpop.eup %8166 }
 0x441   : > { %8186 = vpow2.f32 %v6874_v10  ;;  %v11689_v58 = vunpack.c.l.bf16 %v11688_v21  ;;  %v6872_v5 = vmul.f32 -1.442695, %v11201_v27  ;;  %v5983_v14 = vmul.f32 %v10875_v37, %v5944_v8  ;;  %v8169_v42 = vpop.eup %8168 }
 0x442   : > { %6420 = vst.msk [vmem:[%s11111_s14 + $0x20] sm:$0xf] %vm6411_vm3, %v6924_v62  ;;  %v6927_v28 = vpack.c.bf16 %v6262_v9, %v6262_v9  ;;  %v6260_v1 = vadd.f32 %v11687_v36, %v6228_v48  ;;  %v5942_v43 = vadd.f32 %v5889_v0, %v11052_v63  ;;  %v6231_v7 = vmul.f32 %v8167_v39, %v11063_v60  ;;  %v8171_v31 = vpop.eup %8170  ;;  %v11690_v63 = vld [vmem:[#allocation9_spill] sm:$0xff] }
 0x443   : > { %v6265_v24 = vadd.f32 %v11689_v58, %v6233_v59  ;;  %8188 = vrcp.f32 %v6140_v52  ;;  %v5947_v61 = vadd.f32 %v7943_v41, %v11060_v54  ;;  %v6145_v26 = vadd.f32 1.0, %v8169_v42 }
 0x444   : > { %6423 = vst.msk [vmem:[%s11111_s14 + $0x2c] sm:$0xf] %vm6411_vm3, %v6927_v28  ;;  %v6925_v57 = vpack.c.bf16 %v6260_v1, %v6260_v1  ;;  %8190 = vpow2.f32 %v6872_v5  ;;  %v11218_v4 = vadd.f32 %v10897_v49, %v5983_v14  ;;  %v11691_v0 = vunpack.c.l.bf16 %v11690_v63  ;;  %v8173_v54 = vpop.eup %8172 }
 0x445   : > { %v6930_v44 = vpack.c.bf16 %v6265_v24, %v6265_v24  ;;  %v6234_v3 = vmul.f32 %v8171_v31, %v11066_v55  ;;  %v5981_v60 = vmul.f32 %v10875_v37, %v5942_v43  ;;  %v5986_v6 = vmul.f32 %v10875_v37, %v5947_v61  ;;  %v11696_v61 = vld [vmem:[#allocation11_spill] sm:$0xff] }
 0x446   : > { %6421 = vst.msk [vmem:[%s11111_s14 + $0x24] sm:$0xf] %vm6411_vm3, %v6925_v57  ;;  %v6263_v33 = vadd.f32 %v11691_v0, %v6231_v7  ;;  %8192 = vrcp.f32 %v6145_v26  ;;  %v6875_v41 = vmul.f32 -1.442695, %v11218_v4  ;;  %v5945_v45 = vadd.f32 %v5902_v2, %v11070_v20 }
 0x447   : > { %6426 = vst.msk [vmem:[%s11111_s14 + $0x38] sm:$0xf] %vm6411_vm3, %v6930_v44  ;;  %v5948_v38 = vadd.f32 %v7944_v16, %v11079_v11  ;;  %v11692_v40 = vunpack.c.h.bf16 %v11688_v21  ;;  %v6232_v55 = vmul.f32 %v8173_v54, %v11076_v51  ;;  %v11236_v19 = vadd.f32 %v10897_v49, %v5981_v60  ;;  %v8175_v15 = vpop.eup %8174  ;;  %v5905_v11 = vpop.f32.mrf.mxu1  ;;  %v11694_v21 = vld [vmem:[#allocation12_spill] sm:$0xff] }
 0x448   : > { %v6928_v32 = vpack.c.bf16 %v6263_v33, %v6263_v33  ;;  %8194 = vpow2.f32 %v6875_v41  ;;  %v11239_v13 = vadd.f32 %v10897_v49, %v5986_v6  ;;  %v5984_v10 = vmul.f32 %v10875_v37, %v5945_v45  ;;  %v8177_v12 = vpop.eup %8176 }
 0x449   : > { %v6266_v46 = vadd.f32 %v11692_v40, %v6234_v3  ;;  %v5987_v20 = vmul.f32 %v10875_v37, %v5948_v38  ;;  %v11693_v51 = vunpack.c.h.bf16 %v11690_v63  ;;  %v6143_v30 = vadd.f32 1.0, %v8175_v15  ;;  %v8179_v48 = vpop.eup %8178  ;;  %v11700_v40 = vld [vmem:[#allocation14_spill] sm:$0xff] }
 0x44a   : > { %6424 = vst.msk [vmem:[%s11111_s14 + $0x30] sm:$0xf] %vm6411_vm3, %v6928_v32  ;;  %v6873_v9 = vmul.f32 -1.442695, %v11236_v19  ;;  %v6237_v2 = vmul.f32 %v8177_v12, %v11089_v23  ;;  %v6878_v34 = vmul.f32 -1.442695, %v11239_v13  ;;  %v11251_v59 = vadd.f32 %v10897_v49, %v5984_v10  ;;  %v8181_v28 = vpop.eup %8180 }
 0x44b   : > { %v6931_v35 = vpack.c.bf16 %v6266_v46, %v6266_v46  ;;  %v6264_v62 = vadd.f32 %v11693_v51, %v6232_v55  ;;  %v11254_v8 = vadd.f32 %v10897_v49, %v5987_v20  ;;  %8196 = vrcp.f32 %v6143_v30  ;;  %v8183_v39 = vpop.eup %8182 }
 0x44c   : > { %v6146_v1 = vadd.f32 1.0, %v8179_v48  ;;  %v5946_v52 = vadd.f32 %v5905_v11, %v11086_v47  ;;  %v11695_v23 = vunpack.c.l.bf16 %v11694_v21  ;;  %v6235_v24 = vmul.f32 %v8181_v28, %v11097_v18  ;;  %v8185_v14 = vpop.eup %8184 }
 0x44d   : > { %6427 = vst.msk [vmem:[%s11111_s14 + $0x3c] sm:$0xf] %vm6411_vm3, %v6931_v35  ;;  %v6929_v36 = vpack.c.bf16 %v6264_v62, %v6264_v62  ;;  %8198 = vpow2.f32 %v6873_v9  ;;  %v6876_v5 = vmul.f32 -1.442695, %v11251_v59  ;;  %v6144_v43 = vadd.f32 1.0, %v8183_v39  ;;  %v11702_v62 = vld [vmem:[#allocation13_spill] sm:$0xff] }
 0x44e   : > { %v6269_v58 = vadd.f32 %v11695_v23, %v6237_v2  ;;  %8200 = vrcp.f32 %v6146_v1  ;;  %v6879_v42 = vmul.f32 -1.442695, %v11254_v8  ;;  %v5985_v57 = vmul.f32 %v10875_v37, %v5946_v52  ;;  %v8187_v47 = vpop.eup %8186 }
 0x44f   : > { %6425 = vst.msk [vmem:[%s11111_s14 + $0x34] sm:$0xf] %vm6411_vm3, %v6929_v36  ;;  %v11697_v16 = vunpack.c.l.bf16 %v11696_v61  ;;  %v6238_v18 = vmul.f32 %v8185_v14, %v11103_v56  ;;  %8202 = vpow2.f32 %v6878_v34  ;;  %v6149_v44 = vadd.f32 1.0, %v8187_v47 }
 0x450   : > { %v6934_v7 = vpack.c.bf16 %v6269_v58, %v6269_v58  ;;  %8204 = vrcp.f32 %v6144_v43  ;;  %v11271_v26 = vadd.f32 %v10897_v49, %v5985_v57  ;;  %v8189_v63 = vpop.eup %8188  ;;  %v11698_v37 = vunpack.c.h.bf16 %v11694_v21  ;;  %v11706_v57 = vld [vmem:[#allocation16_spill] sm:$0xff] }
 0x451   : > { %v6267_v31 = vadd.f32 %v11697_v16, %v6235_v24  ;;  %8206 = vpow2.f32 %v6876_v5  ;;  %v8191_v3 = vpop.eup %8190  ;;  %v6236_v60 = vmul.f32 %v8189_v63, %v11120_v53  ;;  %v11699_v41 = vunpack.c.h.bf16 %v11696_v61 }
 0x452   : > { %6430 = vst.msk [vmem:[%s11111_s14 + $0x48] sm:$0xf] %vm6411_vm3, %v6934_v7  ;;  %v6270_v33 = vadd.f32 %v11698_v37, %v6238_v18  ;;  %8208 = vrcp.f32 %v6149_v44  ;;  %v6877_v56 = vmul.f32 -1.442695, %v11271_v26  ;;  %v6147_v6 = vadd.f32 1.0, %v8191_v3 }
 0x453   : > { %v6932_v0 = vpack.c.bf16 %v6267_v31, %v6267_v31  ;;  %8210 = vpow2.f32 %v6879_v42  ;;  %v8193_v54 = vpop.eup %8192  ;;  %v6268_v45 = vadd.f32 %v11699_v41, %v6236_v60  ;;  %v11701_v46 = vunpack.c.l.bf16 %v11700_v40  ;;  %v11708_v31 = vld [vmem:[#allocation15_spill] sm:$0xff] }
 0x454   : > { %v6935_v49 = vpack.c.bf16 %v6270_v33, %v6270_v33  ;;  %8212 = vpow2.f32 %v6877_v56  ;;  %v6241_v38 = vmul.f32 %v8193_v54, %v11135_v25  ;;  %v11703_v30 = vunpack.c.l.bf16 %v11702_v62 }
 0x455   : > { %6428 = vst.msk [vmem:[%s11111_s14 + $0x40] sm:$0xf] %vm6411_vm3, %v6932_v0  ;;  %8214 = vrcp.f32 %v6147_v6  ;;  %v8195_v53 = vpop.eup %8194  ;;  %v6933_v32 = vpack.c.bf16 %v6268_v45, %v6268_v45  ;;  %v11704_v1 = vunpack.c.h.bf16 %v11700_v40  ;;  %v11707_v47 = vunpack.c.l.bf16 %v11706_v57 }
 0x456   : > { %6431 = vst.msk [vmem:[%s11111_s14 + $0x4c] sm:$0xf] %vm6411_vm3, %v6935_v49  ;;  %v6273_v55 = vadd.f32 %v11701_v46, %v6241_v38  ;;  %v6150_v15 = vadd.f32 1.0, %v8195_v53  ;;  %v11709_v18 = vunpack.c.l.bf16 %v11708_v31  ;;  %v11711_v6 = vunpack.c.h.bf16 %v11708_v31  ;;  %v11712_v38 = vld [vmem:[#allocation18_spill] sm:$0xff] }
 0x457   : > { %6429 = vst.msk [vmem:[%s11111_s14 + $0x44] sm:$0xf] %vm6411_vm3, %v6933_v32  ;;  %v11713_v53 = vunpack.c.l.bf16 %v11712_v38 }
 0x458   : > { %v8197_v10 = vpop.eup %8196  ;;  %v6938_v20 = vpack.c.bf16 %v6273_v55, %v6273_v55  ;;  %8216 = vrcp.f32 %v6150_v15  ;;  %v11714_v15 = vld [vmem:[#allocation17_spill] sm:$0xff] }
 0x459   : > { %v6239_v12 = vmul.f32 %v8197_v10, %v11159_v22  ;;  %v11715_v10 = vunpack.c.l.bf16 %v11714_v15 }
 0x45a   : > { %v8199_v11 = vpop.eup %8198  ;;  %6434 = vst.msk [vmem:[%s11111_s14 + $0x58] sm:$0xf] %vm6411_vm3, %v6938_v20 }
 0x45b   : > { %v8201_v35 = vpop.eup %8200  ;;  %v6148_v25 = vadd.f32 1.0, %v8199_v11  ;;  %v6271_v9 = vadd.f32 %v11703_v30, %v6239_v12 }
 0x45c   : > { %v8203_v51 = vpop.eup %8202  ;;  %v6242_v48 = vmul.f32 %v8201_v35, %v11162_v50  ;;  %v11705_v50 = vunpack.c.h.bf16 %v11702_v62  ;;  %v11716_v35 = vunpack.c.h.bf16 %v11712_v38 }
 0x45d   : > { %v8205_v2 = vpop.eup %8204  ;;  %8218 = vrcp.f32 %v6148_v25  ;;  %v6153_v34 = vadd.f32 1.0, %v8203_v51  ;;  %v6936_v36 = vpack.c.bf16 %v6271_v9, %v6271_v9 }
 0x45e   : > { %v8207_v28 = vpop.eup %8206  ;;  %v6274_v22 = vadd.f32 %v11704_v1, %v6242_v48  ;;  %v6240_v52 = vmul.f32 %v8205_v2, %v11176_v29 }
 0x45f   : > { %v8209_v39 = vpop.eup %8208  ;;  %8220 = vrcp.f32 %v6153_v34  ;;  %v6151_v21 = vadd.f32 1.0, %v8207_v28  ;;  %6432 = vst.msk [vmem:[%s11111_s14 + $0x50] sm:$0xf] %vm6411_vm3, %v6936_v36 }
 0x460   : > { %v8211_v23 = vpop.eup %8210  ;;  %v6939_v58 = vpack.c.bf16 %v6274_v22, %v6274_v22  ;;  %v6272_v24 = vadd.f32 %v11705_v50, %v6240_v52  ;;  %v6245_v5 = vmul.f32 %v8209_v39, %v11187_v17 }
 0x461   : > { %v8213_v14 = vpop.eup %8212  ;;  %8222 = vrcp.f32 %v6151_v21  ;;  %v6154_v43 = vadd.f32 1.0, %v8211_v23 }
 0x462   : > { %v8215_v42 = vpop.eup %8214  ;;  %6435 = vst.msk [vmem:[%s11111_s14 + $0x5c] sm:$0xf] %vm6411_vm3, %v6939_v58  ;;  %v6937_v29 = vpack.c.bf16 %v6272_v24, %v6272_v24  ;;  %v6277_v7 = vadd.f32 %v11707_v47, %v6245_v5  ;;  %v6152_v61 = vadd.f32 1.0, %v8213_v14 }
 0x463   : > { %v6243_v16 = vmul.f32 %v8215_v42, %v11201_v27  ;;  %8224 = vrcp.f32 %v6154_v43  ;;  %v11710_v27 = vunpack.c.h.bf16 %v11706_v57 }
 0x464   : > { %6433 = vst.msk [vmem:[%s11111_s14 + $0x54] sm:$0xf] %vm6411_vm3, %v6937_v29  ;;  %v6942_v17 = vpack.c.bf16 %v6277_v7, %v6277_v7  ;;  %8226 = vrcp.f32 %v6152_v61 }
 0x465   : > { %v6275_v44 = vadd.f32 %v11709_v18, %v6243_v16  ;;  %v8217_v63 = vpop.eup %8216 }
 0x466   : > { %6438 = vst.msk [vmem:[%s11111_s14 + $0x68] sm:$0xf] %vm6411_vm3, %v6942_v17  ;;  %v6246_v37 = vmul.f32 %v8217_v63, %v11218_v4 }
 0x467   : > { %v6940_v0 = vpack.c.bf16 %v6275_v44, %v6275_v44 }
 0x468   : > { %v6278_v33 = vadd.f32 %v11710_v27, %v6246_v37 }
 0x469   : > { %6436 = vst.msk [vmem:[%s11111_s14 + $0x60] sm:$0xf] %vm6411_vm3, %v6940_v0 }
 0x46a   : > { %v8219_v3 = vpop.eup %8218  ;;  %v6943_v60 = vpack.c.bf16 %v6278_v33, %v6278_v33 }
 0x46b   : > { %v6244_v56 = vmul.f32 %v8219_v3, %v11236_v19 }
 0x46c   : > { %v8221_v49 = vpop.eup %8220  ;;  %6439 = vst.msk [vmem:[%s11111_s14 + $0x6c] sm:$0xf] %vm6411_vm3, %v6943_v60 }
 0x46d   : > { %v6276_v54 = vadd.f32 %v11711_v6, %v6244_v56  ;;  %v6249_v41 = vmul.f32 %v8221_v49, %v11239_v13 }
 0x46e   : > { %v8223_v4 = vpop.eup %8222 }
 0x46f   : > { %v6941_v45 = vpack.c.bf16 %v6276_v54, %v6276_v54  ;;  %v6281_v32 = vadd.f32 %v11713_v53, %v6249_v41  ;;  %v6247_v40 = vmul.f32 %v8223_v4, %v11251_v59  ;;  %v11717_v59 = vunpack.c.h.bf16 %v11714_v15 }
 0x470   : > { %v8225_v19 = vpop.eup %8224 }
 0x471   : > { %v8227_v46 = vpop.eup %8226  ;;  %6437 = vst.msk [vmem:[%s11111_s14 + $0x64] sm:$0xf] %vm6411_vm3, %v6941_v45  ;;  %v6946_v55 = vpack.c.bf16 %v6281_v32, %v6281_v32  ;;  %v6279_v20 = vadd.f32 %v11715_v10, %v6247_v40  ;;  %v6250_v13 = vmul.f32 %v8225_v19, %v11254_v8 }
 0x472   : > { %v6248_v11 = vmul.f32 %v8227_v46, %v11271_v26 }
 0x473   : > { %6442 = vst.msk [vmem:[%s11111_s14 + $0x78] sm:$0xf] %vm6411_vm3, %v6946_v55  ;;  %v6944_v12 = vpack.c.bf16 %v6279_v20, %v6279_v20  ;;  %v6282_v25 = vadd.f32 %v11716_v35, %v6250_v13 }
 0x474   : > { %v6280_v51 = vadd.f32 %v11717_v59, %v6248_v11 }
 0x475   : > { %6440 = vst.msk [vmem:[%s11111_s14 + $0x70] sm:$0xf] %vm6411_vm3, %v6944_v12  ;;  %v6947_v62 = vpack.c.bf16 %v6282_v25, %v6282_v25 }
 0x476   : > { %v6945_v30 = vpack.c.bf16 %v6280_v51, %v6280_v51 }
 0x477   : > { %6443 = vst.msk [vmem:[%s11111_s14 + $0x7c] sm:$0xf] %vm6411_vm3, %v6947_v62 }
 0x478   : > { %6441 = vst.msk [vmem:[%s11111_s14 + $0x74] sm:$0xf] %vm6411_vm3, %v6945_v30 }
 0x479 PF: > { %s17_s24 = sadd.s32 1, %s8234_s24  }
 0x47a   : > { %p14_p4 = scmp.ge.s32.totalorder %s17_s24, 4  }
 0x47c   :  { %16 = sbr.rel (!%p14_p4) target bundleno = 1 (0x1), region = 96 }

</bundles_post_ra>
